<compile_context>
chip_gen: v7x
topology: tpu7x:2x2x1
jax: 0.10.0
libtpu: 0.0.40
codegen_flags: <defaults>
</compile_context>

<pallas_src>
import functools

import jax
import jax.numpy as jnp
from jax.experimental import pallas as pl
from jax.experimental.pallas import tpu as pltpu


def _round_up(x, m):
    return (x + m - 1) // m * m


# ----------------------------------------------------------------------------
# Kernel 1: fused bidirectional LSTM layer (time-major, bf16 activations)
#   grid = (2,) over direction (0=forward, 1=backward), "parallel"
#   (maps to the two TensorCores on v7x; serial but correct on v5e/v6e).
# ----------------------------------------------------------------------------
def bilstm_layer_kernel(x_ref, wih_ref, whh_ref, b_ref, out_ref, gx_sc):
    # x_ref   : (S, B, In_pad)      bf16  time-major input (shared by both dirs)
    # wih_ref : (1, In_pad, 4H_pad) bf16  this direction's input->gate weights
    # whh_ref : (1, H_pad, 4H_pad)  bf16  this direction's hidden->gate weights
    # b_ref   : (1, 1, 4H_pad)      f32   b_ih + b_hh (padded lanes are zero)
    # out_ref : (S, B, H_pad)       bf16  this direction's half of (S,B,2H_pad)
    # gx_sc   : (S, B, 4H_pad)      bf16  precomputed input projection
    S, B, In = x_ref.shape
    H = out_ref.shape[-1]                       # H_pad (multiple of 128)
    d = pl.program_id(0)

    # Hoist weight reads out of the recurrent loop.
    wih = wih_ref[0]                            # (In, 4H) bf16
    whh = whh_ref[0]                            # (H, 4H)  bf16
    bias = b_ref[0]                             # (1, 4H)  f32

    # Input projection for all timesteps in one MXU matmul (f32 accumulation),
    # stored bf16 to keep the scratch small (v7x 64 MiB VMEM).
    # NOTE: for very long sequences this prologue should be S-chunked.
    x2d = x_ref[...].reshape(S * B, In)         # B is a multiple of 16 -> clean
    gx = jnp.dot(x2d, wih, preferred_element_type=jnp.float32) + bias
    gx_sc[...] = gx.reshape(S, B, 4 * H).astype(gx_sc.dtype)

    h0 = jnp.zeros((B, H), jnp.float32)
    c0 = jnp.zeros((B, H), jnp.float32)

    def step(t, carry):
        h, c = carry
        # Backward direction walks time in reverse, writing to the same index.
        tt = jnp.where(d == 1, S - 1 - t, t)
        gates = gx_sc[tt].astype(jnp.float32) + jnp.dot(
            h.astype(jnp.bfloat16), whh, preferred_element_type=jnp.float32)
        # PyTorch gate ordering: i, f, g, o.  H_pad is a multiple of 128, so
        # every slice is lane-aligned (no masked vector ops).
        i_g = jax.nn.sigmoid(gates[:, 0:H])
        f_g = jax.nn.sigmoid(gates[:, H:2 * H])
        g_g = jnp.tanh(gates[:, 2 * H:3 * H])
        o_g = jax.nn.sigmoid(gates[:, 3 * H:4 * H])
        c_new = f_g * c + i_g * g_g
        h_new = o_g * jnp.tanh(c_new)
        out_ref[tt] = h_new.astype(out_ref.dtype)
        return (h_new, c_new)

    # Unroll so the LLO scheduler can overlap stores / gx loads of adjacent
    # steps with the MXU drain and EUP tail of the current step.
    jax.lax.fori_loop(0, S, step, (h0, c0), unroll=True if S <= 16 else 4)


def bilstm_layer(x_sbi, wih_all, whh_all, b_all, H_pad):
    """x_sbi: (S, B_pad, In_pad) bf16. Returns (S, B_pad, 2*H_pad) bf16."""
    S, B_pad, In_pad = x_sbi.shape
    H4 = 4 * H_pad
    return pl.pallas_call(
        bilstm_layer_kernel,
        out_shape=jax.ShapeDtypeStruct((S, B_pad, 2 * H_pad), jnp.bfloat16),
        grid_spec=pltpu.PrefetchScalarGridSpec(
            num_scalar_prefetch=0,
            grid=(2,),                                   # direction axis
            in_specs=[
                pl.BlockSpec((S, B_pad, In_pad), lambda d: (0, 0, 0)),
                pl.BlockSpec((1, In_pad, H4), lambda d: (d, 0, 0)),
                pl.BlockSpec((1, H_pad, H4), lambda d: (d, 0, 0)),
                pl.BlockSpec((1, 1, H4), lambda d: (d, 0, 0)),
            ],
            # Each direction writes its own 128-lane-aligned half of 2H_pad.
            out_specs=pl.BlockSpec((S, B_pad, H_pad), lambda d: (0, 0, d)),
            scratch_shapes=[
                pltpu.VMEM((S, B_pad, H4), jnp.bfloat16),  # precomputed gx
            ],
        ),
        compiler_params=pltpu.CompilerParams(
            dimension_semantics=("parallel",),
            # 32 MiB is the v7x-safe scoped value; raise on v5e/v6e for large
            # S/H so the full gx precompute stays resident.
            vmem_limit_bytes=32 * 1024 * 1024,
        ),
    )(x_sbi, wih_all, whh_all, b_all)


# ----------------------------------------------------------------------------
# Kernel 2: scoring head, TB batch rows per grid step, lane-dense output.
#   scores[b,i,j] = wf . tanh(h_linear(x[b,i]) + m_linear(x[b,j])) + bf
# ----------------------------------------------------------------------------
def score_kernel(x_ref, wh_ref, bh_ref, wm_ref, bm_ref, wf_ref, bf_ref,
                 out_ref):
    # x_ref  : (S, TB, F_pad)  bf16  time-major LSTM output slab (TB batches)
    # wh/wm  : (F_pad, D_pad)  bf16  (transposed + zero-padded torch weights)
    # bh/bm/wf : (1, D_pad)    f32 ;  bf : (1, 1) f32
    # out_ref: (TB, S, S_pad)  f32   lane-dense (S_pad = round_up(S,128))
    S, TB, F = x_ref.shape
    D = wh_ref.shape[1]
    S_pad = out_ref.shape[-1]

    x2d = x_ref[...].reshape(S * TB, F)                        # bf16, M = S*TB
    h_out = jnp.dot(x2d, wh_ref[...],
                    preferred_element_type=jnp.float32) + bh_ref[...]
    m_out = jnp.dot(x2d, wm_ref[...],
                    preferred_element_type=jnp.float32) + bm_ref[...]
    # Small f32 leading-axis transposes (time-major -> batch-major), in VMEM.
    h_bt = jnp.transpose(h_out.reshape(S, TB, D), (1, 0, 2))   # (TB, S, D)
    m_bt = jnp.transpose(m_out.reshape(S, TB, D), (1, 0, 2))   # (TB, S, D)

    # TODO(synk): for very long S tile the j axis (second S) to bound this
    # buffer on v7x; TB is already capped so it fits at the shapes used here.
    s = jnp.tanh(h_bt[:, :, None, :] + m_bt[:, None, :, :])    # (TB,S,S,D) f32
    # D_pad is a multiple of 128 -> unmasked full-lane reduction.
    sc = jnp.sum(s * wf_ref[...], axis=-1) + bf_ref[0, 0]      # (TB, S, S)

    if S_pad == S:
        out_ref[...] = sc.astype(out_ref.dtype)
    else:
        # Lane-dense writeback: the HBM block is S_pad wide; padded lanes are
        # zero-filled and sliced off in the wrapper.
        out_ref[...] = jnp.zeros_like(out_ref)
        out_ref[:, :, 0:S] = sc.astype(out_ref.dtype)


def _choose_tb(B_pad, S, D_pad, budget_bytes=8 * 1024 * 1024):
    """Largest multiple of 16 dividing B_pad whose tanh buffer fits budget."""
    best = 16
    for c in range(16, B_pad + 1, 16):
        if B_pad % c == 0 and c * S * S * D_pad * 4 <= budget_bytes:
            best = c
    return best


def score_pallas(x_sbf, wh, bh, wm, bm, wf, bf):
    """x_sbf: (S, B_pad, F_pad) bf16 (time-major). Returns (B_pad, S, S_pad) f32."""
    S, B_pad, F_pad = x_sbf.shape
    D_pad = wh.shape[1]
    S_pad = _round_up(S, 128)
    TB = _choose_tb(B_pad, S, D_pad)
    return pl.pallas_call(
        score_kernel,
        out_shape=jax.ShapeDtypeStruct((B_pad, S, S_pad), jnp.float32),
        grid_spec=pltpu.PrefetchScalarGridSpec(
            num_scalar_prefetch=0,
            grid=(B_pad // TB,),
            in_specs=[
                pl.BlockSpec((S, TB, F_pad), lambda g: (0, g, 0)),
                pl.BlockSpec((F_pad, D_pad), lambda g: (0, 0)),
                pl.BlockSpec((1, D_pad), lambda g: (0, 0)),
                pl.BlockSpec((F_pad, D_pad), lambda g: (0, 0)),
                pl.BlockSpec((1, D_pad), lambda g: (0, 0)),
                pl.BlockSpec((1, D_pad), lambda g: (0, 0)),
                pl.BlockSpec((1, 1), lambda g: (0, 0)),
            ],
            out_specs=pl.BlockSpec((TB, S, S_pad), lambda g: (g, 0, 0)),
        ),
        compiler_params=pltpu.CompilerParams(
            dimension_semantics=("parallel",),
            vmem_limit_bytes=32 * 1024 * 1024,
        ),
    )(x_sbf, wh, bh, wm, bm, wf, bf)


# ----------------------------------------------------------------------------
# One-time weight preparation (runs OUTSIDE the jitted forward)
# ----------------------------------------------------------------------------
def _pad_lstm_dir(w_ih, w_hh, b, H, H_pad, In_pad, in_chunks):
    """Pad one direction's torch-layout LSTM weights to lane-aligned tiles.

    w_ih: (4H, In_real), w_hh: (4H, H), b: (4H,)  (b = b_ih + b_hh)
    in_chunks: list of (dst_row, src_col, length) mapping real input features
               into the padded input dimension.
    """
    H4 = 4 * H_pad
    wih_t = jnp.zeros((In_pad, H4), jnp.float32)
    whh_t = jnp.zeros((H_pad, H4), jnp.float32)
    b_p = jnp.zeros((1, H4), jnp.float32)
    for g in range(4):                         # torch gate order i, f, g, o
        col0 = g * H_pad
        for dst, src, ln in in_chunks:
            wih_t = wih_t.at[dst:dst + ln, col0:col0 + H].set(
                w_ih[g * H:(g + 1) * H, src:src + ln].T)
        whh_t = whh_t.at[0:H, col0:col0 + H].set(w_hh[g * H:(g + 1) * H, :].T)
        b_p = b_p.at[0, col0:col0 + H].set(b[g * H:(g + 1) * H])
    return wih_t.astype(jnp.bfloat16), whh_t.astype(jnp.bfloat16), b_p


def _pad_head_linear(w, b, F_pad, D_pad, feat_chunks):
    """w: torch Linear weight (D, 2H), b: (D,)."""
    D = w.shape[0]
    w_p = jnp.zeros((F_pad, D_pad), jnp.float32)
    for dst, src, ln in feat_chunks:
        w_p = w_p.at[dst:dst + ln, 0:D].set(w[:, src:src + ln].T)
    b_p = jnp.zeros((1, D_pad), jnp.float32).at[0, 0:D].set(b)
    return w_p.astype(jnp.bfloat16), b_p


def prepare_params(params):
    """Pad / transpose / cast all weights once. Returns kernel-ready arrays."""
    H = params["lstm"][0]["w_hh_f"].shape[1]   # real hidden size
    D = params["wh"].shape[0]                  # real linear_output_dim
    We = params["words_emb"].shape[1]
    Pe = params["poses_emb"].shape[1]
    In0 = We + Pe
    # NOTE: H << 128 (toy) makes H_pad=128 mostly padding; kept for lane
    # alignment and correctness — revisit the padding strategy for tiny H.
    H_pad = _round_up(H, 128)
    D_pad = _round_up(D, 128)
    In0_pad = _round_up(In0, 128)

    packed = {
        "words_emb": params["words_emb"].astype(jnp.bfloat16),
        "poses_emb": params["poses_emb"].astype(jnp.bfloat16),
        "lstm": [],
    }
    for li, layer_p in enumerate(params["lstm"]):
        if li == 0:
            In_pad = In0_pad
            in_chunks = [(0, 0, In0)]
        else:
            # Previous layer output layout: fwd at [0:H], bwd at [H_pad:H_pad+H].
            In_pad = 2 * H_pad
            in_chunks = [(0, 0, H), (H_pad, H, H)]
        wihs, whhs, bs = [], [], []
        for dkey in ("f", "b"):
            wih_t, whh_t, b_p = _pad_lstm_dir(
                layer_p["w_ih_" + dkey], layer_p["w_hh_" + dkey],
                layer_p["b_" + dkey], H, H_pad, In_pad, in_chunks)
            wihs.append(wih_t)
            whhs.append(whh_t)
            bs.append(b_p)
        packed["lstm"].append({"wih": jnp.stack(wihs),
                               "whh": jnp.stack(whhs),
                               "b": jnp.stack(bs)})

    F_pad = 2 * H_pad
    feat_chunks = [(0, 0, H), (H_pad, H, H)]
    packed["wh"], packed["bh"] = _pad_head_linear(
        params["wh"], params["bh"], F_pad, D_pad, feat_chunks)
    packed["wm"], packed["bm"] = _pad_head_linear(
        params["wm"], params["bm"], F_pad, D_pad, feat_chunks)
    packed["wf"] = jnp.zeros((1, D_pad), jnp.float32).at[0, 0:D].set(params["wf"])
    packed["bf"] = params["bf"].reshape(1, 1)
    return packed


# ----------------------------------------------------------------------------
# Full forward pass (glue + kernels).  Takes the pre-packed weights.
# ----------------------------------------------------------------------------
def dependency_parser_forward(word_ids, pos_ids, packed):
    B, S = word_ids.shape
    B_pad = _round_up(B, 16)                   # bf16 (16,128) tile friendly
    In0 = packed["words_emb"].shape[1] + packed["poses_emb"].shape[1]
    In0_pad = packed["lstm"][0]["wih"].shape[1]
    H_pad = packed["lstm"][0]["whh"].shape[1]

    # Embedding gather with transposed indices -> time-major bf16 activations
    # directly (folds the batch->time transpose into the gather).
    we = jnp.take(packed["words_emb"], word_ids.T, axis=0)    # (S, B, We) bf16
    pe = jnp.take(packed["poses_emb"], pos_ids.T, axis=0)     # (S, B, Pe) bf16
    x = jnp.concatenate([we, pe], axis=-1)                    # (S, B, In0)
    x = jnp.pad(x, ((0, 0), (0, B_pad - B), (0, In0_pad - In0)))

    for layer in packed["lstm"]:
        x = bilstm_layer(x, layer["wih"], layer["whh"], layer["b"], H_pad)
        # TODO(synk): nn.LSTM inter-layer dropout only applies in training
        # mode; this eval-mode forward applies none.

    scores_full = score_pallas(x, packed["wh"], packed["bh"],
                               packed["wm"], packed["bm"],
                               packed["wf"], packed["bf"])
    return scores_full[:B, :, :S]                              # (B, S, S)


# ----------------------------------------------------------------------------
# Deterministic parameter construction (torch-style layouts)
# ----------------------------------------------------------------------------
def init_params(key, words_vocab, poses_vocab, we_dim, pe_dim,
                hidden, num_layers, out_dim):
    keys = iter(jax.random.split(key, 64))
    scale = 0.1
    params = {
        "words_emb": scale * jax.random.normal(next(keys), (words_vocab, we_dim), jnp.float32),
        "poses_emb": scale * jax.random.normal(next(keys), (poses_vocab, pe_dim), jnp.float32),
        "lstm": [],
    }
    in_dim = we_dim + pe_dim
    for layer in range(num_layers):
        layer_in = in_dim if layer == 0 else 2 * hidden
        layer_p = {}
        for d in ("f", "b"):
            layer_p["w_ih_" + d] = scale * jax.random.normal(
                next(keys), (4 * hidden, layer_in), jnp.float32)
            layer_p["w_hh_" + d] = scale * jax.random.normal(
                next(keys), (4 * hidden, hidden), jnp.float32)
            b_ih = scale * jax.random.normal(next(keys), (4 * hidden,), jnp.float32)
            b_hh = scale * jax.random.normal(next(keys), (4 * hidden,), jnp.float32)
            layer_p["b_" + d] = b_ih + b_hh
        params["lstm"].append(layer_p)

    F = 2 * hidden
    params["wh"] = scale * jax.random.normal(next(keys), (out_dim, F), jnp.float32)
    params["bh"] = scale * jax.random.normal(next(keys), (out_dim,), jnp.float32)
    params["wm"] = scale * jax.random.normal(next(keys), (out_dim, F), jnp.float32)
    params["bm"] = scale * jax.random.normal(next(keys), (out_dim,), jnp.float32)
    params["wf"] = scale * jax.random.normal(next(keys), (out_dim,), jnp.float32)
    params["bf"] = scale * jax.random.normal(next(keys), (), jnp.float32)
    return params


if __name__ == "__main__":
    B, S = 2, 8
    WORDS_VOCAB, POSES_VOCAB = 50, 12
    WE_DIM, PE_DIM = 16, 8
    HIDDEN, NUM_LAYERS, OUT_DIM = 16, 2, 32

    root = jax.random.PRNGKey(0)
    k_params, k_words, k_poses = jax.random.split(root, 3)

    params = init_params(k_params, WORDS_VOCAB, POSES_VOCAB,
                         WE_DIM, PE_DIM, HIDDEN, NUM_LAYERS, OUT_DIM)
    packed = prepare_params(params)            # one-time weight repacking

    word_ids = jax.random.randint(k_words, (B, S), 0, WORDS_VOCAB, dtype=jnp.int32)
    pos_ids = jax.random.randint(k_poses, (B, S), 0, POSES_VOCAB, dtype=jnp.int32)

    fwd = jax.jit(functools.partial(dependency_parser_forward))
    scores = fwd(word_ids, pos_ids, packed)
    jax.block_until_ready(scores)

    assert scores.shape == (B, S, S), scores.shape
    assert scores.dtype == jnp.float32
    assert bool(jnp.all(jnp.isfinite(scores)))
    print("KERNEL_OK")
</pallas_src>

<mosaic_0001>
module attributes {stable_mosaic.version = 11 : i64} {
  func.func @score_kernel(%arg0: i32, %arg1: memref<8x16x256xbf16, #tpu.memory_space<vmem>>, %arg2: memref<256x128xbf16, #tpu.memory_space<vmem>>, %arg3: memref<1x128xf32, #tpu.memory_space<vmem>>, %arg4: memref<256x128xbf16, #tpu.memory_space<vmem>>, %arg5: memref<1x128xf32, #tpu.memory_space<vmem>>, %arg6: memref<1x128xf32, #tpu.memory_space<vmem>>, %arg7: memref<1x1xf32, #tpu.memory_space<vmem>>, %arg8: memref<16x8x128xf32, #tpu.memory_space<vmem>>) attributes {dimension_semantics = [#tpu.dimension_semantics<parallel>], iteration_bounds = array<i64: 1>, scalar_prefetch = 0 : i64, scratch_operands = 0 : i64, tpu.core_type = #tpu.core_type<tc>, window_params = [{transform_indices = @transform_0, window_bounds = array<i64: 8, 16, 256>}, {pipeline_mode = #tpu.pipeline_mode<synchronous>, transform_indices = @transform_1, window_bounds = array<i64: 256, 128>}, {pipeline_mode = #tpu.pipeline_mode<synchronous>, transform_indices = @transform_2, window_bounds = array<i64: 1, 128>}, {pipeline_mode = #tpu.pipeline_mode<synchronous>, transform_indices = @transform_3, window_bounds = array<i64: 256, 128>}, {pipeline_mode = #tpu.pipeline_mode<synchronous>, transform_indices = @transform_4, window_bounds = array<i64: 1, 128>}, {pipeline_mode = #tpu.pipeline_mode<synchronous>, transform_indices = @transform_5, window_bounds = array<i64: 1, 128>}, {pipeline_mode = #tpu.pipeline_mode<synchronous>, transform_indices = @transform_6, window_bounds = array<i64: 1, 1>}, {transform_indices = @transform_7, window_bounds = array<i64: 16, 8, 128>}]} {
    %c0 = arith.constant 0 : index
    %c0_0 = arith.constant 0 : index
    %c0_1 = arith.constant 0 : index
    %0 = vector.load %arg1[%c0, %c0_0, %c0_1] : memref<8x16x256xbf16, #tpu.memory_space<vmem>>, vector<8x16x256xbf16>
    %1 = vector.shape_cast %0 : vector<8x16x256xbf16> to vector<128x256xbf16>
    %c0_2 = arith.constant 0 : index
    %c0_3 = arith.constant 0 : index
    %2 = vector.load %arg2[%c0_2, %c0_3] : memref<256x128xbf16, #tpu.memory_space<vmem>>, vector<256x128xbf16>
    %cst = arith.constant dense<0.000000e+00> : vector<128x128xf32>
    %3 = tpu.matmul %1, %2, %cst {dimension_numbers = #tpu.dot_dimension_numbers<[1], [0], [0], [1], [0, 0, 1, 1], [], []>} : vector<128x256xbf16>, vector<256x128xbf16>, vector<128x128xf32> -> vector<128x128xf32>
    %c0_4 = arith.constant 0 : index
    %c0_5 = arith.constant 0 : index
    %4 = vector.load %arg3[%c0_4, %c0_5] : memref<1x128xf32, #tpu.memory_space<vmem>>, vector<1x128xf32>
    %5 = vector.broadcast %4 : vector<1x128xf32> to vector<128x128xf32>
    %6 = arith.addf %3, %5 : vector<128x128xf32>
    %c0_6 = arith.constant 0 : index
    %c0_7 = arith.constant 0 : index
    %7 = vector.load %arg4[%c0_6, %c0_7] : memref<256x128xbf16, #tpu.memory_space<vmem>>, vector<256x128xbf16>
    %cst_8 = arith.constant dense<0.000000e+00> : vector<128x128xf32>
    %8 = tpu.matmul %1, %7, %cst_8 {dimension_numbers = #tpu.dot_dimension_numbers<[1], [0], [0], [1], [0, 0, 1, 1], [], []>} : vector<128x256xbf16>, vector<256x128xbf16>, vector<128x128xf32> -> vector<128x128xf32>
    %c0_9 = arith.constant 0 : index
    %c0_10 = arith.constant 0 : index
    %9 = vector.load %arg5[%c0_9, %c0_10] : memref<1x128xf32, #tpu.memory_space<vmem>>, vector<1x128xf32>
    %10 = vector.broadcast %9 : vector<1x128xf32> to vector<128x128xf32>
    %11 = arith.addf %8, %10 : vector<128x128xf32>
    %12 = vector.shape_cast %6 : vector<128x128xf32> to vector<8x16x128xf32>
    %13 = tpu.transpose %12, [1, 0, 2] : vector<8x16x128xf32> -> vector<16x8x128xf32>
    %14 = vector.shape_cast %11 : vector<128x128xf32> to vector<8x16x128xf32>
    %15 = tpu.transpose %14, [1, 0, 2] : vector<8x16x128xf32> -> vector<16x8x128xf32>
    %16 = vector.shape_cast %13 : vector<16x8x128xf32> to vector<16x8x1x128xf32>
    %17 = vector.shape_cast %15 : vector<16x8x128xf32> to vector<16x1x8x128xf32>
    %18 = vector.broadcast %16 : vector<16x8x1x128xf32> to vector<16x8x8x128xf32>
    %19 = vector.broadcast %17 : vector<16x1x8x128xf32> to vector<16x8x8x128xf32>
    %20 = arith.addf %18, %19 : vector<16x8x8x128xf32>
    %21 = math.tanh %20 : vector<16x8x8x128xf32>
    %c0_11 = arith.constant 0 : index
    %c0_12 = arith.constant 0 : index
    %22 = vector.load %arg6[%c0_11, %c0_12] : memref<1x128xf32, #tpu.memory_space<vmem>>, vector<1x128xf32>
    %23 = vector.shape_cast %22 : vector<1x128xf32> to vector<1x1x1x128xf32>
    %24 = vector.broadcast %23 : vector<1x1x1x128xf32> to vector<16x8x8x128xf32>
    %25 = arith.mulf %21, %24 : vector<16x8x8x128xf32>
    %cst_13 = arith.constant dense<0.000000e+00> : vector<16x8x8xf32>
    %26 = vector.multi_reduction <add>, %25, %cst_13 [3] : vector<16x8x8x128xf32> to vector<16x8x8xf32>
    %c0_14 = arith.constant 0 : index
    %c0_15 = arith.constant 0 : index
    %27 = vector.load %arg7[%c0_14, %c0_15] : memref<1x1xf32, #tpu.memory_space<vmem>>, vector<1x1xf32>
    %28 = vector.extract %27[0, 0] : f32 from vector<1x1xf32>
    %29 = vector.broadcast %28 : f32 to vector<16x8x8xf32>
    %30 = arith.addf %26, %29 : vector<16x8x8xf32>
    %cst_16 = arith.constant 0.000000e+00 : f32
    %31 = vector.broadcast %cst_16 : f32 to vector<16x8x128xf32>
    %c0_17 = arith.constant 0 : index
    %c0_18 = arith.constant 0 : index
    %c0_19 = arith.constant 0 : index
    %32 = vector.load %arg8[%c0_17, %c0_18, %c0_19] : memref<16x8x128xf32, #tpu.memory_space<vmem>>, vector<16x8x128xf32>
    tpu.vector_store %arg8[%c0_17, %c0_18, %c0_19], %31 {strides = array<i32>} : memref<16x8x128xf32, #tpu.memory_space<vmem>>, vector<16x8x128xf32>,
    %c0_20 = arith.constant 0 : index
    %c0_21 = arith.constant 0 : index
    %c0_22 = arith.constant 0 : index
    %33 = vector.load %arg8[%c0_20, %c0_21, %c0_22] : memref<16x8x128xf32, #tpu.memory_space<vmem>>, vector<16x8x8xf32>
    tpu.vector_store %arg8[%c0_20, %c0_21, %c0_22], %30 {strides = array<i32>} : memref<16x8x128xf32, #tpu.memory_space<vmem>>, vector<16x8x8xf32>,
    return
  }
  func.func @transform_0(%arg0: i32) -> (i32, i32, i32) {
    %c0_i32 = arith.constant 0 : i32
    %c0_i32_0 = arith.constant 0 : i32
    %c0_i32_1 = arith.constant 0 : i32
    return %c0_i32, %arg0, %c0_i32_0 : i32, i32, i32
  }
  func.func @transform_1(%arg0: i32) -> (i32, i32) {
    %c0_i32 = arith.constant 0 : i32
    %c0_i32_0 = arith.constant 0 : i32
    %c0_i32_1 = arith.constant 0 : i32
    return %c0_i32, %c0_i32_0 : i32, i32
  }
  func.func @transform_2(%arg0: i32) -> (i32, i32) {
    %c0_i32 = arith.constant 0 : i32
    %c0_i32_0 = arith.constant 0 : i32
    %c0_i32_1 = arith.constant 0 : i32
    return %c0_i32, %c0_i32_0 : i32, i32
  }
  func.func @transform_3(%arg0: i32) -> (i32, i32) {
    %c0_i32 = arith.constant 0 : i32
    %c0_i32_0 = arith.constant 0 : i32
    %c0_i32_1 = arith.constant 0 : i32
    return %c0_i32, %c0_i32_0 : i32, i32
  }
  func.func @transform_4(%arg0: i32) -> (i32, i32) {
    %c0_i32 = arith.constant 0 : i32
    %c0_i32_0 = arith.constant 0 : i32
    %c0_i32_1 = arith.constant 0 : i32
    return %c0_i32, %c0_i32_0 : i32, i32
  }
  func.func @transform_5(%arg0: i32) -> (i32, i32) {
    %c0_i32 = arith.constant 0 : i32
    %c0_i32_0 = arith.constant 0 : i32
    %c0_i32_1 = arith.constant 0 : i32
    return %c0_i32, %c0_i32_0 : i32, i32
  }
  func.func @transform_6(%arg0: i32) -> (i32, i32) {
    %c0_i32 = arith.constant 0 : i32
    %c0_i32_0 = arith.constant 0 : i32
    %c0_i32_1 = arith.constant 0 : i32
    return %c0_i32, %c0_i32_0 : i32, i32
  }
  func.func @transform_7(%arg0: i32) -> (i32, i32, i32) {
    %c0_i32 = arith.constant 0 : i32
    %c0_i32_0 = arith.constant 0 : i32
    %c0_i32_1 = arith.constant 0 : i32
    return %arg0, %c0_i32, %c0_i32_0 : i32, i32, i32
  }
}

module attributes {stable_mosaic.version = 11 : i64} {
  func.func @bilstm_layer_kernel(%arg0: i32, %arg1: memref<8x16x128xbf16, #tpu.memory_space<vmem>>, %arg2: memref<1x128x512xbf16, #tpu.memory_space<vmem>>, %arg3: memref<1x128x512xbf16, #tpu.memory_space<vmem>>, %arg4: memref<1x1x512xf32, #tpu.memory_space<vmem>>, %arg5: memref<8x16x128xbf16, #tpu.memory_space<vmem>>, %arg6: memref<8x16x512xbf16, #tpu.memory_space<vmem>>) attributes {dimension_semantics = [#tpu.dimension_semantics<parallel>], iteration_bounds = array<i64: 2>, scalar_prefetch = 0 : i64, scratch_operands = 1 : i64, tpu.core_type = #tpu.core_type<tc>, window_params = [{pipeline_mode = #tpu.pipeline_mode<synchronous>, transform_indices = @transform_0, window_bounds = array<i64: 8, 16, 128>}, {transform_indices = @transform_1, window_bounds = array<i64: 1, 128, 512>}, {transform_indices = @transform_2, window_bounds = array<i64: 1, 128, 512>}, {transform_indices = @transform_3, window_bounds = array<i64: 1, 1, 512>}, {transform_indices = @transform_4, window_bounds = array<i64: 8, 16, 128>}]} {
    %c0 = arith.constant 0 : index
    %c0_0 = arith.constant 0 : index
    %c0_1 = arith.constant 0 : index
    %0 = vector.load %arg2[%c0, %c0_0, %c0_1] : memref<1x128x512xbf16, #tpu.memory_space<vmem>>, vector<1x128x512xbf16>
    %1 = vector.shape_cast %0 : vector<1x128x512xbf16> to vector<128x512xbf16>
    %c0_2 = arith.constant 0 : index
    %c0_3 = arith.constant 0 : index
    %c0_4 = arith.constant 0 : index
    %2 = vector.load %arg3[%c0_2, %c0_3, %c0_4] : memref<1x128x512xbf16, #tpu.memory_space<vmem>>, vector<1x128x512xbf16>
    %3 = vector.shape_cast %2 : vector<1x128x512xbf16> to vector<128x512xbf16>
    %c0_5 = arith.constant 0 : index
    %c0_6 = arith.constant 0 : index
    %c0_7 = arith.constant 0 : index
    %4 = vector.load %arg4[%c0_5, %c0_6, %c0_7] : memref<1x1x512xf32, #tpu.memory_space<vmem>>, vector<1x1x512xf32>
    %5 = vector.shape_cast %4 : vector<1x1x512xf32> to vector<1x512xf32>
    %c0_8 = arith.constant 0 : index
    %c0_9 = arith.constant 0 : index
    %c0_10 = arith.constant 0 : index
    %6 = vector.load %arg1[%c0_8, %c0_9, %c0_10] : memref<8x16x128xbf16, #tpu.memory_space<vmem>>, vector<8x16x128xbf16>
    %7 = vector.shape_cast %6 : vector<8x16x128xbf16> to vector<128x128xbf16>
    %cst = arith.constant dense<0.000000e+00> : vector<128x512xf32>
    %8 = tpu.matmul %7, %1, %cst {dimension_numbers = #tpu.dot_dimension_numbers<[1], [0], [0], [1], [0, 0, 1, 1], [], []>} : vector<128x128xbf16>, vector<128x512xbf16>, vector<128x512xf32> -> vector<128x512xf32>
    %9 = vector.broadcast %5 : vector<1x512xf32> to vector<128x512xf32>
    %10 = arith.addf %8, %9 : vector<128x512xf32>
    %11 = vector.shape_cast %10 : vector<128x512xf32> to vector<8x16x512xf32>
    %12 = arith.truncf %11 : vector<8x16x512xf32> to vector<8x16x512xbf16>
    %c0_11 = arith.constant 0 : index
    %c0_12 = arith.constant 0 : index
    %c0_13 = arith.constant 0 : index
    %13 = vector.load %arg6[%c0_11, %c0_12, %c0_13] : memref<8x16x512xbf16, #tpu.memory_space<vmem>>, vector<8x16x512xbf16>
    tpu.vector_store %arg6[%c0_11, %c0_12, %c0_13], %12 {strides = array<i32>} : memref<8x16x512xbf16, #tpu.memory_space<vmem>>, vector<8x16x512xbf16>,
    %cst_14 = arith.constant 0.000000e+00 : f32
    %14 = vector.broadcast %cst_14 : f32 to vector<16x128xf32>
    %cst_15 = arith.constant 0.000000e+00 : f32
    %15 = vector.broadcast %cst_15 : f32 to vector<16x128xf32>
    %c0_i32 = arith.constant 0 : i32
    %c1_i32 = arith.constant 1 : i32
    %16 = arith.cmpi eq, %arg0, %c1_i32 : i32
    %c7_i32 = arith.constant 7 : i32
    %17 = arith.subi %c7_i32, %c0_i32 : i32
    %18 = arith.select %16, %17, %c0_i32 : i32
    %19 = arith.index_cast %18 : i32 to index
    %c0_16 = arith.constant 0 : index
    %c0_17 = arith.constant 0 : index
    %20 = vector.load %arg6[%19, %c0_16, %c0_17] : memref<8x16x512xbf16, #tpu.memory_space<vmem>>, vector<1x16x512xbf16>
    %21 = vector.shape_cast %20 : vector<1x16x512xbf16> to vector<16x512xbf16>
    %22 = arith.extf %21 : vector<16x512xbf16> to vector<16x512xf32>
    %23 = arith.truncf %14 : vector<16x128xf32> to vector<16x128xbf16>
    %cst_18 = arith.constant dense<0.000000e+00> : vector<16x512xf32>
    %24 = tpu.matmul %23, %3, %cst_18 {dimension_numbers = #tpu.dot_dimension_numbers<[1], [0], [0], [1], [0, 0, 1, 1], [], []>} : vector<16x128xbf16>, vector<128x512xbf16>, vector<16x512xf32> -> vector<16x512xf32>
    %25 = arith.addf %22, %24 : vector<16x512xf32>
    %26 = vector.extract_strided_slice %25 {offsets = [0, 0], sizes = [16, 128], strides = [1, 1]} : vector<16x512xf32> to vector<16x128xf32>
    %27 = arith.negf %26 : vector<16x128xf32>
    %28 = math.exp %27 : vector<16x128xf32>
    %cst_19 = arith.constant 1.000000e+00 : f32
    %29 = vector.broadcast %cst_19 : f32 to vector<16x128xf32>
    %30 = arith.addf %29, %28 : vector<16x128xf32>
    %31 = arith.divf %29, %30 : vector<16x128xf32>
    %32 = vector.extract_strided_slice %25 {offsets = [0, 128], sizes = [16, 128], strides = [1, 1]} : vector<16x512xf32> to vector<16x128xf32>
    %33 = arith.negf %32 : vector<16x128xf32>
    %34 = math.exp %33 : vector<16x128xf32>
    %cst_20 = arith.constant 1.000000e+00 : f32
    %35 = vector.broadcast %cst_20 : f32 to vector<16x128xf32>
    %36 = arith.addf %35, %34 : vector<16x128xf32>
    %37 = arith.divf %35, %36 : vector<16x128xf32>
    %38 = vector.extract_strided_slice %25 {offsets = [0, 256], sizes = [16, 128], strides = [1, 1]} : vector<16x512xf32> to vector<16x128xf32>
    %39 = math.tanh %38 : vector<16x128xf32>
    %40 = vector.extract_strided_slice %25 {offsets = [0, 384], sizes = [16, 128], strides = [1, 1]} : vector<16x512xf32> to vector<16x128xf32>
    %41 = arith.negf %40 : vector<16x128xf32>
    %42 = math.exp %41 : vector<16x128xf32>
    %cst_21 = arith.constant 1.000000e+00 : f32
    %43 = vector.broadcast %cst_21 : f32 to vector<16x128xf32>
    %44 = arith.addf %43, %42 : vector<16x128xf32>
    %45 = arith.divf %43, %44 : vector<16x128xf32>
    %46 = arith.mulf %37, %15 : vector<16x128xf32>
    %47 = arith.mulf %31, %39 : vector<16x128xf32>
    %48 = arith.addf %46, %47 : vector<16x128xf32>
    %49 = math.tanh %48 : vector<16x128xf32>
    %50 = arith.mulf %45, %49 : vector<16x128xf32>
    %51 = arith.truncf %50 : vector<16x128xf32> to vector<16x128xbf16>
    %52 = arith.index_cast %18 : i32 to index
    %c0_22 = arith.constant 0 : index
    %c0_23 = arith.constant 0 : index
    %53 = vector.load %arg5[%52, %c0_22, %c0_23] : memref<8x16x128xbf16, #tpu.memory_space<vmem>>, vector<1x16x128xbf16>
    %54 = vector.shape_cast %53 : vector<1x16x128xbf16> to vector<16x128xbf16>
    %55 = vector.shape_cast %51 : vector<16x128xbf16> to vector<1x16x128xbf16>
    tpu.vector_store %arg5[%52, %c0_22, %c0_23], %55 {strides = array<i32>} : memref<8x16x128xbf16, #tpu.memory_space<vmem>>, vector<1x16x128xbf16>,
    %c1_i32_24 = arith.constant 1 : i32
    %c1_i32_25 = arith.constant 1 : i32
    %56 = arith.cmpi eq, %arg0, %c1_i32_25 : i32
    %c7_i32_26 = arith.constant 7 : i32
    %57 = arith.subi %c7_i32_26, %c1_i32_24 : i32
    %58 = arith.select %56, %57, %c1_i32_24 : i32
    %59 = arith.index_cast %58 : i32 to index
    %c0_27 = arith.constant 0 : index
    %c0_28 = arith.constant 0 : index
    %60 = vector.load %arg6[%59, %c0_27, %c0_28] : memref<8x16x512xbf16, #tpu.memory_space<vmem>>, vector<1x16x512xbf16>
    %61 = vector.shape_cast %60 : vector<1x16x512xbf16> to vector<16x512xbf16>
    %62 = arith.extf %61 : vector<16x512xbf16> to vector<16x512xf32>
    %63 = arith.truncf %50 : vector<16x128xf32> to vector<16x128xbf16>
    %cst_29 = arith.constant dense<0.000000e+00> : vector<16x512xf32>
    %64 = tpu.matmul %63, %3, %cst_29 {dimension_numbers = #tpu.dot_dimension_numbers<[1], [0], [0], [1], [0, 0, 1, 1], [], []>} : vector<16x128xbf16>, vector<128x512xbf16>, vector<16x512xf32> -> vector<16x512xf32>
    %65 = arith.addf %62, %64 : vector<16x512xf32>
    %66 = vector.extract_strided_slice %65 {offsets = [0, 0], sizes = [16, 128], strides = [1, 1]} : vector<16x512xf32> to vector<16x128xf32>
    %67 = arith.negf %66 : vector<16x128xf32>
    %68 = math.exp %67 : vector<16x128xf32>
    %cst_30 = arith.constant 1.000000e+00 : f32
    %69 = vector.broadcast %cst_30 : f32 to vector<16x128xf32>
    %70 = arith.addf %69, %68 : vector<16x128xf32>
    %71 = arith.divf %69, %70 : vector<16x128xf32>
    %72 = vector.extract_strided_slice %65 {offsets = [0, 128], sizes = [16, 128], strides = [1, 1]} : vector<16x512xf32> to vector<16x128xf32>
    %73 = arith.negf %72 : vector<16x128xf32>
    %74 = math.exp %73 : vector<16x128xf32>
    %cst_31 = arith.constant 1.000000e+00 : f32
    %75 = vector.broadcast %cst_31 : f32 to vector<16x128xf32>
    %76 = arith.addf %75, %74 : vector<16x128xf32>
    %77 = arith.divf %75, %76 : vector<16x128xf32>
    %78 = vector.extract_strided_slice %65 {offsets = [0, 256], sizes = [16, 128], strides = [1, 1]} : vector<16x512xf32> to vector<16x128xf32>
    %79 = math.tanh %78 : vector<16x128xf32>
    %80 = vector.extract_strided_slice %65 {offsets = [0, 384], sizes = [16, 128], strides = [1, 1]} : vector<16x512xf32> to vector<16x128xf32>
    %81 = arith.negf %80 : vector<16x128xf32>
    %82 = math.exp %81 : vector<16x128xf32>
    %cst_32 = arith.constant 1.000000e+00 : f32
    %83 = vector.broadcast %cst_32 : f32 to vector<16x128xf32>
    %84 = arith.addf %83, %82 : vector<16x128xf32>
    %85 = arith.divf %83, %84 : vector<16x128xf32>
    %86 = arith.mulf %77, %48 : vector<16x128xf32>
    %87 = arith.mulf %71, %79 : vector<16x128xf32>
    %88 = arith.addf %86, %87 : vector<16x128xf32>
    %89 = math.tanh %88 : vector<16x128xf32>
    %90 = arith.mulf %85, %89 : vector<16x128xf32>
    %91 = arith.truncf %90 : vector<16x128xf32> to vector<16x128xbf16>
    %92 = arith.index_cast %58 : i32 to index
    %c0_33 = arith.constant 0 : index
    %c0_34 = arith.constant 0 : index
    %93 = vector.load %arg5[%92, %c0_33, %c0_34] : memref<8x16x128xbf16, #tpu.memory_space<vmem>>, vector<1x16x128xbf16>
    %94 = vector.shape_cast %93 : vector<1x16x128xbf16> to vector<16x128xbf16>
    %95 = vector.shape_cast %91 : vector<16x128xbf16> to vector<1x16x128xbf16>
    tpu.vector_store %arg5[%92, %c0_33, %c0_34], %95 {strides = array<i32>} : memref<8x16x128xbf16, #tpu.memory_space<vmem>>, vector<1x16x128xbf16>,
    %c2_i32 = arith.constant 2 : i32
    %c1_i32_35 = arith.constant 1 : i32
    %96 = arith.cmpi eq, %arg0, %c1_i32_35 : i32
    %c7_i32_36 = arith.constant 7 : i32
    %97 = arith.subi %c7_i32_36, %c2_i32 : i32
    %98 = arith.select %96, %97, %c2_i32 : i32
    %99 = arith.index_cast %98 : i32 to index
    %c0_37 = arith.constant 0 : index
    %c0_38 = arith.constant 0 : index
    %100 = vector.load %arg6[%99, %c0_37, %c0_38] : memref<8x16x512xbf16, #tpu.memory_space<vmem>>, vector<1x16x512xbf16>
    %101 = vector.shape_cast %100 : vector<1x16x512xbf16> to vector<16x512xbf16>
    %102 = arith.extf %101 : vector<16x512xbf16> to vector<16x512xf32>
    %103 = arith.truncf %90 : vector<16x128xf32> to vector<16x128xbf16>
    %cst_39 = arith.constant dense<0.000000e+00> : vector<16x512xf32>
    %104 = tpu.matmul %103, %3, %cst_39 {dimension_numbers = #tpu.dot_dimension_numbers<[1], [0], [0], [1], [0, 0, 1, 1], [], []>} : vector<16x128xbf16>, vector<128x512xbf16>, vector<16x512xf32> -> vector<16x512xf32>
    %105 = arith.addf %102, %104 : vector<16x512xf32>
    %106 = vector.extract_strided_slice %105 {offsets = [0, 0], sizes = [16, 128], strides = [1, 1]} : vector<16x512xf32> to vector<16x128xf32>
    %107 = arith.negf %106 : vector<16x128xf32>
    %108 = math.exp %107 : vector<16x128xf32>
    %cst_40 = arith.constant 1.000000e+00 : f32
    %109 = vector.broadcast %cst_40 : f32 to vector<16x128xf32>
    %110 = arith.addf %109, %108 : vector<16x128xf32>
    %111 = arith.divf %109, %110 : vector<16x128xf32>
    %112 = vector.extract_strided_slice %105 {offsets = [0, 128], sizes = [16, 128], strides = [1, 1]} : vector<16x512xf32> to vector<16x128xf32>
    %113 = arith.negf %112 : vector<16x128xf32>
    %114 = math.exp %113 : vector<16x128xf32>
    %cst_41 = arith.constant 1.000000e+00 : f32
    %115 = vector.broadcast %cst_41 : f32 to vector<16x128xf32>
    %116 = arith.addf %115, %114 : vector<16x128xf32>
    %117 = arith.divf %115, %116 : vector<16x128xf32>
    %118 = vector.extract_strided_slice %105 {offsets = [0, 256], sizes = [16, 128], strides = [1, 1]} : vector<16x512xf32> to vector<16x128xf32>
    %119 = math.tanh %118 : vector<16x128xf32>
    %120 = vector.extract_strided_slice %105 {offsets = [0, 384], sizes = [16, 128], strides = [1, 1]} : vector<16x512xf32> to vector<16x128xf32>
    %121 = arith.negf %120 : vector<16x128xf32>
    %122 = math.exp %121 : vector<16x128xf32>
    %cst_42 = arith.constant 1.000000e+00 : f32
    %123 = vector.broadcast %cst_42 : f32 to vector<16x128xf32>
    %124 = arith.addf %123, %122 : vector<16x128xf32>
    %125 = arith.divf %123, %124 : vector<16x128xf32>
    %126 = arith.mulf %117, %88 : vector<16x128xf32>
    %127 = arith.mulf %111, %119 : vector<16x128xf32>
    %128 = arith.addf %126, %127 : vector<16x128xf32>
    %129 = math.tanh %128 : vector<16x128xf32>
    %130 = arith.mulf %125, %129 : vector<16x128xf32>
    %131 = arith.truncf %130 : vector<16x128xf32> to vector<16x128xbf16>
    %132 = arith.index_cast %98 : i32 to index
    %c0_43 = arith.constant 0 : index
    %c0_44 = arith.constant 0 : index
    %133 = vector.load %arg5[%132, %c0_43, %c0_44] : memref<8x16x128xbf16, #tpu.memory_space<vmem>>, vector<1x16x128xbf16>
    %134 = vector.shape_cast %133 : vector<1x16x128xbf16> to vector<16x128xbf16>
    %135 = vector.shape_cast %131 : vector<16x128xbf16> to vector<1x16x128xbf16>
    tpu.vector_store %arg5[%132, %c0_43, %c0_44], %135 {strides = array<i32>} : memref<8x16x128xbf16, #tpu.memory_space<vmem>>, vector<1x16x128xbf16>,
    %c3_i32 = arith.constant 3 : i32
    %c1_i32_45 = arith.constant 1 : i32
    %136 = arith.cmpi eq, %arg0, %c1_i32_45 : i32
    %c7_i32_46 = arith.constant 7 : i32
    %137 = arith.subi %c7_i32_46, %c3_i32 : i32
    %138 = arith.select %136, %137, %c3_i32 : i32
    %139 = arith.index_cast %138 : i32 to index
    %c0_47 = arith.constant 0 : index
    %c0_48 = arith.constant 0 : index
    %140 = vector.load %arg6[%139, %c0_47, %c0_48] : memref<8x16x512xbf16, #tpu.memory_space<vmem>>, vector<1x16x512xbf16>
    %141 = vector.shape_cast %140 : vector<1x16x512xbf16> to vector<16x512xbf16>
    %142 = arith.extf %141 : vector<16x512xbf16> to vector<16x512xf32>
    %143 = arith.truncf %130 : vector<16x128xf32> to vector<16x128xbf16>
    %cst_49 = arith.constant dense<0.000000e+00> : vector<16x512xf32>
    %144 = tpu.matmul %143, %3, %cst_49 {dimension_numbers = #tpu.dot_dimension_numbers<[1], [0], [0], [1], [0, 0, 1, 1], [], []>} : vector<16x128xbf16>, vector<128x512xbf16>, vector<16x512xf32> -> vector<16x512xf32>
    %145 = arith.addf %142, %144 : vector<16x512xf32>
    %146 = vector.extract_strided_slice %145 {offsets = [0, 0], sizes = [16, 128], strides = [1, 1]} : vector<16x512xf32> to vector<16x128xf32>
    %147 = arith.negf %146 : vector<16x128xf32>
    %148 = math.exp %147 : vector<16x128xf32>
    %cst_50 = arith.constant 1.000000e+00 : f32
    %149 = vector.broadcast %cst_50 : f32 to vector<16x128xf32>
    %150 = arith.addf %149, %148 : vector<16x128xf32>
    %151 = arith.divf %149, %150 : vector<16x128xf32>
    %152 = vector.extract_strided_slice %145 {offsets = [0, 128], sizes = [16, 128], strides = [1, 1]} : vector<16x512xf32> to vector<16x128xf32>
    %153 = arith.negf %152 : vector<16x128xf32>
    %154 = math.exp %153 : vector<16x128xf32>
    %cst_51 = arith.constant 1.000000e+00 : f32
    %155 = vector.broadcast %cst_51 : f32 to vector<16x128xf32>
    %156 = arith.addf %155, %154 : vector<16x128xf32>
    %157 = arith.divf %155, %156 : vector<16x128xf32>
    %158 = vector.extract_strided_slice %145 {offsets = [0, 256], sizes = [16, 128], strides = [1, 1]} : vector<16x512xf32> to vector<16x128xf32>
    %159 = math.tanh %158 : vector<16x128xf32>
    %160 = vector.extract_strided_slice %145 {offsets = [0, 384], sizes = [16, 128], strides = [1, 1]} : vector<16x512xf32> to vector<16x128xf32>
    %161 = arith.negf %160 : vector<16x128xf32>
    %162 = math.exp %161 : vector<16x128xf32>
    %cst_52 = arith.constant 1.000000e+00 : f32
    %163 = vector.broadcast %cst_52 : f32 to vector<16x128xf32>
    %164 = arith.addf %163, %162 : vector<16x128xf32>
    %165 = arith.divf %163, %164 : vector<16x128xf32>
    %166 = arith.mulf %157, %128 : vector<16x128xf32>
    %167 = arith.mulf %151, %159 : vector<16x128xf32>
    %168 = arith.addf %166, %167 : vector<16x128xf32>
    %169 = math.tanh %168 : vector<16x128xf32>
    %170 = arith.mulf %165, %169 : vector<16x128xf32>
    %171 = arith.truncf %170 : vector<16x128xf32> to vector<16x128xbf16>
    %172 = arith.index_cast %138 : i32 to index
    %c0_53 = arith.constant 0 : index
    %c0_54 = arith.constant 0 : index
    %173 = vector.load %arg5[%172, %c0_53, %c0_54] : memref<8x16x128xbf16, #tpu.memory_space<vmem>>, vector<1x16x128xbf16>
    %174 = vector.shape_cast %173 : vector<1x16x128xbf16> to vector<16x128xbf16>
    %175 = vector.shape_cast %171 : vector<16x128xbf16> to vector<1x16x128xbf16>
    tpu.vector_store %arg5[%172, %c0_53, %c0_54], %175 {strides = array<i32>} : memref<8x16x128xbf16, #tpu.memory_space<vmem>>, vector<1x16x128xbf16>,
    %c4_i32 = arith.constant 4 : i32
    %c1_i32_55 = arith.constant 1 : i32
    %176 = arith.cmpi eq, %arg0, %c1_i32_55 : i32
    %c7_i32_56 = arith.constant 7 : i32
    %177 = arith.subi %c7_i32_56, %c4_i32 : i32
    %178 = arith.select %176, %177, %c4_i32 : i32
    %179 = arith.index_cast %178 : i32 to index
    %c0_57 = arith.constant 0 : index
    %c0_58 = arith.constant 0 : index
    %180 = vector.load %arg6[%179, %c0_57, %c0_58] : memref<8x16x512xbf16, #tpu.memory_space<vmem>>, vector<1x16x512xbf16>
    %181 = vector.shape_cast %180 : vector<1x16x512xbf16> to vector<16x512xbf16>
    %182 = arith.extf %181 : vector<16x512xbf16> to vector<16x512xf32>
    %183 = arith.truncf %170 : vector<16x128xf32> to vector<16x128xbf16>
    %cst_59 = arith.constant dense<0.000000e+00> : vector<16x512xf32>
    %184 = tpu.matmul %183, %3, %cst_59 {dimension_numbers = #tpu.dot_dimension_numbers<[1], [0], [0], [1], [0, 0, 1, 1], [], []>} : vector<16x128xbf16>, vector<128x512xbf16>, vector<16x512xf32> -> vector<16x512xf32>
    %185 = arith.addf %182, %184 : vector<16x512xf32>
    %186 = vector.extract_strided_slice %185 {offsets = [0, 0], sizes = [16, 128], strides = [1, 1]} : vector<16x512xf32> to vector<16x128xf32>
    %187 = arith.negf %186 : vector<16x128xf32>
    %188 = math.exp %187 : vector<16x128xf32>
    %cst_60 = arith.constant 1.000000e+00 : f32
    %189 = vector.broadcast %cst_60 : f32 to vector<16x128xf32>
    %190 = arith.addf %189, %188 : vector<16x128xf32>
    %191 = arith.divf %189, %190 : vector<16x128xf32>
    %192 = vector.extract_strided_slice %185 {offsets = [0, 128], sizes = [16, 128], strides = [1, 1]} : vector<16x512xf32> to vector<16x128xf32>
    %193 = arith.negf %192 : vector<16x128xf32>
    %194 = math.exp %193 : vector<16x128xf32>
    %cst_61 = arith.constant 1.000000e+00 : f32
    %195 = vector.broadcast %cst_61 : f32 to vector<16x128xf32>
    %196 = arith.addf %195, %194 : vector<16x128xf32>
    %197 = arith.divf %195, %196 : vector<16x128xf32>
    %198 = vector.extract_strided_slice %185 {offsets = [0, 256], sizes = [16, 128], strides = [1, 1]} : vector<16x512xf32> to vector<16x128xf32>
    %199 = math.tanh %198 : vector<16x128xf32>
    %200 = vector.extract_strided_slice %185 {offsets = [0, 384], sizes = [16, 128], strides = [1, 1]} : vector<16x512xf32> to vector<16x128xf32>
    %201 = arith.negf %200 : vector<16x128xf32>
    %202 = math.exp %201 : vector<16x128xf32>
    %cst_62 = arith.constant 1.000000e+00 : f32
    %203 = vector.broadcast %cst_62 : f32 to vector<16x128xf32>
    %204 = arith.addf %203, %202 : vector<16x128xf32>
    %205 = arith.divf %203, %204 : vector<16x128xf32>
    %206 = arith.mulf %197, %168 : vector<16x128xf32>
    %207 = arith.mulf %191, %199 : vector<16x128xf32>
    %208 = arith.addf %206, %207 : vector<16x128xf32>
    %209 = math.tanh %208 : vector<16x128xf32>
    %210 = arith.mulf %205, %209 : vector<16x128xf32>
    %211 = arith.truncf %210 : vector<16x128xf32> to vector<16x128xbf16>
    %212 = arith.index_cast %178 : i32 to index
    %c0_63 = arith.constant 0 : index
    %c0_64 = arith.constant 0 : index
    %213 = vector.load %arg5[%212, %c0_63, %c0_64] : memref<8x16x128xbf16, #tpu.memory_space<vmem>>, vector<1x16x128xbf16>
    %214 = vector.shape_cast %213 : vector<1x16x128xbf16> to vector<16x128xbf16>
    %215 = vector.shape_cast %211 : vector<16x128xbf16> to vector<1x16x128xbf16>
    tpu.vector_store %arg5[%212, %c0_63, %c0_64], %215 {strides = array<i32>} : memref<8x16x128xbf16, #tpu.memory_space<vmem>>, vector<1x16x128xbf16>,
    %c5_i32 = arith.constant 5 : i32
    %c1_i32_65 = arith.constant 1 : i32
    %216 = arith.cmpi eq, %arg0, %c1_i32_65 : i32
    %c7_i32_66 = arith.constant 7 : i32
    %217 = arith.subi %c7_i32_66, %c5_i32 : i32
    %218 = arith.select %216, %217, %c5_i32 : i32
    %219 = arith.index_cast %218 : i32 to index
    %c0_67 = arith.constant 0 : index
    %c0_68 = arith.constant 0 : index
    %220 = vector.load %arg6[%219, %c0_67, %c0_68] : memref<8x16x512xbf16, #tpu.memory_space<vmem>>, vector<1x16x512xbf16>
    %221 = vector.shape_cast %220 : vector<1x16x512xbf16> to vector<16x512xbf16>
    %222 = arith.extf %221 : vector<16x512xbf16> to vector<16x512xf32>
    %223 = arith.truncf %210 : vector<16x128xf32> to vector<16x128xbf16>
    %cst_69 = arith.constant dense<0.000000e+00> : vector<16x512xf32>
    %224 = tpu.matmul %223, %3, %cst_69 {dimension_numbers = #tpu.dot_dimension_numbers<[1], [0], [0], [1], [0, 0, 1, 1], [], []>} : vector<16x128xbf16>, vector<128x512xbf16>, vector<16x512xf32> -> vector<16x512xf32>
    %225 = arith.addf %222, %224 : vector<16x512xf32>
    %226 = vector.extract_strided_slice %225 {offsets = [0, 0], sizes = [16, 128], strides = [1, 1]} : vector<16x512xf32> to vector<16x128xf32>
    %227 = arith.negf %226 : vector<16x128xf32>
    %228 = math.exp %227 : vector<16x128xf32>
    %cst_70 = arith.constant 1.000000e+00 : f32
    %229 = vector.broadcast %cst_70 : f32 to vector<16x128xf32>
    %230 = arith.addf %229, %228 : vector<16x128xf32>
    %231 = arith.divf %229, %230 : vector<16x128xf32>
    %232 = vector.extract_strided_slice %225 {offsets = [0, 128], sizes = [16, 128], strides = [1, 1]} : vector<16x512xf32> to vector<16x128xf32>
    %233 = arith.negf %232 : vector<16x128xf32>
    %234 = math.exp %233 : vector<16x128xf32>
    %cst_71 = arith.constant 1.000000e+00 : f32
    %235 = vector.broadcast %cst_71 : f32 to vector<16x128xf32>
    %236 = arith.addf %235, %234 : vector<16x128xf32>
    %237 = arith.divf %235, %236 : vector<16x128xf32>
    %238 = vector.extract_strided_slice %225 {offsets = [0, 256], sizes = [16, 128], strides = [1, 1]} : vector<16x512xf32> to vector<16x128xf32>
    %239 = math.tanh %238 : vector<16x128xf32>
    %240 = vector.extract_strided_slice %225 {offsets = [0, 384], sizes = [16, 128], strides = [1, 1]} : vector<16x512xf32> to vector<16x128xf32>
    %241 = arith.negf %240 : vector<16x128xf32>
    %242 = math.exp %241 : vector<16x128xf32>
    %cst_72 = arith.constant 1.000000e+00 : f32
    %243 = vector.broadcast %cst_72 : f32 to vector<16x128xf32>
    %244 = arith.addf %243, %242 : vector<16x128xf32>
    %245 = arith.divf %243, %244 : vector<16x128xf32>
    %246 = arith.mulf %237, %208 : vector<16x128xf32>
    %247 = arith.mulf %231, %239 : vector<16x128xf32>
    %248 = arith.addf %246, %247 : vector<16x128xf32>
    %249 = math.tanh %248 : vector<16x128xf32>
    %250 = arith.mulf %245, %249 : vector<16x128xf32>
    %251 = arith.truncf %250 : vector<16x128xf32> to vector<16x128xbf16>
    %252 = arith.index_cast %218 : i32 to index
    %c0_73 = arith.constant 0 : index
    %c0_74 = arith.constant 0 : index
    %253 = vector.load %arg5[%252, %c0_73, %c0_74] : memref<8x16x128xbf16, #tpu.memory_space<vmem>>, vector<1x16x128xbf16>
    %254 = vector.shape_cast %253 : vector<1x16x128xbf16> to vector<16x128xbf16>
    %255 = vector.shape_cast %251 : vector<16x128xbf16> to vector<1x16x128xbf16>
    tpu.vector_store %arg5[%252, %c0_73, %c0_74], %255 {strides = array<i32>} : memref<8x16x128xbf16, #tpu.memory_space<vmem>>, vector<1x16x128xbf16>,
    %c6_i32 = arith.constant 6 : i32
    %c1_i32_75 = arith.constant 1 : i32
    %256 = arith.cmpi eq, %arg0, %c1_i32_75 : i32
    %c7_i32_76 = arith.constant 7 : i32
    %257 = arith.subi %c7_i32_76, %c6_i32 : i32
    %258 = arith.select %256, %257, %c6_i32 : i32
    %259 = arith.index_cast %258 : i32 to index
    %c0_77 = arith.constant 0 : index
    %c0_78 = arith.constant 0 : index
    %260 = vector.load %arg6[%259, %c0_77, %c0_78] : memref<8x16x512xbf16, #tpu.memory_space<vmem>>, vector<1x16x512xbf16>
    %261 = vector.shape_cast %260 : vector<1x16x512xbf16> to vector<16x512xbf16>
    %262 = arith.extf %261 : vector<16x512xbf16> to vector<16x512xf32>
    %263 = arith.truncf %250 : vector<16x128xf32> to vector<16x128xbf16>
    %cst_79 = arith.constant dense<0.000000e+00> : vector<16x512xf32>
    %264 = tpu.matmul %263, %3, %cst_79 {dimension_numbers = #tpu.dot_dimension_numbers<[1], [0], [0], [1], [0, 0, 1, 1], [], []>} : vector<16x128xbf16>, vector<128x512xbf16>, vector<16x512xf32> -> vector<16x512xf32>
    %265 = arith.addf %262, %264 : vector<16x512xf32>
    %266 = vector.extract_strided_slice %265 {offsets = [0, 0], sizes = [16, 128], strides = [1, 1]} : vector<16x512xf32> to vector<16x128xf32>
    %267 = arith.negf %266 : vector<16x128xf32>
    %268 = math.exp %267 : vector<16x128xf32>
    %cst_80 = arith.constant 1.000000e+00 : f32
    %269 = vector.broadcast %cst_80 : f32 to vector<16x128xf32>
    %270 = arith.addf %269, %268 : vector<16x128xf32>
    %271 = arith.divf %269, %270 : vector<16x128xf32>
    %272 = vector.extract_strided_slice %265 {offsets = [0, 128], sizes = [16, 128], strides = [1, 1]} : vector<16x512xf32> to vector<16x128xf32>
    %273 = arith.negf %272 : vector<16x128xf32>
    %274 = math.exp %273 : vector<16x128xf32>
    %cst_81 = arith.constant 1.000000e+00 : f32
    %275 = vector.broadcast %cst_81 : f32 to vector<16x128xf32>
    %276 = arith.addf %275, %274 : vector<16x128xf32>
    %277 = arith.divf %275, %276 : vector<16x128xf32>
    %278 = vector.extract_strided_slice %265 {offsets = [0, 256], sizes = [16, 128], strides = [1, 1]} : vector<16x512xf32> to vector<16x128xf32>
    %279 = math.tanh %278 : vector<16x128xf32>
    %280 = vector.extract_strided_slice %265 {offsets = [0, 384], sizes = [16, 128], strides = [1, 1]} : vector<16x512xf32> to vector<16x128xf32>
    %281 = arith.negf %280 : vector<16x128xf32>
    %282 = math.exp %281 : vector<16x128xf32>
    %cst_82 = arith.constant 1.000000e+00 : f32
    %283 = vector.broadcast %cst_82 : f32 to vector<16x128xf32>
    %284 = arith.addf %283, %282 : vector<16x128xf32>
    %285 = arith.divf %283, %284 : vector<16x128xf32>
    %286 = arith.mulf %277, %248 : vector<16x128xf32>
    %287 = arith.mulf %271, %279 : vector<16x128xf32>
    %288 = arith.addf %286, %287 : vector<16x128xf32>
    %289 = math.tanh %288 : vector<16x128xf32>
    %290 = arith.mulf %285, %289 : vector<16x128xf32>
    %291 = arith.truncf %290 : vector<16x128xf32> to vector<16x128xbf16>
    %292 = arith.index_cast %258 : i32 to index
    %c0_83 = arith.constant 0 : index
    %c0_84 = arith.constant 0 : index
    %293 = vector.load %arg5[%292, %c0_83, %c0_84] : memref<8x16x128xbf16, #tpu.memory_space<vmem>>, vector<1x16x128xbf16>
    %294 = vector.shape_cast %293 : vector<1x16x128xbf16> to vector<16x128xbf16>
    %295 = vector.shape_cast %291 : vector<16x128xbf16> to vector<1x16x128xbf16>
    tpu.vector_store %arg5[%292, %c0_83, %c0_84], %295 {strides = array<i32>} : memref<8x16x128xbf16, #tpu.memory_space<vmem>>, vector<1x16x128xbf16>,
    %c7_i32_85 = arith.constant 7 : i32
    %c1_i32_86 = arith.constant 1 : i32
    %296 = arith.cmpi eq, %arg0, %c1_i32_86 : i32
    %c7_i32_87 = arith.constant 7 : i32
    %297 = arith.subi %c7_i32_87, %c7_i32_85 : i32
    %298 = arith.select %296, %297, %c7_i32_85 : i32
    %299 = arith.index_cast %298 : i32 to index
    %c0_88 = arith.constant 0 : index
    %c0_89 = arith.constant 0 : index
    %300 = vector.load %arg6[%299, %c0_88, %c0_89] : memref<8x16x512xbf16, #tpu.memory_space<vmem>>, vector<1x16x512xbf16>
    %301 = vector.shape_cast %300 : vector<1x16x512xbf16> to vector<16x512xbf16>
    %302 = arith.extf %301 : vector<16x512xbf16> to vector<16x512xf32>
    %303 = arith.truncf %290 : vector<16x128xf32> to vector<16x128xbf16>
    %cst_90 = arith.constant dense<0.000000e+00> : vector<16x512xf32>
    %304 = tpu.matmul %303, %3, %cst_90 {dimension_numbers = #tpu.dot_dimension_numbers<[1], [0], [0], [1], [0, 0, 1, 1], [], []>} : vector<16x128xbf16>, vector<128x512xbf16>, vector<16x512xf32> -> vector<16x512xf32>
    %305 = arith.addf %302, %304 : vector<16x512xf32>
    %306 = vector.extract_strided_slice %305 {offsets = [0, 0], sizes = [16, 128], strides = [1, 1]} : vector<16x512xf32> to vector<16x128xf32>
    %307 = arith.negf %306 : vector<16x128xf32>
    %308 = math.exp %307 : vector<16x128xf32>
    %cst_91 = arith.constant 1.000000e+00 : f32
    %309 = vector.broadcast %cst_91 : f32 to vector<16x128xf32>
    %310 = arith.addf %309, %308 : vector<16x128xf32>
    %311 = arith.divf %309, %310 : vector<16x128xf32>
    %312 = vector.extract_strided_slice %305 {offsets = [0, 128], sizes = [16, 128], strides = [1, 1]} : vector<16x512xf32> to vector<16x128xf32>
    %313 = arith.negf %312 : vector<16x128xf32>
    %314 = math.exp %313 : vector<16x128xf32>
    %cst_92 = arith.constant 1.000000e+00 : f32
    %315 = vector.broadcast %cst_92 : f32 to vector<16x128xf32>
    %316 = arith.addf %315, %314 : vector<16x128xf32>
    %317 = arith.divf %315, %316 : vector<16x128xf32>
    %318 = vector.extract_strided_slice %305 {offsets = [0, 256], sizes = [16, 128], strides = [1, 1]} : vector<16x512xf32> to vector<16x128xf32>
    %319 = math.tanh %318 : vector<16x128xf32>
    %320 = vector.extract_strided_slice %305 {offsets = [0, 384], sizes = [16, 128], strides = [1, 1]} : vector<16x512xf32> to vector<16x128xf32>
    %321 = arith.negf %320 : vector<16x128xf32>
    %322 = math.exp %321 : vector<16x128xf32>
    %cst_93 = arith.constant 1.000000e+00 : f32
    %323 = vector.broadcast %cst_93 : f32 to vector<16x128xf32>
    %324 = arith.addf %323, %322 : vector<16x128xf32>
    %325 = arith.divf %323, %324 : vector<16x128xf32>
    %326 = arith.mulf %317, %288 : vector<16x128xf32>
    %327 = arith.mulf %311, %319 : vector<16x128xf32>
    %328 = arith.addf %326, %327 : vector<16x128xf32>
    %329 = math.tanh %328 : vector<16x128xf32>
    %330 = arith.mulf %325, %329 : vector<16x128xf32>
    %331 = arith.truncf %330 : vector<16x128xf32> to vector<16x128xbf16>
    %332 = arith.index_cast %298 : i32 to index
    %c0_94 = arith.constant 0 : index
    %c0_95 = arith.constant 0 : index
    %333 = vector.load %arg5[%332, %c0_94, %c0_95] : memref<8x16x128xbf16, #tpu.memory_space<vmem>>, vector<1x16x128xbf16>
    %334 = vector.shape_cast %333 : vector<1x16x128xbf16> to vector<16x128xbf16>
    %335 = vector.shape_cast %331 : vector<16x128xbf16> to vector<1x16x128xbf16>
    tpu.vector_store %arg5[%332, %c0_94, %c0_95], %335 {strides = array<i32>} : memref<8x16x128xbf16, #tpu.memory_space<vmem>>, vector<1x16x128xbf16>,
    %c8_i32 = arith.constant 8 : i32
    return
  }
  func.func @transform_0(%arg0: i32) -> (i32, i32, i32) {
    %c0_i32 = arith.constant 0 : i32
    %c0_i32_0 = arith.constant 0 : i32
    %c0_i32_1 = arith.constant 0 : i32
    %c0_i32_2 = arith.constant 0 : i32
    return %c0_i32, %c0_i32_0, %c0_i32_1 : i32, i32, i32
  }
  func.func @transform_1(%arg0: i32) -> (i32, i32, i32) {
    %c0_i32 = arith.constant 0 : i32
    %c0_i32_0 = arith.constant 0 : i32
    %c0_i32_1 = arith.constant 0 : i32
    return %arg0, %c0_i32, %c0_i32_0 : i32, i32, i32
  }
  func.func @transform_2(%arg0: i32) -> (i32, i32, i32) {
    %c0_i32 = arith.constant 0 : i32
    %c0_i32_0 = arith.constant 0 : i32
    %c0_i32_1 = arith.constant 0 : i32
    return %arg0, %c0_i32, %c0_i32_0 : i32, i32, i32
  }
  func.func @transform_3(%arg0: i32) -> (i32, i32, i32) {
    %c0_i32 = arith.constant 0 : i32
    %c0_i32_0 = arith.constant 0 : i32
    %c0_i32_1 = arith.constant 0 : i32
    return %arg0, %c0_i32, %c0_i32_0 : i32, i32, i32
  }
  func.func @transform_4(%arg0: i32) -> (i32, i32, i32) {
    %c0_i32 = arith.constant 0 : i32
    %c0_i32_0 = arith.constant 0 : i32
    %c0_i32_1 = arith.constant 0 : i32
    return %c0_i32, %c0_i32_0, %arg0 : i32, i32, i32
  }
}

module attributes {stable_mosaic.version = 11 : i64} {
  func.func @bilstm_layer_kernel(%arg0: i32, %arg1: memref<8x16x256xbf16, #tpu.memory_space<vmem>>, %arg2: memref<1x256x512xbf16, #tpu.memory_space<vmem>>, %arg3: memref<1x128x512xbf16, #tpu.memory_space<vmem>>, %arg4: memref<1x1x512xf32, #tpu.memory_space<vmem>>, %arg5: memref<8x16x128xbf16, #tpu.memory_space<vmem>>, %arg6: memref<8x16x512xbf16, #tpu.memory_space<vmem>>) attributes {dimension_semantics = [#tpu.dimension_semantics<parallel>], iteration_bounds = array<i64: 2>, scalar_prefetch = 0 : i64, scratch_operands = 1 : i64, tpu.core_type = #tpu.core_type<tc>, window_params = [{pipeline_mode = #tpu.pipeline_mode<synchronous>, transform_indices = @transform_0, window_bounds = array<i64: 8, 16, 256>}, {transform_indices = @transform_1, window_bounds = array<i64: 1, 256, 512>}, {transform_indices = @transform_2, window_bounds = array<i64: 1, 128, 512>}, {transform_indices = @transform_3, window_bounds = array<i64: 1, 1, 512>}, {transform_indices = @transform_4, window_bounds = array<i64: 8, 16, 128>}]} {
    %c0 = arith.constant 0 : index
    %c0_0 = arith.constant 0 : index
    %c0_1 = arith.constant 0 : index
    %0 = vector.load %arg2[%c0, %c0_0, %c0_1] : memref<1x256x512xbf16, #tpu.memory_space<vmem>>, vector<1x256x512xbf16>
    %1 = vector.shape_cast %0 : vector<1x256x512xbf16> to vector<256x512xbf16>
    %c0_2 = arith.constant 0 : index
    %c0_3 = arith.constant 0 : index
    %c0_4 = arith.constant 0 : index
    %2 = vector.load %arg3[%c0_2, %c0_3, %c0_4] : memref<1x128x512xbf16, #tpu.memory_space<vmem>>, vector<1x128x512xbf16>
    %3 = vector.shape_cast %2 : vector<1x128x512xbf16> to vector<128x512xbf16>
    %c0_5 = arith.constant 0 : index
    %c0_6 = arith.constant 0 : index
    %c0_7 = arith.constant 0 : index
    %4 = vector.load %arg4[%c0_5, %c0_6, %c0_7] : memref<1x1x512xf32, #tpu.memory_space<vmem>>, vector<1x1x512xf32>
    %5 = vector.shape_cast %4 : vector<1x1x512xf32> to vector<1x512xf32>
    %c0_8 = arith.constant 0 : index
    %c0_9 = arith.constant 0 : index
    %c0_10 = arith.constant 0 : index
    %6 = vector.load %arg1[%c0_8, %c0_9, %c0_10] : memref<8x16x256xbf16, #tpu.memory_space<vmem>>, vector<8x16x256xbf16>
    %7 = vector.shape_cast %6 : vector<8x16x256xbf16> to vector<128x256xbf16>
    %cst = arith.constant dense<0.000000e+00> : vector<128x512xf32>
    %8 = tpu.matmul %7, %1, %cst {dimension_numbers = #tpu.dot_dimension_numbers<[1], [0], [0], [1], [0, 0, 1, 1], [], []>} : vector<128x256xbf16>, vector<256x512xbf16>, vector<128x512xf32> -> vector<128x512xf32>
    %9 = vector.broadcast %5 : vector<1x512xf32> to vector<128x512xf32>
    %10 = arith.addf %8, %9 : vector<128x512xf32>
    %11 = vector.shape_cast %10 : vector<128x512xf32> to vector<8x16x512xf32>
    %12 = arith.truncf %11 : vector<8x16x512xf32> to vector<8x16x512xbf16>
    %c0_11 = arith.constant 0 : index
    %c0_12 = arith.constant 0 : index
    %c0_13 = arith.constant 0 : index
    %13 = vector.load %arg6[%c0_11, %c0_12, %c0_13] : memref<8x16x512xbf16, #tpu.memory_space<vmem>>, vector<8x16x512xbf16>
    tpu.vector_store %arg6[%c0_11, %c0_12, %c0_13], %12 {strides = array<i32>} : memref<8x16x512xbf16, #tpu.memory_space<vmem>>, vector<8x16x512xbf16>,
    %cst_14 = arith.constant 0.000000e+00 : f32
    %14 = vector.broadcast %cst_14 : f32 to vector<16x128xf32>
    %cst_15 = arith.constant 0.000000e+00 : f32
    %15 = vector.broadcast %cst_15 : f32 to vector<16x128xf32>
    %c0_i32 = arith.constant 0 : i32
    %c1_i32 = arith.constant 1 : i32
    %16 = arith.cmpi eq, %arg0, %c1_i32 : i32
    %c7_i32 = arith.constant 7 : i32
    %17 = arith.subi %c7_i32, %c0_i32 : i32
    %18 = arith.select %16, %17, %c0_i32 : i32
    %19 = arith.index_cast %18 : i32 to index
    %c0_16 = arith.constant 0 : index
    %c0_17 = arith.constant 0 : index
    %20 = vector.load %arg6[%19, %c0_16, %c0_17] : memref<8x16x512xbf16, #tpu.memory_space<vmem>>, vector<1x16x512xbf16>
    %21 = vector.shape_cast %20 : vector<1x16x512xbf16> to vector<16x512xbf16>
    %22 = arith.extf %21 : vector<16x512xbf16> to vector<16x512xf32>
    %23 = arith.truncf %14 : vector<16x128xf32> to vector<16x128xbf16>
    %cst_18 = arith.constant dense<0.000000e+00> : vector<16x512xf32>
    %24 = tpu.matmul %23, %3, %cst_18 {dimension_numbers = #tpu.dot_dimension_numbers<[1], [0], [0], [1], [0, 0, 1, 1], [], []>} : vector<16x128xbf16>, vector<128x512xbf16>, vector<16x512xf32> -> vector<16x512xf32>
    %25 = arith.addf %22, %24 : vector<16x512xf32>
    %26 = vector.extract_strided_slice %25 {offsets = [0, 0], sizes = [16, 128], strides = [1, 1]} : vector<16x512xf32> to vector<16x128xf32>
    %27 = arith.negf %26 : vector<16x128xf32>
    %28 = math.exp %27 : vector<16x128xf32>
    %cst_19 = arith.constant 1.000000e+00 : f32
    %29 = vector.broadcast %cst_19 : f32 to vector<16x128xf32>
    %30 = arith.addf %29, %28 : vector<16x128xf32>
    %31 = arith.divf %29, %30 : vector<16x128xf32>
    %32 = vector.extract_strided_slice %25 {offsets = [0, 128], sizes = [16, 128], strides = [1, 1]} : vector<16x512xf32> to vector<16x128xf32>
    %33 = arith.negf %32 : vector<16x128xf32>
    %34 = math.exp %33 : vector<16x128xf32>
    %cst_20 = arith.constant 1.000000e+00 : f32
    %35 = vector.broadcast %cst_20 : f32 to vector<16x128xf32>
    %36 = arith.addf %35, %34 : vector<16x128xf32>
    %37 = arith.divf %35, %36 : vector<16x128xf32>
    %38 = vector.extract_strided_slice %25 {offsets = [0, 256], sizes = [16, 128], strides = [1, 1]} : vector<16x512xf32> to vector<16x128xf32>
    %39 = math.tanh %38 : vector<16x128xf32>
    %40 = vector.extract_strided_slice %25 {offsets = [0, 384], sizes = [16, 128], strides = [1, 1]} : vector<16x512xf32> to vector<16x128xf32>
    %41 = arith.negf %40 : vector<16x128xf32>
    %42 = math.exp %41 : vector<16x128xf32>
    %cst_21 = arith.constant 1.000000e+00 : f32
    %43 = vector.broadcast %cst_21 : f32 to vector<16x128xf32>
    %44 = arith.addf %43, %42 : vector<16x128xf32>
    %45 = arith.divf %43, %44 : vector<16x128xf32>
    %46 = arith.mulf %37, %15 : vector<16x128xf32>
    %47 = arith.mulf %31, %39 : vector<16x128xf32>
    %48 = arith.addf %46, %47 : vector<16x128xf32>
    %49 = math.tanh %48 : vector<16x128xf32>
    %50 = arith.mulf %45, %49 : vector<16x128xf32>
    %51 = arith.truncf %50 : vector<16x128xf32> to vector<16x128xbf16>
    %52 = arith.index_cast %18 : i32 to index
    %c0_22 = arith.constant 0 : index
    %c0_23 = arith.constant 0 : index
    %53 = vector.load %arg5[%52, %c0_22, %c0_23] : memref<8x16x128xbf16, #tpu.memory_space<vmem>>, vector<1x16x128xbf16>
    %54 = vector.shape_cast %53 : vector<1x16x128xbf16> to vector<16x128xbf16>
    %55 = vector.shape_cast %51 : vector<16x128xbf16> to vector<1x16x128xbf16>
    tpu.vector_store %arg5[%52, %c0_22, %c0_23], %55 {strides = array<i32>} : memref<8x16x128xbf16, #tpu.memory_space<vmem>>, vector<1x16x128xbf16>,
    %c1_i32_24 = arith.constant 1 : i32
    %c1_i32_25 = arith.constant 1 : i32
    %56 = arith.cmpi eq, %arg0, %c1_i32_25 : i32
    %c7_i32_26 = arith.constant 7 : i32
    %57 = arith.subi %c7_i32_26, %c1_i32_24 : i32
    %58 = arith.select %56, %57, %c1_i32_24 : i32
    %59 = arith.index_cast %58 : i32 to index
    %c0_27 = arith.constant 0 : index
    %c0_28 = arith.constant 0 : index
    %60 = vector.load %arg6[%59, %c0_27, %c0_28] : memref<8x16x512xbf16, #tpu.memory_space<vmem>>, vector<1x16x512xbf16>
    %61 = vector.shape_cast %60 : vector<1x16x512xbf16> to vector<16x512xbf16>
    %62 = arith.extf %61 : vector<16x512xbf16> to vector<16x512xf32>
    %63 = arith.truncf %50 : vector<16x128xf32> to vector<16x128xbf16>
    %cst_29 = arith.constant dense<0.000000e+00> : vector<16x512xf32>
    %64 = tpu.matmul %63, %3, %cst_29 {dimension_numbers = #tpu.dot_dimension_numbers<[1], [0], [0], [1], [0, 0, 1, 1], [], []>} : vector<16x128xbf16>, vector<128x512xbf16>, vector<16x512xf32> -> vector<16x512xf32>
    %65 = arith.addf %62, %64 : vector<16x512xf32>
    %66 = vector.extract_strided_slice %65 {offsets = [0, 0], sizes = [16, 128], strides = [1, 1]} : vector<16x512xf32> to vector<16x128xf32>
    %67 = arith.negf %66 : vector<16x128xf32>
    %68 = math.exp %67 : vector<16x128xf32>
    %cst_30 = arith.constant 1.000000e+00 : f32
    %69 = vector.broadcast %cst_30 : f32 to vector<16x128xf32>
    %70 = arith.addf %69, %68 : vector<16x128xf32>
    %71 = arith.divf %69, %70 : vector<16x128xf32>
    %72 = vector.extract_strided_slice %65 {offsets = [0, 128], sizes = [16, 128], strides = [1, 1]} : vector<16x512xf32> to vector<16x128xf32>
    %73 = arith.negf %72 : vector<16x128xf32>
    %74 = math.exp %73 : vector<16x128xf32>
    %cst_31 = arith.constant 1.000000e+00 : f32
    %75 = vector.broadcast %cst_31 : f32 to vector<16x128xf32>
    %76 = arith.addf %75, %74 : vector<16x128xf32>
    %77 = arith.divf %75, %76 : vector<16x128xf32>
    %78 = vector.extract_strided_slice %65 {offsets = [0, 256], sizes = [16, 128], strides = [1, 1]} : vector<16x512xf32> to vector<16x128xf32>
    %79 = math.tanh %78 : vector<16x128xf32>
    %80 = vector.extract_strided_slice %65 {offsets = [0, 384], sizes = [16, 128], strides = [1, 1]} : vector<16x512xf32> to vector<16x128xf32>
    %81 = arith.negf %80 : vector<16x128xf32>
    %82 = math.exp %81 : vector<16x128xf32>
    %cst_32 = arith.constant 1.000000e+00 : f32
    %83 = vector.broadcast %cst_32 : f32 to vector<16x128xf32>
    %84 = arith.addf %83, %82 : vector<16x128xf32>
    %85 = arith.divf %83, %84 : vector<16x128xf32>
    %86 = arith.mulf %77, %48 : vector<16x128xf32>
    %87 = arith.mulf %71, %79 : vector<16x128xf32>
    %88 = arith.addf %86, %87 : vector<16x128xf32>
    %89 = math.tanh %88 : vector<16x128xf32>
    %90 = arith.mulf %85, %89 : vector<16x128xf32>
    %91 = arith.truncf %90 : vector<16x128xf32> to vector<16x128xbf16>
    %92 = arith.index_cast %58 : i32 to index
    %c0_33 = arith.constant 0 : index
    %c0_34 = arith.constant 0 : index
    %93 = vector.load %arg5[%92, %c0_33, %c0_34] : memref<8x16x128xbf16, #tpu.memory_space<vmem>>, vector<1x16x128xbf16>
    %94 = vector.shape_cast %93 : vector<1x16x128xbf16> to vector<16x128xbf16>
    %95 = vector.shape_cast %91 : vector<16x128xbf16> to vector<1x16x128xbf16>
    tpu.vector_store %arg5[%92, %c0_33, %c0_34], %95 {strides = array<i32>} : memref<8x16x128xbf16, #tpu.memory_space<vmem>>, vector<1x16x128xbf16>,
    %c2_i32 = arith.constant 2 : i32
    %c1_i32_35 = arith.constant 1 : i32
    %96 = arith.cmpi eq, %arg0, %c1_i32_35 : i32
    %c7_i32_36 = arith.constant 7 : i32
    %97 = arith.subi %c7_i32_36, %c2_i32 : i32
    %98 = arith.select %96, %97, %c2_i32 : i32
    %99 = arith.index_cast %98 : i32 to index
    %c0_37 = arith.constant 0 : index
    %c0_38 = arith.constant 0 : index
    %100 = vector.load %arg6[%99, %c0_37, %c0_38] : memref<8x16x512xbf16, #tpu.memory_space<vmem>>, vector<1x16x512xbf16>
    %101 = vector.shape_cast %100 : vector<1x16x512xbf16> to vector<16x512xbf16>
    %102 = arith.extf %101 : vector<16x512xbf16> to vector<16x512xf32>
    %103 = arith.truncf %90 : vector<16x128xf32> to vector<16x128xbf16>
    %cst_39 = arith.constant dense<0.000000e+00> : vector<16x512xf32>
    %104 = tpu.matmul %103, %3, %cst_39 {dimension_numbers = #tpu.dot_dimension_numbers<[1], [0], [0], [1], [0, 0, 1, 1], [], []>} : vector<16x128xbf16>, vector<128x512xbf16>, vector<16x512xf32> -> vector<16x512xf32>
    %105 = arith.addf %102, %104 : vector<16x512xf32>
    %106 = vector.extract_strided_slice %105 {offsets = [0, 0], sizes = [16, 128], strides = [1, 1]} : vector<16x512xf32> to vector<16x128xf32>
    %107 = arith.negf %106 : vector<16x128xf32>
    %108 = math.exp %107 : vector<16x128xf32>
    %cst_40 = arith.constant 1.000000e+00 : f32
    %109 = vector.broadcast %cst_40 : f32 to vector<16x128xf32>
    %110 = arith.addf %109, %108 : vector<16x128xf32>
    %111 = arith.divf %109, %110 : vector<16x128xf32>
    %112 = vector.extract_strided_slice %105 {offsets = [0, 128], sizes = [16, 128], strides = [1, 1]} : vector<16x512xf32> to vector<16x128xf32>
    %113 = arith.negf %112 : vector<16x128xf32>
    %114 = math.exp %113 : vector<16x128xf32>
    %cst_41 = arith.constant 1.000000e+00 : f32
    %115 = vector.broadcast %cst_41 : f32 to vector<16x128xf32>
    %116 = arith.addf %115, %114 : vector<16x128xf32>
    %117 = arith.divf %115, %116 : vector<16x128xf32>
    %118 = vector.extract_strided_slice %105 {offsets = [0, 256], sizes = [16, 128], strides = [1, 1]} : vector<16x512xf32> to vector<16x128xf32>
    %119 = math.tanh %118 : vector<16x128xf32>
    %120 = vector.extract_strided_slice %105 {offsets = [0, 384], sizes = [16, 128], strides = [1, 1]} : vector<16x512xf32> to vector<16x128xf32>
    %121 = arith.negf %120 : vector<16x128xf32>
    %122 = math.exp %121 : vector<16x128xf32>
    %cst_42 = arith.constant 1.000000e+00 : f32
    %123 = vector.broadcast %cst_42 : f32 to vector<16x128xf32>
    %124 = arith.addf %123, %122 : vector<16x128xf32>
    %125 = arith.divf %123, %124 : vector<16x128xf32>
    %126 = arith.mulf %117, %88 : vector<16x128xf32>
    %127 = arith.mulf %111, %119 : vector<16x128xf32>
    %128 = arith.addf %126, %127 : vector<16x128xf32>
    %129 = math.tanh %128 : vector<16x128xf32>
    %130 = arith.mulf %125, %129 : vector<16x128xf32>
    %131 = arith.truncf %130 : vector<16x128xf32> to vector<16x128xbf16>
    %132 = arith.index_cast %98 : i32 to index
    %c0_43 = arith.constant 0 : index
    %c0_44 = arith.constant 0 : index
    %133 = vector.load %arg5[%132, %c0_43, %c0_44] : memref<8x16x128xbf16, #tpu.memory_space<vmem>>, vector<1x16x128xbf16>
    %134 = vector.shape_cast %133 : vector<1x16x128xbf16> to vector<16x128xbf16>
    %135 = vector.shape_cast %131 : vector<16x128xbf16> to vector<1x16x128xbf16>
    tpu.vector_store %arg5[%132, %c0_43, %c0_44], %135 {strides = array<i32>} : memref<8x16x128xbf16, #tpu.memory_space<vmem>>, vector<1x16x128xbf16>,
    %c3_i32 = arith.constant 3 : i32
    %c1_i32_45 = arith.constant 1 : i32
    %136 = arith.cmpi eq, %arg0, %c1_i32_45 : i32
    %c7_i32_46 = arith.constant 7 : i32
    %137 = arith.subi %c7_i32_46, %c3_i32 : i32
    %138 = arith.select %136, %137, %c3_i32 : i32
    %139 = arith.index_cast %138 : i32 to index
    %c0_47 = arith.constant 0 : index
    %c0_48 = arith.constant 0 : index
    %140 = vector.load %arg6[%139, %c0_47, %c0_48] : memref<8x16x512xbf16, #tpu.memory_space<vmem>>, vector<1x16x512xbf16>
    %141 = vector.shape_cast %140 : vector<1x16x512xbf16> to vector<16x512xbf16>
    %142 = arith.extf %141 : vector<16x512xbf16> to vector<16x512xf32>
    %143 = arith.truncf %130 : vector<16x128xf32> to vector<16x128xbf16>
    %cst_49 = arith.constant dense<0.000000e+00> : vector<16x512xf32>
    %144 = tpu.matmul %143, %3, %cst_49 {dimension_numbers = #tpu.dot_dimension_numbers<[1], [0], [0], [1], [0, 0, 1, 1], [], []>} : vector<16x128xbf16>, vector<128x512xbf16>, vector<16x512xf32> -> vector<16x512xf32>
    %145 = arith.addf %142, %144 : vector<16x512xf32>
    %146 = vector.extract_strided_slice %145 {offsets = [0, 0], sizes = [16, 128], strides = [1, 1]} : vector<16x512xf32> to vector<16x128xf32>
    %147 = arith.negf %146 : vector<16x128xf32>
    %148 = math.exp %147 : vector<16x128xf32>
    %cst_50 = arith.constant 1.000000e+00 : f32
    %149 = vector.broadcast %cst_50 : f32 to vector<16x128xf32>
    %150 = arith.addf %149, %148 : vector<16x128xf32>
    %151 = arith.divf %149, %150 : vector<16x128xf32>
    %152 = vector.extract_strided_slice %145 {offsets = [0, 128], sizes = [16, 128], strides = [1, 1]} : vector<16x512xf32> to vector<16x128xf32>
    %153 = arith.negf %152 : vector<16x128xf32>
    %154 = math.exp %153 : vector<16x128xf32>
    %cst_51 = arith.constant 1.000000e+00 : f32
    %155 = vector.broadcast %cst_51 : f32 to vector<16x128xf32>
    %156 = arith.addf %155, %154 : vector<16x128xf32>
    %157 = arith.divf %155, %156 : vector<16x128xf32>
    %158 = vector.extract_strided_slice %145 {offsets = [0, 256], sizes = [16, 128], strides = [1, 1]} : vector<16x512xf32> to vector<16x128xf32>
    %159 = math.tanh %158 : vector<16x128xf32>
    %160 = vector.extract_strided_slice %145 {offsets = [0, 384], sizes = [16, 128], strides = [1, 1]} : vector<16x512xf32> to vector<16x128xf32>
    %161 = arith.negf %160 : vector<16x128xf32>
    %162 = math.exp %161 : vector<16x128xf32>
    %cst_52 = arith.constant 1.000000e+00 : f32
    %163 = vector.broadcast %cst_52 : f32 to vector<16x128xf32>
    %164 = arith.addf %163, %162 : vector<16x128xf32>
    %165 = arith.divf %163, %164 : vector<16x128xf32>
    %166 = arith.mulf %157, %128 : vector<16x128xf32>
    %167 = arith.mulf %151, %159 : vector<16x128xf32>
    %168 = arith.addf %166, %167 : vector<16x128xf32>
    %169 = math.tanh %168 : vector<16x128xf32>
    %170 = arith.mulf %165, %169 : vector<16x128xf32>
    %171 = arith.truncf %170 : vector<16x128xf32> to vector<16x128xbf16>
    %172 = arith.index_cast %138 : i32 to index
    %c0_53 = arith.constant 0 : index
    %c0_54 = arith.constant 0 : index
    %173 = vector.load %arg5[%172, %c0_53, %c0_54] : memref<8x16x128xbf16, #tpu.memory_space<vmem>>, vector<1x16x128xbf16>
    %174 = vector.shape_cast %173 : vector<1x16x128xbf16> to vector<16x128xbf16>
    %175 = vector.shape_cast %171 : vector<16x128xbf16> to vector<1x16x128xbf16>
    tpu.vector_store %arg5[%172, %c0_53, %c0_54], %175 {strides = array<i32>} : memref<8x16x128xbf16, #tpu.memory_space<vmem>>, vector<1x16x128xbf16>,
    %c4_i32 = arith.constant 4 : i32
    %c1_i32_55 = arith.constant 1 : i32
    %176 = arith.cmpi eq, %arg0, %c1_i32_55 : i32
    %c7_i32_56 = arith.constant 7 : i32
    %177 = arith.subi %c7_i32_56, %c4_i32 : i32
    %178 = arith.select %176, %177, %c4_i32 : i32
    %179 = arith.index_cast %178 : i32 to index
    %c0_57 = arith.constant 0 : index
    %c0_58 = arith.constant 0 : index
    %180 = vector.load %arg6[%179, %c0_57, %c0_58] : memref<8x16x512xbf16, #tpu.memory_space<vmem>>, vector<1x16x512xbf16>
    %181 = vector.shape_cast %180 : vector<1x16x512xbf16> to vector<16x512xbf16>
    %182 = arith.extf %181 : vector<16x512xbf16> to vector<16x512xf32>
    %183 = arith.truncf %170 : vector<16x128xf32> to vector<16x128xbf16>
    %cst_59 = arith.constant dense<0.000000e+00> : vector<16x512xf32>
    %184 = tpu.matmul %183, %3, %cst_59 {dimension_numbers = #tpu.dot_dimension_numbers<[1], [0], [0], [1], [0, 0, 1, 1], [], []>} : vector<16x128xbf16>, vector<128x512xbf16>, vector<16x512xf32> -> vector<16x512xf32>
    %185 = arith.addf %182, %184 : vector<16x512xf32>
    %186 = vector.extract_strided_slice %185 {offsets = [0, 0], sizes = [16, 128], strides = [1, 1]} : vector<16x512xf32> to vector<16x128xf32>
    %187 = arith.negf %186 : vector<16x128xf32>
    %188 = math.exp %187 : vector<16x128xf32>
    %cst_60 = arith.constant 1.000000e+00 : f32
    %189 = vector.broadcast %cst_60 : f32 to vector<16x128xf32>
    %190 = arith.addf %189, %188 : vector<16x128xf32>
    %191 = arith.divf %189, %190 : vector<16x128xf32>
    %192 = vector.extract_strided_slice %185 {offsets = [0, 128], sizes = [16, 128], strides = [1, 1]} : vector<16x512xf32> to vector<16x128xf32>
    %193 = arith.negf %192 : vector<16x128xf32>
    %194 = math.exp %193 : vector<16x128xf32>
    %cst_61 = arith.constant 1.000000e+00 : f32
    %195 = vector.broadcast %cst_61 : f32 to vector<16x128xf32>
    %196 = arith.addf %195, %194 : vector<16x128xf32>
    %197 = arith.divf %195, %196 : vector<16x128xf32>
    %198 = vector.extract_strided_slice %185 {offsets = [0, 256], sizes = [16, 128], strides = [1, 1]} : vector<16x512xf32> to vector<16x128xf32>
    %199 = math.tanh %198 : vector<16x128xf32>
    %200 = vector.extract_strided_slice %185 {offsets = [0, 384], sizes = [16, 128], strides = [1, 1]} : vector<16x512xf32> to vector<16x128xf32>
    %201 = arith.negf %200 : vector<16x128xf32>
    %202 = math.exp %201 : vector<16x128xf32>
    %cst_62 = arith.constant 1.000000e+00 : f32
    %203 = vector.broadcast %cst_62 : f32 to vector<16x128xf32>
    %204 = arith.addf %203, %202 : vector<16x128xf32>
    %205 = arith.divf %203, %204 : vector<16x128xf32>
    %206 = arith.mulf %197, %168 : vector<16x128xf32>
    %207 = arith.mulf %191, %199 : vector<16x128xf32>
    %208 = arith.addf %206, %207 : vector<16x128xf32>
    %209 = math.tanh %208 : vector<16x128xf32>
    %210 = arith.mulf %205, %209 : vector<16x128xf32>
    %211 = arith.truncf %210 : vector<16x128xf32> to vector<16x128xbf16>
    %212 = arith.index_cast %178 : i32 to index
    %c0_63 = arith.constant 0 : index
    %c0_64 = arith.constant 0 : index
    %213 = vector.load %arg5[%212, %c0_63, %c0_64] : memref<8x16x128xbf16, #tpu.memory_space<vmem>>, vector<1x16x128xbf16>
    %214 = vector.shape_cast %213 : vector<1x16x128xbf16> to vector<16x128xbf16>
    %215 = vector.shape_cast %211 : vector<16x128xbf16> to vector<1x16x128xbf16>
    tpu.vector_store %arg5[%212, %c0_63, %c0_64], %215 {strides = array<i32>} : memref<8x16x128xbf16, #tpu.memory_space<vmem>>, vector<1x16x128xbf16>,
    %c5_i32 = arith.constant 5 : i32
    %c1_i32_65 = arith.constant 1 : i32
    %216 = arith.cmpi eq, %arg0, %c1_i32_65 : i32
    %c7_i32_66 = arith.constant 7 : i32
    %217 = arith.subi %c7_i32_66, %c5_i32 : i32
    %218 = arith.select %216, %217, %c5_i32 : i32
    %219 = arith.index_cast %218 : i32 to index
    %c0_67 = arith.constant 0 : index
    %c0_68 = arith.constant 0 : index
    %220 = vector.load %arg6[%219, %c0_67, %c0_68] : memref<8x16x512xbf16, #tpu.memory_space<vmem>>, vector<1x16x512xbf16>
    %221 = vector.shape_cast %220 : vector<1x16x512xbf16> to vector<16x512xbf16>
    %222 = arith.extf %221 : vector<16x512xbf16> to vector<16x512xf32>
    %223 = arith.truncf %210 : vector<16x128xf32> to vector<16x128xbf16>
    %cst_69 = arith.constant dense<0.000000e+00> : vector<16x512xf32>
    %224 = tpu.matmul %223, %3, %cst_69 {dimension_numbers = #tpu.dot_dimension_numbers<[1], [0], [0], [1], [0, 0, 1, 1], [], []>} : vector<16x128xbf16>, vector<128x512xbf16>, vector<16x512xf32> -> vector<16x512xf32>
    %225 = arith.addf %222, %224 : vector<16x512xf32>
    %226 = vector.extract_strided_slice %225 {offsets = [0, 0], sizes = [16, 128], strides = [1, 1]} : vector<16x512xf32> to vector<16x128xf32>
    %227 = arith.negf %226 : vector<16x128xf32>
    %228 = math.exp %227 : vector<16x128xf32>
    %cst_70 = arith.constant 1.000000e+00 : f32
    %229 = vector.broadcast %cst_70 : f32 to vector<16x128xf32>
    %230 = arith.addf %229, %228 : vector<16x128xf32>
    %231 = arith.divf %229, %230 : vector<16x128xf32>
    %232 = vector.extract_strided_slice %225 {offsets = [0, 128], sizes = [16, 128], strides = [1, 1]} : vector<16x512xf32> to vector<16x128xf32>
    %233 = arith.negf %232 : vector<16x128xf32>
    %234 = math.exp %233 : vector<16x128xf32>
    %cst_71 = arith.constant 1.000000e+00 : f32
    %235 = vector.broadcast %cst_71 : f32 to vector<16x128xf32>
    %236 = arith.addf %235, %234 : vector<16x128xf32>
    %237 = arith.divf %235, %236 : vector<16x128xf32>
    %238 = vector.extract_strided_slice %225 {offsets = [0, 256], sizes = [16, 128], strides = [1, 1]} : vector<16x512xf32> to vector<16x128xf32>
    %239 = math.tanh %238 : vector<16x128xf32>
    %240 = vector.extract_strided_slice %225 {offsets = [0, 384], sizes = [16, 128], strides = [1, 1]} : vector<16x512xf32> to vector<16x128xf32>
    %241 = arith.negf %240 : vector<16x128xf32>
    %242 = math.exp %241 : vector<16x128xf32>
    %cst_72 = arith.constant 1.000000e+00 : f32
    %243 = vector.broadcast %cst_72 : f32 to vector<16x128xf32>
    %244 = arith.addf %243, %242 : vector<16x128xf32>
    %245 = arith.divf %243, %244 : vector<16x128xf32>
    %246 = arith.mulf %237, %208 : vector<16x128xf32>
    %247 = arith.mulf %231, %239 : vector<16x128xf32>
    %248 = arith.addf %246, %247 : vector<16x128xf32>
    %249 = math.tanh %248 : vector<16x128xf32>
    %250 = arith.mulf %245, %249 : vector<16x128xf32>
    %251 = arith.truncf %250 : vector<16x128xf32> to vector<16x128xbf16>
    %252 = arith.index_cast %218 : i32 to index
    %c0_73 = arith.constant 0 : index
    %c0_74 = arith.constant 0 : index
    %253 = vector.load %arg5[%252, %c0_73, %c0_74] : memref<8x16x128xbf16, #tpu.memory_space<vmem>>, vector<1x16x128xbf16>
    %254 = vector.shape_cast %253 : vector<1x16x128xbf16> to vector<16x128xbf16>
    %255 = vector.shape_cast %251 : vector<16x128xbf16> to vector<1x16x128xbf16>
    tpu.vector_store %arg5[%252, %c0_73, %c0_74], %255 {strides = array<i32>} : memref<8x16x128xbf16, #tpu.memory_space<vmem>>, vector<1x16x128xbf16>,
    %c6_i32 = arith.constant 6 : i32
    %c1_i32_75 = arith.constant 1 : i32
    %256 = arith.cmpi eq, %arg0, %c1_i32_75 : i32
    %c7_i32_76 = arith.constant 7 : i32
    %257 = arith.subi %c7_i32_76, %c6_i32 : i32
    %258 = arith.select %256, %257, %c6_i32 : i32
    %259 = arith.index_cast %258 : i32 to index
    %c0_77 = arith.constant 0 : index
    %c0_78 = arith.constant 0 : index
    %260 = vector.load %arg6[%259, %c0_77, %c0_78] : memref<8x16x512xbf16, #tpu.memory_space<vmem>>, vector<1x16x512xbf16>
    %261 = vector.shape_cast %260 : vector<1x16x512xbf16> to vector<16x512xbf16>
    %262 = arith.extf %261 : vector<16x512xbf16> to vector<16x512xf32>
    %263 = arith.truncf %250 : vector<16x128xf32> to vector<16x128xbf16>
    %cst_79 = arith.constant dense<0.000000e+00> : vector<16x512xf32>
    %264 = tpu.matmul %263, %3, %cst_79 {dimension_numbers = #tpu.dot_dimension_numbers<[1], [0], [0], [1], [0, 0, 1, 1], [], []>} : vector<16x128xbf16>, vector<128x512xbf16>, vector<16x512xf32> -> vector<16x512xf32>
    %265 = arith.addf %262, %264 : vector<16x512xf32>
    %266 = vector.extract_strided_slice %265 {offsets = [0, 0], sizes = [16, 128], strides = [1, 1]} : vector<16x512xf32> to vector<16x128xf32>
    %267 = arith.negf %266 : vector<16x128xf32>
    %268 = math.exp %267 : vector<16x128xf32>
    %cst_80 = arith.constant 1.000000e+00 : f32
    %269 = vector.broadcast %cst_80 : f32 to vector<16x128xf32>
    %270 = arith.addf %269, %268 : vector<16x128xf32>
    %271 = arith.divf %269, %270 : vector<16x128xf32>
    %272 = vector.extract_strided_slice %265 {offsets = [0, 128], sizes = [16, 128], strides = [1, 1]} : vector<16x512xf32> to vector<16x128xf32>
    %273 = arith.negf %272 : vector<16x128xf32>
    %274 = math.exp %273 : vector<16x128xf32>
    %cst_81 = arith.constant 1.000000e+00 : f32
    %275 = vector.broadcast %cst_81 : f32 to vector<16x128xf32>
    %276 = arith.addf %275, %274 : vector<16x128xf32>
    %277 = arith.divf %275, %276 : vector<16x128xf32>
    %278 = vector.extract_strided_slice %265 {offsets = [0, 256], sizes = [16, 128], strides = [1, 1]} : vector<16x512xf32> to vector<16x128xf32>
    %279 = math.tanh %278 : vector<16x128xf32>
    %280 = vector.extract_strided_slice %265 {offsets = [0, 384], sizes = [16, 128], strides = [1, 1]} : vector<16x512xf32> to vector<16x128xf32>
    %281 = arith.negf %280 : vector<16x128xf32>
    %282 = math.exp %281 : vector<16x128xf32>
    %cst_82 = arith.constant 1.000000e+00 : f32
    %283 = vector.broadcast %cst_82 : f32 to vector<16x128xf32>
    %284 = arith.addf %283, %282 : vector<16x128xf32>
    %285 = arith.divf %283, %284 : vector<16x128xf32>
    %286 = arith.mulf %277, %248 : vector<16x128xf32>
    %287 = arith.mulf %271, %279 : vector<16x128xf32>
    %288 = arith.addf %286, %287 : vector<16x128xf32>
    %289 = math.tanh %288 : vector<16x128xf32>
    %290 = arith.mulf %285, %289 : vector<16x128xf32>
    %291 = arith.truncf %290 : vector<16x128xf32> to vector<16x128xbf16>
    %292 = arith.index_cast %258 : i32 to index
    %c0_83 = arith.constant 0 : index
    %c0_84 = arith.constant 0 : index
    %293 = vector.load %arg5[%292, %c0_83, %c0_84] : memref<8x16x128xbf16, #tpu.memory_space<vmem>>, vector<1x16x128xbf16>
    %294 = vector.shape_cast %293 : vector<1x16x128xbf16> to vector<16x128xbf16>
    %295 = vector.shape_cast %291 : vector<16x128xbf16> to vector<1x16x128xbf16>
    tpu.vector_store %arg5[%292, %c0_83, %c0_84], %295 {strides = array<i32>} : memref<8x16x128xbf16, #tpu.memory_space<vmem>>, vector<1x16x128xbf16>,
    %c7_i32_85 = arith.constant 7 : i32
    %c1_i32_86 = arith.constant 1 : i32
    %296 = arith.cmpi eq, %arg0, %c1_i32_86 : i32
    %c7_i32_87 = arith.constant 7 : i32
    %297 = arith.subi %c7_i32_87, %c7_i32_85 : i32
    %298 = arith.select %296, %297, %c7_i32_85 : i32
    %299 = arith.index_cast %298 : i32 to index
    %c0_88 = arith.constant 0 : index
    %c0_89 = arith.constant 0 : index
    %300 = vector.load %arg6[%299, %c0_88, %c0_89] : memref<8x16x512xbf16, #tpu.memory_space<vmem>>, vector<1x16x512xbf16>
    %301 = vector.shape_cast %300 : vector<1x16x512xbf16> to vector<16x512xbf16>
    %302 = arith.extf %301 : vector<16x512xbf16> to vector<16x512xf32>
    %303 = arith.truncf %290 : vector<16x128xf32> to vector<16x128xbf16>
    %cst_90 = arith.constant dense<0.000000e+00> : vector<16x512xf32>
    %304 = tpu.matmul %303, %3, %cst_90 {dimension_numbers = #tpu.dot_dimension_numbers<[1], [0], [0], [1], [0, 0, 1, 1], [], []>} : vector<16x128xbf16>, vector<128x512xbf16>, vector<16x512xf32> -> vector<16x512xf32>
    %305 = arith.addf %302, %304 : vector<16x512xf32>
    %306 = vector.extract_strided_slice %305 {offsets = [0, 0], sizes = [16, 128], strides = [1, 1]} : vector<16x512xf32> to vector<16x128xf32>
    %307 = arith.negf %306 : vector<16x128xf32>
    %308 = math.exp %307 : vector<16x128xf32>
    %cst_91 = arith.constant 1.000000e+00 : f32
    %309 = vector.broadcast %cst_91 : f32 to vector<16x128xf32>
    %310 = arith.addf %309, %308 : vector<16x128xf32>
    %311 = arith.divf %309, %310 : vector<16x128xf32>
    %312 = vector.extract_strided_slice %305 {offsets = [0, 128], sizes = [16, 128], strides = [1, 1]} : vector<16x512xf32> to vector<16x128xf32>
    %313 = arith.negf %312 : vector<16x128xf32>
    %314 = math.exp %313 : vector<16x128xf32>
    %cst_92 = arith.constant 1.000000e+00 : f32
    %315 = vector.broadcast %cst_92 : f32 to vector<16x128xf32>
    %316 = arith.addf %315, %314 : vector<16x128xf32>
    %317 = arith.divf %315, %316 : vector<16x128xf32>
    %318 = vector.extract_strided_slice %305 {offsets = [0, 256], sizes = [16, 128], strides = [1, 1]} : vector<16x512xf32> to vector<16x128xf32>
    %319 = math.tanh %318 : vector<16x128xf32>
    %320 = vector.extract_strided_slice %305 {offsets = [0, 384], sizes = [16, 128], strides = [1, 1]} : vector<16x512xf32> to vector<16x128xf32>
    %321 = arith.negf %320 : vector<16x128xf32>
    %322 = math.exp %321 : vector<16x128xf32>
    %cst_93 = arith.constant 1.000000e+00 : f32
    %323 = vector.broadcast %cst_93 : f32 to vector<16x128xf32>
    %324 = arith.addf %323, %322 : vector<16x128xf32>
    %325 = arith.divf %323, %324 : vector<16x128xf32>
    %326 = arith.mulf %317, %288 : vector<16x128xf32>
    %327 = arith.mulf %311, %319 : vector<16x128xf32>
    %328 = arith.addf %326, %327 : vector<16x128xf32>
    %329 = math.tanh %328 : vector<16x128xf32>
    %330 = arith.mulf %325, %329 : vector<16x128xf32>
    %331 = arith.truncf %330 : vector<16x128xf32> to vector<16x128xbf16>
    %332 = arith.index_cast %298 : i32 to index
    %c0_94 = arith.constant 0 : index
    %c0_95 = arith.constant 0 : index
    %333 = vector.load %arg5[%332, %c0_94, %c0_95] : memref<8x16x128xbf16, #tpu.memory_space<vmem>>, vector<1x16x128xbf16>
    %334 = vector.shape_cast %333 : vector<1x16x128xbf16> to vector<16x128xbf16>
    %335 = vector.shape_cast %331 : vector<16x128xbf16> to vector<1x16x128xbf16>
    tpu.vector_store %arg5[%332, %c0_94, %c0_95], %335 {strides = array<i32>} : memref<8x16x128xbf16, #tpu.memory_space<vmem>>, vector<1x16x128xbf16>,
    %c8_i32 = arith.constant 8 : i32
    return
  }
  func.func @transform_0(%arg0: i32) -> (i32, i32, i32) {
    %c0_i32 = arith.constant 0 : i32
    %c0_i32_0 = arith.constant 0 : i32
    %c0_i32_1 = arith.constant 0 : i32
    %c0_i32_2 = arith.constant 0 : i32
    return %c0_i32, %c0_i32_0, %c0_i32_1 : i32, i32, i32
  }
  func.func @transform_1(%arg0: i32) -> (i32, i32, i32) {
    %c0_i32 = arith.constant 0 : i32
    %c0_i32_0 = arith.constant 0 : i32
    %c0_i32_1 = arith.constant 0 : i32
    return %arg0, %c0_i32, %c0_i32_0 : i32, i32, i32
  }
  func.func @transform_2(%arg0: i32) -> (i32, i32, i32) {
    %c0_i32 = arith.constant 0 : i32
    %c0_i32_0 = arith.constant 0 : i32
    %c0_i32_1 = arith.constant 0 : i32
    return %arg0, %c0_i32, %c0_i32_0 : i32, i32, i32
  }
  func.func @transform_3(%arg0: i32) -> (i32, i32, i32) {
    %c0_i32 = arith.constant 0 : i32
    %c0_i32_0 = arith.constant 0 : i32
    %c0_i32_1 = arith.constant 0 : i32
    return %arg0, %c0_i32, %c0_i32_0 : i32, i32, i32
  }
  func.func @transform_4(%arg0: i32) -> (i32, i32, i32) {
    %c0_i32 = arith.constant 0 : i32
    %c0_i32_0 = arith.constant 0 : i32
    %c0_i32_1 = arith.constant 0 : i32
    return %c0_i32, %c0_i32_0, %arg0 : i32, i32, i32
  }
}

</mosaic_0001>

<bundles_post_ra>
// kernel: dependency_parser_forward.3
= control target key start
LH: loop header
LB: loop body
LE: loop exit
PB: predicated region body
PF: predicated region fallthrough
CT: control target
= control target key end

     0   :  { %s4481_s0 = inlined_call_operand.vmem [shape: bf16[8,16,128], index: 0, kind: input, shape index: {}]   ;;  %s4482_s1 = inlined_call_operand.hbm [shape: bf16[2,128,512], index: 1, kind: input, shape index: {}]   ;;  %s4483_s2 = inlined_call_operand.hbm [shape: bf16[2,128,512], index: 2, kind: input, shape index: {}]   ;;  %s4484_s3 = inlined_call_operand.hbm [shape: f32[2,1,512], index: 3, kind: input, shape index: {}]   ;;  %s4485_s4 = inlined_call_operand.vmem [shape: bf16[8,16,256], index: 4, kind: output, shape index: {}]  }
   0x1   :  { %4491 = sst [smem:[#allocation13_spill]] %s4482_s1 }
   0x2   :  { %4492 = sst [smem:[#allocation14_spill]] %s4483_s2 }
   0x3   :  { %9 = vsyncpa [#allocation4], 0 }
   0x4   :  { %11 = vsyncpa [#allocation4 + $0x1], 0 }
   0x5   :  { %12 = vsyncpa [#allocation6], 0 }
   0x6   :  { %14 = vsyncpa [#allocation6 + $0x1], 0  ;;  %s3531_s15 = smov 0   ;;  %s3533_s16 = smov 0  }
   0x7   :  { %s3535_s17 = smov 0   ;;  %s3537_s18 = smov 0  }
   0x8 LB: > { %4493 = sst [smem:[#allocation11_spill]] %s3494_s17  ;;  %s3550_s19 = sadd.s32 4294967295, %s3498_s18   ;;  %s3498_s18 = sphi %s3537_s18, %s4521_s18   ;;  %s3494_s17 = sphi %s3535_s17, %s4518_s17   ;;  %s3490_s16 = sphi %s3533_s16, %s4520_s16   ;;  %s3486_s15 = sphi %s3531_s15, %s4519_s15  }
   0x9   : > { %s3553_s20 = sadd.s32 1, %s3498_s18   ;;  %s48_s22 = sadd.s32 1, %s3494_s17 }
   0xa   : > { %s45_s21 = ssub.s32 %s3498_s18, %s3553_s20  ;;  %p55_p1 = scmp.ne.s32.totalorder %s3494_s17, %s3490_s16 }
   0xb   : > { %p46_p0 = scmp.eq.s32.totalorder %s45_s21, 0  ;;  %p56_p2 = scmp.eq.s32.totalorder %s3498_s18, 0 }
   0xc   : > { %p61_p3 = scmp.ne.s32.totalorder %s3490_s16, %s3486_s15  ;;  %p62_p5 = scmp.eq.s32.totalorder %s3550_s19, 0 }
   0xd   : > { %s3563_s23 = scalar_select %p46_p0, %s3494_s17, %s48_s22  }
   0xe   : > { %p57_p4 = por %p56_p2, %p55_p1  ;;  %p4486_p6 = scmp.eq.s32.totalorder %s3550_s19, 1 }
   0xf   : > { %4494 = sst [smem:[#allocation12_spill]] %s3563_s23  ;;  %p3567_p7 = por %p62_p5, %p61_p3 }
  0x10   : > { %p2942_p8 = scmp.lt.s32.totalorder %s3498_s18, 2  ;;  %p3574_p9 = por %p4486_p6, %p55_p1 }
  0x11   : > { %s4495_s24 = scalar_select %p3567_p7, 1, 0 }
  0x12   : > { %s4496_s25 = scalar_select %p3574_p9, 1, 0 }
  0x13   : > { %s3579_s26 = sand.u32 1, %s3494_s17   ;;  %s2851_s28 = sshll.u32 %s3498_s18, 12 }
  0x14   : > { %s2665_s27 = sshll.u32 %s3579_s26, 8  ;;  %p3583_p10 = pnand %p2942_p8, %p57_p4 }
  0x15   : > { %s187_s30 = sand.u32 1, %s3498_s18   ;;  %s4498_s2 = sld [smem:[#allocation14_spill]] }
  0x16   : > { %s4497_s29 = scalar_select %p3583_p10, 1, 0 }
  0x17   : > { %s191_s8 = scalar_lea.vmem [#allocation5], %s2665_s27  ;;  %s3601_s10 = scalar_lea.sflag [#allocation6], %s187_s30 }
  0x18   : > { %s198_s9 = sshll.u32 %s191_s8, 4  ;;  %p3607_p0 = pneg %p3583_p10  ;;  %s3598_s9 = int_to_ptr.vmem [resolvable:$true] %s198_s9 }
  0x1b   : > { %s3593_s7 = scalar_lea.hbm %s4498_s2, %s2851_s28  ;;  %s3375_s15 = scalar_lea.hbm %s4498_s2, 8192 }
  0x1c   : > { %s3370_s11 = scalar_lea.hbm %s3593_s7, 4096  ;;  %p3376_p3 = scmp.lt.u32.totalorder %s3593_s7, %s4498_s2 }
  0x1d   : > { %p3371_p13 = scmp.ne.s32.totalorder %s3593_s7, %s3370_s11  ;;  %p3377_p4 = scmp.lt.u32.totalorder %s3375_s15, %s3370_s11 }
  0x1e   : > { %p3379_p8 = scmp.lt.u32.totalorder %s3370_s11, %s3593_s7 }
  0x1f   : > { %p3373_p1 = pnand %p3607_p0, %p3371_p13  ;;  %p3378_p5 = por %p3377_p4, %p3376_p3 }
  0x21   : > { %p3374_p2 = pneg %p3373_p1  ;;  %p3380_p6 = por %p3379_p8, %p3378_p5 }
  0x23   : > { %p3381_p11 = pnand %p3380_p6, %p3374_p2 }
  0x25   : > { %3384 = shalt.err (!%p3381_p11)
}
  0x26   : > { %s3385_s30 = scalar_lea.vmem %s3598_s9, 4096  ;;  %s3500_s5 = smov [#allocation5]  }
  0x27   : > { %p3386_p13 = scmp.ne.s32.totalorder %s3598_s9, %s3385_s30  ;;  %s3390_s6 = sshll.u32 %s3500_s5, 4  ;;  %s3391_s6 = int_to_ptr.vmem [resolvable:$false] %s3390_s6 }
  0x28   : > { %s3392_s8 = scalar_lea.vmem %s3391_s6, 8192  ;;  %p3393_p9 = scmp.lt.s32.totalorder %s3598_s9, %s3391_s6 }
  0x29   : > { %p3388_p1 = pnand %p3386_p13, %p3607_p0  ;;  %p3394_p7 = scmp.lt.s32.totalorder %s3392_s8, %s3385_s30 }
  0x2b   : > { %p3389_p12 = pneg %p3388_p1  ;;  %p3395_p3 = por %p3394_p7, %p3393_p9 }
  0x2d   : > { %p3396_p4 = pnand %p3395_p3, %p3389_p12 }
  0x2f   : > { %3399 = shalt.err (!%p3396_p4)
}
  0x30   : > { %s4488_s11 = smov 256   ;;  %s3502_s13 = smov 16  }
  0x31   : > { %2938 = dma.hbm_to_vmem [thread:$0]  (!%p3583_p10), %s3593_s7, 4096, %s3598_s9, %s3601_s10, %s4488_s11, %s4488_s11, %s3502_s13  }
  0x32   : > { %p4500_p6 = scmp.lt.s32.totalorder %s3498_s18, 3  ;;  %p4501_p7 = scmp.ge.s32.totalorder %s3498_s18, 1 }
  0x33   : > { %s4503_s1 = sld [smem:[#allocation13_spill]]  ;;  %s170_s30 = scalar_lea.vmem [#allocation3], %s2665_s27 }
  0x34   : > { %p3638_p9 = pnand %p4501_p7, %p4500_p6  ;;  %s177_s5 = sshll.u32 %s170_s30, 4  ;;  %s3652_s5 = int_to_ptr.vmem [resolvable:$true] %s177_s5 }
  0x35   : > { %s2671_s7 = sshll.u32 %s3579_s26, 2  ;;  %s167_s9 = scalar_lea.sflag [#allocation4], %s3579_s26 }
  0x36   : > { %s4502_s14 = scalar_select %p3638_p9, 1, 0 }
  0x39   : > { %s3647_s22 = scalar_lea.hbm %s4503_s1, %s2851_s28  ;;  %s3405_s28 = scalar_lea.hbm %s4503_s1, 8192 }
  0x3a   : > { %s3400_s6 = scalar_lea.hbm %s3647_s22, 4096  ;;  %p3406_p5 = scmp.lt.u32.totalorder %s3647_s22, %s4503_s1 }
  0x3b   : > { %p3401_p11 = scmp.ne.s32.totalorder %s3647_s22, %s3400_s6  ;;  %p3407_p8 = scmp.lt.u32.totalorder %s3405_s28, %s3400_s6 }
  0x3c   : > { %p3409_p1 = scmp.lt.u32.totalorder %s3400_s6, %s3647_s22 }
  0x3d   : > { %p3403_p12 = pnand %p3401_p11, %p3607_p0  ;;  %p3408_p13 = por %p3407_p8, %p3406_p5 }
  0x3f   : > { %p3404_p2 = pneg %p3403_p12  ;;  %p3410_p3 = por %p3409_p1, %p3408_p13 }
  0x41   : > { %p3411_p4 = pnand %p3410_p3, %p3404_p2 }
  0x43   : > { %3414 = shalt.err (!%p3411_p4)
}
  0x44   : > { %s3415_s27 = scalar_lea.vmem %s3652_s5, 4096  ;;  %s3503_s30 = smov [#allocation3]  }
  0x45   : > { %p3416_p6 = scmp.ne.s32.totalorder %s3652_s5, %s3415_s27  ;;  %s3420_s8 = sshll.u32 %s3503_s30, 4  ;;  %s3421_s8 = int_to_ptr.vmem [resolvable:$false] %s3420_s8 }
  0x46   : > { %s3422_s11 = scalar_lea.vmem %s3421_s8, 8192  ;;  %p3423_p12 = scmp.lt.s32.totalorder %s3652_s5, %s3421_s8 }
  0x47   : > { %p3418_p7 = pnand %p3416_p6, %p3607_p0  ;;  %p3424_p9 = scmp.lt.s32.totalorder %s3422_s11, %s3415_s27 }
  0x49   : > { %p3419_p11 = pneg %p3418_p7  ;;  %p3425_p5 = por %p3424_p9, %p3423_p12 }
  0x4b   : > { %p3426_p8 = pnand %p3425_p5, %p3419_p11 }
  0x4d   : > { %3429 = shalt.err (!%p3426_p8)
}
  0x4e   : > { %s4504_s6 = smov 256   ;;  %s2853_s15 = sshll.u32 %s3498_s18, 6 }
  0x4f   : > { %2935 = dma.hbm_to_vmem [thread:$0]  (!%p3583_p10), %s3647_s22, 4096, %s3652_s5, %s167_s9, %s4504_s6, %s4504_s6, %s3502_s13  }
  0x50   : > { %s212_s28 = scalar_lea.vmem [#allocation7], %s2671_s7  ;;  %s218_s8 = scalar_lea.hbm %s4484_s3, %s2853_s15 }
  0x51   : > { %s220_s21 = sshll.u32 %s212_s28, 4  ;;  %s3430_s11 = scalar_lea.hbm %s218_s8, 64  ;;  %s221_s21 = int_to_ptr.vmem [resolvable:$true] %s220_s21 }
  0x52   : > { %p3431_p9 = scmp.ne.s32.totalorder %s218_s8, %s3430_s11  ;;  %s3435_s23 = scalar_lea.hbm %s4484_s3, 128 }
  0x53   : > { %p3436_p1 = scmp.lt.u32.totalorder %s218_s8, %s4484_s3  ;;  %p3437_p3 = scmp.lt.u32.totalorder %s3435_s23, %s3430_s11 }
  0x54   : > { %p3433_p2 = pnand %p3431_p9, %p3607_p0  ;;  %p3439_p6 = scmp.lt.u32.totalorder %s3430_s11, %s218_s8 }
  0x55   : > { %p3438_p4 = por %p3437_p3, %p3436_p1 }
  0x56   : > { %p3434_p13 = pneg %p3433_p2 }
  0x57   : > { %p3440_p7 = por %p3439_p6, %p3438_p4 }
  0x59   : > { %p3441_p11 = pnand %p3440_p7, %p3434_p13 }
  0x5b   : > { %3444 = shalt.err (!%p3441_p11)
}
  0x5c   : > { %s3445_s18 = scalar_lea.vmem %s221_s21, 64  ;;  %s3504_s26 = smov [#allocation7]  }
  0x5d   : > { %p3446_p12 = scmp.ne.s32.totalorder %s221_s21, %s3445_s18  ;;  %s3450_s22 = sshll.u32 %s3504_s26, 4  ;;  %s3451_s22 = int_to_ptr.vmem [resolvable:$false] %s3450_s22 }
  0x5e   : > { %s3452_s1 = scalar_lea.vmem %s3451_s22, 128  ;;  %p3453_p9 = scmp.lt.s32.totalorder %s221_s21, %s3451_s22 }
  0x5f   : > { %p3448_p5 = pnand %p3446_p12, %p3607_p0  ;;  %p3454_p2 = scmp.lt.s32.totalorder %s3452_s1, %s3445_s18 }
  0x61   : > { %p3449_p8 = pneg %p3448_p5  ;;  %p3455_p10 = por %p3454_p2, %p3453_p9 }
  0x63   : > { %p3456_p1 = pnand %p3455_p10, %p3449_p8 }
  0x65   : > { %3459 = shalt.err (!%p3456_p1)
}
  0x66   : > { %p4505_p3 = scmp.ne.s32.totalorder %s4497_s29, 0  ;;  %p4506_p13 = scmp.ne.s32.totalorder %s4502_s14, 0 }
  0x67   : > { %s3703_s2 = sand.u32 (!%p4506_p13), 1, %s3490_s16   ;;  %p4507_p0 = scmp.ne.s32.totalorder (!%p4506_p13), %s4495_s24, 0 }
  0x68   : > { %2941 = dma.hbm_to_vmem [thread:$0]  (!%p4505_p3), %s218_s8, 64, %s221_s21, %s3601_s10  }
  0x69   : > { %229 = sbr.rel (%p4506_p13) target bundleno = 2344 (0x928), region = 36  ;;  %s2675_s17 = sshll.u32 (!%p4506_p13), %s3703_s2, 8 }
  0x6a   : > { %s232_s23 = scalar_lea.sflag (!%p4506_p13), [#allocation4], %s3703_s2  ;;  %s3707_s12 = scalar_lea.vmem (!%p4506_p13), [#allocation3], %s2675_s17 }
  0x70   : > { %3477 = dma.done.wait (%p4507_p0), %s232_s23, 4096  }
  0x71   : > { %3479 = vsyncadd (%p4507_p0), %s232_s23, 4294963200  ;;  %s240_s29 = sand.u32 1, %s3550_s19   ;;  %s3714_s14 = scalar_lea.vmem [#allocation5], %s2675_s17 }
  0x72   : > { %s241_s10 = scalar_lea.sflag [#allocation6], %s240_s29 }
  0x73   : > { %3481 = dma.done.wait (%p4507_p0), %s241_s10, 4160  }
  0x74   : > { %3483 = vsyncadd (%p4507_p0), %s241_s10, 4294963136  ;;  %v3505_v0 = vmov 0   ;;  %v2978_v1 = vld [vmem:[%s3707_s12 + $0x4] ss:$16 sps:$4 sm:$0xff]   ;;  %v2980_v2 = vld [vmem:[%s3707_s12 + $0xc] ss:$16 sps:$4 sm:$0xff]  }
  0x75   : > { %630 = vmatprep.mubr.bf16.mxu0 %v3505_v0  ;;  %743 = vmatprep.mubr.bf16.mxu1 %v3505_v0  ;;  %v2982_v3 = vld [vmem:[%s3707_s12] ss:$16 sps:$4 sm:$0xff]   ;;  %v2983_v4 = vld [vmem:[%s3707_s12 + $0x8] ss:$16 sps:$4 sm:$0xff]   ;;  %v2984_v5 = vld [vmem:[%s3707_s12 + $0x24] ss:$16 sps:$4 sm:$0xff]  }
  0x76   : > { %598 = vmatprep.subr.bf16.mxu0 %v2978_v1  ;;  %711 = vmatprep.subr.bf16.mxu1 %v2980_v2  ;;  %v2986_v6 = vld [vmem:[%s3707_s12 + $0x2c] ss:$16 sps:$4 sm:$0xff]   ;;  %v2988_v7 = vld [vmem:[%s3707_s12 + $0x20] ss:$16 sps:$4 sm:$0xff]   ;;  %v2989_v8 = vld [vmem:[%s3707_s12 + $0x28] ss:$16 sps:$4 sm:$0xff]  }
  0x77   : > { %599 = vmatpush1.bf16.msra.mxu0 %v2982_v3  ;;  %712 = vmatpush1.bf16.msra.mxu1 %v2983_v4  ;;  %v2990_v9 = vld [vmem:[%s3707_s12 + $0x44] ss:$16 sps:$4 sm:$0xff]   ;;  %v2992_v10 = vld [vmem:[%s3707_s12 + $0x4c] ss:$16 sps:$4 sm:$0xff]   ;;  %v2994_v11 = vld [vmem:[%s3707_s12 + $0x40] ss:$16 sps:$4 sm:$0xff]  }
  0x78   : > { %600 = vmatprep.subr.bf16.mxu0 %v2984_v5  ;;  %713 = vmatprep.subr.bf16.mxu1 %v2986_v6  ;;  %v2995_v12 = vld [vmem:[%s3707_s12 + $0x48] ss:$16 sps:$4 sm:$0xff]   ;;  %v2996_v13 = vld [vmem:[%s3707_s12 + $0x64] ss:$16 sps:$4 sm:$0xff]   ;;  %v2998_v14 = vld [vmem:[%s3707_s12 + $0x6c] ss:$16 sps:$4 sm:$0xff]  }
  0x79   : > { %v3000_v15 = vld [vmem:[%s3707_s12 + $0x60] ss:$16 sps:$4 sm:$0xff]   ;;  %v3001_v16 = vld [vmem:[%s3707_s12 + $0x68] ss:$16 sps:$4 sm:$0xff]   ;;  %v3002_v17 = vld [vmem:[%s3707_s12 + $0x84] ss:$16 sps:$4 sm:$0xff]  }
  0x7a   : > { %v3004_v18 = vld [vmem:[%s3707_s12 + $0x8c] ss:$16 sps:$4 sm:$0xff]   ;;  %v3006_v19 = vld [vmem:[%s3707_s12 + $0x80] ss:$16 sps:$4 sm:$0xff]   ;;  %v3007_v20 = vld [vmem:[%s3707_s12 + $0x88] ss:$16 sps:$4 sm:$0xff]  }
  0x7b   : > { %601 = vmatpush1.bf16.msra.mxu0 %v2988_v7  ;;  %714 = vmatpush1.bf16.msra.mxu1 %v2989_v8  ;;  %v3008_v21 = vld [vmem:[%s3707_s12 + $0xa4] ss:$16 sps:$4 sm:$0xff]   ;;  %v3010_v22 = vld [vmem:[%s3707_s12 + $0xac] ss:$16 sps:$4 sm:$0xff]   ;;  %v3012_v23 = vld [vmem:[%s3707_s12 + $0xa0] ss:$16 sps:$4 sm:$0xff]  }
  0x7c   : > { %602 = vmatprep.subr.bf16.mxu0 %v2990_v9  ;;  %715 = vmatprep.subr.bf16.mxu1 %v2992_v10  ;;  %v3013_v24 = vld [vmem:[%s3707_s12 + $0xa8] ss:$16 sps:$4 sm:$0xff]   ;;  %v3014_v25 = vld [vmem:[%s3707_s12 + $0xc4] ss:$16 sps:$4 sm:$0xff]   ;;  %v3016_v26 = vld [vmem:[%s3707_s12 + $0xcc] ss:$16 sps:$4 sm:$0xff]   ;;  %v370_v10 = vlaneseq }
  0x7d   : > { %v3018_v27 = vld [vmem:[%s3707_s12 + $0xc0] ss:$16 sps:$4 sm:$0xff]   ;;  %v3019_v28 = vld [vmem:[%s3707_s12 + $0xc8] ss:$16 sps:$4 sm:$0xff]   ;;  %v3020_v29 = vld [vmem:[%s3707_s12 + $0xe4] ss:$16 sps:$4 sm:$0xff]  }
  0x7e   : > { %v3022_v30 = vld [vmem:[%s3707_s12 + $0xec] ss:$16 sps:$4 sm:$0xff]   ;;  %v3024_v31 = vld [vmem:[%s3707_s12 + $0xe0] ss:$16 sps:$4 sm:$0xff]   ;;  %v3025_v32 = vld [vmem:[%s3707_s12 + $0xe8] ss:$16 sps:$4 sm:$0xff]  }
  0x7f   : > { %603 = vmatpush1.bf16.msra.mxu0 %v2994_v11  ;;  %716 = vmatpush1.bf16.msra.mxu1 %v2995_v12  ;;  %v3755_v33 = vld [vmem:[%s3714_s14 + $0x4] ss:$16 sps:$4 sm:$0xff]   ;;  %v3758_v34 = vld [vmem:[%s3714_s14 + $0xc] ss:$16 sps:$4 sm:$0xff]   ;;  %v3764_v36 = vld [vmem:[%s3714_s14] ss:$16 sps:$4 sm:$0xff]  }
  0x80   : > { %604 = vmatprep.subr.bf16.mxu0 %v2996_v13  ;;  %717 = vmatprep.subr.bf16.mxu1 %v2998_v14  ;;  %v3026_v35 = vld [vmem:[%s4481_s0] sm:$0xff]   ;;  %v3772_v38 = vld [vmem:[%s3714_s14 + $0x8] ss:$16 sps:$4 sm:$0xff]   ;;  %v3775_v39 = vld [vmem:[%s3714_s14 + $0x2c] ss:$16 sps:$4 sm:$0xff]   ;;  %s2677_s1 = sshll.u32 %s3703_s2, 2 }
  0x81   : > { %v3768_v37 = vld [vmem:[%s3714_s14 + $0x24] ss:$16 sps:$4 sm:$0xff]   ;;  %v3780_v40 = vld [vmem:[%s3714_s14 + $0x20] ss:$16 sps:$4 sm:$0xff]   ;;  %v3789_v42 = vld [vmem:[%s3714_s14 + $0x28] ss:$16 sps:$4 sm:$0xff]  }
  0x82   : > { %v3785_v41 = vld [vmem:[%s3714_s14 + $0x44] ss:$16 sps:$4 sm:$0xff]   ;;  %v3030_v43 = vld [vmem:[%s4481_s0 + $0x8] sm:$0xff]   ;;  %v3797_v44 = vld [vmem:[%s3714_s14 + $0x40] ss:$16 sps:$4 sm:$0xff]   ;;  %v371_v11 = vshrl.u32 %v370_v10, 7 }
  0x83   : > { %605 = vmatpush1.bf16.msra.mxu0 %v3000_v15  ;;  %718 = vmatpush1.bf16.msra.mxu1 %v3001_v16  ;;  %v3800_v45 = vld [vmem:[%s3714_s14 + $0x64] ss:$16 sps:$4 sm:$0xff]   ;;  %v3804_v46 = vld [vmem:[%s3714_s14 + $0x4c] ss:$16 sps:$4 sm:$0xff]   ;;  %v3808_v47 = vld [vmem:[%s3714_s14 + $0x48] ss:$16 sps:$4 sm:$0xff]  }
  0x84   : > { %606 = vmatprep.subr.bf16.mxu0 %v3002_v17  ;;  %719 = vmatprep.subr.bf16.mxu1 %v3004_v18  ;;  %v3811_v48 = vld [vmem:[%s3714_s14 + $0x6c] ss:$16 sps:$4 sm:$0xff]   ;;  %v3817_v49 = vld [vmem:[%s3714_s14 + $0x60] ss:$16 sps:$4 sm:$0xff]   ;;  %v3822_v50 = vld [vmem:[%s3714_s14 + $0x84] ss:$16 sps:$4 sm:$0xff]  }
  0x85   : > { %v3826_v51 = vld [vmem:[%s3714_s14 + $0x68] ss:$16 sps:$4 sm:$0xff]   ;;  %v3034_v52 = vld [vmem:[%s4481_s0 + $0x10] sm:$0xff]   ;;  %v3837_v54 = vld [vmem:[%s3714_s14 + $0x8c] ss:$16 sps:$4 sm:$0xff]   ;;  %v380_v12 = vsub.s32 2, %v371_v11 }
  0x86   : > { %v3833_v53 = vld [vmem:[%s3714_s14 + $0x80] ss:$16 sps:$4 sm:$0xff]   ;;  %v3841_v55 = vld [vmem:[%s3714_s14 + $0xa4] ss:$16 sps:$4 sm:$0xff]   ;;  %v3845_v56 = vld [vmem:[%s3714_s14 + $0x88] ss:$16 sps:$4 sm:$0xff]  }
  0x87   : > { %607 = vmatpush1.bf16.msra.mxu0 %v3006_v19  ;;  %720 = vmatpush1.bf16.msra.mxu1 %v3007_v20  ;;  %v3848_v57 = vld [vmem:[%s3714_s14 + $0xac] ss:$16 sps:$4 sm:$0xff]   ;;  %v3854_v58 = vld [vmem:[%s3714_s14 + $0xa0] ss:$16 sps:$4 sm:$0xff]   ;;  %v3859_v59 = vld [vmem:[%s3714_s14 + $0xc4] ss:$16 sps:$4 sm:$0xff]  }
  0x88   : > { %608 = vmatprep.subr.bf16.mxu0 %v3008_v21  ;;  %721 = vmatprep.subr.bf16.mxu1 %v3010_v22  ;;  %v3863_v60 = vld [vmem:[%s3714_s14 + $0xa8] ss:$16 sps:$4 sm:$0xff]   ;;  %v3871_v62 = vld [vmem:[%s3714_s14 + $0xc0] ss:$16 sps:$4 sm:$0xff]   ;;  %v3874_v63 = vld [vmem:[%s3714_s14 + $0xcc] ss:$16 sps:$4 sm:$0xff]  }
  0x89   : > { %v3041_v61 = vld [vmem:[%s4481_s0 + $0x18] sm:$0xff]   ;;  %v3879_v1 = vld [vmem:[%s3714_s14 + $0xe4] ss:$16 sps:$4 sm:$0xff]   ;;  %v3891_v4 = vld [vmem:[%s3714_s14 + $0xe0] ss:$16 sps:$4 sm:$0xff]   ;;  %v384_v13 = vsub.s32 3, %v371_v11 }
  0x8a   : > { %v3882_v2 = vld [vmem:[%s3714_s14 + $0xc8] ss:$16 sps:$4 sm:$0xff]   ;;  %v3885_v3 = vld [vmem:[%s3714_s14 + $0xec] ss:$16 sps:$4 sm:$0xff]   ;;  %v3048_v6 = vld [vmem:[%s4481_s0 + $0x20] sm:$0xff]   ;;  %v372_v14 = vsub.s32 0, %v371_v11 }
  0x8b   : > { %609 = vmatpush1.bf16.msra.mxu0 %v3012_v23  ;;  %722 = vmatpush1.bf16.msra.mxu1 %v3013_v24  ;;  %v3897_v5 = vld [vmem:[%s3714_s14 + $0xe8] ss:$16 sps:$4 sm:$0xff]   ;;  %v3062_v8 = vld [vmem:[%s4481_s0 + $0x30] sm:$0xff]   ;;  %s253_s17 = scalar_lea.vmem [#allocation7], %s2677_s1  ;;  %v376_v16 = vsub.s32 1, %v371_v11  ;;  %p4508_p10 = scmp.eq.s32.totalorder %s3550_s19, 1 }
  0x8c   : > { %610 = vmatprep.subr.bf16.mxu0 %v3014_v25  ;;  %723 = vmatprep.subr.bf16.mxu1 %v3016_v26  ;;  %v3055_v7 = vld [vmem:[%s4481_s0 + $0x28] sm:$0xff]   ;;  %v3069_v9 = vld [vmem:[%s4481_s0 + $0x38] sm:$0xff]   ;;  %v352_v15 = vld [vmem:[%s253_s17] sm:$0xf]  ;;  %s2678_s10 = sshll.u32 %s3703_s2, 6  ;;  %p4516_p9 = scmp.ne.s32.totalorder %s4496_s25, 0 }
  0x8d   : > { %v3961_v17 = vrot.slane %v352_v15, %v380_v12  ;;  %v3963_v18 = vrot.slane %v352_v15, %v384_v13  ;;  %v3965_v19 = vrot.slane %v352_v15, %v372_v14  ;;  %v3967_v21 = vrot.slane %v352_v15, %v376_v16  ;;  %s4035_s23 = scalar_select %p4508_p10, 7, 0 }
  0x8e   : > { %s4046_s5 = scalar_lea.vmem [#allocation8], %s2678_s10  ;;  %p4509_p4 = pmov %p4508_p10 }
  0x8f   : > { %611 = vmatpush1.bf16.msra.mxu0 %v3018_v27  ;;  %724 = vmatpush1.bf16.msra.mxu1 %v3019_v28  ;;  %s2854_s12 = sshll.u32 %s4035_s23, 5  ;;  %s2857_s24 = sshll.u32 %s4035_s23, 3 }
  0x90   : > { %612 = vmatprep.subr.bf16.mxu0 %v3020_v29  ;;  %725 = vmatprep.subr.bf16.mxu1 %v3022_v30  ;;  %s892_s29 = scalar_lea.vmem [#allocation2], %s2854_s12  ;;  %s1217_s7 = scalar_lea.vmem %s4046_s5, %s2857_s24 [#allocation8] }
  0x91   : > { %s4085_s2 = scalar_select %p4509_p4, 6, 1 }
  0x92   : > { %p4510_p6 = pmov %p4509_p4  ;;  %p4511_p7 = pmov %p4509_p4 }
  0x93   : > { %613 = vmatpush1.bf16.msra.mxu0 %v3024_v31  ;;  %726 = vmatpush1.bf16.msra.mxu1 %v3025_v32  ;;  %s2858_s9 = sshll.u32 %s4085_s2, 5  ;;  %s2861_s15 = sshll.u32 %s4085_s2, 3 }
  0x94   : > { %1065 = vmatprep.subr.bf16.mxu0 %v3755_v33  ;;  %1108 = vmatprep.subr.bf16.mxu1 %v3758_v34  ;;  %s1223_s6 = scalar_lea.vmem [#allocation2], %s2858_s9  ;;  %s1388_s28 = scalar_lea.vmem %s4046_s5, %s2861_s15 [#allocation8] }
  0x95   : > { %s4230_s21 = scalar_select %p4510_p6, 5, 2 }
  0x96   : > { %631 = vmatmul.mubr.bf16.vlgmr.msra.gmra.mrb[0].mxu0 %v3026_v35  ;;  %744 = vmatmul.mubr.bf16.vlgmr.msra.gmra.mrb[0].mxu1 %v3026_v35  ;;  %s4279_s11 = scalar_select %p4511_p7, 4, 3 }
  0x97   : > { %1066 = vmatpush1.bf16.msra.mxu0 %v3764_v36  ;;  %640 = vmatprep.mubr.bf16.mxu0 %v3505_v0  ;;  %s2862_s27 = sshll.u32 %s4230_s21, 5  ;;  %p4512_p11 = pmov %p4509_p4 }
  0x98   : > { %753 = vmatprep.mubr.bf16.mxu1 %v3505_v0  ;;  %1067 = vmatprep.subr.bf16.mxu0 %v3768_v37  ;;  %s1394_s30 = scalar_lea.vmem [#allocation2], %s2862_s27  ;;  %s2866_s13 = sshll.u32 %s4279_s11, 5 }
  0x99   : > { %1109 = vmatpush1.bf16.msra.mxu1 %v3772_v38  ;;  %s1565_s18 = scalar_lea.vmem [#allocation2], %s2866_s13  ;;  %s2869_s26 = sshll.u32 %s4279_s11, 3 }
  0x9a   : > { %1110 = vmatprep.subr.bf16.mxu1 %v3775_v39  ;;  %s1730_s22 = scalar_lea.vmem %s4046_s5, %s2869_s26 [#allocation8]  ;;  %p4513_p12 = pmov %p4509_p4 }
  0x9b   : > { %1068 = vmatpush1.bf16.msra.mxu0 %v3780_v40  ;;  %s4328_s1 = scalar_select %p4512_p11, 3, 4 }
  0x9c   : > { %1069 = vmatprep.subr.bf16.mxu0 %v3785_v41  ;;  %s4377_s10 = scalar_select %p4513_p12, 2, 5 }
  0x9d   : > { %1111 = vmatpush1.bf16.msra.mxu1 %v3789_v42  ;;  %s2870_s17 = sshll.u32 %s4328_s1, 5  ;;  %s2873_s12 = sshll.u32 %s4328_s1, 3 }
  0x9e   : > { %641 = vmatmul.mubr.bf16.gmra.mrb[4].mxu0 %v3030_v43  ;;  %754 = vmatmul.mubr.bf16.gmra.mrb[4].mxu1 %v3030_v43  ;;  %s1736_s23 = scalar_lea.vmem [#allocation2], %s2870_s17  ;;  %s2874_s24 = sshll.u32 %s4377_s10, 5 }
  0x9f   : > { %650 = vmatprep.mubr.bf16.mxu0 %v3505_v0  ;;  %763 = vmatprep.mubr.bf16.mxu1 %v3505_v0  ;;  %s2877_s2 = sshll.u32 %s4377_s10, 3  ;;  %p4514_p5 = pmov %p4509_p4 }
  0xa0   : > { %1070 = vmatpush1.bf16.msra.mxu0 %v3797_v44  ;;  %1112 = vmatprep.subr.bf16.mxu1 %v3804_v46  ;;  %s2072_s9 = scalar_lea.vmem %s4046_s5, %s2877_s2 [#allocation8]  ;;  %p4515_p8 = pmov %p4509_p4 }
  0xa1   : > { %1071 = vmatprep.subr.bf16.mxu0 %v3800_v45  ;;  %1113 = vmatpush1.bf16.msra.mxu1 %v3808_v47 }
  0xa2   : > { %1114 = vmatprep.subr.bf16.mxu1 %v3811_v48 }
  0xa4   : > { %1072 = vmatpush1.bf16.msra.mxu0 %v3817_v49 }
  0xa5   : > { %1073 = vmatprep.subr.bf16.mxu0 %v3822_v50  ;;  %1115 = vmatpush1.bf16.msra.mxu1 %v3826_v51 }
  0xa6   : > { %651 = vmatmul.mubr.bf16.gmra.mrb[8].mxu0 %v3034_v52  ;;  %764 = vmatmul.mubr.bf16.gmra.mrb[8].mxu1 %v3034_v52 }
  0xa7   : > { %660 = vmatprep.mubr.bf16.mxu0 %v3505_v0  ;;  %773 = vmatprep.mubr.bf16.mxu1 %v3505_v0 }
  0xa8   : > { %1074 = vmatpush1.bf16.msra.mxu0 %v3833_v53  ;;  %1116 = vmatprep.subr.bf16.mxu1 %v3837_v54 }
  0xa9   : > { %1075 = vmatprep.subr.bf16.mxu0 %v3841_v55  ;;  %1117 = vmatpush1.bf16.msra.mxu1 %v3845_v56 }
  0xaa   : > { %1118 = vmatprep.subr.bf16.mxu1 %v3848_v57 }
  0xac   : > { %1076 = vmatpush1.bf16.msra.mxu0 %v3854_v58 }
  0xad   : > { %1077 = vmatprep.subr.bf16.mxu0 %v3859_v59  ;;  %1119 = vmatpush1.bf16.msra.mxu1 %v3863_v60 }
  0xae   : > { %661 = vmatmul.mubr.bf16.gmra.mrb[12].mxu0 %v3041_v61  ;;  %774 = vmatmul.mubr.bf16.gmra.mrb[12].mxu1 %v3041_v61 }
  0xaf   : > { %670 = vmatprep.mubr.bf16.mxu0 %v3505_v0  ;;  %783 = vmatprep.mubr.bf16.mxu1 %v3505_v0 }
  0xb0   : > { %1078 = vmatpush1.bf16.msra.mxu0 %v3871_v62  ;;  %1120 = vmatprep.subr.bf16.mxu1 %v3874_v63 }
  0xb1   : > { %1079 = vmatprep.subr.bf16.mxu0 %v3879_v1  ;;  %1121 = vmatpush1.bf16.msra.mxu1 %v3882_v2 }
  0xb2   : > { %1122 = vmatprep.subr.bf16.mxu1 %v3885_v3 }
  0xb4   : > { %1080 = vmatpush1.bf16.msra.mxu0 %v3891_v4 }
  0xb5   : > { %1123 = vmatpush1.bf16.msra.mxu1 %v3897_v5  ;;  %1236 = vmatprep.subr.bf16.mxu0 %v3755_v33 }
  0xb6   : > { %671 = vmatmul.mubr.bf16.gmra.mrb[16].mxu0 %v3048_v6  ;;  %784 = vmatmul.mubr.bf16.gmra.mrb[16].mxu1 %v3048_v6 }
  0xb7   : > { %680 = vmatprep.mubr.bf16.mxu0 %v3505_v0  ;;  %793 = vmatprep.mubr.bf16.mxu1 %v3505_v0 }
  0xb8   : > { %1279 = vmatprep.subr.bf16.mxu1 %v3758_v34 }
  0xbe   : > { %681 = vmatmul.mubr.bf16.gmra.mrb[20].mxu0 %v3055_v7  ;;  %794 = vmatmul.mubr.bf16.gmra.mrb[20].mxu1 %v3055_v7 }
  0xbf   : > { %690 = vmatprep.mubr.bf16.mxu0 %v3505_v0  ;;  %803 = vmatprep.mubr.bf16.mxu1 %v3505_v0 }
  0xc6   : > { %691 = vmatmul.mubr.bf16.gmra.mrb[24].mxu0 %v3062_v8  ;;  %804 = vmatmul.mubr.bf16.gmra.mrb[24].mxu1 %v3062_v8 }
  0xc7   : > { %700 = vmatprep.mubr.bf16.mxu0 %v3505_v0  ;;  %813 = vmatprep.mubr.bf16.mxu1 %v3505_v0 }
  0xce   : > { %701 = vmatmul.mubr.bf16.gmra.mrb[28].mxu0 %v3069_v9  ;;  %814 = vmatmul.mubr.bf16.gmra.mrb[28].mxu1 %v3069_v9 }
  0xcf   : > { %1097 = vmatprep.mubr.bf16.mxu0 %v3505_v0  ;;  %1140 = vmatprep.mubr.bf16.mxu1 %v3505_v0 }
  0xd6   : > { %1098 = vmatmul.mubr.bf16.vlgmr.msra.gmra.mrb[32].mxu0 %v3505_v0  ;;  %1141 = vmatmul.mubr.bf16.vlgmr.msra.gmra.mrb[32].mxu1 %v3505_v0 }
  0xd7   : > { %1237 = vmatpush1.bf16.msra.mxu0 %v3764_v36  ;;  %1280 = vmatpush1.bf16.msra.mxu1 %v3772_v38 }
  0xd8   : > { %1238 = vmatprep.subr.bf16.mxu0 %v3768_v37  ;;  %1281 = vmatprep.subr.bf16.mxu1 %v3775_v39 }
  0xd9   : > { %1268 = vmatprep.mubr.bf16.mxu0 %v3505_v0  ;;  %1311 = vmatprep.mubr.bf16.mxu1 %v3505_v0 }
  0xdb   : > { %1239 = vmatpush1.bf16.msra.mxu0 %v3780_v40  ;;  %1282 = vmatpush1.bf16.msra.mxu1 %v3789_v42 }
  0xdc   : > { %1240 = vmatprep.subr.bf16.mxu0 %v3785_v41  ;;  %1283 = vmatprep.subr.bf16.mxu1 %v3804_v46 }
  0xdf   : > { %1241 = vmatpush1.bf16.msra.mxu0 %v3797_v44  ;;  %1284 = vmatpush1.bf16.msra.mxu1 %v3808_v47 }
  0xe0   : > { %1242 = vmatprep.subr.bf16.mxu0 %v3800_v45  ;;  %1285 = vmatprep.subr.bf16.mxu1 %v3811_v48 }
  0xe3   : > { %1243 = vmatpush1.bf16.msra.mxu0 %v3817_v49  ;;  %1286 = vmatpush1.bf16.msra.mxu1 %v3826_v51 }
  0xe4   : > { %1244 = vmatprep.subr.bf16.mxu0 %v3822_v50  ;;  %1287 = vmatprep.subr.bf16.mxu1 %v3837_v54 }
  0xe7   : > { %1245 = vmatpush1.bf16.msra.mxu0 %v3833_v53  ;;  %1288 = vmatpush1.bf16.msra.mxu1 %v3845_v56 }
  0xe8   : > { %1246 = vmatprep.subr.bf16.mxu0 %v3841_v55  ;;  %1289 = vmatprep.subr.bf16.mxu1 %v3848_v57 }
  0xeb   : > { %1247 = vmatpush1.bf16.msra.mxu0 %v3854_v58  ;;  %1290 = vmatpush1.bf16.msra.mxu1 %v3863_v60 }
  0xec   : > { %1248 = vmatprep.subr.bf16.mxu0 %v3859_v59  ;;  %1291 = vmatprep.subr.bf16.mxu1 %v3874_v63 }
  0xef   : > { %1249 = vmatpush1.bf16.msra.mxu0 %v3871_v62  ;;  %1292 = vmatpush1.bf16.msra.mxu1 %v3882_v2 }
  0xf0   : > { %1250 = vmatprep.subr.bf16.mxu0 %v3879_v1  ;;  %1293 = vmatprep.subr.bf16.mxu1 %v3885_v3 }
  0xf3   : > { %1251 = vmatpush1.bf16.msra.mxu0 %v3891_v4  ;;  %1294 = vmatpush1.bf16.msra.mxu1 %v3897_v5 }
  0xf4   : > { %1407 = vmatprep.subr.bf16.mxu0 %v3755_v33  ;;  %1450 = vmatprep.subr.bf16.mxu1 %v3758_v34 }
 0x169   : > { %v632_v20 = vpop.f32.mrb[0].mxu0  ;;  %v745_v22 = vpop.f32.mrb[0].mxu1 }
 0x16a   : > { %v634_v23 = vpop.f32.mrb[1].mxu0  ;;  %v746_v24 = vadd.f32 %v745_v22, %v3961_v17  ;;  %v747_v25 = vpop.f32.mrb[1].mxu1  ;;  %v633_v29 = vadd.f32 %v632_v20, %v3965_v19 }
 0x16b   : > { %v636_v26 = vpop.f32.mrb[2].mxu0  ;;  %v748_v27 = vadd.f32 %v747_v25, %v3963_v18  ;;  %v749_v28 = vpop.f32.mrb[2].mxu1  ;;  %v635_v43 = vadd.f32 %v634_v23, %v3967_v21 }
 0x16c   : > { %v637_v30 = vadd.f32 %v636_v26, %v3965_v19  ;;  %v638_v31 = vpop.f32.mrb[3].mxu0  ;;  %v750_v32 = vadd.f32 %v749_v28, %v3961_v17  ;;  %v751_v35 = vpop.f32.mrb[3].mxu1 }
 0x16d   : > { %v639_v52 = vadd.f32 %v638_v31, %v3967_v21  ;;  %v752_v61 = vadd.f32 %v751_v35, %v3963_v18 }
 0x16e   : > { %v824_v6 = vpack.c.bf16 %v637_v30, %v633_v29  ;;  %v826_v7 = vpack.c.bf16 %v750_v32, %v746_v24 }
 0x16f   : > { %v825_v8 = vpack.c.bf16 %v639_v52, %v635_v43  ;;  %v827_v9 = vpack.c.bf16 %v752_v61, %v748_v27 }
 0x170   : > { %856 = vst [vmem:[#allocation2] sm:$0xff] %v824_v6  ;;  %858 = vst [vmem:[#allocation2 + $0x10] sm:$0xff] %v826_v7 }
 0x171   : > { %857 = vst [vmem:[#allocation2 + $0x8] sm:$0xff] %v825_v8  ;;  %v642_v10 = vpop.f32.mrb[4].mxu0  ;;  %859 = vst [vmem:[#allocation2 + $0x18] sm:$0xff] %v827_v9  ;;  %v755_v11 = vpop.f32.mrb[4].mxu1 }
 0x172   : > { %v644_v12 = vpop.f32.mrb[5].mxu0  ;;  %v756_v13 = vadd.f32 %v755_v11, %v3961_v17  ;;  %v757_v14 = vpop.f32.mrb[5].mxu1  ;;  %v643_v22 = vadd.f32 %v642_v10, %v3965_v19 }
 0x173   : > { %v646_v15 = vpop.f32.mrb[6].mxu0  ;;  %v758_v16 = vadd.f32 %v757_v14, %v3963_v18  ;;  %v759_v20 = vpop.f32.mrb[6].mxu1  ;;  %v645_v27 = vadd.f32 %v644_v12, %v3967_v21 }
 0x174   : > { %v647_v23 = vadd.f32 %v646_v15, %v3965_v19  ;;  %v648_v24 = vpop.f32.mrb[7].mxu0  ;;  %v760_v25 = vadd.f32 %v759_v20, %v3961_v17  ;;  %v761_v26 = vpop.f32.mrb[7].mxu1 }
 0x175   : > { %v649_v28 = vadd.f32 %v648_v24, %v3967_v21  ;;  %v762_v29 = vadd.f32 %v761_v26, %v3963_v18 }
 0x176   : > { %v828_v30 = vpack.c.bf16 %v647_v23, %v643_v22  ;;  %v830_v31 = vpack.c.bf16 %v760_v25, %v756_v13 }
 0x177   : > { %v829_v32 = vpack.c.bf16 %v649_v28, %v645_v27  ;;  %v831_v35 = vpack.c.bf16 %v762_v29, %v758_v16 }
 0x178   : > { %860 = vst [vmem:[#allocation2 + $0x20] sm:$0xff] %v828_v30  ;;  %862 = vst [vmem:[#allocation2 + $0x30] sm:$0xff] %v830_v31 }
 0x179   : > { %861 = vst [vmem:[#allocation2 + $0x28] sm:$0xff] %v829_v32  ;;  %v652_v43 = vpop.f32.mrb[8].mxu0  ;;  %863 = vst [vmem:[#allocation2 + $0x38] sm:$0xff] %v831_v35  ;;  %v765_v52 = vpop.f32.mrb[8].mxu1 }
 0x17a   : > { %v654_v61 = vpop.f32.mrb[9].mxu0  ;;  %v766_v6 = vadd.f32 %v765_v52, %v3961_v17  ;;  %v767_v7 = vpop.f32.mrb[9].mxu1  ;;  %v653_v11 = vadd.f32 %v652_v43, %v3965_v19 }
 0x17b   : > { %v656_v8 = vpop.f32.mrb[10].mxu0  ;;  %v768_v9 = vadd.f32 %v767_v7, %v3963_v18  ;;  %v769_v10 = vpop.f32.mrb[10].mxu1  ;;  %v655_v16 = vadd.f32 %v654_v61, %v3967_v21 }
 0x17c   : > { %v657_v12 = vadd.f32 %v656_v8, %v3965_v19  ;;  %v658_v13 = vpop.f32.mrb[11].mxu0  ;;  %v770_v14 = vadd.f32 %v769_v10, %v3961_v17  ;;  %v771_v15 = vpop.f32.mrb[11].mxu1 }
 0x17d   : > { %v659_v20 = vadd.f32 %v658_v13, %v3967_v21  ;;  %v772_v22 = vadd.f32 %v771_v15, %v3963_v18 }
 0x17e   : > { %v832_v23 = vpack.c.bf16 %v657_v12, %v653_v11  ;;  %v834_v24 = vpack.c.bf16 %v770_v14, %v766_v6 }
 0x17f   : > { %v833_v25 = vpack.c.bf16 %v659_v20, %v655_v16  ;;  %v835_v26 = vpack.c.bf16 %v772_v22, %v768_v9 }
 0x180   : > { %864 = vst [vmem:[#allocation2 + $0x40] sm:$0xff] %v832_v23  ;;  %866 = vst [vmem:[#allocation2 + $0x50] sm:$0xff] %v834_v24 }
 0x181   : > { %865 = vst [vmem:[#allocation2 + $0x48] sm:$0xff] %v833_v25  ;;  %v662_v27 = vpop.f32.mrb[12].mxu0  ;;  %867 = vst [vmem:[#allocation2 + $0x58] sm:$0xff] %v835_v26  ;;  %v775_v28 = vpop.f32.mrb[12].mxu1 }
 0x182   : > { %v664_v29 = vpop.f32.mrb[13].mxu0  ;;  %v776_v30 = vadd.f32 %v775_v28, %v3961_v17  ;;  %v777_v31 = vpop.f32.mrb[13].mxu1  ;;  %v663_v52 = vadd.f32 %v662_v27, %v3965_v19 }
 0x183   : > { %v666_v32 = vpop.f32.mrb[14].mxu0  ;;  %v778_v35 = vadd.f32 %v777_v31, %v3963_v18  ;;  %v779_v43 = vpop.f32.mrb[14].mxu1  ;;  %v665_v9 = vadd.f32 %v664_v29, %v3967_v21 }
 0x184   : > { %v667_v61 = vadd.f32 %v666_v32, %v3965_v19  ;;  %v668_v6 = vpop.f32.mrb[15].mxu0  ;;  %v780_v7 = vadd.f32 %v779_v43, %v3961_v17  ;;  %v781_v8 = vpop.f32.mrb[15].mxu1 }
 0x185   : > { %v669_v10 = vadd.f32 %v668_v6, %v3967_v21  ;;  %v782_v11 = vadd.f32 %v781_v8, %v3963_v18 }
 0x186   : > { %v836_v12 = vpack.c.bf16 %v667_v61, %v663_v52  ;;  %v838_v13 = vpack.c.bf16 %v780_v7, %v776_v30 }
 0x187   : > { %v837_v14 = vpack.c.bf16 %v669_v10, %v665_v9  ;;  %v839_v15 = vpack.c.bf16 %v782_v11, %v778_v35 }
 0x188   : > { %868 = vst [vmem:[#allocation2 + $0x60] sm:$0xff] %v836_v12  ;;  %870 = vst [vmem:[#allocation2 + $0x70] sm:$0xff] %v838_v13 }
 0x189   : > { %869 = vst [vmem:[#allocation2 + $0x68] sm:$0xff] %v837_v14  ;;  %v672_v16 = vpop.f32.mrb[16].mxu0  ;;  %871 = vst [vmem:[#allocation2 + $0x78] sm:$0xff] %v839_v15  ;;  %v785_v20 = vpop.f32.mrb[16].mxu1 }
 0x18a   : > { %v674_v22 = vpop.f32.mrb[17].mxu0  ;;  %v786_v23 = vadd.f32 %v785_v20, %v3961_v17  ;;  %v787_v24 = vpop.f32.mrb[17].mxu1  ;;  %v673_v28 = vadd.f32 %v672_v16, %v3965_v19 }
 0x18b   : > { %v676_v25 = vpop.f32.mrb[18].mxu0  ;;  %v788_v26 = vadd.f32 %v787_v24, %v3963_v18  ;;  %v789_v27 = vpop.f32.mrb[18].mxu1  ;;  %v675_v35 = vadd.f32 %v674_v22, %v3967_v21 }
 0x18c   : > { %v677_v29 = vadd.f32 %v676_v25, %v3965_v19  ;;  %v678_v30 = vpop.f32.mrb[19].mxu0  ;;  %v790_v31 = vadd.f32 %v789_v27, %v3961_v17  ;;  %v791_v32 = vpop.f32.mrb[19].mxu1 }
 0x18d   : > { %v679_v43 = vadd.f32 %v678_v30, %v3967_v21  ;;  %v792_v52 = vadd.f32 %v791_v32, %v3963_v18 }
 0x18e   : > { %v840_v61 = vpack.c.bf16 %v677_v29, %v673_v28  ;;  %v842_v6 = vpack.c.bf16 %v790_v31, %v786_v23 }
 0x18f   : > { %v841_v7 = vpack.c.bf16 %v679_v43, %v675_v35  ;;  %v843_v8 = vpack.c.bf16 %v792_v52, %v788_v26 }
 0x190   : > { %872 = vst [vmem:[#allocation2 + $0x80] sm:$0xff] %v840_v61  ;;  %874 = vst [vmem:[#allocation2 + $0x90] sm:$0xff] %v842_v6 }
 0x191   : > { %873 = vst [vmem:[#allocation2 + $0x88] sm:$0xff] %v841_v7  ;;  %875 = vst [vmem:[#allocation2 + $0x98] sm:$0xff] %v843_v8  ;;  %v682_v9 = vpop.f32.mrb[20].mxu0  ;;  %v795_v10 = vpop.f32.mrb[20].mxu1 }
 0x192   : > { %v796_v11 = vadd.f32 %v795_v10, %v3961_v17  ;;  %v684_v12 = vpop.f32.mrb[21].mxu0  ;;  %v797_v13 = vpop.f32.mrb[21].mxu1  ;;  %v683_v20 = vadd.f32 %v682_v9, %v3965_v19 }
 0x193   : > { %v798_v14 = vadd.f32 %v797_v13, %v3963_v18  ;;  %v686_v15 = vpop.f32.mrb[22].mxu0  ;;  %v799_v16 = vpop.f32.mrb[22].mxu1  ;;  %v685_v26 = vadd.f32 %v684_v12, %v3967_v21 }
 0x194   : > { %v687_v22 = vadd.f32 %v686_v15, %v3965_v19  ;;  %v800_v23 = vadd.f32 %v799_v16, %v3961_v17  ;;  %v688_v24 = vpop.f32.mrb[23].mxu0  ;;  %v801_v25 = vpop.f32.mrb[23].mxu1 }
 0x195   : > { %v689_v27 = vadd.f32 %v688_v24, %v3967_v21  ;;  %v802_v28 = vadd.f32 %v801_v25, %v3963_v18 }
 0x196   : > { %v844_v29 = vpack.c.bf16 %v687_v22, %v683_v20  ;;  %v846_v30 = vpack.c.bf16 %v800_v23, %v796_v11 }
 0x197   : > { %v845_v31 = vpack.c.bf16 %v689_v27, %v685_v26  ;;  %v847_v32 = vpack.c.bf16 %v802_v28, %v798_v14 }
 0x198   : > { %876 = vst [vmem:[#allocation2 + $0xa0] sm:$0xff] %v844_v29  ;;  %878 = vst [vmem:[#allocation2 + $0xb0] sm:$0xff] %v846_v30 }
 0x199   : > { %877 = vst [vmem:[#allocation2 + $0xa8] sm:$0xff] %v845_v31  ;;  %879 = vst [vmem:[#allocation2 + $0xb8] sm:$0xff] %v847_v32  ;;  %v692_v35 = vpop.f32.mrb[24].mxu0  ;;  %v805_v43 = vpop.f32.mrb[24].mxu1 }
 0x19a   : > { %v806_v52 = vadd.f32 %v805_v43, %v3961_v17  ;;  %v694_v61 = vpop.f32.mrb[25].mxu0  ;;  %v807_v6 = vpop.f32.mrb[25].mxu1  ;;  %v693_v10 = vadd.f32 %v692_v35, %v3965_v19 }
 0x19b   : > { %v808_v7 = vadd.f32 %v807_v6, %v3963_v18  ;;  %v696_v8 = vpop.f32.mrb[26].mxu0  ;;  %v809_v9 = vpop.f32.mrb[26].mxu1  ;;  %v695_v15 = vadd.f32 %v694_v61, %v3967_v21 }
 0x19c   : > { %v697_v11 = vadd.f32 %v696_v8, %v3965_v19  ;;  %v810_v12 = vadd.f32 %v809_v9, %v3961_v17  ;;  %v698_v13 = vpop.f32.mrb[27].mxu0  ;;  %v811_v14 = vpop.f32.mrb[27].mxu1 }
 0x19d   : > { %v699_v16 = vadd.f32 %v698_v13, %v3967_v21  ;;  %v812_v20 = vadd.f32 %v811_v14, %v3963_v18 }
 0x19e   : > { %v848_v22 = vpack.c.bf16 %v697_v11, %v693_v10  ;;  %v850_v23 = vpack.c.bf16 %v810_v12, %v806_v52 }
 0x19f   : > { %v849_v24 = vpack.c.bf16 %v699_v16, %v695_v15  ;;  %v851_v25 = vpack.c.bf16 %v812_v20, %v808_v7 }
 0x1a0   : > { %880 = vst [vmem:[#allocation2 + $0xc0] sm:$0xff] %v848_v22  ;;  %882 = vst [vmem:[#allocation2 + $0xd0] sm:$0xff] %v850_v23 }
 0x1a1   : > { %881 = vst [vmem:[#allocation2 + $0xc8] sm:$0xff] %v849_v24  ;;  %883 = vst [vmem:[#allocation2 + $0xd8] sm:$0xff] %v851_v25  ;;  %v702_v26 = vpop.f32.mrb[28].mxu0  ;;  %v815_v27 = vpop.f32.mrb[28].mxu1 }
 0x1a2   : > { %v816_v28 = vadd.f32 %v815_v27, %v3961_v17  ;;  %v704_v29 = vpop.f32.mrb[29].mxu0  ;;  %v817_v30 = vpop.f32.mrb[29].mxu1  ;;  %v703_v43 = vadd.f32 %v702_v26, %v3965_v19 }
 0x1a3   : > { %v818_v31 = vadd.f32 %v817_v30, %v3963_v18  ;;  %v706_v32 = vpop.f32.mrb[30].mxu0  ;;  %v819_v35 = vpop.f32.mrb[30].mxu1  ;;  %v705_v8 = vadd.f32 %v704_v29, %v3967_v21 }
 0x1a4   : > { %v707_v52 = vadd.f32 %v706_v32, %v3965_v19  ;;  %v820_v61 = vadd.f32 %v819_v35, %v3961_v17  ;;  %v708_v6 = vpop.f32.mrb[31].mxu0  ;;  %v821_v7 = vpop.f32.mrb[31].mxu1 }
 0x1a5   : > { %v709_v9 = vadd.f32 %v708_v6, %v3967_v21  ;;  %v822_v10 = vadd.f32 %v821_v7, %v3963_v18 }
 0x1a6   : > { %v852_v11 = vpack.c.bf16 %v707_v52, %v703_v43  ;;  %v854_v12 = vpack.c.bf16 %v820_v61, %v816_v28 }
 0x1a7   : > { %v853_v13 = vpack.c.bf16 %v709_v9, %v705_v8  ;;  %v855_v14 = vpack.c.bf16 %v822_v10, %v818_v31 }
 0x1a8   : > { %884 = vst [vmem:[#allocation2 + $0xe0] sm:$0xff] %v852_v11  ;;  %886 = vst [vmem:[#allocation2 + $0xf0] sm:$0xff] %v854_v12 }
 0x1a9   : > { %885 = vst [vmem:[#allocation2 + $0xe8] sm:$0xff] %v853_v13  ;;  %887 = vst [vmem:[#allocation2 + $0xf8] sm:$0xff] %v855_v14  ;;  %v1099_v17 = vpop.f32.mrb[32].mxu0  ;;  %v1142_v19 = vpop.f32.mrb[32].mxu1 }
 0x1aa   : > { %v1101_v15 = vpop.f32.mrb[33].mxu0  ;;  %v1144_v16 = vpop.f32.mrb[33].mxu1 }
 0x1ab   : > { %v1103_v21 = vpop.f32.mrb[34].mxu0  ;;  %v1146_v20 = vpop.f32.mrb[34].mxu1 }
 0x1ac   : > { %v1105_v18 = vpop.f32.mrb[35].mxu0  ;;  %v1148_v22 = vpop.f32.mrb[35].mxu1 }
 0x1b0   : > { %v893_v23 = vld [vmem:[%s892_s29] sm:$0xff]  ;;  %v894_v25 = vld [vmem:[%s892_s29 + $0x8] sm:$0xff]  ;;  %v896_v31 = vld [vmem:[%s892_s29 + $0x18] sm:$0xff] }
 0x1b1   : > { %v897_v24 = vunpack.c.l.bf16 %v893_v23  ;;  %v901_v26 = vunpack.c.h.bf16 %v893_v23  ;;  %v898_v27 = vunpack.c.l.bf16 %v894_v25  ;;  %v902_v28 = vunpack.c.h.bf16 %v894_v25  ;;  %v895_v61 = vld [vmem:[%s892_s29 + $0x10] sm:$0xff]  ;;  %s1901_s29 = scalar_lea.vmem %s4046_s5, %s2873_s12 [#allocation8] }
 0x1b2   : > { %v900_v8 = vunpack.c.l.bf16 %v896_v31  ;;  %v904_v9 = vunpack.c.h.bf16 %v896_v31  ;;  %v899_v10 = vunpack.c.l.bf16 %v895_v61  ;;  %v903_v11 = vunpack.c.h.bf16 %v895_v61 }
 0x1b3   : > { %v1151_v29 = vadd.f32 %v1099_v17, %v897_v24  ;;  %v1155_v30 = vadd.f32 %v1103_v21, %v901_v26  ;;  %v1152_v32 = vadd.f32 %v1101_v15, %v898_v27  ;;  %v1156_v35 = vadd.f32 %v1105_v18, %v902_v28 }
 0x1b4   : > { %v1154_v12 = vadd.f32 %v1144_v16, %v900_v8  ;;  %v1158_v13 = vadd.f32 %v1148_v22, %v904_v9  ;;  %v1153_v14 = vadd.f32 %v1142_v19, %v899_v10  ;;  %v1157_v17 = vadd.f32 %v1146_v20, %v903_v11 }
 0x1b5   : > { %v2753_v43 = vmul.f32 -1.442695, %v1151_v29  ;;  %v2754_v52 = vmul.f32 -1.442695, %v1155_v30  ;;  %v2755_v6 = vmul.f32 -1.442695, %v1152_v32 }
 0x1b6   : > { %v2756_v7 = vmul.f32 -1.442695, %v1156_v35  ;;  %v2757_v21 = vmul.f32 -1.442695, %v1154_v12  ;;  %v2758_v15 = vmul.f32 -1.442695, %v1158_v13 }
 0x1b7   : > { %3082 = vpow2.f32 %v2753_v43 }
 0x1b8   : > { %3084 = vpow2.f32 %v2755_v6 }
 0x1b9   : > { %3086 = vpow2.f32 %v2754_v52 }
 0x1ba   : > { %3088 = vpow2.f32 %v2756_v7 }
 0x1bb   : > { %3090 = vtanh.f32 %v1153_v14 }
 0x1bc   : > { %3092 = vtanh.f32 %v1157_v17 }
 0x1bd   : > { %3094 = vpow2.f32 %v2757_v21 }
 0x1be   : > { %3096 = vpow2.f32 %v2758_v15 }
 0x1c1   : > { %v3083_v18 = vpop.eup %3082 }
 0x1c2   : > { %v3085_v23 = vpop.eup %3084  ;;  %v1165_v24 = vadd.f32 1.0, %v3083_v18 }
 0x1c3   : > { %v3087_v25 = vpop.eup %3086  ;;  %v1177_v26 = vadd.f32 1.0, %v3085_v23 }
 0x1c4   : > { %v3089_v27 = vpop.eup %3088  ;;  %3098 = vrcp.f32 %v1165_v24  ;;  %v1166_v28 = vadd.f32 1.0, %v3087_v25 }
 0x1c5   : > { %3100 = vrcp.f32 %v1177_v26  ;;  %v1178_v29 = vadd.f32 1.0, %v3089_v27  ;;  %v3091_v19 = vpop.eup %3090 }
 0x1c6   : > { %3102 = vrcp.f32 %v1166_v28  ;;  %v3093_v16 = vpop.eup %3092 }
 0x1c7   : > { %3104 = vrcp.f32 %v1178_v29  ;;  %v3095_v20 = vpop.eup %3094 }
 0x1c8   : > { %v3097_v22 = vpop.eup %3096  ;;  %v1191_v35 = vadd.f32 1.0, %v3095_v20 }
 0x1c9   : > { %v1192_v7 = vadd.f32 1.0, %v3097_v22 }
 0x1ca   : > { %3106 = vrcp.f32 %v1191_v35 }
 0x1ce   : > { %v3099_v30 = vpop.eup %3098 }
 0x1cf   : > { %v3101_v31 = vpop.eup %3100  ;;  %v1199_v32 = vmul.f32 %v3099_v30, %v3091_v19 }
 0x1d0   : > { %v3103_v43 = vpop.eup %3102  ;;  %v1197_v52 = vmul.f32 0.0, %v3101_v31 }
 0x1d1   : > { %v3105_v61 = vpop.eup %3104  ;;  %v1200_v6 = vmul.f32 %v3103_v43, %v3093_v16 }
 0x1d2   : > { %v1198_v8 = vmul.f32 0.0, %v3105_v61  ;;  %v4038_v9 = vadd.f32 %v1199_v32, %v1197_v52 }
 0x1d4   : > { %3108 = vtanh.f32 %v4038_v9  ;;  %v4041_v10 = vadd.f32 %v1200_v6, %v1198_v8  ;;  %v3107_v11 = vpop.eup %3106 }
 0x1d5   : > { %3110 = vrcp.f32 %v1192_v7 }
 0x1d6   : > { %3112 = vtanh.f32 %v4041_v10 }
 0x1de   : > { %v3109_v12 = vpop.eup %3108 }
 0x1df   : > { %v3111_v13 = vpop.eup %3110  ;;  %v1205_v14 = vmul.f32 %v3109_v12, %v3107_v11 }
 0x1e0   : > { %v3113_v17 = vpop.eup %3112 }
 0x1e1   : > { %v1206_v21 = vmul.f32 %v3113_v17, %v3111_v13 }
 0x1e3   : > { %v1207_v15 = vpack.c.bf16 %v1206_v21, %v1205_v14 }
 0x1e5   : > { %2890 = vst [vmem:[%s1217_s7] sm:$0xff] %v1207_v15   ;;  %1269 = vmatmul.mubr.bf16.vlgmr.msra.gmra.mrb[36].mxu0 %v1207_v15  ;;  %1312 = vmatmul.mubr.bf16.vlgmr.msra.gmra.mrb[36].mxu1 %v1207_v15  ;;  %s1907_s7 = scalar_lea.vmem [#allocation2], %s2874_s24 }
 0x1e6   : > { %1408 = vmatpush1.bf16.msra.mxu0 %v3764_v36  ;;  %1451 = vmatpush1.bf16.msra.mxu1 %v3772_v38  ;;  %v1224_v36 = vld [vmem:[%s1223_s6] sm:$0xff] }
 0x1e7   : > { %1409 = vmatprep.subr.bf16.mxu0 %v3768_v37  ;;  %1452 = vmatprep.subr.bf16.mxu1 %v3775_v39  ;;  %v1225_v37 = vld [vmem:[%s1223_s6 + $0x8] sm:$0xff]  ;;  %v1228_v38 = vunpack.c.l.bf16 %v1224_v36 }
 0x1e8   : > { %1439 = vmatprep.mubr.bf16.mxu0 %v3505_v0  ;;  %1482 = vmatprep.mubr.bf16.mxu1 %v3505_v0 }
 0x1ea   : > { %1410 = vmatpush1.bf16.msra.mxu0 %v3780_v40  ;;  %1453 = vmatpush1.bf16.msra.mxu1 %v3789_v42 }
 0x1eb   : > { %1411 = vmatprep.subr.bf16.mxu0 %v3785_v41  ;;  %1454 = vmatprep.subr.bf16.mxu1 %v3804_v46  ;;  %v1229_v41 = vunpack.c.l.bf16 %v1225_v37  ;;  %v1232_v46 = vunpack.c.h.bf16 %v1224_v36 }
 0x1ee   : > { %1412 = vmatpush1.bf16.msra.mxu0 %v3797_v44  ;;  %1455 = vmatpush1.bf16.msra.mxu1 %v3808_v47 }
 0x1ef   : > { %1413 = vmatprep.subr.bf16.mxu0 %v3800_v45  ;;  %1456 = vmatprep.subr.bf16.mxu1 %v3811_v48 }
 0x1f2   : > { %1414 = vmatpush1.bf16.msra.mxu0 %v3817_v49  ;;  %1457 = vmatpush1.bf16.msra.mxu1 %v3826_v51 }
 0x1f3   : > { %1415 = vmatprep.subr.bf16.mxu0 %v3822_v50  ;;  %1458 = vmatprep.subr.bf16.mxu1 %v3837_v54  ;;  %v1227_v50 = vld [vmem:[%s1223_s6 + $0x18] sm:$0xff] }
 0x1f6   : > { %1416 = vmatpush1.bf16.msra.mxu0 %v3833_v53  ;;  %1459 = vmatpush1.bf16.msra.mxu1 %v3845_v56 }
 0x1f7   : > { %1417 = vmatprep.subr.bf16.mxu0 %v3841_v55  ;;  %1460 = vmatprep.subr.bf16.mxu1 %v3848_v57 }
 0x1fa   : > { %1418 = vmatpush1.bf16.msra.mxu0 %v3854_v58  ;;  %1461 = vmatpush1.bf16.msra.mxu1 %v3863_v60  ;;  %v1226_v58 = vld [vmem:[%s1223_s6 + $0x10] sm:$0xff]  ;;  %s4424_s6 = scalar_select %p4514_p5, 1, 6 }
 0x1fb   : > { %1419 = vmatprep.subr.bf16.mxu0 %v3859_v59  ;;  %1462 = vmatprep.subr.bf16.mxu1 %v3874_v63  ;;  %v1231_v59 = vunpack.c.l.bf16 %v1227_v50  ;;  %v1230_v63 = vunpack.c.l.bf16 %v1226_v58 }
 0x1fc   : > { %s2878_s15 = sshll.u32 %s4424_s6, 5 }
 0x1fe   : > { %1420 = vmatpush1.bf16.msra.mxu0 %v3871_v62  ;;  %1463 = vmatpush1.bf16.msra.mxu1 %v3882_v2 }
 0x1ff   : > { %1421 = vmatprep.subr.bf16.mxu0 %v3879_v1  ;;  %1464 = vmatprep.subr.bf16.mxu1 %v3885_v3  ;;  %v1235_v1 = vunpack.c.h.bf16 %v1227_v50  ;;  %v1234_v3 = vunpack.c.h.bf16 %v1226_v58  ;;  %v4153_v50 = vld [vmem:[%s3714_s14 + $0x68] ss:$16 sps:$4 sm:$0xff]   ;;  %v4181_v58 = vld [vmem:[%s3714_s14 + $0xa0] ss:$16 sps:$4 sm:$0xff]  }
 0x202   : > { %1422 = vmatpush1.bf16.msra.mxu0 %v3891_v4  ;;  %1465 = vmatpush1.bf16.msra.mxu1 %v3897_v5 }
 0x203   : > { %1578 = vmatprep.subr.bf16.mxu0 %v3755_v33  ;;  %1621 = vmatprep.subr.bf16.mxu1 %v3758_v34  ;;  %v1233_v34 = vunpack.c.h.bf16 %v1225_v37 }
 0x2b8   : > { %v1270_v39 = vpop.f32.mrb[36].mxu0  ;;  %v1313_v40 = vpop.f32.mrb[36].mxu1 }
 0x2b9   : > { %v1322_v42 = vadd.f32 %v1270_v39, %v1228_v38  ;;  %v1272_v44 = vpop.f32.mrb[37].mxu0  ;;  %v1315_v45 = vpop.f32.mrb[37].mxu1  ;;  %v1324_v2 = vadd.f32 %v1313_v40, %v1230_v63  ;;  %v4099_v38 = vld [vmem:[%s3714_s14] ss:$16 sps:$4 sm:$0xff]   ;;  %v4103_v39 = vld [vmem:[%s3714_s14 + $0x8] ss:$16 sps:$4 sm:$0xff]  }
 0x2ba   : > { %v1323_v47 = vadd.f32 %v1272_v44, %v1229_v41  ;;  %v1274_v33 = vpop.f32.mrb[38].mxu0  ;;  %v1317_v48 = vpop.f32.mrb[38].mxu1  ;;  %v1325_v62 = vadd.f32 %v1315_v45, %v1231_v59  ;;  %v4107_v40 = vld [vmem:[%s3714_s14 + $0x24] ss:$16 sps:$4 sm:$0xff]   ;;  %v4111_v41 = vld [vmem:[%s3714_s14 + $0x2c] ss:$16 sps:$4 sm:$0xff]  }
 0x2bb   : > { %v2765_v49 = vmul.f32 -1.442695, %v1322_v42  ;;  %v1326_v51 = vadd.f32 %v1274_v33, %v1232_v46  ;;  %v1276_v53 = vpop.f32.mrb[39].mxu0  ;;  %v1319_v54 = vpop.f32.mrb[39].mxu1  ;;  %v1328_v18 = vadd.f32 %v1317_v48, %v1234_v3  ;;  %v4117_v42 = vld [vmem:[%s3714_s14 + $0x20] ss:$16 sps:$4 sm:$0xff]  }
 0x2bc   : > { %v2767_v55 = vmul.f32 -1.442695, %v1323_v47  ;;  %v1327_v56 = vadd.f32 %v1276_v53, %v1233_v34  ;;  %v2769_v4 = vmul.f32 -1.442695, %v1325_v62  ;;  %v1329_v5 = vadd.f32 %v1319_v54, %v1235_v1  ;;  %v4121_v44 = vld [vmem:[%s3714_s14 + $0x28] ss:$16 sps:$4 sm:$0xff]  }
 0x2bd   : > { %3114 = vpow2.f32 %v2765_v49  ;;  %v2766_v57 = vmul.f32 -1.442695, %v1326_v51  ;;  %v4125_v45 = vld [vmem:[%s3714_s14 + $0x44] ss:$16 sps:$4 sm:$0xff]   ;;  %v4129_v46 = vld [vmem:[%s3714_s14 + $0x4c] ss:$16 sps:$4 sm:$0xff]  }
 0x2be   : > { %3116 = vpow2.f32 %v2767_v55  ;;  %v2768_v60 = vmul.f32 -1.442695, %v1327_v56  ;;  %v2770_v26 = vmul.f32 -1.442695, %v1329_v5  ;;  %v4133_v47 = vld [vmem:[%s3714_s14 + $0x40] ss:$16 sps:$4 sm:$0xff]  }
 0x2bf   : > { %3118 = vpow2.f32 %v2766_v57  ;;  %v4137_v33 = vld [vmem:[%s3714_s14 + $0x48] ss:$16 sps:$4 sm:$0xff]   ;;  %v4141_v48 = vld [vmem:[%s3714_s14 + $0x64] ss:$16 sps:$4 sm:$0xff]   ;;  %v4145_v34 = vld [vmem:[%s3714_s14 + $0x6c] ss:$16 sps:$4 sm:$0xff]  }
 0x2c0   : > { %3120 = vpow2.f32 %v2768_v60  ;;  %v4149_v49 = vld [vmem:[%s3714_s14 + $0x60] ss:$16 sps:$4 sm:$0xff]   ;;  %v4157_v51 = vld [vmem:[%s3714_s14 + $0x84] ss:$16 sps:$4 sm:$0xff]   ;;  %v4161_v53 = vld [vmem:[%s3714_s14 + $0x8c] ss:$16 sps:$4 sm:$0xff]  }
 0x2c1   : > { %3122 = vtanh.f32 %v1324_v2  ;;  %v4165_v54 = vld [vmem:[%s3714_s14 + $0x80] ss:$16 sps:$4 sm:$0xff]   ;;  %v4169_v55 = vld [vmem:[%s3714_s14 + $0x88] ss:$16 sps:$4 sm:$0xff]   ;;  %v4173_v56 = vld [vmem:[%s3714_s14 + $0xa4] ss:$16 sps:$4 sm:$0xff]  }
 0x2c2   : > { %3124 = vpow2.f32 %v2769_v4  ;;  %v4177_v57 = vld [vmem:[%s3714_s14 + $0xac] ss:$16 sps:$4 sm:$0xff]   ;;  %v4185_v59 = vld [vmem:[%s3714_s14 + $0xa8] ss:$16 sps:$4 sm:$0xff]   ;;  %v4189_v60 = vld [vmem:[%s3714_s14 + $0xc4] ss:$16 sps:$4 sm:$0xff]  }
 0x2c3   : > { %3126 = vtanh.f32 %v1328_v18  ;;  %v4193_v62 = vld [vmem:[%s3714_s14 + $0xcc] ss:$16 sps:$4 sm:$0xff]   ;;  %v4197_v63 = vld [vmem:[%s3714_s14 + $0xc0] ss:$16 sps:$4 sm:$0xff]   ;;  %v4201_v1 = vld [vmem:[%s3714_s14 + $0xc8] ss:$16 sps:$4 sm:$0xff]  }
 0x2c4   : > { %v4205_v2 = vld [vmem:[%s3714_s14 + $0xe4] ss:$16 sps:$4 sm:$0xff]   ;;  %v4209_v3 = vld [vmem:[%s3714_s14 + $0xec] ss:$16 sps:$4 sm:$0xff]   ;;  %v4213_v4 = vld [vmem:[%s3714_s14 + $0xe0] ss:$16 sps:$4 sm:$0xff]  }
 0x2c5   : > { %v4217_v5 = vld [vmem:[%s3714_s14 + $0xe8] ss:$16 sps:$4 sm:$0xff]   ;;  %v4221_v18 = vld [vmem:[%s3714_s14 + $0x4] ss:$16 sps:$4 sm:$0xff]  }
 0x2c7   : > { %v3115_v23 = vpop.eup %3114 }
 0x2c8   : > { %v3117_v24 = vpop.eup %3116  ;;  %v1336_v25 = vadd.f32 1.0, %v3115_v23  ;;  %v4225_v23 = vld [vmem:[%s3714_s14 + $0xc] ss:$16 sps:$4 sm:$0xff]   ;;  %s2865_s14 = sshll.u32 %s4230_s21, 3  ;;  %s2881_s21 = sshll.u32 %s4424_s6, 3 }
 0x2c9   : > { %v1348_v27 = vadd.f32 1.0, %v3117_v24  ;;  %v3119_v28 = vpop.eup %3118  ;;  %v1395_v24 = vld [vmem:[%s1394_s30] sm:$0xff]  ;;  %s1559_s8 = scalar_lea.vmem %s4046_s5, %s2865_s14 [#allocation8]  ;;  %s2243_s27 = scalar_lea.vmem %s4046_s5, %s2881_s21 [#allocation8] }
 0x2ca   : > { %3128 = vrcp.f32 %v1336_v25  ;;  %v1337_v29 = vadd.f32 1.0, %v3119_v28  ;;  %v3121_v19 = vpop.eup %3120  ;;  %v1396_v25 = vld [vmem:[%s1394_s30 + $0x8] sm:$0xff] }
 0x2cb   : > { %3130 = vrcp.f32 %v1348_v27  ;;  %v1349_v16 = vadd.f32 1.0, %v3121_v19  ;;  %v3123_v20 = vpop.eup %3122 }
 0x2cc   : > { %3132 = vpow2.f32 %v2770_v26  ;;  %v3125_v22 = vpop.eup %3124  ;;  %v1399_v26 = vunpack.c.l.bf16 %v1395_v24 }
 0x2cd   : > { %3134 = vrcp.f32 %v1337_v29  ;;  %v3127_v30 = vpop.eup %3126  ;;  %v1362_v6 = vadd.f32 1.0, %v3125_v22  ;;  %v1400_v29 = vunpack.c.l.bf16 %v1396_v25  ;;  %v1403_v22 = vunpack.c.h.bf16 %v1395_v24 }
 0x2ce   : > { %3136 = vrcp.f32 %v1349_v16 }
 0x2cf   : > { %3138 = vrcp.f32 %v1362_v6 }
 0x2d4   : > { %v3129_v31 = vpop.eup %3128 }
 0x2d5   : > { %v3131_v32 = vpop.eup %3130  ;;  %v1370_v35 = vmul.f32 %v3129_v31, %v3123_v20 }
 0x2d6   : > { %v3133_v43 = vpop.eup %3132  ;;  %v1368_v52 = vmul.f32 %v3131_v32, %v4038_v9 }
 0x2d7   : > { %v3135_v61 = vpop.eup %3134  ;;  %v1363_v12 = vadd.f32 1.0, %v3133_v43 }
 0x2d8   : > { %v4089_v7 = vadd.f32 %v1370_v35, %v1368_v52  ;;  %v1371_v8 = vmul.f32 %v3135_v61, %v3127_v30  ;;  %v3137_v11 = vpop.eup %3136  ;;  %v1404_v35 = vunpack.c.h.bf16 %v1396_v25  ;;  %v1398_v52 = vld [vmem:[%s1394_s30 + $0x18] sm:$0xff] }
 0x2d9   : > { %v1369_v13 = vmul.f32 %v3137_v11, %v4041_v10  ;;  %v3139_v9 = vpop.eup %3138 }
 0x2da   : > { %3140 = vtanh.f32 %v4089_v7 }
 0x2db   : > { %v4093_v14 = vadd.f32 %v1371_v8, %v1369_v13  ;;  %3142 = vrcp.f32 %v1363_v12 }
 0x2dd   : > { %3144 = vtanh.f32 %v4093_v14 }
 0x2e4   : > { %v3141_v17 = vpop.eup %3140 }
 0x2e5   : > { %v3143_v21 = vpop.eup %3142  ;;  %v1376_v36 = vmul.f32 %v3141_v17, %v3139_v9  ;;  %v1397_v9 = vld [vmem:[%s1394_s30 + $0x10] sm:$0xff]  ;;  %v1402_v17 = vunpack.c.l.bf16 %v1398_v52  ;;  %s4439_s30 = scalar_select %p4515_p8, 0, 7 }
 0x2e6   : > { %v1405_v24 = vunpack.c.h.bf16 %v1397_v9 }
 0x2e7   : > { %v3145_v15 = vpop.eup %3144  ;;  %s2882_s14 = sshll.u32 %s4439_s30, 5  ;;  %s2885_s11 = sshll.u32 %s4439_s30, 3 }
 0x2e8   : > { %v1377_v37 = vmul.f32 %v3145_v15, %v3143_v21  ;;  %s2414_s13 = scalar_lea.vmem %s4046_s5, %s2885_s11 [#allocation8] }
 0x2ea   : > { %v1378_v10 = vpack.c.bf16 %v1377_v37, %v1376_v36  ;;  %v1401_v36 = vunpack.c.l.bf16 %v1397_v9  ;;  %v1406_v37 = vunpack.c.h.bf16 %v1398_v52 }
 0x2ec   : > { %2895 = vst [vmem:[%s1388_s28] sm:$0xff] %v1378_v10   ;;  %1440 = vmatmul.mubr.bf16.vlgmr.msra.gmra.mrb[40].mxu0 %v1378_v10  ;;  %1483 = vmatmul.mubr.bf16.vlgmr.msra.gmra.mrb[40].mxu1 %v1378_v10  ;;  %s2078_s28 = scalar_lea.vmem [#allocation2], %s2878_s15 }
 0x2ed   : > { %1579 = vmatpush1.bf16.msra.mxu0 %v4099_v38  ;;  %1622 = vmatpush1.bf16.msra.mxu1 %v4103_v39 }
 0x2ee   : > { %1580 = vmatprep.subr.bf16.mxu0 %v4107_v40  ;;  %1623 = vmatprep.subr.bf16.mxu1 %v4111_v41 }
 0x2ef   : > { %1610 = vmatprep.mubr.bf16.mxu0 %v3505_v0  ;;  %1653 = vmatprep.mubr.bf16.mxu1 %v3505_v0 }
 0x2f1   : > { %1581 = vmatpush1.bf16.msra.mxu0 %v4117_v42  ;;  %1624 = vmatpush1.bf16.msra.mxu1 %v4121_v44 }
 0x2f2   : > { %1582 = vmatprep.subr.bf16.mxu0 %v4125_v45  ;;  %1625 = vmatprep.subr.bf16.mxu1 %v4129_v46 }
 0x2f5   : > { %1583 = vmatpush1.bf16.msra.mxu0 %v4133_v47  ;;  %1626 = vmatpush1.bf16.msra.mxu1 %v4137_v33 }
 0x2f6   : > { %1584 = vmatprep.subr.bf16.mxu0 %v4141_v48  ;;  %1627 = vmatprep.subr.bf16.mxu1 %v4145_v34 }
 0x2f9   : > { %1585 = vmatpush1.bf16.msra.mxu0 %v4149_v49  ;;  %1628 = vmatpush1.bf16.msra.mxu1 %v4153_v50 }
 0x2fa   : > { %1586 = vmatprep.subr.bf16.mxu0 %v4157_v51  ;;  %1629 = vmatprep.subr.bf16.mxu1 %v4161_v53 }
 0x2fd   : > { %1587 = vmatpush1.bf16.msra.mxu0 %v4165_v54  ;;  %1630 = vmatpush1.bf16.msra.mxu1 %v4169_v55 }
 0x2fe   : > { %1588 = vmatprep.subr.bf16.mxu0 %v4173_v56  ;;  %1631 = vmatprep.subr.bf16.mxu1 %v4177_v57 }
 0x301   : > { %1589 = vmatpush1.bf16.msra.mxu0 %v4181_v58  ;;  %1632 = vmatpush1.bf16.msra.mxu1 %v4185_v59 }
 0x302   : > { %1590 = vmatprep.subr.bf16.mxu0 %v4189_v60  ;;  %1633 = vmatprep.subr.bf16.mxu1 %v4193_v62 }
 0x305   : > { %1591 = vmatpush1.bf16.msra.mxu0 %v4197_v63  ;;  %1634 = vmatpush1.bf16.msra.mxu1 %v4201_v1 }
 0x306   : > { %1592 = vmatprep.subr.bf16.mxu0 %v4205_v2  ;;  %1635 = vmatprep.subr.bf16.mxu1 %v4209_v3 }
 0x309   : > { %1593 = vmatpush1.bf16.msra.mxu0 %v4213_v4  ;;  %1636 = vmatpush1.bf16.msra.mxu1 %v4217_v5 }
 0x30a   : > { %1749 = vmatprep.subr.bf16.mxu0 %v4221_v18  ;;  %1792 = vmatprep.subr.bf16.mxu1 %v4225_v23 }
 0x3bf   : > { %v1441_v27 = vpop.f32.mrb[40].mxu0  ;;  %v1484_v28 = vpop.f32.mrb[40].mxu1 }
 0x3c0   : > { %v1493_v19 = vadd.f32 %v1441_v27, %v1399_v26  ;;  %v1443_v16 = vpop.f32.mrb[41].mxu0  ;;  %v1486_v20 = vpop.f32.mrb[41].mxu1  ;;  %v1495_v10 = vadd.f32 %v1484_v28, %v1401_v36 }
 0x3c1   : > { %v1494_v30 = vadd.f32 %v1443_v16, %v1400_v29  ;;  %v1445_v31 = vpop.f32.mrb[42].mxu0  ;;  %v1488_v32 = vpop.f32.mrb[42].mxu1  ;;  %v1496_v15 = vadd.f32 %v1486_v20, %v1402_v17 }
 0x3c2   : > { %v2777_v43 = vmul.f32 -1.442695, %v1493_v19  ;;  %v1497_v61 = vadd.f32 %v1445_v31, %v1403_v22  ;;  %v1447_v6 = vpop.f32.mrb[43].mxu0  ;;  %v1490_v8 = vpop.f32.mrb[43].mxu1  ;;  %v1499_v27 = vadd.f32 %v1488_v32, %v1405_v24 }
 0x3c3   : > { %v2779_v11 = vmul.f32 -1.442695, %v1494_v30  ;;  %v1498_v12 = vadd.f32 %v1447_v6, %v1404_v35  ;;  %v2781_v25 = vmul.f32 -1.442695, %v1496_v15  ;;  %v1500_v26 = vadd.f32 %v1490_v8, %v1406_v37 }
 0x3c4   : > { %3146 = vpow2.f32 %v2777_v43  ;;  %v2778_v13 = vmul.f32 -1.442695, %v1497_v61 }
 0x3c5   : > { %3148 = vpow2.f32 %v2779_v11  ;;  %v2780_v21 = vmul.f32 -1.442695, %v1498_v12  ;;  %v2782_v22 = vmul.f32 -1.442695, %v1500_v26 }
 0x3c6   : > { %3150 = vpow2.f32 %v2778_v13 }
 0x3c7   : > { %3152 = vpow2.f32 %v2780_v21 }
 0x3c8   : > { %3154 = vtanh.f32 %v1495_v10 }
 0x3c9   : > { %3156 = vpow2.f32 %v2781_v25 }
 0x3ca   : > { %3158 = vtanh.f32 %v1499_v27 }
 0x3ce   : > { %v3147_v29 = vpop.eup %3146 }
 0x3cf   : > { %v3149_v19 = vpop.eup %3148  ;;  %v1507_v16 = vadd.f32 1.0, %v3147_v29 }
 0x3d0   : > { %v1519_v30 = vadd.f32 1.0, %v3149_v19  ;;  %v3151_v31 = vpop.eup %3150 }
 0x3d1   : > { %3160 = vrcp.f32 %v1507_v16  ;;  %v1508_v20 = vadd.f32 1.0, %v3151_v31  ;;  %v3153_v35 = vpop.eup %3152  ;;  %v1567_v16 = vld [vmem:[%s1565_s18 + $0x8] sm:$0xff] }
 0x3d2   : > { %3162 = vrcp.f32 %v1519_v30  ;;  %v1520_v28 = vadd.f32 1.0, %v3153_v35  ;;  %v3155_v43 = vpop.eup %3154 }
 0x3d3   : > { %3164 = vpow2.f32 %v2782_v22  ;;  %v3157_v52 = vpop.eup %3156 }
 0x3d4   : > { %3166 = vrcp.f32 %v1508_v20  ;;  %v3159_v32 = vpop.eup %3158  ;;  %v1533_v9 = vadd.f32 1.0, %v3157_v52  ;;  %v1571_v20 = vunpack.c.l.bf16 %v1567_v16 }
 0x3d5   : > { %3168 = vrcp.f32 %v1520_v28 }
 0x3d6   : > { %3170 = vrcp.f32 %v1533_v9 }
 0x3db   : > { %v3161_v61 = vpop.eup %3160 }
 0x3dc   : > { %v3163_v6 = vpop.eup %3162  ;;  %v1541_v8 = vmul.f32 %v3161_v61, %v3155_v43 }
 0x3dd   : > { %v3165_v11 = vpop.eup %3164  ;;  %v1539_v12 = vmul.f32 %v3163_v6, %v4089_v7 }
 0x3de   : > { %v3167_v13 = vpop.eup %3166  ;;  %v1534_v36 = vadd.f32 1.0, %v3165_v11 }
 0x3df   : > { %v4234_v17 = vadd.f32 %v1541_v8, %v1539_v12  ;;  %v1542_v21 = vmul.f32 %v3167_v13, %v3159_v32  ;;  %v3169_v15 = vpop.eup %3168  ;;  %v1575_v8 = vunpack.c.h.bf16 %v1567_v16  ;;  %v1569_v12 = vld [vmem:[%s1565_s18 + $0x18] sm:$0xff] }
 0x3e0   : > { %v1540_v37 = vmul.f32 %v3169_v15, %v4093_v14  ;;  %v3171_v7 = vpop.eup %3170  ;;  %v1566_v14 = vld [vmem:[%s1565_s18] sm:$0xff] }
 0x3e1   : > { %3172 = vtanh.f32 %v4234_v17  ;;  %v1570_v22 = vunpack.c.l.bf16 %v1566_v14  ;;  %v1574_v52 = vunpack.c.h.bf16 %v1566_v14 }
 0x3e2   : > { %v4238_v10 = vadd.f32 %v1542_v21, %v1540_v37  ;;  %3174 = vrcp.f32 %v1534_v36 }
 0x3e4   : > { %3176 = vtanh.f32 %v4238_v10 }
 0x3eb   : > { %v3173_v24 = vpop.eup %3172 }
 0x3ec   : > { %v3175_v25 = vpop.eup %3174  ;;  %v1547_v27 = vmul.f32 %v3173_v24, %v3171_v7  ;;  %v1568_v7 = vld [vmem:[%s1565_s18 + $0x10] sm:$0xff]  ;;  %v1573_v24 = vunpack.c.l.bf16 %v1569_v12  ;;  %s2848_s18 = sshll.u32 (%p4516_p9), %s3550_s19, 2 }
 0x3ed   : > { %v1576_v14 = vunpack.c.h.bf16 %v1568_v7  ;;  %s2425_s1 = scalar_lea.vmem (%p4516_p9), %s4485_s4, %s2848_s18 }
 0x3ee   : > { %v3177_v26 = vpop.eup %3176 }
 0x3ef   : > { %v1548_v29 = vmul.f32 %v3177_v26, %v3175_v25 }
 0x3f1   : > { %v1549_v19 = vpack.c.bf16 %v1548_v29, %v1547_v27  ;;  %v1572_v27 = vunpack.c.l.bf16 %v1568_v7  ;;  %v1577_v29 = vunpack.c.h.bf16 %v1569_v12 }
 0x3f3   : > { %2900 = vst [vmem:[%s1559_s8] sm:$0xff] %v1549_v19   ;;  %1611 = vmatmul.mubr.bf16.vlgmr.msra.gmra.mrb[44].mxu0 %v1549_v19  ;;  %1654 = vmatmul.mubr.bf16.vlgmr.msra.gmra.mrb[44].mxu1 %v1549_v19  ;;  %s2249_s8 = scalar_lea.vmem [#allocation2], %s2882_s14 }
 0x3f4   : > { %1750 = vmatpush1.bf16.msra.mxu0 %v4099_v38  ;;  %1793 = vmatpush1.bf16.msra.mxu1 %v4103_v39 }
 0x3f5   : > { %1751 = vmatprep.subr.bf16.mxu0 %v4107_v40  ;;  %1794 = vmatprep.subr.bf16.mxu1 %v4111_v41 }
 0x3f6   : > { %1781 = vmatprep.mubr.bf16.mxu0 %v3505_v0  ;;  %1824 = vmatprep.mubr.bf16.mxu1 %v3505_v0 }
 0x3f8   : > { %1752 = vmatpush1.bf16.msra.mxu0 %v4117_v42  ;;  %1795 = vmatpush1.bf16.msra.mxu1 %v4121_v44 }
 0x3f9   : > { %1753 = vmatprep.subr.bf16.mxu0 %v4125_v45  ;;  %1796 = vmatprep.subr.bf16.mxu1 %v4129_v46 }
 0x3fc   : > { %1754 = vmatpush1.bf16.msra.mxu0 %v4133_v47  ;;  %1797 = vmatpush1.bf16.msra.mxu1 %v4137_v33 }
 0x3fd   : > { %1755 = vmatprep.subr.bf16.mxu0 %v4141_v48  ;;  %1798 = vmatprep.subr.bf16.mxu1 %v4145_v34 }
 0x400   : > { %1756 = vmatpush1.bf16.msra.mxu0 %v4149_v49  ;;  %1799 = vmatpush1.bf16.msra.mxu1 %v4153_v50 }
 0x401   : > { %1757 = vmatprep.subr.bf16.mxu0 %v4157_v51  ;;  %1800 = vmatprep.subr.bf16.mxu1 %v4161_v53 }
 0x404   : > { %1758 = vmatpush1.bf16.msra.mxu0 %v4165_v54  ;;  %1801 = vmatpush1.bf16.msra.mxu1 %v4169_v55 }
 0x405   : > { %1759 = vmatprep.subr.bf16.mxu0 %v4173_v56  ;;  %1802 = vmatprep.subr.bf16.mxu1 %v4177_v57 }
 0x408   : > { %1760 = vmatpush1.bf16.msra.mxu0 %v4181_v58  ;;  %1803 = vmatpush1.bf16.msra.mxu1 %v4185_v59 }
 0x409   : > { %1761 = vmatprep.subr.bf16.mxu0 %v4189_v60  ;;  %1804 = vmatprep.subr.bf16.mxu1 %v4193_v62 }
 0x40c   : > { %1762 = vmatpush1.bf16.msra.mxu0 %v4197_v63  ;;  %1805 = vmatpush1.bf16.msra.mxu1 %v4201_v1 }
 0x40d   : > { %1763 = vmatprep.subr.bf16.mxu0 %v4205_v2  ;;  %1806 = vmatprep.subr.bf16.mxu1 %v4209_v3 }
 0x410   : > { %1764 = vmatpush1.bf16.msra.mxu0 %v4213_v4  ;;  %1807 = vmatpush1.bf16.msra.mxu1 %v4217_v5 }
 0x411   : > { %1920 = vmatprep.subr.bf16.mxu0 %v4221_v18  ;;  %1963 = vmatprep.subr.bf16.mxu1 %v4225_v23 }
 0x4c6   : > { %v1612_v30 = vpop.f32.mrb[44].mxu0  ;;  %v1655_v31 = vpop.f32.mrb[44].mxu1 }
 0x4c7   : > { %v1664_v35 = vadd.f32 %v1612_v30, %v1570_v22  ;;  %v1614_v28 = vpop.f32.mrb[45].mxu0  ;;  %v1657_v43 = vpop.f32.mrb[45].mxu1  ;;  %v1666_v19 = vadd.f32 %v1655_v31, %v1572_v27 }
 0x4c8   : > { %v1665_v32 = vadd.f32 %v1614_v28, %v1571_v20  ;;  %v1616_v61 = vpop.f32.mrb[46].mxu0  ;;  %v1659_v6 = vpop.f32.mrb[46].mxu1  ;;  %v1667_v26 = vadd.f32 %v1657_v43, %v1573_v24 }
 0x4c9   : > { %v2789_v11 = vmul.f32 -1.442695, %v1664_v35  ;;  %v1668_v13 = vadd.f32 %v1616_v61, %v1574_v52  ;;  %v1618_v9 = vpop.f32.mrb[47].mxu0  ;;  %v1661_v21 = vpop.f32.mrb[47].mxu1  ;;  %v1670_v30 = vadd.f32 %v1659_v6, %v1576_v14 }
 0x4ca   : > { %v2791_v15 = vmul.f32 -1.442695, %v1665_v32  ;;  %v1669_v36 = vadd.f32 %v1618_v9, %v1575_v8  ;;  %v2793_v16 = vmul.f32 -1.442695, %v1667_v26  ;;  %v1671_v22 = vadd.f32 %v1661_v21, %v1577_v29 }
 0x4cb   : > { %3178 = vpow2.f32 %v2789_v11  ;;  %v2790_v37 = vmul.f32 -1.442695, %v1668_v13 }
 0x4cc   : > { %3180 = vpow2.f32 %v2791_v15  ;;  %v2792_v25 = vmul.f32 -1.442695, %v1669_v36  ;;  %v2794_v52 = vmul.f32 -1.442695, %v1671_v22 }
 0x4cd   : > { %3182 = vpow2.f32 %v2790_v37 }
 0x4ce   : > { %3184 = vpow2.f32 %v2792_v25 }
 0x4cf   : > { %3186 = vtanh.f32 %v1666_v19 }
 0x4d0   : > { %3188 = vpow2.f32 %v2793_v16 }
 0x4d1   : > { %3190 = vtanh.f32 %v1670_v30 }
 0x4d5   : > { %v3179_v20 = vpop.eup %3178 }
 0x4d6   : > { %v3181_v35 = vpop.eup %3180  ;;  %v1678_v28 = vadd.f32 1.0, %v3179_v20 }
 0x4d7   : > { %v1690_v32 = vadd.f32 1.0, %v3181_v35  ;;  %v3183_v61 = vpop.eup %3182 }
 0x4d8   : > { %3192 = vrcp.f32 %v1678_v28  ;;  %v1679_v43 = vadd.f32 1.0, %v3183_v61  ;;  %v3185_v8 = vpop.eup %3184  ;;  %v1738_v28 = vld [vmem:[%s1736_s23 + $0x8] sm:$0xff] }
 0x4d9   : > { %3194 = vrcp.f32 %v1690_v32  ;;  %v1691_v31 = vadd.f32 1.0, %v3185_v8  ;;  %v3187_v11 = vpop.eup %3186 }
 0x4da   : > { %3196 = vpow2.f32 %v2794_v52  ;;  %v3189_v12 = vpop.eup %3188 }
 0x4db   : > { %3198 = vrcp.f32 %v1679_v43  ;;  %v3191_v6 = vpop.eup %3190  ;;  %v1704_v7 = vadd.f32 1.0, %v3189_v12  ;;  %v1742_v43 = vunpack.c.l.bf16 %v1738_v28 }
 0x4dc   : > { %3200 = vrcp.f32 %v1691_v31 }
 0x4dd   : > { %3202 = vrcp.f32 %v1704_v7 }
 0x4e2   : > { %v3193_v13 = vpop.eup %3192 }
 0x4e3   : > { %v3195_v9 = vpop.eup %3194  ;;  %v1712_v21 = vmul.f32 %v3193_v13, %v3187_v11 }
 0x4e4   : > { %v3197_v15 = vpop.eup %3196  ;;  %v1710_v36 = vmul.f32 %v3195_v9, %v4234_v17 }
 0x4e5   : > { %v3199_v37 = vpop.eup %3198  ;;  %v1705_v27 = vadd.f32 1.0, %v3197_v15 }
 0x4e6   : > { %v4283_v24 = vadd.f32 %v1712_v21, %v1710_v36  ;;  %v1713_v25 = vmul.f32 %v3199_v37, %v3191_v6  ;;  %v3201_v26 = vpop.eup %3200  ;;  %v1746_v21 = vunpack.c.h.bf16 %v1738_v28  ;;  %v1740_v36 = vld [vmem:[%s1736_s23 + $0x18] sm:$0xff] }
 0x4e7   : > { %v1711_v29 = vmul.f32 %v3201_v26, %v4238_v10  ;;  %v3203_v17 = vpop.eup %3202  ;;  %v1737_v10 = vld [vmem:[%s1736_s23] sm:$0xff] }
 0x4e8   : > { %3204 = vtanh.f32 %v4283_v24  ;;  %v1741_v52 = vunpack.c.l.bf16 %v1737_v10  ;;  %v1745_v12 = vunpack.c.h.bf16 %v1737_v10 }
 0x4e9   : > { %v4287_v19 = vadd.f32 %v1713_v25, %v1711_v29  ;;  %3206 = vrcp.f32 %v1705_v27 }
 0x4eb   : > { %3208 = vtanh.f32 %v4287_v19 }
 0x4f2   : > { %v3205_v14 = vpop.eup %3204 }
 0x4f3   : > { %v3207_v16 = vpop.eup %3206  ;;  %v1718_v30 = vmul.f32 %v3205_v14, %v3203_v17  ;;  %v1739_v17 = vld [vmem:[%s1736_s23 + $0x10] sm:$0xff]  ;;  %v1744_v14 = vunpack.c.l.bf16 %v1740_v36 }
 0x4f4   : > { %v1747_v10 = vunpack.c.h.bf16 %v1739_v17 }
 0x4f5   : > { %v3209_v22 = vpop.eup %3208 }
 0x4f6   : > { %v1719_v20 = vmul.f32 %v3209_v22, %v3207_v16 }
 0x4f8   : > { %v1720_v35 = vpack.c.bf16 %v1719_v20, %v1718_v30  ;;  %v1743_v30 = vunpack.c.l.bf16 %v1739_v17  ;;  %v1748_v20 = vunpack.c.h.bf16 %v1740_v36 }
 0x4fa   : > { %2905 = vst [vmem:[%s1730_s22] sm:$0xff] %v1720_v35   ;;  %1782 = vmatmul.mubr.bf16.vlgmr.msra.gmra.mrb[48].mxu0 %v1720_v35  ;;  %1825 = vmatmul.mubr.bf16.vlgmr.msra.gmra.mrb[48].mxu1 %v1720_v35 }
 0x4fb   : > { %1921 = vmatpush1.bf16.msra.mxu0 %v4099_v38  ;;  %1964 = vmatpush1.bf16.msra.mxu1 %v4103_v39 }
 0x4fc   : > { %1922 = vmatprep.subr.bf16.mxu0 %v4107_v40  ;;  %1965 = vmatprep.subr.bf16.mxu1 %v4111_v41 }
 0x4fd   : > { %1952 = vmatprep.mubr.bf16.mxu0 %v3505_v0  ;;  %1995 = vmatprep.mubr.bf16.mxu1 %v3505_v0 }
 0x4ff   : > { %1923 = vmatpush1.bf16.msra.mxu0 %v4117_v42  ;;  %1966 = vmatpush1.bf16.msra.mxu1 %v4121_v44 }
 0x500   : > { %1924 = vmatprep.subr.bf16.mxu0 %v4125_v45  ;;  %1967 = vmatprep.subr.bf16.mxu1 %v4129_v46 }
 0x503   : > { %1925 = vmatpush1.bf16.msra.mxu0 %v4133_v47  ;;  %1968 = vmatpush1.bf16.msra.mxu1 %v4137_v33 }
 0x504   : > { %1926 = vmatprep.subr.bf16.mxu0 %v4141_v48  ;;  %1969 = vmatprep.subr.bf16.mxu1 %v4145_v34 }
 0x507   : > { %1927 = vmatpush1.bf16.msra.mxu0 %v4149_v49  ;;  %1970 = vmatpush1.bf16.msra.mxu1 %v4153_v50 }
 0x508   : > { %1928 = vmatprep.subr.bf16.mxu0 %v4157_v51  ;;  %1971 = vmatprep.subr.bf16.mxu1 %v4161_v53 }
 0x50b   : > { %1929 = vmatpush1.bf16.msra.mxu0 %v4165_v54  ;;  %1972 = vmatpush1.bf16.msra.mxu1 %v4169_v55 }
 0x50c   : > { %1930 = vmatprep.subr.bf16.mxu0 %v4173_v56  ;;  %1973 = vmatprep.subr.bf16.mxu1 %v4177_v57 }
 0x50f   : > { %1931 = vmatpush1.bf16.msra.mxu0 %v4181_v58  ;;  %1974 = vmatpush1.bf16.msra.mxu1 %v4185_v59 }
 0x510   : > { %1932 = vmatprep.subr.bf16.mxu0 %v4189_v60  ;;  %1975 = vmatprep.subr.bf16.mxu1 %v4193_v62 }
 0x513   : > { %1933 = vmatpush1.bf16.msra.mxu0 %v4197_v63  ;;  %1976 = vmatpush1.bf16.msra.mxu1 %v4201_v1 }
 0x514   : > { %1934 = vmatprep.subr.bf16.mxu0 %v4205_v2  ;;  %1977 = vmatprep.subr.bf16.mxu1 %v4209_v3 }
 0x517   : > { %1935 = vmatpush1.bf16.msra.mxu0 %v4213_v4  ;;  %1978 = vmatpush1.bf16.msra.mxu1 %v4217_v5 }
 0x518   : > { %2091 = vmatprep.subr.bf16.mxu0 %v4221_v18  ;;  %2134 = vmatprep.subr.bf16.mxu1 %v4225_v23 }
 0x5cd   : > { %v1783_v32 = vpop.f32.mrb[48].mxu0  ;;  %v1826_v61 = vpop.f32.mrb[48].mxu1 }
 0x5ce   : > { %v1835_v8 = vadd.f32 %v1783_v32, %v1741_v52  ;;  %v1785_v31 = vpop.f32.mrb[49].mxu0  ;;  %v1828_v11 = vpop.f32.mrb[49].mxu1  ;;  %v1837_v35 = vadd.f32 %v1826_v61, %v1743_v30 }
 0x5cf   : > { %v1836_v6 = vadd.f32 %v1785_v31, %v1742_v43  ;;  %v1787_v13 = vpop.f32.mrb[50].mxu0  ;;  %v1830_v9 = vpop.f32.mrb[50].mxu1  ;;  %v1838_v22 = vadd.f32 %v1828_v11, %v1744_v14 }
 0x5d0   : > { %v2801_v15 = vmul.f32 -1.442695, %v1835_v8  ;;  %v1839_v37 = vadd.f32 %v1787_v13, %v1745_v12  ;;  %v1789_v7 = vpop.f32.mrb[51].mxu0  ;;  %v1832_v25 = vpop.f32.mrb[51].mxu1  ;;  %v1841_v32 = vadd.f32 %v1830_v9, %v1747_v10 }
 0x5d1   : > { %v2803_v26 = vmul.f32 -1.442695, %v1836_v6  ;;  %v1840_v27 = vadd.f32 %v1789_v7, %v1746_v21  ;;  %v2805_v28 = vmul.f32 -1.442695, %v1838_v22  ;;  %v1842_v52 = vadd.f32 %v1832_v25, %v1748_v20 }
 0x5d2   : > { %3210 = vpow2.f32 %v2801_v15  ;;  %v2802_v29 = vmul.f32 -1.442695, %v1839_v37 }
 0x5d3   : > { %3212 = vpow2.f32 %v2803_v26  ;;  %v2804_v16 = vmul.f32 -1.442695, %v1840_v27  ;;  %v2806_v12 = vmul.f32 -1.442695, %v1842_v52 }
 0x5d4   : > { %3214 = vpow2.f32 %v2802_v29 }
 0x5d5   : > { %3216 = vpow2.f32 %v2804_v16 }
 0x5d6   : > { %3218 = vtanh.f32 %v1837_v35 }
 0x5d7   : > { %3220 = vpow2.f32 %v2805_v28 }
 0x5d8   : > { %3222 = vtanh.f32 %v1841_v32 }
 0x5dc   : > { %v3211_v43 = vpop.eup %3210 }
 0x5dd   : > { %v3213_v8 = vpop.eup %3212  ;;  %v1849_v31 = vadd.f32 1.0, %v3211_v43 }
 0x5de   : > { %v1861_v6 = vadd.f32 1.0, %v3213_v8  ;;  %v3215_v13 = vpop.eup %3214 }
 0x5df   : > { %3224 = vrcp.f32 %v1849_v31  ;;  %v1850_v11 = vadd.f32 1.0, %v3215_v13  ;;  %v3217_v21 = vpop.eup %3216  ;;  %v1909_v31 = vld [vmem:[%s1907_s7 + $0x8] sm:$0xff] }
 0x5e0   : > { %3226 = vrcp.f32 %v1861_v6  ;;  %v1862_v61 = vadd.f32 1.0, %v3217_v21  ;;  %v3219_v15 = vpop.eup %3218 }
 0x5e1   : > { %3228 = vpow2.f32 %v2806_v12  ;;  %v3221_v36 = vpop.eup %3220 }
 0x5e2   : > { %3230 = vrcp.f32 %v1850_v11  ;;  %v3223_v9 = vpop.eup %3222  ;;  %v1875_v17 = vadd.f32 1.0, %v3221_v36  ;;  %v1913_v11 = vunpack.c.l.bf16 %v1909_v31 }
 0x5e3   : > { %3232 = vrcp.f32 %v1862_v61 }
 0x5e4   : > { %3234 = vrcp.f32 %v1875_v17 }
 0x5e9   : > { %v3225_v37 = vpop.eup %3224 }
 0x5ea   : > { %v3227_v7 = vpop.eup %3226  ;;  %v1883_v25 = vmul.f32 %v3225_v37, %v3219_v15 }
 0x5eb   : > { %v3229_v26 = vpop.eup %3228  ;;  %v1881_v27 = vmul.f32 %v3227_v7, %v4283_v24 }
 0x5ec   : > { %v3231_v29 = vpop.eup %3230  ;;  %v1876_v30 = vadd.f32 1.0, %v3229_v26 }
 0x5ed   : > { %v4332_v14 = vadd.f32 %v1883_v25, %v1881_v27  ;;  %v1884_v16 = vmul.f32 %v3231_v29, %v3223_v9  ;;  %v3233_v22 = vpop.eup %3232  ;;  %v1911_v25 = vld [vmem:[%s1907_s7 + $0x18] sm:$0xff] }
 0x5ee   : > { %v1882_v20 = vmul.f32 %v3233_v22, %v4287_v19  ;;  %v3235_v24 = vpop.eup %3234  ;;  %v1908_v19 = vld [vmem:[%s1907_s7] sm:$0xff] }
 0x5ef   : > { %3236 = vtanh.f32 %v4332_v14  ;;  %v1912_v12 = vunpack.c.l.bf16 %v1908_v19  ;;  %v1916_v36 = vunpack.c.h.bf16 %v1908_v19 }
 0x5f0   : > { %v4336_v35 = vadd.f32 %v1884_v16, %v1882_v20  ;;  %3238 = vrcp.f32 %v1876_v30  ;;  %v1910_v30 = vld [vmem:[%s1907_s7 + $0x10] sm:$0xff]  ;;  %v1915_v20 = vunpack.c.l.bf16 %v1911_v25 }
 0x5f2   : > { %3240 = vtanh.f32 %v4336_v35 }
 0x5f9   : > { %v3237_v10 = vpop.eup %3236 }
 0x5fa   : > { %v3239_v28 = vpop.eup %3238  ;;  %v1889_v32 = vmul.f32 %v3237_v10, %v3235_v24 }
 0x5fc   : > { %v3241_v52 = vpop.eup %3240 }
 0x5fd   : > { %v1890_v43 = vmul.f32 %v3241_v52, %v3239_v28  ;;  %v1914_v28 = vunpack.c.l.bf16 %v1910_v30  ;;  %v1919_v52 = vunpack.c.h.bf16 %v1911_v25 }
 0x5ff   : > { %v1891_v8 = vpack.c.bf16 %v1890_v43, %v1889_v32  ;;  %v1918_v43 = vunpack.c.h.bf16 %v1910_v30 }
 0x601   : > { %2910 = vst [vmem:[%s1901_s29] sm:$0xff] %v1891_v8   ;;  %1953 = vmatmul.mubr.bf16.vlgmr.msra.gmra.mrb[52].mxu0 %v1891_v8  ;;  %1996 = vmatmul.mubr.bf16.vlgmr.msra.gmra.mrb[52].mxu1 %v1891_v8 }
 0x602   : > { %2092 = vmatpush1.bf16.msra.mxu0 %v4099_v38  ;;  %2135 = vmatpush1.bf16.msra.mxu1 %v4103_v39 }
 0x603   : > { %2093 = vmatprep.subr.bf16.mxu0 %v4107_v40  ;;  %2136 = vmatprep.subr.bf16.mxu1 %v4111_v41 }
 0x604   : > { %2123 = vmatprep.mubr.bf16.mxu0 %v3505_v0  ;;  %2166 = vmatprep.mubr.bf16.mxu1 %v3505_v0 }
 0x606   : > { %2094 = vmatpush1.bf16.msra.mxu0 %v4117_v42  ;;  %2137 = vmatpush1.bf16.msra.mxu1 %v4121_v44 }
 0x607   : > { %2095 = vmatprep.subr.bf16.mxu0 %v4125_v45  ;;  %2138 = vmatprep.subr.bf16.mxu1 %v4129_v46 }
 0x60a   : > { %2096 = vmatpush1.bf16.msra.mxu0 %v4133_v47  ;;  %2139 = vmatpush1.bf16.msra.mxu1 %v4137_v33 }
 0x60b   : > { %2097 = vmatprep.subr.bf16.mxu0 %v4141_v48  ;;  %2140 = vmatprep.subr.bf16.mxu1 %v4145_v34 }
 0x60e   : > { %2098 = vmatpush1.bf16.msra.mxu0 %v4149_v49  ;;  %2141 = vmatpush1.bf16.msra.mxu1 %v4153_v50 }
 0x60f   : > { %2099 = vmatprep.subr.bf16.mxu0 %v4157_v51  ;;  %2142 = vmatprep.subr.bf16.mxu1 %v4161_v53 }
 0x612   : > { %2100 = vmatpush1.bf16.msra.mxu0 %v4165_v54  ;;  %2143 = vmatpush1.bf16.msra.mxu1 %v4169_v55 }
 0x613   : > { %2101 = vmatprep.subr.bf16.mxu0 %v4173_v56  ;;  %2144 = vmatprep.subr.bf16.mxu1 %v4177_v57 }
 0x616   : > { %2102 = vmatpush1.bf16.msra.mxu0 %v4181_v58  ;;  %2145 = vmatpush1.bf16.msra.mxu1 %v4185_v59 }
 0x617   : > { %2103 = vmatprep.subr.bf16.mxu0 %v4189_v60  ;;  %2146 = vmatprep.subr.bf16.mxu1 %v4193_v62 }
 0x61a   : > { %2104 = vmatpush1.bf16.msra.mxu0 %v4197_v63  ;;  %2147 = vmatpush1.bf16.msra.mxu1 %v4201_v1 }
 0x61b   : > { %2105 = vmatprep.subr.bf16.mxu0 %v4205_v2  ;;  %2148 = vmatprep.subr.bf16.mxu1 %v4209_v3 }
 0x61e   : > { %2106 = vmatpush1.bf16.msra.mxu0 %v4213_v4  ;;  %2149 = vmatpush1.bf16.msra.mxu1 %v4217_v5 }
 0x61f   : > { %2262 = vmatprep.subr.bf16.mxu0 %v4221_v18  ;;  %2305 = vmatprep.subr.bf16.mxu1 %v4225_v23  ;;  %v1917_v23 = vunpack.c.h.bf16 %v1909_v31 }
 0x6d4   : > { %v1954_v6 = vpop.f32.mrb[52].mxu0  ;;  %v1997_v13 = vpop.f32.mrb[52].mxu1 }
 0x6d5   : > { %v2006_v21 = vadd.f32 %v1954_v6, %v1912_v12  ;;  %v1956_v61 = vpop.f32.mrb[53].mxu0  ;;  %v1999_v15 = vpop.f32.mrb[53].mxu1  ;;  %v2008_v32 = vadd.f32 %v1997_v13, %v1914_v28 }
 0x6d6   : > { %v2007_v9 = vadd.f32 %v1956_v61, %v1913_v11  ;;  %v1958_v18 = vpop.f32.mrb[54].mxu0  ;;  %v2001_v37 = vpop.f32.mrb[54].mxu1  ;;  %v2009_v10 = vadd.f32 %v1999_v15, %v1915_v20 }
 0x6d7   : > { %v2813_v7 = vmul.f32 -1.442695, %v2006_v21  ;;  %v2010_v26 = vadd.f32 %v1958_v18, %v1916_v36  ;;  %v1960_v27 = vpop.f32.mrb[55].mxu0  ;;  %v2003_v29 = vpop.f32.mrb[55].mxu1  ;;  %v2012_v31 = vadd.f32 %v2001_v37, %v1918_v43 }
 0x6d8   : > { %v2815_v17 = vmul.f32 -1.442695, %v2007_v9  ;;  %v2011_v16 = vadd.f32 %v1960_v27, %v1917_v23  ;;  %v2817_v8 = vmul.f32 -1.442695, %v2009_v10  ;;  %v2013_v19 = vadd.f32 %v2003_v29, %v1919_v52 }
 0x6d9   : > { %3242 = vpow2.f32 %v2813_v7  ;;  %v2814_v22 = vmul.f32 -1.442695, %v2010_v26 }
 0x6da   : > { %3244 = vpow2.f32 %v2815_v17  ;;  %v2816_v24 = vmul.f32 -1.442695, %v2011_v16  ;;  %v2818_v21 = vmul.f32 -1.442695, %v2013_v19 }
 0x6db   : > { %3246 = vpow2.f32 %v2814_v22 }
 0x6dc   : > { %3248 = vpow2.f32 %v2816_v24 }
 0x6dd   : > { %3250 = vtanh.f32 %v2008_v32 }
 0x6de   : > { %3252 = vpow2.f32 %v2817_v8 }
 0x6df   : > { %3254 = vtanh.f32 %v2012_v31 }
 0x6e3   : > { %v3243_v12 = vpop.eup %3242 }
 0x6e4   : > { %v3245_v6 = vpop.eup %3244  ;;  %v2020_v11 = vadd.f32 1.0, %v3243_v12 }
 0x6e5   : > { %v2032_v61 = vadd.f32 1.0, %v3245_v6  ;;  %v3247_v36 = vpop.eup %3246 }
 0x6e6   : > { %3256 = vrcp.f32 %v2020_v11  ;;  %v2021_v15 = vadd.f32 1.0, %v3247_v36  ;;  %v3249_v9 = vpop.eup %3248 }
 0x6e7   : > { %3258 = vrcp.f32 %v2032_v61  ;;  %v2033_v13 = vadd.f32 1.0, %v3249_v9  ;;  %v3251_v18 = vpop.eup %3250 }
 0x6e8   : > { %3260 = vpow2.f32 %v2818_v21  ;;  %v3253_v23 = vpop.eup %3252 }
 0x6e9   : > { %3262 = vrcp.f32 %v2021_v15  ;;  %v3255_v37 = vpop.eup %3254  ;;  %v2046_v16 = vadd.f32 1.0, %v3253_v23 }
 0x6ea   : > { %3264 = vrcp.f32 %v2033_v13 }
 0x6eb   : > { %3266 = vrcp.f32 %v2046_v16 }
 0x6f0   : > { %v3257_v7 = vpop.eup %3256 }
 0x6f1   : > { %v3259_v25 = vpop.eup %3258  ;;  %v2054_v26 = vmul.f32 %v3257_v7, %v3251_v18 }
 0x6f2   : > { %v3261_v27 = vpop.eup %3260  ;;  %v2052_v29 = vmul.f32 %v3259_v25, %v4332_v14 }
 0x6f3   : > { %v3263_v17 = vpop.eup %3262  ;;  %v2047_v24 = vadd.f32 1.0, %v3261_v27 }
 0x6f4   : > { %v4381_v22 = vadd.f32 %v2054_v26, %v2052_v29  ;;  %v2055_v30 = vmul.f32 %v3263_v17, %v3255_v37  ;;  %v3265_v20 = vpop.eup %3264 }
 0x6f5   : > { %v2053_v10 = vmul.f32 %v3265_v20, %v4336_v35  ;;  %v3267_v14 = vpop.eup %3266 }
 0x6f6   : > { %3268 = vtanh.f32 %v4381_v22 }
 0x6f7   : > { %v4385_v28 = vadd.f32 %v2055_v30, %v2053_v10  ;;  %3270 = vrcp.f32 %v2047_v24 }
 0x6f9   : > { %3272 = vtanh.f32 %v4385_v28 }
 0x700   : > { %v3269_v52 = vpop.eup %3268 }
 0x701   : > { %v3271_v32 = vpop.eup %3270  ;;  %v2060_v8 = vmul.f32 %v3269_v52, %v3267_v14 }
 0x703   : > { %v3273_v43 = vpop.eup %3272 }
 0x704   : > { %v2061_v19 = vmul.f32 %v3273_v43, %v3271_v32 }
 0x706   : > { %v2062_v31 = vpack.c.bf16 %v2061_v19, %v2060_v8 }
 0x708   : > { %2915 = vst [vmem:[%s2072_s9] sm:$0xff] %v2062_v31   ;;  %2124 = vmatmul.mubr.bf16.vlgmr.msra.gmra.mrb[56].mxu0 %v2062_v31  ;;  %2167 = vmatmul.mubr.bf16.vlgmr.msra.gmra.mrb[56].mxu1 %v2062_v31 }
 0x709   : > { %2263 = vmatpush1.bf16.msra.mxu0 %v4099_v38  ;;  %2306 = vmatpush1.bf16.msra.mxu1 %v4103_v39  ;;  %v2080_v38 = vld [vmem:[%s2078_s28 + $0x8] sm:$0xff] }
 0x70a   : > { %2264 = vmatprep.subr.bf16.mxu0 %v4107_v40  ;;  %2307 = vmatprep.subr.bf16.mxu1 %v4111_v41 }
 0x70b   : > { %2294 = vmatprep.mubr.bf16.mxu0 %v3505_v0  ;;  %2337 = vmatprep.mubr.bf16.mxu1 %v3505_v0  ;;  %v2079_v0 = vld [vmem:[%s2078_s28] sm:$0xff] }
 0x70c   : > { %v2083_v39 = vunpack.c.l.bf16 %v2079_v0 }
 0x70d   : > { %2265 = vmatpush1.bf16.msra.mxu0 %v4117_v42  ;;  %2308 = vmatpush1.bf16.msra.mxu1 %v4121_v44  ;;  %v2084_v42 = vunpack.c.l.bf16 %v2080_v38 }
 0x70e   : > { %2266 = vmatprep.subr.bf16.mxu0 %v4125_v45  ;;  %2309 = vmatprep.subr.bf16.mxu1 %v4129_v46 }
 0x711   : > { %2267 = vmatpush1.bf16.msra.mxu0 %v4133_v47  ;;  %2310 = vmatpush1.bf16.msra.mxu1 %v4137_v33  ;;  %v2087_v47 = vunpack.c.h.bf16 %v2079_v0 }
 0x712   : > { %2268 = vmatprep.subr.bf16.mxu0 %v4141_v48  ;;  %2311 = vmatprep.subr.bf16.mxu1 %v4145_v34 }
 0x715   : > { %2269 = vmatpush1.bf16.msra.mxu0 %v4149_v49  ;;  %2312 = vmatpush1.bf16.msra.mxu1 %v4153_v50  ;;  %v2088_v49 = vunpack.c.h.bf16 %v2080_v38 }
 0x716   : > { %2270 = vmatprep.subr.bf16.mxu0 %v4157_v51  ;;  %2313 = vmatprep.subr.bf16.mxu1 %v4161_v53  ;;  %v2082_v51 = vld [vmem:[%s2078_s28 + $0x18] sm:$0xff] }
 0x719   : > { %2271 = vmatpush1.bf16.msra.mxu0 %v4165_v54  ;;  %2314 = vmatpush1.bf16.msra.mxu1 %v4169_v55 }
 0x71a   : > { %2272 = vmatprep.subr.bf16.mxu0 %v4173_v56  ;;  %2315 = vmatprep.subr.bf16.mxu1 %v4177_v57 }
 0x71d   : > { %2273 = vmatpush1.bf16.msra.mxu0 %v4181_v58  ;;  %2316 = vmatpush1.bf16.msra.mxu1 %v4185_v59  ;;  %v2081_v59 = vld [vmem:[%s2078_s28 + $0x10] sm:$0xff] }
 0x71e   : > { %2274 = vmatprep.subr.bf16.mxu0 %v4189_v60  ;;  %2317 = vmatprep.subr.bf16.mxu1 %v4193_v62  ;;  %v2086_v60 = vunpack.c.l.bf16 %v2082_v51 }
 0x721   : > { %2275 = vmatpush1.bf16.msra.mxu0 %v4197_v63  ;;  %2318 = vmatpush1.bf16.msra.mxu1 %v4201_v1  ;;  %v2085_v1 = vunpack.c.l.bf16 %v2081_v59 }
 0x722   : > { %2276 = vmatprep.subr.bf16.mxu0 %v4205_v2  ;;  %2319 = vmatprep.subr.bf16.mxu1 %v4209_v3  ;;  %v2090_v2 = vunpack.c.h.bf16 %v2082_v51 }
 0x725   : > { %2277 = vmatpush1.bf16.msra.mxu0 %v4213_v4  ;;  %2320 = vmatpush1.bf16.msra.mxu1 %v4217_v5  ;;  %v2089_v4 = vunpack.c.h.bf16 %v2081_v59 }
 0x7db   : > { %v2125_v40 = vpop.f32.mrb[56].mxu0  ;;  %v2168_v41 = vpop.f32.mrb[56].mxu1 }
 0x7dc   : > { %v2177_v44 = vadd.f32 %v2125_v40, %v2083_v39  ;;  %v2127_v45 = vpop.f32.mrb[57].mxu0  ;;  %v2170_v46 = vpop.f32.mrb[57].mxu1  ;;  %v2179_v3 = vadd.f32 %v2168_v41, %v2085_v1  ;;  %v2251_v39 = vld [vmem:[%s2249_s8 + $0x8] sm:$0xff] }
 0x7dd   : > { %v2178_v33 = vadd.f32 %v2127_v45, %v2084_v42  ;;  %v2129_v48 = vpop.f32.mrb[58].mxu0  ;;  %v2172_v34 = vpop.f32.mrb[58].mxu1  ;;  %v2180_v63 = vadd.f32 %v2170_v46, %v2086_v60  ;;  %v2252_v60 = vld [vmem:[%s2249_s8 + $0x10] sm:$0xff] }
 0x7de   : > { %v2825_v50 = vmul.f32 -1.442695, %v2177_v44  ;;  %v2181_v53 = vadd.f32 %v2129_v48, %v2087_v47  ;;  %v2131_v54 = vpop.f32.mrb[59].mxu0  ;;  %v2174_v55 = vpop.f32.mrb[59].mxu1  ;;  %v2183_v12 = vadd.f32 %v2172_v34, %v2089_v4  ;;  %v2255_v44 = vunpack.c.l.bf16 %v2251_v39 }
 0x7df   : > { %v2827_v56 = vmul.f32 -1.442695, %v2178_v33  ;;  %v2182_v57 = vadd.f32 %v2131_v54, %v2088_v49  ;;  %v2829_v5 = vmul.f32 -1.442695, %v2180_v63  ;;  %v2184_v35 = vadd.f32 %v2174_v55, %v2090_v2 }
 0x7e0   : > { %3274 = vpow2.f32 %v2825_v50  ;;  %v2826_v58 = vmul.f32 -1.442695, %v2181_v53  ;;  %v2259_v50 = vunpack.c.h.bf16 %v2251_v39  ;;  %v2253_v53 = vld [vmem:[%s2249_s8 + $0x18] sm:$0xff]  ;;  %v2256_v2 = vunpack.c.l.bf16 %v2252_v60 }
 0x7e1   : > { %3276 = vpow2.f32 %v2827_v56  ;;  %v2828_v62 = vmul.f32 -1.442695, %v2182_v57  ;;  %v2830_v61 = vmul.f32 -1.442695, %v2184_v35 }
 0x7e2   : > { %3278 = vpow2.f32 %v2826_v58 }
 0x7e3   : > { %3280 = vpow2.f32 %v2828_v62  ;;  %v2257_v62 = vunpack.c.l.bf16 %v2253_v53 }
 0x7e4   : > { %3282 = vtanh.f32 %v2179_v3  ;;  %v2261_v3 = vunpack.c.h.bf16 %v2253_v53 }
 0x7e5   : > { %3284 = vpow2.f32 %v2829_v5  ;;  %v2260_v5 = vunpack.c.h.bf16 %v2252_v60 }
 0x7e6   : > { %3286 = vtanh.f32 %v2183_v12 }
 0x7ea   : > { %v3275_v6 = vpop.eup %3274 }
 0x7eb   : > { %v3277_v11 = vpop.eup %3276  ;;  %v2191_v21 = vadd.f32 1.0, %v3275_v6 }
 0x7ec   : > { %v2203_v36 = vadd.f32 1.0, %v3277_v11  ;;  %v3279_v15 = vpop.eup %3278 }
 0x7ed   : > { %3288 = vrcp.f32 %v2191_v21  ;;  %v2192_v9 = vadd.f32 1.0, %v3279_v15  ;;  %v3281_v13 = vpop.eup %3280 }
 0x7ee   : > { %3290 = vrcp.f32 %v2203_v36  ;;  %v2204_v18 = vadd.f32 1.0, %v3281_v13  ;;  %v3283_v23 = vpop.eup %3282 }
 0x7ef   : > { %3292 = vpow2.f32 %v2830_v61  ;;  %v3285_v37 = vpop.eup %3284 }
 0x7f0   : > { %3294 = vrcp.f32 %v2192_v9  ;;  %v3287_v7 = vpop.eup %3286  ;;  %v2217_v30 = vadd.f32 1.0, %v3285_v37 }
 0x7f1   : > { %3296 = vrcp.f32 %v2204_v18 }
 0x7f2   : > { %3298 = vrcp.f32 %v2217_v30 }
 0x7f7   : > { %v3289_v25 = vpop.eup %3288 }
 0x7f8   : > { %v3291_v26 = vpop.eup %3290  ;;  %v2225_v27 = vmul.f32 %v3289_v25, %v3283_v23 }
 0x7f9   : > { %v3293_v29 = vpop.eup %3292  ;;  %v2223_v17 = vmul.f32 %v3291_v26, %v4381_v22 }
 0x7fa   : > { %v3295_v16 = vpop.eup %3294  ;;  %v2218_v14 = vadd.f32 1.0, %v3293_v29 }
 0x7fb   : > { %v4428_v20 = vadd.f32 %v2225_v27, %v2223_v17  ;;  %v2226_v24 = vmul.f32 %v3295_v16, %v3287_v7  ;;  %v3297_v10 = vpop.eup %3296 }
 0x7fc   : > { %v2224_v52 = vmul.f32 %v3297_v10, %v4385_v28  ;;  %v3299_v22 = vpop.eup %3298  ;;  %v2250_v28 = vld [vmem:[%s2249_s8] sm:$0xff] }
 0x7fd   : > { %3300 = vtanh.f32 %v4428_v20  ;;  %v2254_v40 = vunpack.c.l.bf16 %v2250_v28  ;;  %v2258_v33 = vunpack.c.h.bf16 %v2250_v28 }
 0x7fe   : > { %v4432_v32 = vadd.f32 %v2226_v24, %v2224_v52  ;;  %3302 = vrcp.f32 %v2218_v14 }
 0x800   : > { %3304 = vtanh.f32 %v4432_v32 }
 0x807   : > { %v3301_v43 = vpop.eup %3300 }
 0x808   : > { %v3303_v8 = vpop.eup %3302  ;;  %v2231_v31 = vmul.f32 %v3301_v43, %v3299_v22 }
 0x80a   : > { %v3305_v19 = vpop.eup %3304 }
 0x80b   : > { %v2232_v0 = vmul.f32 %v3305_v19, %v3303_v8 }
 0x80d   : > { %v2233_v38 = vpack.c.bf16 %v2232_v0, %v2231_v31 }
 0x80f   : > { %2920 = vst [vmem:[%s2243_s27] sm:$0xff] %v2233_v38   ;;  %2295 = vmatmul.mubr.bf16.vlgmr.msra.gmra.mrb[60].mxu0 %v2233_v38  ;;  %2338 = vmatmul.mubr.bf16.vlgmr.msra.gmra.mrb[60].mxu1 %v2233_v38 }
 0x8e2   : > { %v2296_v41 = vpop.f32.mrb[60].mxu0  ;;  %v2339_v42 = vpop.f32.mrb[60].mxu1 }
 0x8e3   : > { %v2348_v45 = vadd.f32 %v2296_v41, %v2254_v40  ;;  %v2298_v46 = vpop.f32.mrb[61].mxu0  ;;  %v2341_v47 = vpop.f32.mrb[61].mxu1  ;;  %v2350_v4 = vadd.f32 %v2339_v42, %v2256_v2 }
 0x8e4   : > { %v2349_v48 = vadd.f32 %v2298_v46, %v2255_v44  ;;  %v2300_v34 = vpop.f32.mrb[62].mxu0  ;;  %v2343_v49 = vpop.f32.mrb[62].mxu1  ;;  %v2351_v1 = vadd.f32 %v2341_v47, %v2257_v62 }
 0x8e5   : > { %v2837_v51 = vmul.f32 -1.442695, %v2348_v45  ;;  %v2352_v54 = vadd.f32 %v2300_v34, %v2258_v33  ;;  %v2302_v55 = vpop.f32.mrb[63].mxu0  ;;  %v2345_v56 = vpop.f32.mrb[63].mxu1  ;;  %v2354_v6 = vadd.f32 %v2343_v49, %v2260_v5 }
 0x8e6   : > { %v2839_v57 = vmul.f32 -1.442695, %v2349_v48  ;;  %v2353_v58 = vadd.f32 %v2302_v55, %v2259_v50  ;;  %v2841_v35 = vmul.f32 -1.442695, %v2351_v1  ;;  %v2355_v12 = vadd.f32 %v2345_v56, %v2261_v3 }
 0x8e7   : > { %3306 = vpow2.f32 %v2837_v51  ;;  %v2838_v59 = vmul.f32 -1.442695, %v2352_v54 }
 0x8e8   : > { %3308 = vpow2.f32 %v2839_v57  ;;  %v2840_v63 = vmul.f32 -1.442695, %v2353_v58  ;;  %v2842_v36 = vmul.f32 -1.442695, %v2355_v12 }
 0x8e9   : > { %3310 = vpow2.f32 %v2838_v59 }
 0x8ea   : > { %3312 = vpow2.f32 %v2840_v63 }
 0x8eb   : > { %3314 = vtanh.f32 %v2350_v4 }
 0x8ec   : > { %3316 = vpow2.f32 %v2841_v35 }
 0x8ed   : > { %3318 = vtanh.f32 %v2354_v6 }
 0x8f1   : > { %v3307_v11 = vpop.eup %3306 }
 0x8f2   : > { %v3309_v21 = vpop.eup %3308  ;;  %v2362_v61 = vadd.f32 1.0, %v3307_v11 }
 0x8f3   : > { %v2374_v15 = vadd.f32 1.0, %v3309_v21  ;;  %v3311_v9 = vpop.eup %3310 }
 0x8f4   : > { %3320 = vrcp.f32 %v2362_v61  ;;  %v2363_v13 = vadd.f32 1.0, %v3311_v9  ;;  %v3313_v18 = vpop.eup %3312 }
 0x8f5   : > { %3322 = vrcp.f32 %v2374_v15  ;;  %v2375_v23 = vadd.f32 1.0, %v3313_v18  ;;  %v3315_v37 = vpop.eup %3314 }
 0x8f6   : > { %3324 = vpow2.f32 %v2842_v36  ;;  %v3317_v7 = vpop.eup %3316 }
 0x8f7   : > { %3326 = vrcp.f32 %v2363_v13  ;;  %v3319_v25 = vpop.eup %3318  ;;  %v2388_v17 = vadd.f32 1.0, %v3317_v7 }
 0x8f8   : > { %3328 = vrcp.f32 %v2375_v23 }
 0x8f9   : > { %3330 = vrcp.f32 %v2388_v17 }
 0x8fe   : > { %v3321_v26 = vpop.eup %3320 }
 0x8ff   : > { %v3323_v27 = vpop.eup %3322  ;;  %v2396_v29 = vmul.f32 %v3321_v26, %v3315_v37 }
 0x900   : > { %v3325_v16 = vpop.eup %3324  ;;  %v2394_v30 = vmul.f32 %v3323_v27, %v4428_v20 }
 0x901   : > { %v3327_v24 = vpop.eup %3326  ;;  %v2389_v22 = vadd.f32 1.0, %v3325_v16 }
 0x902   : > { %v2398_v10 = vadd.f32 %v2396_v29, %v2394_v30  ;;  %v2397_v14 = vmul.f32 %v3327_v24, %v3319_v25  ;;  %v3329_v52 = vpop.eup %3328 }
 0x903   : > { %v2395_v43 = vmul.f32 %v3329_v52, %v4432_v32  ;;  %v3331_v19 = vpop.eup %3330 }
 0x904   : > { %3332 = vtanh.f32 %v2398_v10 }
 0x905   : > { %v2399_v8 = vadd.f32 %v2397_v14, %v2395_v43  ;;  %3334 = vrcp.f32 %v2389_v22 }
 0x907   : > { %3336 = vtanh.f32 %v2399_v8 }
 0x90e   : > { %v3333_v31 = vpop.eup %3332 }
 0x90f   : > { %v2402_v0 = vmul.f32 %v3333_v31, %v3331_v19  ;;  %v3335_v38 = vpop.eup %3334 }
 0x910   : > { %2423 = sbr.rel (!%p4516_p9) target bundleno = 2344 (0x928), region = 52 }
 0x911   : > { %v3337_v20 = vpop.eup %3336 }
 0x912   : > { %v2403_v28 = vmul.f32 %v3337_v20, %v3335_v38 }
 0x914   : > { %v2924_v39 = vpack.c.bf16 %v2403_v28, %v2402_v0 }
 0x916   : > { %2925 = vst [vmem:[%s2414_s13] sm:$0xff] %v2924_v39  }
 0x91d   : > { %v2441_v32 = vld [vmem:[%s4046_s5] sm:$0xf]  ;;  %v2443_v40 = vld [vmem:[%s4046_s5 + $0x4] sm:$0xf]  ;;  %v2445_v41 = vld [vmem:[%s4046_s5 + $0x8] sm:$0xf] }
 0x91e   : > { %v2447_v42 = vld [vmem:[%s4046_s5 + $0xc] sm:$0xf]  ;;  %v2449_v44 = vld [vmem:[%s4046_s5 + $0x10] sm:$0xf]  ;;  %2442 = vst [vmem:[%s2425_s1] sm:$0xf] %v2441_v32 }
 0x91f   : > { %2444 = vst [vmem:[%s2425_s1 + $0x8] sm:$0xf] %v2443_v40  ;;  %2446 = vst [vmem:[%s2425_s1 + $0x10] sm:$0xf] %v2445_v41  ;;  %v2451_v45 = vld [vmem:[%s4046_s5 + $0x14] sm:$0xf] }
 0x920   : > { %2448 = vst [vmem:[%s2425_s1 + $0x18] sm:$0xf] %v2447_v42  ;;  %2450 = vst [vmem:[%s2425_s1 + $0x20] sm:$0xf] %v2449_v44  ;;  %v2453_v46 = vld [vmem:[%s4046_s5 + $0x18] sm:$0xf] }
 0x921   : > { %v2455_v47 = vld [vmem:[%s4046_s5 + $0x1c] sm:$0xf]  ;;  %2452 = vst [vmem:[%s2425_s1 + $0x28] sm:$0xf] %v2451_v45  ;;  %2454 = vst [vmem:[%s2425_s1 + $0x30] sm:$0xf] %v2453_v46 }
 0x922   : > { %2456 = vst [vmem:[%s2425_s1 + $0x38] sm:$0xf] %v2455_v47  ;;  %v2457_v33 = vld [vmem:[%s4046_s5 + $0x20] sm:$0xf]  ;;  %v2459_v48 = vld [vmem:[%s4046_s5 + $0x24] sm:$0xf] }
 0x923   : > { %v2461_v34 = vld [vmem:[%s4046_s5 + $0x28] sm:$0xf]  ;;  %2458 = vst [vmem:[%s2425_s1 + $0x40] sm:$0xf] %v2457_v33  ;;  %2460 = vst [vmem:[%s2425_s1 + $0x48] sm:$0xf] %v2459_v48 }
 0x924   : > { %2462 = vst [vmem:[%s2425_s1 + $0x50] sm:$0xf] %v2461_v34  ;;  %v2463_v49 = vld [vmem:[%s4046_s5 + $0x2c] sm:$0xf]  ;;  %v2465_v50 = vld [vmem:[%s4046_s5 + $0x30] sm:$0xf] }
 0x925   : > { %v2467_v51 = vld [vmem:[%s4046_s5 + $0x34] sm:$0xf]  ;;  %2464 = vst [vmem:[%s2425_s1 + $0x58] sm:$0xf] %v2463_v49  ;;  %2466 = vst [vmem:[%s2425_s1 + $0x60] sm:$0xf] %v2465_v50 }
 0x926   : > { %2468 = vst [vmem:[%s2425_s1 + $0x68] sm:$0xf] %v2467_v51  ;;  %v2469_v53 = vld [vmem:[%s4046_s5 + $0x38] sm:$0xf]  ;;  %v2471_v54 = vld [vmem:[%s4046_s5 + $0x3c] sm:$0xf] }
 0x927   : > { %2470 = vst [vmem:[%s2425_s1 + $0x70] sm:$0xf] %v2469_v53  ;;  %2472 = vst [vmem:[%s2425_s1 + $0x78] sm:$0xf] %v2471_v54 }
 0x928 PF: > { %s4517_s19 = sld [smem:[#allocation11_spill]]  ;;  %s4518_s17 = sld [smem:[#allocation12_spill]] }
 0x929   : > { %p17_p2 = scmp.ge.s32.totalorder %s3553_s20, 4   ;;  %s4519_s15 = smov %s3490_s16 }
 0x92a   : > { %s4521_s18 = smov %s3553_s20 }
 0x92b   :  { %19 = sbr.rel (!%p17_p2) target bundleno = 8 (0x8), region = 157 }
 0x92e   : > { %s4520_s16 = smov %s4517_s19 }
 0x932   :  { %2537 = vsyncpa [#allocation4], 1 }
 0x933   :  { %2539 = vsyncpa [#allocation4 + $0x1], 1 }
 0x934   :  { %2540 = vsyncpa [#allocation6], 1 }
 0x935   :  { %2542 = vsyncpa [#allocation6 + $0x1], 1 }

// kernel: dependency_parser_forward.5
= control target key start
LH: loop header
LB: loop body
LE: loop exit
PB: predicated region body
PF: predicated region fallthrough
CT: control target
= control target key end

     0   :  { %vm4009_vm0 = vcmask 1041409   ;;  %vm4011_vm1 = vcmask 1042434   ;;  %vm4013_vm2 = vcmask 1043459   ;;  %vm4015_vm3 = vcmask 1044484   ;;  %s7033_s1 = inlined_call_operand.vmem [shape: bf16[256,128], index: 1, kind: input, shape index: {}]   ;;  %s7034_s3 = inlined_call_operand.vmem [shape: bf16[256,128], index: 3, kind: input, shape index: {}]   ;;  %s7035_s0 = inlined_call_operand.vmem [shape: bf16[8,16,256], index: 0, kind: input, shape index: {}]   ;;  %s7036_s4 = inlined_call_operand.vmem [shape: f32[1,128], index: 4, kind: input, shape index: {}]   ;;  %s7037_s2 = inlined_call_operand.vmem [shape: f32[1,128], index: 2, kind: input, shape index: {}]   ;;  %s7038_s5 = inlined_call_operand.vmem [shape: f32[1,128], index: 5, kind: input, shape index: {}]   ;;  %s7039_s6 = inlined_call_operand.<no memory space> [shape: f32[1,1], index: 6, kind: input, shape index: {}]   ;;  %s7040_s7 = inlined_call_operand.vmem [shape: f32[16,8,128], index: 7, kind: output, shape index: {}]  }
   0x1   :  { %v4366_v0 = vld [vmem:[%s7033_s1 + $0x40] sm:$0xff]   ;;  %v4370_v4 = vld [vmem:[%s7033_s1 + $0x48] sm:$0xff]   ;;  %v4374_v8 = vld [vmem:[%s7033_s1 + $0x50] sm:$0xff]   ;;  %vm4017_vm4 = vcmask 1045509   ;;  %vm4019_vm5 = vcmask 1046534   ;;  %vm4021_vm6 = vcmask 1047559  }
   0x2   :  { %v4367_v1 = vld [vmem:[%s7034_s3 + $0x40] sm:$0xff]   ;;  %4232 = vmatprep.subr.bf16.mxu0 %v4366_v0  ;;  %v4371_v5 = vld [vmem:[%s7034_s3 + $0x48] sm:$0xff]   ;;  %v4375_v9 = vld [vmem:[%s7034_s3 + $0x50] sm:$0xff]   ;;  %vm4144_vm7 = vcmask 64512  }
   0x3   :  { %v4368_v2 = vld [vmem:[%s7033_s1] sm:$0xff]   ;;  %4296 = vmatprep.subr.bf16.mxu1 %v4367_v1  ;;  %v4372_v6 = vld [vmem:[%s7033_s1 + $0x8] sm:$0xff]   ;;  %v4376_v10 = vld [vmem:[%s7033_s1 + $0x10] sm:$0xff]  }
   0x4   :  { %v4369_v3 = vld [vmem:[%s7034_s3] sm:$0xff]   ;;  %4233 = vmatpush3.bf16.msra.mxu0 %v4368_v2  ;;  %v4373_v7 = vld [vmem:[%s7034_s3 + $0x8] sm:$0xff]   ;;  %v4377_v11 = vld [vmem:[%s7034_s3 + $0x10] sm:$0xff]  }
   0x5   :  { %4297 = vmatpush3.bf16.msra.mxu1 %v4369_v3  ;;  %4234 = vmatprep.subr.bf16.mxu0 %v4370_v4  ;;  %v4378_v12 = vld [vmem:[%s7033_s1 + $0x58] sm:$0xff]   ;;  %v4382_v16 = vld [vmem:[%s7033_s1 + $0x60] sm:$0xff]   ;;  %v4386_v20 = vld [vmem:[%s7033_s1 + $0x68] sm:$0xff]  }
   0x6   :  { %4298 = vmatprep.subr.bf16.mxu1 %v4371_v5  ;;  %v4379_v13 = vld [vmem:[%s7034_s3 + $0x58] sm:$0xff]   ;;  %v4383_v17 = vld [vmem:[%s7034_s3 + $0x60] sm:$0xff]   ;;  %v4387_v21 = vld [vmem:[%s7034_s3 + $0x68] sm:$0xff]  }
   0x7   :  { %v4380_v14 = vld [vmem:[%s7033_s1 + $0x18] sm:$0xff]   ;;  %v4384_v18 = vld [vmem:[%s7033_s1 + $0x20] sm:$0xff]   ;;  %v4388_v22 = vld [vmem:[%s7033_s1 + $0x28] sm:$0xff]  }
   0x8   :  { %4235 = vmatpush3.bf16.msra.mxu0 %v4372_v6  ;;  %v4381_v15 = vld [vmem:[%s7034_s3 + $0x18] sm:$0xff]   ;;  %v4385_v19 = vld [vmem:[%s7034_s3 + $0x20] sm:$0xff]   ;;  %v4389_v23 = vld [vmem:[%s7034_s3 + $0x28] sm:$0xff]  }
   0x9   :  { %4299 = vmatpush3.bf16.msra.mxu1 %v4373_v7  ;;  %4236 = vmatprep.subr.bf16.mxu0 %v4374_v8  ;;  %v4390_v24 = vld [vmem:[%s7033_s1 + $0x70] sm:$0xff]   ;;  %v4394_v28 = vld [vmem:[%s7033_s1 + $0x78] sm:$0xff]   ;;  %v4398_v32 = vld [vmem:[%s7035_s0] ss:$8 sps:$4 sm:$0xff]  }
   0xa   :  { %4300 = vmatprep.subr.bf16.mxu1 %v4375_v9  ;;  %v4391_v25 = vld [vmem:[%s7034_s3 + $0x70] sm:$0xff]   ;;  %v4395_v29 = vld [vmem:[%s7034_s3 + $0x78] sm:$0xff]   ;;  %v4400_v33 = vld [vmem:[%s7035_s0 + $0x4] ss:$8 sps:$4 sm:$0xff]  }
   0xb   :  { %v4392_v26 = vld [vmem:[%s7033_s1 + $0x30] sm:$0xff]   ;;  %v4396_v30 = vld [vmem:[%s7033_s1 + $0x38] sm:$0xff]   ;;  %292 = vmatprep.mubr.bf16.mxu0 %v4400_v33  ;;  %524 = vmatprep.mubr.bf16.mxu1 %v4400_v33  ;;  %v4404_v36 = vld [vmem:[%s7035_s0 + $0x24] ss:$8 sps:$4 sm:$0xff]  }
   0xc   :  { %4237 = vmatpush3.bf16.msra.mxu0 %v4376_v10  ;;  %v4393_v27 = vld [vmem:[%s7034_s3 + $0x30] sm:$0xff]   ;;  %v4397_v31 = vld [vmem:[%s7034_s3 + $0x38] sm:$0xff]   ;;  %v4406_v37 = vld [vmem:[%s7035_s0 + $0x20] ss:$8 sps:$4 sm:$0xff]  }
   0xd   :  { %4301 = vmatpush3.bf16.msra.mxu1 %v4377_v11  ;;  %4238 = vmatprep.subr.bf16.mxu0 %v4378_v12  ;;  %v4401_v34 = vld [vmem:[%s7035_s0 + $0x14] ss:$8 sps:$4 sm:$0xff]   ;;  %v4403_v35 = vld [vmem:[%s7035_s0 + $0x10] ss:$8 sps:$4 sm:$0xff]   ;;  %v4410_v40 = vld [vmem:[%s7035_s0 + $0x44] ss:$8 sps:$4 sm:$0xff]  }
   0xe   :  { %4302 = vmatprep.subr.bf16.mxu1 %v4379_v13  ;;  %v4407_v38 = vld [vmem:[%s7035_s0 + $0x34] ss:$8 sps:$4 sm:$0xff]   ;;  %v4409_v39 = vld [vmem:[%s7035_s0 + $0x30] ss:$8 sps:$4 sm:$0xff]   ;;  %v4412_v41 = vld [vmem:[%s7035_s0 + $0x40] ss:$8 sps:$4 sm:$0xff]  }
   0xf   :  { %v4413_v42 = vld [vmem:[%s7035_s0 + $0x54] ss:$8 sps:$4 sm:$0xff]   ;;  %v4415_v43 = vld [vmem:[%s7035_s0 + $0x50] ss:$8 sps:$4 sm:$0xff]   ;;  %v4416_v44 = vld [vmem:[%s7035_s0 + $0x64] ss:$8 sps:$4 sm:$0xff]  }
  0x10   :  { %4239 = vmatpush3.bf16.msra.mxu0 %v4380_v14  ;;  %v4418_v45 = vld [vmem:[%s7035_s0 + $0x60] ss:$8 sps:$4 sm:$0xff]   ;;  %v4419_v46 = vld [vmem:[%s7035_s0 + $0x74] ss:$8 sps:$4 sm:$0xff]   ;;  %v4421_v47 = vld [vmem:[%s7035_s0 + $0x70] ss:$8 sps:$4 sm:$0xff]  }
  0x11   :  { %4303 = vmatpush3.bf16.msra.mxu1 %v4381_v15  ;;  %4240 = vmatprep.subr.bf16.mxu0 %v4382_v16  ;;  %v4871_v57 = vld [vmem:[%s7036_s4] ss:$0 sm:$0xff]  ;;  %v4680_v14 = vmov 1983009808   ;;  %v7041_v16 = vlaneseq }
  0x12   :  { %4304 = vmatprep.subr.bf16.mxu1 %v4383_v17  ;;  %v4876_v61 = vld [vmem:[%s7037_s2] ss:$0 sm:$0xff]  ;;  %v592_v15 = vunpack.c.l.s4 %v4680_v14 }
  0x14   :  { %4241 = vmatpush3.bf16.msra.mxu0 %v4384_v18 }
  0x15   :  { %4305 = vmatpush3.bf16.msra.mxu1 %v4385_v19  ;;  %4242 = vmatprep.subr.bf16.mxu0 %v4386_v20 }
  0x16   :  { %4306 = vmatprep.subr.bf16.mxu1 %v4387_v21 }
  0x18   :  { %4243 = vmatpush3.bf16.msra.mxu0 %v4388_v22 }
  0x19   :  { %4307 = vmatpush3.bf16.msra.mxu1 %v4389_v23  ;;  %4244 = vmatprep.subr.bf16.mxu0 %v4390_v24 }
  0x1a   :  { %4308 = vmatprep.subr.bf16.mxu1 %v4391_v25 }
  0x1c   :  { %4245 = vmatpush3.bf16.msra.mxu0 %v4392_v26 }
  0x1d   :  { %4309 = vmatpush3.bf16.msra.mxu1 %v4393_v27  ;;  %4246 = vmatprep.subr.bf16.mxu0 %v4394_v28  ;;  %v593_v27 = vunpack.c.0.s8 %v592_v15  ;;  %v4891_v28 = vshrl.u32 %v7041_v16, 7 }
  0x1e   :  { %4310 = vmatprep.subr.bf16.mxu1 %v4395_v29 }
  0x1f   :  { %7066 = vst [vmem:[#allocation3_spill] sm:$0xff] %v4891_v28 }
  0x20   :  { %4247 = vmatpush3.bf16.msra.mxu0 %v4396_v30 }
  0x21   :  { %4311 = vmatpush3.bf16.msra.mxu1 %v4397_v31 }
  0x23   :  { %293 = vmatmul.mubr.bf16.vlgmr.msra.gmra.mrb[0].mxu0 %v4398_v32 }
  0x24   :  { %525 = vmatmul.mubr.bf16.vlgmr.msra.gmra.mrb[0].mxu1 %v4398_v32  ;;  %300 = vmatprep.mubr.bf16.mxu0 %v4401_v34 }
  0x25   :  { %532 = vmatprep.mubr.bf16.mxu1 %v4401_v34 }
  0x2b   :  { %301 = vmatmul.mubr.bf16.gmra.mrb[4].mxu0 %v4403_v35 }
  0x2c   :  { %533 = vmatmul.mubr.bf16.gmra.mrb[4].mxu1 %v4403_v35  ;;  %308 = vmatprep.mubr.bf16.mxu0 %v4404_v36 }
  0x2d   :  { %540 = vmatprep.mubr.bf16.mxu1 %v4404_v36 }
  0x33   :  { %309 = vmatmul.mubr.bf16.gmra.mrb[8].mxu0 %v4406_v37 }
  0x34   :  { %541 = vmatmul.mubr.bf16.gmra.mrb[8].mxu1 %v4406_v37  ;;  %316 = vmatprep.mubr.bf16.mxu0 %v4407_v38 }
  0x35   :  { %548 = vmatprep.mubr.bf16.mxu1 %v4407_v38 }
  0x3b   :  { %317 = vmatmul.mubr.bf16.gmra.mrb[12].mxu0 %v4409_v39 }
  0x3c   :  { %549 = vmatmul.mubr.bf16.gmra.mrb[12].mxu1 %v4409_v39  ;;  %324 = vmatprep.mubr.bf16.mxu0 %v4410_v40 }
  0x3d   :  { %556 = vmatprep.mubr.bf16.mxu1 %v4410_v40 }
  0x43   :  { %325 = vmatmul.mubr.bf16.gmra.mrb[16].mxu0 %v4412_v41 }
  0x44   :  { %557 = vmatmul.mubr.bf16.gmra.mrb[16].mxu1 %v4412_v41  ;;  %332 = vmatprep.mubr.bf16.mxu0 %v4413_v42  ;;  %v4898_v41 = vsub.s32 %v593_v27, %v4891_v28 }
  0x45   :  { %564 = vmatprep.mubr.bf16.mxu1 %v4413_v42 }
  0x4b   :  { %333 = vmatmul.mubr.bf16.gmra.mrb[20].mxu0 %v4415_v43 }
  0x4c   :  { %565 = vmatmul.mubr.bf16.gmra.mrb[20].mxu1 %v4415_v43  ;;  %340 = vmatprep.mubr.bf16.mxu0 %v4416_v44 }
  0x4d   :  { %572 = vmatprep.mubr.bf16.mxu1 %v4416_v44  ;;  %v4681_v44 = vmov 1934713408  }
  0x53   :  { %341 = vmatmul.mubr.bf16.gmra.mrb[24].mxu0 %v4418_v45 }
  0x54   :  { %573 = vmatmul.mubr.bf16.gmra.mrb[24].mxu1 %v4418_v45  ;;  %348 = vmatprep.mubr.bf16.mxu0 %v4419_v46  ;;  %v656_v45 = vunpack.c.l.s4 %v4681_v44 }
  0x55   :  { %580 = vmatprep.mubr.bf16.mxu1 %v4419_v46 }
  0x5b   :  { %349 = vmatmul.mubr.bf16.gmra.mrb[28].mxu0 %v4421_v47 }
  0x5c   :  { %581 = vmatmul.mubr.bf16.gmra.mrb[28].mxu1 %v4421_v47 }
  0xf6   :  { %v4248_v48 = vpop.f32.mrb[0].mxu0 }
  0xf7   :  { %v4312_v49 = vpop.f32.mrb[0].mxu1  ;;  %v4249_v50 = vpop.f32.mrb[1].mxu0 }
  0xf8   :  { %v4313_v51 = vpop.f32.mrb[1].mxu1  ;;  %v4250_v52 = vadd.f32 %v4249_v50, %v4248_v48  ;;  %v4251_v53 = vpop.f32.mrb[2].mxu0 }
  0xf9   :  { %v4314_v54 = vadd.f32 %v4313_v51, %v4312_v49  ;;  %v4315_v55 = vpop.f32.mrb[2].mxu1  ;;  %v4252_v56 = vpop.f32.mrb[3].mxu0 }
  0xfa   :  { %v4316_v58 = vpop.f32.mrb[3].mxu1  ;;  %v4253_v59 = vadd.f32 %v4252_v56, %v4251_v53  ;;  %v295_v25 = vadd.f32 %v4250_v52, %v4876_v61 }
  0xfb   :  { %v4317_v60 = vadd.f32 %v4316_v58, %v4315_v55  ;;  %v527_v26 = vadd.f32 %v4314_v54, %v4871_v57 }
  0xfc   :  { %v298_v62 = vadd.f32 %v4253_v59, %v4876_v61 }
  0xfd   :  { %v4880_v63 = vadd.f32 %v4317_v60, %v4871_v57 }
  0xfe   :  { %v4254_v0 = vpop.f32.mrb[4].mxu0 }
  0xff   :  { %v4318_v1 = vpop.f32.mrb[4].mxu1  ;;  %v4255_v2 = vpop.f32.mrb[5].mxu0 }
 0x100   :  { %v4319_v3 = vpop.f32.mrb[5].mxu1  ;;  %v4256_v4 = vadd.f32 %v4255_v2, %v4254_v0  ;;  %v4257_v5 = vpop.f32.mrb[6].mxu0 }
 0x101   :  { %v4320_v6 = vadd.f32 %v4319_v3, %v4318_v1  ;;  %v4321_v7 = vpop.f32.mrb[6].mxu1  ;;  %v4258_v8 = vpop.f32.mrb[7].mxu0 }
 0x102   :  { %v4322_v9 = vpop.f32.mrb[7].mxu1  ;;  %v4259_v10 = vadd.f32 %v4258_v8, %v4257_v5  ;;  %v303_v52 = vadd.f32 %v4256_v4, %v4876_v61  ;;  %v657_v8 = vunpack.c.0.s8 %v656_v45 }
 0x103   :  { %v4323_v11 = vadd.f32 %v4322_v9, %v4321_v7  ;;  %v535_v53 = vadd.f32 %v4320_v6, %v4871_v57 }
 0x104   :  { %v4883_v12 = vadd.f32 %v4259_v10, %v4876_v61  ;;  %v4965_v44 = vsub.s32 %v657_v8, %v4891_v28 }
 0x105   :  { %v4886_v13 = vadd.f32 %v4323_v11, %v4871_v57 }
 0x106   :  { %v4260_v17 = vpop.f32.mrb[8].mxu0 }
 0x107   :  { %v4324_v18 = vpop.f32.mrb[8].mxu1  ;;  %v4261_v19 = vpop.f32.mrb[9].mxu0 }
 0x108   :  { %v4325_v20 = vpop.f32.mrb[9].mxu1  ;;  %v4262_v21 = vadd.f32 %v4261_v19, %v4260_v17  ;;  %v4263_v23 = vpop.f32.mrb[10].mxu0 }
 0x109   :  { %v4326_v22 = vadd.f32 %v4325_v20, %v4324_v18  ;;  %v4327_v24 = vpop.f32.mrb[10].mxu1  ;;  %v4264_v29 = vpop.f32.mrb[11].mxu0 }
 0x10a   :  { %v4328_v30 = vpop.f32.mrb[11].mxu1  ;;  %v311_v31 = vadd.f32 %v4262_v21, %v4876_v61  ;;  %v4265_v33 = vadd.f32 %v4264_v29, %v4263_v23 }
 0x10b   :  { %v543_v32 = vadd.f32 %v4326_v22, %v4871_v57  ;;  %v4329_v34 = vadd.f32 %v4328_v30, %v4327_v24 }
 0x10c   :  { %v589_v35 = vcombine.low %v295_v25, %v311_v31  ;;  %v590_v36 = vcombine.high %v295_v25, %v311_v31  ;;  %v314_v39 = vadd.f32 %v4265_v33, %v4876_v61 }
 0x10d   :  { %v861_v37 = vcombine.low %v527_v26, %v543_v32  ;;  %v862_v38 = vcombine.high %v527_v26, %v543_v32  ;;  %v546_v40 = vadd.f32 %v4329_v34, %v4871_v57 }
 0x10e   :  { %v4266_v42 = vpop.f32.mrb[12].mxu0  ;;  %v725_v46 = vcombine.low %v298_v62, %v314_v39  ;;  %v726_v47 = vcombine.high %v298_v62, %v314_v39  ;;  %v4919_v6 = vrot.slane %v589_v35, %v4898_v41  ;;  %v4922_v7 = vrot.slane %v590_v36, %v4898_v41 }
 0x10f   :  { %v4330_v43 = vpop.f32.mrb[12].mxu1  ;;  %v997_v48 = vcombine.low %v4880_v63, %v546_v40  ;;  %v998_v49 = vcombine.high %v4880_v63, %v546_v40  ;;  %v4267_v50 = vpop.f32.mrb[13].mxu0  ;;  %v4925_v15 = vrot.slane %v861_v37, %v4898_v41  ;;  %v4928_v17 = vrot.slane %v862_v38, %v4898_v41 }
 0x110   :  { %v4331_v51 = vpop.f32.mrb[13].mxu1  ;;  %v4268_v54 = vadd.f32 %v4267_v50, %v4266_v42  ;;  %v4269_v56 = vpop.f32.mrb[14].mxu0  ;;  %v4905_v59 = vrot.slane %v725_v46, %v4898_v41  ;;  %v4908_v60 = vrot.slane %v726_v47, %v4898_v41 }
 0x111   :  { %v4332_v55 = vadd.f32 %v4331_v51, %v4330_v43  ;;  %v4333_v58 = vpop.f32.mrb[14].mxu1  ;;  %v4911_v62 = vrot.slane %v997_v48, %v4898_v41  ;;  %v4914_v63 = vrot.slane %v998_v49, %v4898_v41  ;;  %v4270_v0 = vpop.f32.mrb[15].mxu0 }
 0x112   :  { %v4334_v1 = vpop.f32.mrb[15].mxu1  ;;  %v319_v2 = vadd.f32 %v4268_v54, %v4876_v61  ;;  %v4271_v4 = vadd.f32 %v4270_v0, %v4269_v56 }
 0x113   :  { %v551_v3 = vadd.f32 %v4332_v55, %v4871_v57  ;;  %v4335_v5 = vadd.f32 %v4334_v1, %v4333_v58 }
 0x114   :  { %v605_v9 = vcombine.low %v303_v52, %v319_v2  ;;  %v606_v10 = vcombine.high %v303_v52, %v319_v2  ;;  %v322_v18 = vadd.f32 %v4271_v4, %v4876_v61 }
 0x115   :  { %v877_v11 = vcombine.low %v535_v53, %v551_v3  ;;  %v878_v14 = vcombine.high %v535_v53, %v551_v3  ;;  %v554_v19 = vadd.f32 %v4335_v5, %v4871_v57 }
 0x116   :  { %v4933_v20 = vrot.slane %v605_v9, %v4898_v41  ;;  %v4936_v21 = vrot.slane %v606_v10, %v4898_v41  ;;  %v4272_v24 = vpop.f32.mrb[16].mxu0  ;;  %v741_v26 = vcombine.low %v4883_v12, %v322_v18  ;;  %v742_v27 = vcombine.high %v4883_v12, %v322_v18 }
 0x117   :  { %v4939_v22 = vrot.slane %v877_v11, %v4898_v41  ;;  %v4942_v23 = vrot.slane %v878_v14, %v4898_v41  ;;  %v4336_v25 = vpop.f32.mrb[16].mxu1  ;;  %v1013_v29 = vcombine.low %v4886_v13, %v554_v19  ;;  %v1014_v30 = vcombine.high %v4886_v13, %v554_v19  ;;  %v4273_v31 = vpop.f32.mrb[17].mxu0 }
 0x118   :  { %v4337_v32 = vpop.f32.mrb[17].mxu1  ;;  %v653_v33 = vcombine.low %v4919_v6, %v4933_v20  ;;  %v654_v34 = vcombine.high %v4919_v6, %v4933_v20  ;;  %v669_v35 = vcombine.low %v4922_v7, %v4936_v21  ;;  %v670_v36 = vcombine.high %v4922_v7, %v4936_v21  ;;  %v4275_v37 = vpop.f32.mrb[18].mxu0 }
 0x119   :  { %v4339_v12 = vpop.f32.mrb[18].mxu1  ;;  %v925_v38 = vcombine.low %v4925_v15, %v4939_v22  ;;  %v926_v13 = vcombine.high %v4925_v15, %v4939_v22  ;;  %v941_v39 = vcombine.low %v4928_v17, %v4942_v23  ;;  %v942_v40 = vcombine.high %v4928_v17, %v4942_v23  ;;  %v4276_v42 = vpop.f32.mrb[19].mxu0 }
 0x11a   :  { %v4340_v43 = vpop.f32.mrb[19].mxu1  ;;  %v749_v45 = vrot.slane %v741_v26, %v4898_v41  ;;  %v756_v46 = vrot.slane %v742_v27, %v4898_v41  ;;  %v1021_v47 = vrot.slane %v1013_v29, %v4898_v41  ;;  %v1028_v48 = vrot.slane %v1014_v30, %v4898_v41 }
 0x11b   :  { %v4274_v49 = vadd.f32 %v4273_v31, %v4272_v24  ;;  %v4277_v50 = vadd.f32 %v4276_v42, %v4275_v37  ;;  %v4338_v51 = vadd.f32 %v4337_v32, %v4336_v25  ;;  %v4341_v52 = vadd.f32 %v4340_v43, %v4339_v12 }
 0x11c   :  { %v789_v53 = vcombine.low %v4905_v59, %v749_v45  ;;  %v790_v54 = vcombine.high %v4905_v59, %v749_v45  ;;  %v805_v55 = vcombine.low %v4908_v60, %v756_v46  ;;  %v806_v56 = vcombine.high %v4908_v60, %v756_v46 }
 0x11d   :  { %v1061_v1 = vcombine.low %v4911_v62, %v1021_v47  ;;  %v1062_v2 = vcombine.high %v4911_v62, %v1021_v47  ;;  %v1077_v3 = vcombine.low %v4914_v63, %v1028_v48  ;;  %v1078_v4 = vcombine.high %v4914_v63, %v1028_v48 }
 0x11e   :  { %v4278_v58 = vpop.f32.mrb[20].mxu0  ;;  %v4980_v9 = vrot.slane %v789_v53, %v4965_v44  ;;  %v4983_v59 = vrot.slane %v790_v54, %v4965_v44  ;;  %v4986_v60 = vrot.slane %v805_v55, %v4965_v44  ;;  %v4989_v10 = vrot.slane %v806_v56, %v4965_v44 }
 0x11f   :  { %v4342_v0 = vpop.f32.mrb[20].mxu1  ;;  %v4279_v5 = vpop.f32.mrb[21].mxu0  ;;  %v4992_v14 = vrot.slane %v1061_v1, %v4965_v44  ;;  %v4995_v63 = vrot.slane %v1062_v2, %v4965_v44  ;;  %v4998_v18 = vrot.slane %v1077_v3, %v4965_v44  ;;  %v5001_v19 = vrot.slane %v1078_v4, %v4965_v44 }
 0x120   :  { %v4343_v8 = vpop.f32.mrb[21].mxu1  ;;  %v4281_v11 = vpop.f32.mrb[22].mxu0  ;;  %v330_v26 = vadd.f32 %v4277_v50, %v4876_v61  ;;  %v562_v27 = vadd.f32 %v4341_v52, %v4871_v57  ;;  %v4280_v29 = vadd.f32 %v4279_v5, %v4278_v58  ;;  %v327_v52 = vadd.f32 %v4274_v49, %v4876_v61 }
 0x121   :  { %v4345_v62 = vpop.f32.mrb[22].mxu1  ;;  %v4282_v24 = vpop.f32.mrb[23].mxu0  ;;  %v4344_v31 = vadd.f32 %v4343_v8, %v4342_v0  ;;  %v559_v54 = vadd.f32 %v4338_v51, %v4871_v57  ;;  %v5021_v49 = vrot.slane %v653_v33, %v4965_v44  ;;  %v5027_v51 = vrot.slane %v654_v34, %v4965_v44 }
 0x122   :  { %v4346_v25 = vpop.f32.mrb[23].mxu1  ;;  %v4283_v30 = vadd.f32 %v4282_v24, %v4281_v11  ;;  %v335_v33 = vadd.f32 %v4280_v29, %v4876_v61 }
 0x123   :  { %v4347_v32 = vadd.f32 %v4346_v25, %v4345_v62 }
 0x124   :  { %v5006_v37 = vadd.f32 %v4283_v30, %v4876_v61  ;;  %v4682_v30 = vmov 1966171168  }
 0x125   :  { %v5009_v12 = vadd.f32 %v4347_v32, %v4871_v57  ;;  %v5029_v32 = vunpack.c.l.s4 %v4682_v30 }
 0x126   :  { %v4284_v42 = vpop.f32.mrb[24].mxu0 }
 0x127   :  { %v4348_v43 = vpop.f32.mrb[24].mxu1  ;;  %v4285_v45 = vpop.f32.mrb[25].mxu0 }
 0x128   :  { %v4349_v46 = vpop.f32.mrb[25].mxu1  ;;  %v4286_v47 = vadd.f32 %v4285_v45, %v4284_v42  ;;  %v4287_v53 = vpop.f32.mrb[26].mxu0 }
 0x129   :  { %v4350_v48 = vadd.f32 %v4349_v46, %v4348_v43  ;;  %v4351_v50 = vpop.f32.mrb[26].mxu1  ;;  %v4288_v55 = vpop.f32.mrb[27].mxu0 }
 0x12a   :  { %v4352_v56 = vpop.f32.mrb[27].mxu1  ;;  %v343_v58 = vadd.f32 %v4286_v47, %v4876_v61  ;;  %v4289_v1 = vadd.f32 %v4288_v55, %v4287_v53  ;;  %v567_v53 = vadd.f32 %v4344_v31, %v4871_v57 }
 0x12b   :  { %v575_v0 = vadd.f32 %v4350_v48, %v4871_v57  ;;  %v4353_v2 = vadd.f32 %v4352_v56, %v4351_v50 }
 0x12c   :  { %v621_v3 = vcombine.low %v327_v52, %v343_v58  ;;  %v622_v4 = vcombine.high %v327_v52, %v343_v58  ;;  %v346_v11 = vadd.f32 %v4289_v1, %v4876_v61  ;;  %v5051_v1 = vrot.slane %v669_v35, %v4965_v44 }
 0x12d   :  { %v893_v5 = vcombine.low %v559_v54, %v575_v0  ;;  %v894_v8 = vcombine.high %v559_v54, %v575_v0  ;;  %v578_v62 = vadd.f32 %v4353_v2, %v4871_v57  ;;  %v5057_v2 = vrot.slane %v670_v36, %v4965_v44 }
 0x12e   :  { %v4290_v24 = vpop.f32.mrb[28].mxu0  ;;  %v757_v42 = vcombine.low %v330_v26, %v346_v11  ;;  %v758_v43 = vcombine.high %v330_v26, %v346_v11  ;;  %v629_v11 = vrot.slane %v621_v3, %v4898_v41 }
 0x12f   :  { %v4354_v25 = vpop.f32.mrb[28].mxu1  ;;  %v1029_v45 = vcombine.low %v562_v27, %v578_v62  ;;  %v1030_v46 = vcombine.high %v562_v27, %v578_v62  ;;  %v4291_v47 = vpop.f32.mrb[29].mxu0  ;;  %v636_v62 = vrot.slane %v622_v4, %v4898_v41 }
 0x130   :  { %v4355_v48 = vpop.f32.mrb[29].mxu1  ;;  %v4292_v50 = vadd.f32 %v4291_v47, %v4290_v24  ;;  %v4293_v6 = vpop.f32.mrb[30].mxu0  ;;  %v5034_v34 = vrot.slane %v757_v42, %v4898_v41  ;;  %v5037_v54 = vrot.slane %v758_v43, %v4898_v41  ;;  %v901_v43 = vrot.slane %v893_v5, %v4898_v41 }
 0x131   :  { %v4356_v52 = vadd.f32 %v4355_v48, %v4354_v25  ;;  %v4357_v20 = vpop.f32.mrb[30].mxu1  ;;  %v5040_v26 = vrot.slane %v1029_v45, %v4898_v41  ;;  %v5043_v27 = vrot.slane %v1030_v46, %v4898_v41  ;;  %v4294_v55 = vpop.f32.mrb[31].mxu0  ;;  %v908_v45 = vrot.slane %v894_v8, %v4898_v41 }
 0x132   :  { %v4358_v29 = vpop.f32.mrb[31].mxu1  ;;  %v351_v31 = vadd.f32 %v4292_v50, %v4876_v61  ;;  %v4295_v58 = vadd.f32 %v4294_v55, %v4293_v6 }
 0x133   :  { %v583_v56 = vadd.f32 %v4356_v52, %v4871_v57  ;;  %v4359_v0 = vadd.f32 %v4358_v29, %v4357_v20 }
 0x134   :  { %v637_v24 = vcombine.low %v335_v33, %v351_v31  ;;  %v638_v25 = vcombine.high %v335_v33, %v351_v31  ;;  %v354_v35 = vadd.f32 %v4295_v58, %v4876_v61 }
 0x135   :  { %v909_v30 = vcombine.low %v567_v53, %v583_v56  ;;  %v910_v42 = vcombine.high %v567_v53, %v583_v56  ;;  %v586_v46 = vadd.f32 %v4359_v0, %v4871_v57 }
 0x136   :  { %v645_v7 = vrot.slane %v637_v24, %v4898_v41  ;;  %v652_v21 = vrot.slane %v638_v25, %v4898_v41  ;;  %v773_v4 = vcombine.low %v5006_v37, %v354_v35  ;;  %v774_v47 = vcombine.high %v5006_v37, %v354_v35 }
 0x137   :  { %v917_v36 = vrot.slane %v909_v30, %v4898_v41  ;;  %v924_v3 = vrot.slane %v910_v42, %v4898_v41  ;;  %v1045_v5 = vcombine.low %v5009_v12, %v586_v46  ;;  %v1046_v8 = vcombine.high %v5009_v12, %v586_v46 }
 0x138   :  { %v685_v48 = vcombine.low %v629_v11, %v645_v7  ;;  %v686_v61 = vcombine.high %v629_v11, %v645_v7  ;;  %v701_v33 = vcombine.low %v636_v62, %v652_v21  ;;  %v702_v57 = vcombine.high %v636_v62, %v652_v21 }
 0x139   :  { %v957_v53 = vcombine.low %v901_v43, %v917_v36  ;;  %v958_v50 = vcombine.high %v901_v43, %v917_v36  ;;  %v973_v52 = vcombine.low %v908_v45, %v924_v3  ;;  %v974_v6 = vcombine.high %v908_v45, %v924_v3 }
 0x13a   :  { %v5074_v20 = vrot.slane %v685_v48, %v4965_v44  ;;  %v5077_v55 = vrot.slane %v686_v61, %v4965_v44  ;;  %v5080_v37 = vrot.slane %v701_v33, %v4965_v44  ;;  %v5083_v29 = vrot.slane %v702_v57, %v4965_v44 }
 0x13b   :  { %v965_v12 = vrot.slane %v957_v53, %v4965_v44  ;;  %v972_v31 = vrot.slane %v958_v50, %v4965_v44  ;;  %v981_v56 = vrot.slane %v973_v52, %v4965_v44  ;;  %v988_v58 = vrot.slane %v974_v6, %v4965_v44 }
 0x13c   :  { %v717_v0 = vcombine.low %v5021_v49, %v5074_v20  ;;  %v718_v11 = vcombine.high %v5021_v49, %v5074_v20  ;;  %v719_v62 = vcombine.low %v5027_v51, %v5077_v55  ;;  %v720_v24 = vcombine.high %v5027_v51, %v5077_v55 }
 0x13d   :  { %v721_v25 = vcombine.low %v5051_v1, %v5080_v37  ;;  %v933_v49 = vrot.slane %v925_v38, %v4965_v44  ;;  %v940_v45 = vrot.slane %v926_v13, %v4965_v44  ;;  %v949_v35 = vrot.slane %v941_v39, %v4965_v44 }
 0x13e   :  { %v956_v46 = vrot.slane %v942_v40, %v4965_v44  ;;  %v1152_v7 = vunpack.c.0.s8 %v5029_v32  ;;  %v781_v17 = vrot.slane %v773_v4, %v4898_v41  ;;  %v788_v23 = vrot.slane %v774_v47, %v4898_v41 }
 0x13f   :  { %v5122_v21 = vcombine.low %v933_v49, %v965_v12  ;;  %v5124_v38 = vcombine.high %v933_v49, %v965_v12  ;;  %v5126_v36 = vcombine.low %v940_v45, %v972_v31  ;;  %v5128_v15 = vcombine.high %v940_v45, %v972_v31 }
 0x140   :  { %v5130_v22 = vcombine.low %v949_v35, %v981_v56  ;;  %v5132_v13 = vcombine.high %v949_v35, %v981_v56  ;;  %v5134_v39 = vcombine.low %v956_v46, %v988_v58  ;;  %v5136_v3 = vcombine.high %v956_v46, %v988_v58 }
 0x141   :  { %v1053_v40 = vrot.slane %v1045_v5, %v4898_v41  ;;  %v1060_v32 = vrot.slane %v1046_v8, %v4898_v41  ;;  %v4215_v48 = vcombine.low %v5074_v20, %v5074_v20  ;;  %v4216_v61 = vcombine.high %v5074_v20, %v5074_v20 }
 0x142   :  { %v5147_v33 = vsub.s32 %v1152_v7, %v4891_v28  ;;  %v821_v57 = vcombine.low %v5034_v34, %v781_v17  ;;  %v822_v53 = vcombine.high %v5034_v34, %v781_v17  ;;  %v837_v4 = vcombine.low %v5037_v54, %v788_v23 }
 0x143   :  { %v838_v47 = vcombine.high %v5037_v54, %v788_v23  ;;  %v1093_v5 = vcombine.low %v5040_v26, %v1053_v40  ;;  %v1094_v41 = vcombine.high %v5040_v26, %v1053_v40  ;;  %v1109_v8 = vcombine.low %v5043_v27, %v1060_v32 }
 0x144   :  { %v1110_v50 = vcombine.high %v5043_v27, %v1060_v32  ;;  %v5158_v52 = vrot.slane %v821_v57, %v4965_v44  ;;  %v5161_v6 = vrot.slane %v822_v53, %v4965_v44  ;;  %v5164_v34 = vrot.slane %v837_v4, %v4965_v44 }
 0x145   :  { %v5167_v20 = vrot.slane %v838_v47, %v4965_v44  ;;  %v1101_v54 = vrot.slane %v1093_v5, %v4965_v44  ;;  %v1108_v26 = vrot.slane %v1094_v41, %v4965_v44  ;;  %v1117_v12 = vrot.slane %v1109_v8, %v4965_v44 }
 0x146   :  { %v1124_v27 = vrot.slane %v1110_v50, %v4965_v44  ;;  %v5190_v7 = vrot.slane %v717_v0, %v5147_v33  ;;  %v1163_v17 = vrot.slane %v4215_v48, %v5147_v33  ;;  %v1205_v23 = vrot.slane %v718_v11, %v5147_v33 }
 0x147   :  { %v5195_v40 = vsub.s32 0, %v4891_v28  ;;  %v1212_v32 = vrot.slane %v4216_v61, %v5147_v33  ;;  %v5199_v57 = vcombine.low %v4992_v14, %v1101_v54  ;;  %v5202_v53 = vcombine.high %v4992_v14, %v1101_v54 }
 0x148   :  { %v5205_v4 = vcombine.low %v4995_v63, %v1108_v26  ;;  %v5208_v0 = vcombine.high %v4995_v63, %v1108_v26  ;;  %v5211_v48 = vcombine.low %v4998_v18, %v1117_v12  ;;  %v5214_v11 = vcombine.high %v4998_v18, %v1117_v12 }
 0x149   :  { %v5217_v61 = vcombine.low %v5001_v19, %v1124_v27  ;;  %v5220_v47 = vcombine.high %v5001_v19, %v1124_v27  ;;  %v1172_v14 = vrot.slane %v5190_v7, %v5147_v33  ;;  %v5225_v5 = vrot.slane %v1163_v17, %v5147_v33 }
 0x14a   :  { %7067 = vst [vmem:[#allocation4_spill] sm:$0xff] %v5205_v4  ;;  %v1165_v63 = vcombine.high %v1163_v17, %v1163_v17  ;;  %v5228_v41 = vrot.slane %v1205_v23, %v5147_v33  ;;  %v4217_v18 = vcombine.low %v5077_v55, %v5077_v55  ;;  %v1213_v8 = vcombine.high %v1205_v23, %v1205_v23 }
 0x14b   :  { %v1214_v50 = vcombine.high %v1212_v32, %v1212_v32  ;;  %v1936_v54 = vrot.slane %v1172_v14, %v5195_v40  ;;  %v1194_v26 = vcombine.high %v1172_v14, %v1172_v14  ;;  %v1952_v19 = vrot.slane %v5225_v5, %v5195_v40 }
 0x14c   :  { %v5236_v12 = vrot.slane %v1165_v63, %v5147_v33  ;;  %v1968_v27 = vrot.slane %v5228_v41, %v5195_v40  ;;  %v5241_v17 = vrot.slane %v1213_v8, %v5147_v33  ;;  %v5244_v16 = vrot.slane %v1212_v32, %v5147_v33 }
 0x14d   :  { %v1254_v23 = vrot.slane %v719_v62, %v5147_v33  ;;  %v2573_v14 = vadd.f32 %v1936_v54, %v5122_v21  ;;  %v1944_v58 = vrot.slane %v1194_v26, %v5195_v40  ;;  %v2577_v63 = vadd.f32 %v1952_v19, %v5122_v21 }
 0x14e   :  { %v1956_v56 = vrot.slane %v5236_v12, %v5195_v40  ;;  %v5256_v8 = vrot.slane %v1214_v50, %v5147_v33  ;;  %v1972_v62 = vrot.slane %v5241_v17, %v5195_v40  ;;  %v1984_v54 = vrot.slane %v5244_v16, %v5195_v40 }
 0x14f   :  { %4422 = vtanh.f32 %v2573_v14  ;;  %v2575_v32 = vadd.f32 %v1944_v58, %v5122_v21  ;;  %v1262_v26 = vcombine.high %v1254_v23, %v1254_v23  ;;  %v2581_v19 = vadd.f32 %v1968_v27, %v5124_v38 }
 0x150   :  { %v2578_v31 = vadd.f32 %v1956_v56, %v5122_v21  ;;  %4424 = vtanh.f32 %v2577_v63  ;;  %v5266_v46 = vrot.slane %v1254_v23, %v5147_v33  ;;  %v1261_v50 = vrot.slane %v4217_v18, %v5147_v33 }
 0x151   :  { %4426 = vtanh.f32 %v2575_v32  ;;  %v4218_v58 = vcombine.high %v5077_v55, %v5077_v55  ;;  %v5272_v56 = vrot.slane %v1262_v26, %v5147_v33  ;;  %v1303_v14 = vrot.slane %v720_v24, %v5147_v33  ;;  %v5292_v24 = vld [vmem:[%s7038_s5] ss:$0 sm:$0xff] }
 0x152   :  { %4428 = vtanh.f32 %v2578_v31  ;;  %v2582_v63 = vadd.f32 %v1972_v62, %v5124_v38  ;;  %v1988_v27 = vrot.slane %v5256_v8, %v5195_v40  ;;  %v1263_v23 = vcombine.high %v1261_v50, %v1261_v50 }
 0x153   :  { %4430 = vtanh.f32 %v2581_v19  ;;  %v2585_v18 = vadd.f32 %v1984_v54, %v5124_v38  ;;  %v2000_v32 = vrot.slane %v5266_v46, %v5195_v40  ;;  %v5285_v26 = vrot.slane %v1261_v50, %v5147_v33 }
 0x154   :  { %v2004_v51 = vrot.slane %v5272_v56, %v5195_v40  ;;  %v1311_v55 = vcombine.high %v1303_v14, %v1303_v14  ;;  %4432 = vtanh.f32 %v2582_v63  ;;  %v2586_v31 = vadd.f32 %v1988_v27, %v5124_v38 }
 0x155   :  { %v5296_v62 = vrot.slane %v1263_v23, %v5147_v33  ;;  %v1310_v54 = vrot.slane %v4218_v58, %v5147_v33  ;;  %4434 = vtanh.f32 %v2585_v18  ;;  %v2589_v50 = vadd.f32 %v2000_v32, %v5126_v36 }
 0x156   :  { %v2016_v44 = vrot.slane %v5285_v26, %v5195_v40  ;;  %v5303_v35 = vrot.slane %v1303_v14, %v5147_v33  ;;  %v4219_v63 = vcombine.low %v5080_v37, %v5080_v37  ;;  %v2590_v23 = vadd.f32 %v2004_v51, %v5126_v36 }
 0x157   :  { %7068 = vst [vmem:[#allocation5_spill] sm:$0xff] %v5296_v62  ;;  %v5310_v58 = vrot.slane %v1311_v55, %v5147_v33  ;;  %4436 = vtanh.f32 %v2586_v31  ;;  %v2020_v32 = vrot.slane %v5296_v62, %v5195_v40  ;;  %v1312_v49 = vcombine.high %v1310_v54, %v1310_v54 }
 0x158   :  { %v1352_v14 = vrot.slane %v721_v25, %v5147_v33  ;;  %4438 = vtanh.f32 %v2589_v50  ;;  %v2593_v51 = vadd.f32 %v2016_v44, %v5126_v36  ;;  %v2032_v55 = vrot.slane %v5303_v35, %v5195_v40 }
 0x159   :  { %v4423_v19 = vpop.eup %4422  ;;  %7069 = vst [vmem:[#allocation6_spill] sm:$0xff] %v5310_v58  ;;  %v5323_v31 = vrot.slane %v1310_v54, %v5147_v33  ;;  %4440 = vtanh.f32 %v2590_v23  ;;  %v2036_v25 = vrot.slane %v5310_v58, %v5195_v40  ;;  %v5330_v50 = vrot.slane %v1312_v49, %v5147_v33 }
 0x15a   :  { %v4425_v45 = vpop.eup %4424  ;;  %v2836_v27 = vmul.f32 %v4423_v19, %v5292_v24  ;;  %v1360_v44 = vcombine.high %v1352_v14, %v1352_v14  ;;  %v1359_v30 = vrot.slane %v4219_v63, %v5147_v33  ;;  %4442 = vtanh.f32 %v2593_v51 }
 0x15b   :  { %v4427_v18 = vpop.eup %4426  ;;  %v2840_v42 = vmul.f32 %v4425_v45, %v5292_v24  ;;  %7070 = vst [vmem:[#allocation7_spill] sm:$0xff] %v5330_v50  ;;  %v2048_v45 = vrot.slane %v5323_v31, %v5195_v40  ;;  %v5338_v23 = vrot.slane %v1352_v14, %v5147_v33  ;;  %v4220_v49 = vcombine.high %v5080_v37, %v5080_v37 }
 0x15c   :  { %2964 = vadd.xlane.f32.xlu0 %v2836_v27  ;;  %v2838_v43 = vmul.f32 %v4427_v18, %v5292_v24  ;;  %v4429_v19 = vpop.eup %4428  ;;  %v2594_v18 = vadd.f32 %v2020_v32, %v5126_v36  ;;  %v7071_v63 = vcombine.high %v5051_v1, %v5080_v37  ;;  %v5351_v14 = vrot.slane %v1360_v44, %v5147_v33 }
 0x15d   :  { %v4431_v27 = vpop.eup %4430  ;;  %v2841_v54 = vmul.f32 %v4429_v19, %v5292_v24  ;;  %v1361_v4 = vcombine.high %v1359_v30, %v1359_v30  ;;  %v2064_v1 = vrot.slane %v5338_v23, %v5195_v40  ;;  %v5358_v37 = vrot.slane %v1359_v30, %v5147_v33 }
 0x15e   :  { %2968 = vadd.xlane.f32.xlu1 %v2838_v43  ;;  %v4433_v28 = vpop.eup %4432  ;;  %v2597_v43 = vadd.f32 %v2032_v55, %v5128_v15  ;;  %v2844_v32 = vmul.f32 %v4431_v27, %v5292_v24  ;;  %v1401_v19 = vrot.slane %v7071_v63, %v5147_v33  ;;  %4444 = vtanh.f32 %v2594_v18  ;;  %7072 = vst [vmem:[#allocation8_spill] sm:$0xff] %v5351_v14 }
 0x15f   :  { %v4435_v51 = vpop.eup %4434  ;;  %v2052_v55 = vrot.slane %v5330_v50, %v5195_v40 }
 0x160   :  { %2972 = vadd.xlane.f32.xlu0 %v2840_v42  ;;  %v2598_v42 = vadd.f32 %v2036_v25, %v5128_v15  ;;  %4446 = vtanh.f32 %v2597_v43  ;;  %v2601_v25 = vadd.f32 %v2048_v45, %v5128_v15  ;;  %v2848_v18 = vmul.f32 %v4435_v51, %v5292_v24 }
 0x161   :  { %v4437_v27 = vpop.eup %4436  ;;  %v1409_v44 = vcombine.high %v1401_v19, %v1401_v19  ;;  %v5365_v43 = vrot.slane %v1361_v4, %v5147_v33  ;;  %v1408_v45 = vrot.slane %v4220_v49, %v5147_v33  ;;  %v2605_v51 = vadd.f32 %v2064_v1, %v5130_v22 }
 0x162   :  { %2974 = vadd.xlane.f32.xlu1 %v2841_v54  ;;  %v2845_v54 = vmul.f32 %v4433_v28, %v5292_v24  ;;  %4448 = vtanh.f32 %v2598_v42  ;;  %v4439_v63 = vpop.eup %4438  ;;  %v2068_v28 = vrot.slane %v5351_v14, %v5195_v40  ;;  %v2849_v30 = vmul.f32 %v4437_v27, %v5292_v24 }
 0x163   :  { %7073 = vst [vmem:[#allocation9_spill] sm:$0xff] %v5365_v43  ;;  %v4441_v50 = vpop.eup %4440  ;;  %4450 = vtanh.f32 %v2601_v25  ;;  %v2080_v42 = vrot.slane %v5358_v37, %v5195_v40  ;;  %v2852_v4 = vmul.f32 %v4439_v63, %v5292_v24  ;;  %v5379_v49 = vrot.slane %v1409_v44, %v5147_v33 }
 0x164   :  { %2980 = vadd.xlane.f32.xlu0 %v2844_v32  ;;  %v2602_v32 = vadd.f32 %v2052_v55, %v5128_v15  ;;  %v5373_v55 = vrot.slane %v1401_v19, %v5147_v33  ;;  %v7075_v27 = vcombine.low %v5057_v2, %v5083_v29  ;;  %v4443_v1 = vpop.eup %4442  ;;  %v2084_v19 = vrot.slane %v5365_v43, %v5195_v40 }
 0x165   :  { %7074 = vst [vmem:[#allocation10_spill] sm:$0xff] %v5379_v49  ;;  %v1410_v14 = vcombine.high %v1408_v45, %v1408_v45  ;;  %v2609_v44 = vadd.f32 %v2080_v42, %v5130_v22 }
 0x166   :  { %2982 = vadd.xlane.f32.xlu1 %v2845_v54  ;;  %v4221_v54 = vcombine.low %v5083_v29, %v5083_v29  ;;  %v1450_v25 = vrot.slane %v7075_v27, %v5147_v33  ;;  %4452 = vtanh.f32 %v2602_v32  ;;  %v2096_v58 = vrot.slane %v5373_v55, %v5195_v40 }
 0x167   :  { %4454 = vtanh.f32 %v2605_v51  ;;  %v5393_v27 = vrot.slane %v1408_v45, %v5147_v33  ;;  %v2856_v32 = vmul.f32 %v4443_v1, %v5292_v24  ;;  %v5400_v51 = vrot.slane %v1410_v14, %v5147_v33 }
 0x168   :  { %2988 = vadd.xlane.f32.xlu0 %v2848_v18  ;;  %v2606_v18 = vadd.f32 %v2068_v28, %v5130_v22  ;;  %v4445_v63 = vpop.eup %4444  ;;  %v2100_v28 = vrot.slane %v5379_v49, %v5195_v40  ;;  %v1458_v43 = vcombine.high %v1450_v25, %v1450_v25  ;;  %v1457_v42 = vrot.slane %v4221_v54, %v5147_v33 }
 0x169   :  { %7076 = vst [vmem:[#allocation11_spill] sm:$0xff] %v5400_v51  ;;  %v2857_v45 = vmul.f32 %v4445_v63, %v5292_v24  ;;  %v2613_v1 = vadd.f32 %v2096_v58, %v5132_v13  ;;  %v5408_v49 = vrot.slane %v1450_v25, %v5147_v33  ;;  %v2116_v58 = vrot.slane %v5400_v51, %v5195_v40 }
 0x16a   :  { %2990 = vadd.xlane.f32.xlu1 %v2849_v30  ;;  %v2853_v30 = vmul.f32 %v4441_v50, %v5292_v24  ;;  %4456 = vtanh.f32 %v2606_v18  ;;  %v2610_v50 = vadd.f32 %v2084_v19, %v5130_v22  ;;  %v4222_v18 = vcombine.high %v5083_v29, %v5083_v29 }
 0x16b   :  { %4458 = vtanh.f32 %v2609_v44  ;;  %v2614_v54 = vadd.f32 %v2100_v28, %v5132_v13  ;;  %v5415_v19 = vrot.slane %v1458_v43, %v5147_v33  ;;  %v1459_v44 = vcombine.high %v1457_v42, %v1457_v42 }
 0x16c   :  { %2996 = vadd.xlane.f32.xlu0 %v2852_v4  ;;  %v4447_v4 = vpop.eup %4446  ;;  %4460 = vtanh.f32 %v2610_v50  ;;  %v7078_v25 = vcombine.high %v5057_v2, %v5083_v29  ;;  %v2128_v43 = vrot.slane %v5408_v49, %v5195_v40  ;;  %v5428_v50 = vrot.slane %v1457_v42, %v5147_v33 }
 0x16d   :  { %v4449_v62 = vpop.eup %4448  ;;  %v2860_v14 = vmul.f32 %v4447_v4, %v5292_v24  ;;  %7077 = vst [vmem:[#allocation12_spill] sm:$0xff] %v5415_v19  ;;  %4462 = vtanh.f32 %v2613_v1  ;;  %v2132_v2 = vrot.slane %v5415_v19, %v5195_v40  ;;  %v5435_v1 = vrot.slane %v1459_v44, %v5147_v33 }
 0x16e   :  { %2998 = vadd.xlane.f32.xlu1 %v2853_v30  ;;  %v2112_v30 = vrot.slane %v5393_v27, %v5195_v40  ;;  %v4451_v63 = vpop.eup %4450  ;;  %4464 = vtanh.f32 %v2614_v54  ;;  %v2144_v54 = vrot.slane %v5428_v50, %v5195_v40 }
 0x16f   :  { %v2864_v51 = vmul.f32 %v4451_v63, %v5292_v24  ;;  %v2621_v63 = vadd.f32 %v2128_v43, %v5134_v39  ;;  %v2622_v44 = vadd.f32 %v2132_v2, %v5134_v39 }
 0x170   :  { %3004 = vadd.xlane.f32.xlu0 %v2856_v32  ;;  %v1499_v32 = vrot.slane %v7078_v25, %v5147_v33  ;;  %v4453_v4 = vpop.eup %4452  ;;  %v2617_v28 = vadd.f32 %v2112_v30, %v5132_v13 }
 0x171   :  { %v4455_v29 = vpop.eup %4454  ;;  %v2865_v42 = vmul.f32 %v4453_v4, %v5292_v24 }
 0x172   :  { %3006 = vadd.xlane.f32.xlu1 %v2857_v45  ;;  %v2861_v45 = vmul.f32 %v4449_v62, %v5292_v24  ;;  %v2618_v62 = vadd.f32 %v2116_v58, %v5132_v13  ;;  %v1507_v30 = vcombine.high %v1499_v32, %v1499_v32  ;;  %4466 = vtanh.f32 %v2617_v28 }
 0x173   :  { %v2868_v58 = vmul.f32 %v4455_v29, %v5292_v24  ;;  %v2625_v29 = vadd.f32 %v2144_v54, %v5134_v39  ;;  %v7081_v54 = vcombine.high %v4983_v59, %v5161_v6 }
 0x174   :  { %3012 = vadd.xlane.f32.xlu0 %v2860_v14  ;;  %v1506_v14 = vrot.slane %v4222_v18, %v5147_v33  ;;  %v4457_v25 = vpop.eup %4456  ;;  %4468 = vtanh.f32 %v2618_v62  ;;  %v5450_v18 = vrot.slane %v1507_v30, %v5147_v33  ;;  %v1164_v62 = vcombine.high %v5190_v7, %v5190_v7 }
 0x175   :  { %v4459_v19 = vpop.eup %4458  ;;  %v2869_v28 = vmul.f32 %v4457_v25, %v5292_v24  ;;  %4470 = vtanh.f32 %v2621_v63 }
 0x176   :  { %3014 = vadd.xlane.f32.xlu1 %v2861_v45  ;;  %v5443_v45 = vrot.slane %v1499_v32, %v5147_v33  ;;  %7079 = vst [vmem:[#allocation13_spill] sm:$0xff] %v5450_v18  ;;  %v1508_v4 = vcombine.high %v1506_v14, %v1506_v14  ;;  %v5454_v32 = vrot.slane %v1506_v14, %v5147_v33  ;;  %v4461_v43 = vpop.eup %4460  ;;  %4472 = vtanh.f32 %v2622_v44 }
 0x177   :  { %v2872_v30 = vmul.f32 %v4459_v19, %v5292_v24  ;;  %v2164_v14 = vrot.slane %v5450_v18, %v5195_v40  ;;  %v2873_v19 = vmul.f32 %v4461_v43, %v5292_v24  ;;  %4474 = vtanh.f32 %v2625_v29 }
 0x178   :  { %3020 = vadd.xlane.f32.xlu0 %v2864_v51  ;;  %v2148_v51 = vrot.slane %v5435_v1, %v5195_v40  ;;  %v2160_v2 = vrot.slane %v5443_v45, %v5195_v40  ;;  %v5466_v63 = vrot.slane %v1508_v4, %v5147_v33  ;;  %v2176_v44 = vrot.slane %v5454_v32, %v5195_v40 }
 0x179   :  { %v2630_v43 = vadd.f32 %v2164_v14, %v5136_v3 }
 0x17a   :  { %3022 = vadd.xlane.f32.xlu1 %v2865_v42  ;;  %v4463_v42 = vpop.eup %4462  ;;  %v2626_v25 = vadd.f32 %v2148_v51, %v5134_v39  ;;  %7080 = vst [vmem:[#allocation14_spill] sm:$0xff] %v5466_v63  ;;  %v2629_v51 = vadd.f32 %v2160_v2, %v5136_v3  ;;  %v2180_v29 = vrot.slane %v5466_v63, %v5195_v40 }
 0x17b   :  { %v4465_v7 = vpop.eup %4464  ;;  %v2876_v4 = vmul.f32 %v4463_v42, %v5292_v24  ;;  %v2633_v42 = vadd.f32 %v2176_v44, %v5136_v3 }
 0x17c   :  { %3028 = vadd.xlane.f32.xlu0 %v2868_v58  ;;  %v5472_v58 = vrot.slane %v7081_v54, %v5147_v33  ;;  %v7083_v54 = vcombine.low %v4986_v60, %v5164_v34  ;;  %4476 = vtanh.f32 %v2626_v25  ;;  %v1195_v25 = vcombine.high %v5225_v5, %v5225_v5 }
 0x17d   :  { %4478 = vtanh.f32 %v2629_v51  ;;  %v7086_v51 = vcombine.high %v4986_v60, %v5164_v34 }
 0x17e   :  { %3030 = vadd.xlane.f32.xlu1 %v2869_v28  ;;  %7082 = vst [vmem:[#allocation15_spill] sm:$0xff] %v5472_v58  ;;  %v5479_v28 = vrot.slane %v1164_v62, %v5147_v33  ;;  %v5486_v18 = vrot.slane %v7083_v54, %v5147_v33  ;;  %v5493_v2 = vrot.slane %v5472_v58, %v5147_v33  ;;  %4480 = vtanh.f32 %v2630_v43 }
 0x17f   :  { %v2877_v62 = vmul.f32 %v4465_v7, %v5292_v24  ;;  %v2634_v7 = vadd.f32 %v2180_v29, %v5136_v3  ;;  %v5513_v63 = vrot.slane %v7086_v51, %v5147_v33  ;;  %4482 = vtanh.f32 %v2633_v42 }
 0x180   :  { %3036 = vadd.xlane.f32.xlu0 %v2872_v30  ;;  %v4467_v30 = vpop.eup %4466  ;;  %7084 = vst [vmem:[#allocation16_spill] sm:$0xff] %v5493_v2  ;;  %v1940_v54 = vrot.slane %v5479_v28, %v5195_v40  ;;  %v5504_v58 = vrot.slane %v5486_v18, %v5147_v33  ;;  %v2288_v44 = vrot.slane %v5493_v2, %v5195_v40  ;;  %v12_v2 = vstv %s7039_s6 }
 0x181   :  { %v2880_v14 = vmul.f32 %v4467_v30, %v5292_v24  ;;  %7087 = vst [vmem:[#allocation18_spill] sm:$0xff] %v5513_v63  ;;  %v1960_v43 = vrot.slane %v1195_v25, %v5195_v40  ;;  %v1243_v29 = vcombine.high %v5228_v41, %v5228_v41  ;;  %13 = vst [vmem:[#allocation2] sm:$0x1] %v12_v2  ;;  %4484 = vtanh.f32 %v2634_v7 }
 0x182   :  { %3038 = vadd.xlane.f32.xlu1 %v2873_v19  ;;  %v4469_v19 = vpop.eup %4468  ;;  %7085 = vst [vmem:[#allocation17_spill] sm:$0xff] %v5504_v58  ;;  %v2661_v42 = vadd.f32 %v2288_v44, %v5208_v0  ;;  %v7089_v41 = vcombine.low %v4989_v10, %v5167_v20  ;;  %v1244_v2 = vcombine.high %v5244_v16, %v5244_v16 }
 0x183   :  { %v2881_v30 = vmul.f32 %v4469_v19, %v5292_v24  ;;  %v2579_v7 = vadd.f32 %v1960_v43, %v5122_v21  ;;  %v1976_v44 = vrot.slane %v1243_v29, %v5195_v40 }
 0x184   :  { %3044 = vadd.xlane.f32.xlu0 %v2876_v4  ;;  %v4471_v4 = vpop.eup %4470  ;;  %v5535_v25 = vrot.slane %v7089_v41, %v5147_v33 }
 0x185   :  { %v4473_v5 = vpop.eup %4472  ;;  %v2884_v60 = vmul.f32 %v4471_v4, %v5292_v24 }
 0x186   :  { %3046 = vadd.xlane.f32.xlu1 %v2877_v62  ;;  %v2574_v62 = vadd.f32 %v1940_v54, %v5122_v21  ;;  %v4475_v19 = vpop.eup %4474  ;;  %v5529_v54 = vrot.slane %v5513_v63, %v5147_v33  ;;  %7090 = vst [vmem:[#allocation20_spill] sm:$0xff] %v5535_v25  ;;  %v2885_v4 = vmul.f32 %v4473_v5, %v5292_v24 }
 0x187   :  { %v4477_v51 = vpop.eup %4476  ;;  %v5550_v16 = vrot.slane %v5535_v25, %v5147_v33  ;;  %v4228_v63 = vcombine.high %v5164_v34, %v5164_v34 }
 0x188   :  { %3052 = vadd.xlane.f32.xlu0 %v2880_v14  ;;  %v2320_v14 = vrot.slane %v5504_v58, %v5195_v40  ;;  %7088 = vst [vmem:[#allocation19_spill] sm:$0xff] %v5529_v54  ;;  %4486 = vtanh.f32 %v2574_v62  ;;  %v2888_v58 = vmul.f32 %v4475_v19, %v5292_v24  ;;  %v2352_v5 = vrot.slane %v5529_v54, %v5195_v40  ;;  %v3220_v25 = vld [vmem:[#allocation2] sm:$0x1] }
 0x189   :  { %4488 = vtanh.f32 %v2661_v42  ;;  %7091 = vst [vmem:[#allocation21_spill] sm:$0xff] %v5550_v16  ;;  %v7092_v62 = vcombine.high %v4989_v10, %v5167_v20  ;;  %v2889_v29 = vmul.f32 %v4477_v51, %v5292_v24  ;;  %v2583_v42 = vadd.f32 %v1976_v44, %v5124_v38  ;;  %4360 = vpush %v3220_v25 }
 0x18a   :  { %3054 = vadd.xlane.f32.xlu1 %v2881_v30  ;;  %v4226_v30 = vcombine.high %v5161_v6, %v5161_v6  ;;  %v2669_v41 = vadd.f32 %v2320_v14, %v5211_v48  ;;  %v1992_v14 = vrot.slane %v1244_v2, %v5195_v40  ;;  %4490 = vtanh.f32 %v2579_v7 }
 0x18b   :  { %v5556_v43 = vrot.slane %v7092_v62, %v5147_v33  ;;  %v2384_v2 = vrot.slane %v5550_v16, %v5195_v40 }
 0x18c   :  { %3060 = vadd.xlane.f32.xlu0 %v2884_v60  ;;  %v4479_v60 = vpop.eup %4478  ;;  %4492 = vtanh.f32 %v2669_v41  ;;  %v2587_v44 = vadd.f32 %v1992_v14, %v5124_v38  ;;  %v1293_v41 = vcombine.high %v5285_v26, %v5285_v26 }
 0x18d   :  { %v4481_v19 = vpop.eup %4480  ;;  %v2892_v10 = vmul.f32 %v4479_v60, %v5292_v24  ;;  %v5571_v51 = vrot.slane %v5556_v43, %v5147_v33  ;;  %4494 = vtanh.f32 %v2583_v42 }
 0x18e   :  { %3062 = vadd.xlane.f32.xlu1 %v2885_v4  ;;  %v1292_v4 = vcombine.high %v5266_v46, %v5266_v46  ;;  %v4483_v54 = vpop.eup %4482  ;;  %v5574_v46 = vrot.slane %v4226_v30, %v5147_v33  ;;  %v2893_v7 = vmul.f32 %v4481_v19, %v5292_v24  ;;  %v1341_v30 = vcombine.high %v5303_v35, %v5303_v35 }
 0x18f   :  { %v4485_v60 = vpop.eup %4484  ;;  %v2896_v62 = vmul.f32 %v4483_v54, %v5292_v24  ;;  %v2685_v19 = vadd.f32 %v2384_v2, %v5217_v61  ;;  %v2416_v42 = vrot.slane %v5571_v51, %v5195_v40 }
 0x190   :  { %3068 = vadd.xlane.f32.xlu0 %v2888_v58  ;;  %v2677_v58 = vadd.f32 %v2352_v5, %v5214_v11  ;;  %7093 = vst [vmem:[#allocation22_spill] sm:$0xff] %v5574_v46  ;;  %v2008_v25 = vrot.slane %v1292_v4, %v5195_v40  ;;  %v4230_v5 = vcombine.high %v5167_v20, %v5167_v20 }
 0x191   :  { %v5594_v26 = vrot.slane %v5574_v46, %v5147_v33  ;;  %v2897_v54 = vmul.f32 %v4485_v60, %v5292_v24 }
 0x192   :  { %3070 = vadd.xlane.f32.xlu1 %v2889_v29  ;;  %v5587_v29 = vrot.slane %v4228_v63, %v5147_v33  ;;  %v4487_v14 = vpop.eup %4486  ;;  %4496 = vtanh.f32 %v2677_v58  ;;  %v2591_v35 = vadd.f32 %v2008_v25, %v5126_v36  ;;  %v2024_v63 = vrot.slane %v1293_v41, %v5195_v40 }
 0x193   :  { %4498 = vtanh.f32 %v2587_v44  ;;  %v4489_v4 = vpop.eup %4488  ;;  %v2040_v58 = vrot.slane %v1341_v30, %v5195_v40  ;;  %v2304_v44 = vrot.slane %v5594_v26, %v5195_v40  ;;  %v5609_v60 = vrot.slane %v4230_v5, %v5147_v33 }
 0x194   :  { %3076 = vadd.xlane.f32.xlu0 %v2892_v10  ;;  %7094 = vst [vmem:[#allocation23_spill] sm:$0xff] %v5587_v29  ;;  %v2837_v10 = vmul.f32 %v4487_v14, %v5292_v24  ;;  %v5603_v2 = vrot.slane %v5587_v29, %v5147_v33  ;;  %4500 = vtanh.f32 %v2685_v19  ;;  %v2924_v41 = vmul.f32 %v4489_v4, %v5292_v24 }
 0x195   :  { %7096 = vst [vmem:[#allocation25_spill] sm:$0xff] %v5609_v60  ;;  %v1342_v30 = vcombine.high %v5323_v31, %v5323_v31  ;;  %v4223_v14 = vcombine.low %v5158_v52, %v5158_v52  ;;  %4502 = vtanh.f32 %v2591_v35  ;;  %v2595_v19 = vadd.f32 %v2024_v63, %v5126_v36 }
 0x196   :  { %3078 = vadd.xlane.f32.xlu1 %v2893_v7  ;;  %7095 = vst [vmem:[#allocation24_spill] sm:$0xff] %v5603_v2  ;;  %v4491_v7 = vpop.eup %4490  ;;  %v2368_v5 = vrot.slane %v5603_v2, %v5195_v40  ;;  %v2665_v4 = vadd.f32 %v2304_v44, %v5208_v0  ;;  %v5624_v31 = vrot.slane %v5609_v60, %v5147_v33 }
 0x197   :  { %v4493_v25 = vpop.eup %4492  ;;  %v2056_v63 = vrot.slane %v1342_v30, %v5195_v40  ;;  %v1390_v44 = vcombine.high %v5338_v23, %v5338_v23  ;;  %v1196_v23 = vcombine.high %v5479_v28, %v5479_v28 }
 0x198   :  { %3084 = vadd.xlane.f32.xlu0 %v2896_v62  ;;  %v2693_v62 = vadd.f32 %v2416_v42, %v5220_v47  ;;  %v2842_v42 = vmul.f32 %v4491_v7, %v5292_v24  ;;  %7097 = vst [vmem:[#allocation26_spill] sm:$0xff] %v5624_v31  ;;  %v2932_v35 = vmul.f32 %v4493_v25, %v5292_v24 }
 0x199   :  { %v2681_v60 = vadd.f32 %v2368_v5, %v5214_v11  ;;  %v2603_v5 = vadd.f32 %v2056_v63, %v5128_v15  ;;  %v2072_v29 = vrot.slane %v1390_v44, %v5195_v40 }
 0x19a   :  { %3086 = vadd.xlane.f32.xlu1 %v2897_v54  ;;  %v2599_v54 = vadd.f32 %v2040_v58, %v5128_v15  ;;  %4504 = vtanh.f32 %v2693_v62  ;;  %v7098_v58 = vcombine.low %v4980_v9, %v5158_v52  ;;  %v4224_v62 = vcombine.high %v5158_v52, %v5158_v52 }
 0x19b   :  { %4506 = vtanh.f32 %v2595_v19  ;;  %v2432_v19 = vrot.slane %v5624_v31, %v5195_v40 }
 0x19c   :  { %2966 = vadd.xlane.f32.xlu0 %v2837_v10  ;;  %v4495_v10 = vpop.eup %4494  ;;  %v5632_v7 = vrot.slane %v7098_v58, %v5147_v33  ;;  %4508 = vtanh.f32 %v2599_v54 }
 0x19d   :  { %v2846_v30 = vmul.f32 %v4495_v10, %v5292_v24  ;;  %4510 = vtanh.f32 %v2665_v4  ;;  %v7099_v4 = vcombine.high %v4980_v9, %v5158_v52  ;;  %v2697_v44 = vadd.f32 %v2432_v19, %v5220_v47 }
 0x19e   :  { %3140 = vadd.xlane.f32.xlu1 %v2924_v41  ;;  %v4497_v41 = vpop.eup %4496  ;;  %v5645_v58 = vrot.slane %v5632_v7, %v5147_v33  ;;  %4512 = vtanh.f32 %v2681_v60  ;;  %v5686_v60 = vrot.slane %v4224_v62, %v5147_v33  ;;  %v2607_v19 = vadd.f32 %v2072_v29, %v5130_v22 }
 0x19f   :  { %v4499_v25 = vpop.eup %4498  ;;  %v2940_v54 = vmul.f32 %v4497_v41, %v5292_v24  ;;  %v1197_v41 = vcombine.high %v5236_v12, %v5236_v12  ;;  %4514 = vtanh.f32 %v2603_v5  ;;  %v1440_v5 = vcombine.high %v5393_v27, %v5393_v27 }
 0x1a0   :  { %2976 = vadd.xlane.f32.xlu0 %v2842_v42  ;;  %v5639_v42 = vrot.slane %v4223_v14, %v5147_v33  ;;  %v2192_v10 = vrot.slane %v5645_v58, %v5195_v40  ;;  %v4501_v31 = vpop.eup %4500  ;;  %v2850_v28 = vmul.f32 %v4499_v25, %v5292_v24  ;;  %v5699_v62 = vrot.slane %v5686_v60, %v5147_v33 }
 0x1a1   :  { %v4503_v25 = vpop.eup %4502  ;;  %v2948_v12 = vmul.f32 %v4501_v31, %v5292_v24  ;;  %4516 = vtanh.f32 %v2697_v44  ;;  %v1488_v27 = vcombine.high %v5408_v49, %v5408_v49 }
 0x1a2   :  { %3156 = vadd.xlane.f32.xlu1 %v2932_v35  ;;  %v5653_v14 = vrot.slane %v5639_v42, %v5147_v33  ;;  %v5663_v35 = vrot.slane %v7099_v4, %v5147_v33  ;;  %v5674_v9 = vadd.f32 %v2192_v10, %v5199_v57  ;;  %v2854_v31 = vmul.f32 %v4503_v25, %v5292_v24 }
 0x1a3   :  { %4518 = vtanh.f32 %v2607_v19 }
 0x1a4   :  { %2984 = vadd.xlane.f32.xlu0 %v2846_v30  ;;  %v1391_v30 = vcombine.high %v5358_v37, %v5358_v37  ;;  %v2208_v63 = vrot.slane %v5653_v14, %v5195_v40  ;;  %v5678_v52 = vrot.slane %v5663_v35, %v5147_v33  ;;  %v1948_v37 = vrot.slane %v1196_v23, %v5195_v40  ;;  %v4505_v2 = vpop.eup %4504 }
 0x1a5   :  { %v4507_v29 = vpop.eup %4506 }
 0x1a6   :  { %3172 = vadd.xlane.f32.xlu1 %v2940_v54  ;;  %v5683_v4 = vadd.f32 %v2208_v63, %v5199_v57  ;;  %v1439_v54 = vcombine.high %v5373_v55, %v5373_v55  ;;  %v2224_v10 = vrot.slane %v5678_v52, %v5195_v40  ;;  %v2088_v23 = vrot.slane %v1391_v30, %v5195_v40  ;;  %v4509_v46 = vpop.eup %4508 }
 0x1a7   :  { %v1245_v63 = vcombine.high %v5241_v17, %v5241_v17  ;;  %v1964_v55 = vrot.slane %v1197_v41, %v5195_v40  ;;  %v2576_v30 = vadd.f32 %v1948_v37, %v5122_v21  ;;  %v1246_v17 = vcombine.high %v5256_v8, %v5256_v8 }
 0x1a8   :  { %2992 = vadd.xlane.f32.xlu0 %v2850_v28  ;;  %v5706_v28 = vadd.f32 %v2224_v10, %v5202_v53  ;;  %v2956_v41 = vmul.f32 %v4505_v2, %v5292_v24  ;;  %v2104_v25 = vrot.slane %v1439_v54, %v5195_v40  ;;  %v4511_v10 = vpop.eup %4510  ;;  %v2611_v44 = vadd.f32 %v2088_v23, %v5130_v22 }
 0x1a9   :  { %v1980_v37 = vrot.slane %v1245_v63, %v5195_v40  ;;  %v2858_v16 = vmul.f32 %v4507_v29, %v5292_v24  ;;  %4520 = vtanh.f32 %v2576_v30  ;;  %v2580_v2 = vadd.f32 %v1964_v55, %v5122_v21  ;;  %v4513_v49 = vpop.eup %4512  ;;  %v7100_v30 = vld [vmem:[#allocation5_spill] sm:$0xff] }
 0x1aa   :  { %3188 = vadd.xlane.f32.xlu1 %v2948_v12  ;;  %v2240_v12 = vrot.slane %v5699_v62, %v5195_v40  ;;  %v1996_v54 = vrot.slane %v1246_v17, %v5195_v40  ;;  %v2928_v19 = vmul.f32 %v4511_v10, %v5292_v24  ;;  %v2615_v23 = vadd.f32 %v2104_v25, %v5132_v13  ;;  %v4515_v21 = vpop.eup %4514 }
 0x1ab   :  { %v2136_v63 = vrot.slane %v1488_v27, %v5195_v40  ;;  %4522 = vtanh.f32 %v2611_v44  ;;  %v2584_v29 = vadd.f32 %v1980_v37, %v5124_v38  ;;  %v2862_v55 = vmul.f32 %v4509_v46, %v5292_v24  ;;  %v4517_v27 = vpop.eup %4516 }
 0x1ac   :  { %3000 = vadd.xlane.f32.xlu0 %v2854_v31  ;;  %v5720_v8 = vadd.f32 %v2240_v12, %v5202_v53  ;;  %v2120_v31 = vrot.slane %v1440_v5, %v5195_v40  ;;  %v1294_v12 = vcombine.high %v5272_v56, %v5272_v56  ;;  %v1489_v5 = vcombine.high %v5428_v50, %v5428_v50 }
 0x1ad   :  { %v1295_v17 = vcombine.high %v7100_v30, %v7100_v30  ;;  %4524 = vtanh.f32 %v2580_v2  ;;  %v2944_v56 = vmul.f32 %v4513_v49, %v5292_v24  ;;  %v2623_v25 = vadd.f32 %v2136_v63, %v5134_v39  ;;  %v4519_v37 = vpop.eup %4518  ;;  %v7101_v63 = vld [vmem:[#allocation6_spill] sm:$0xff] }
 0x1ae   :  { %3204 = vadd.xlane.f32.xlu1 %v2956_v41  ;;  %v2588_v41 = vadd.f32 %v1996_v54, %v5124_v38  ;;  %4526 = vtanh.f32 %v2615_v23  ;;  %v2012_v50 = vrot.slane %v1294_v12, %v5195_v40  ;;  %v2152_v46 = vrot.slane %v1489_v5, %v5195_v40 }
 0x1af   :  { %4528 = vtanh.f32 %v2584_v29  ;;  %v2866_v10 = vmul.f32 %v4515_v21, %v5292_v24  ;;  %v2028_v44 = vrot.slane %v1295_v17, %v5195_v40  ;;  %v1537_v38 = vcombine.high %v5443_v45, %v5443_v45 }
 0x1b0   :  { %3008 = vadd.xlane.f32.xlu0 %v2858_v16  ;;  %v2619_v16 = vadd.f32 %v2120_v31, %v5132_v13  ;;  %v1586_v31 = vcombine.high %v5645_v58, %v5645_v58  ;;  %v1556_v2 = vcombine.high %v5632_v7, %v5632_v7  ;;  %v2960_v54 = vmul.f32 %v4517_v27, %v5292_v24 }
 0x1b1   :  { %v2592_v49 = vadd.f32 %v2012_v50, %v5126_v36  ;;  %v2627_v23 = vadd.f32 %v2152_v46, %v5134_v39  ;;  %v1343_v45 = vcombine.high %v7101_v63, %v7101_v63  ;;  %v2870_v7 = vmul.f32 %v4519_v37, %v5292_v24  ;;  %v7102_v37 = vld [vmem:[#allocation7_spill] sm:$0xff] }
 0x1b2   :  { %3148 = vadd.xlane.f32.xlu1 %v2928_v19  ;;  %4530 = vtanh.f32 %v2619_v16  ;;  %v2200_v12 = vrot.slane %v1586_v31, %v5195_v40  ;;  %v5758_v29 = vrot.slane %v1556_v2, %v5147_v33  ;;  %v2596_v58 = vadd.f32 %v2028_v44, %v5126_v36 }
 0x1b3   :  { %4532 = vtanh.f32 %v2588_v41  ;;  %v4521_v19 = vpop.eup %4520  ;;  %v2168_v5 = vrot.slane %v1537_v38, %v5195_v40  ;;  %v1587_v21 = vcombine.high %v5653_v14, %v5653_v14  ;;  %v1538_v16 = vcombine.high %v5454_v32, %v5454_v32 }
 0x1b4   :  { %3016 = vadd.xlane.f32.xlu0 %v2862_v55  ;;  %4534 = vtanh.f32 %v2623_v25  ;;  %v5768_v30 = vadd.f32 %v2200_v12, %v5199_v57  ;;  %v2196_v17 = vrot.slane %v5758_v29, %v5195_v40  ;;  %v1557_v41 = vcombine.high %v5639_v42, %v5639_v42 }
 0x1b5   :  { %v4523_v55 = vpop.eup %4522  ;;  %v2839_v36 = vmul.f32 %v4521_v19, %v5292_v24  ;;  %v1635_v14 = vcombine.high %v5678_v52, %v5678_v52  ;;  %v1605_v32 = vcombine.high %v5663_v35, %v5663_v35  ;;  %4536 = vtanh.f32 %v2592_v49 }
 0x1b6   :  { %3180 = vadd.xlane.f32.xlu1 %v2944_v56  ;;  %v2216_v56 = vrot.slane %v1587_v21, %v5195_v40  ;;  %v2044_v50 = vrot.slane %v1343_v45, %v5195_v40  ;;  %v5782_v27 = vadd.f32 %v2196_v17, %v5199_v57  ;;  %v5785_v42 = vrot.slane %v1557_v41, %v5147_v33 }
 0x1b7   :  { %v4525_v25 = vpop.eup %4524  ;;  %v2232_v52 = vrot.slane %v1635_v14, %v5195_v40  ;;  %v5793_v35 = vrot.slane %v1605_v32, %v5147_v33  ;;  %4538 = vtanh.f32 %v2627_v23  ;;  %v1344_v31 = vcombine.high %v7102_v37, %v7102_v37  ;;  %v7104_v37 = vld [vmem:[#allocation9_spill] sm:$0xff] }
 0x1b8   :  { %3024 = vadd.xlane.f32.xlu0 %v2866_v10  ;;  %v4527_v46 = vpop.eup %4526  ;;  %v2874_v10 = vmul.f32 %v4523_v55, %v5292_v24  ;;  %v5789_v44 = vadd.f32 %v2216_v56, %v5199_v57  ;;  %v2212_v2 = vrot.slane %v5785_v42, %v5195_v40  ;;  %v2843_v49 = vmul.f32 %v4525_v25, %v5292_v24 }
 0x1b9   :  { %v4529_v38 = vpop.eup %4528  ;;  %v2631_v19 = vadd.f32 %v2168_v5, %v5136_v3  ;;  %v2184_v63 = vrot.slane %v1538_v16, %v5195_v40  ;;  %v5803_v45 = vadd.f32 %v2232_v52, %v5202_v53  ;;  %v1636_v21 = vcombine.high %v5699_v62, %v5699_v62 }
 0x1ba   :  { %3212 = vadd.xlane.f32.xlu1 %v2960_v54  ;;  %v5806_v23 = vadd.f32 %v2212_v2, %v5199_v57  ;;  %v1606_v55 = vcombine.high %v5686_v60, %v5686_v60  ;;  %v2878_v5 = vmul.f32 %v4527_v46, %v5292_v24  ;;  %4540 = vtanh.f32 %v2596_v58  ;;  %s4361_s30 = spop %4360 }
 0x1bb   :  { %v2600_v16 = vadd.f32 %v2044_v50, %v5128_v15  ;;  %v2060_v41 = vrot.slane %v1344_v31, %v5195_v40  ;;  %v2248_v62 = vrot.slane %v1636_v21, %v5195_v40  ;;  %v2847_v60 = vmul.f32 %v4529_v38, %v5292_v24 }
 0x1bc   :  { %3032 = vadd.xlane.f32.xlu0 %v2870_v7  ;;  %v4531_v54 = vpop.eup %4530  ;;  %v2228_v7 = vrot.slane %v5793_v35, %v5195_v40  ;;  %v5825_v32 = vrot.slane %v1606_v55, %v5147_v33  ;;  %4542 = vtanh.f32 %v2631_v19  ;;  %v2635_v58 = vadd.f32 %v2184_v63, %v5136_v3 }
 0x1bd   :  { %v4533_v12 = vpop.eup %4532  ;;  %v5829_v25 = vadd.f32 %v2248_v62, %v5202_v53  ;;  %v2882_v50 = vmul.f32 %v4531_v54, %v5292_v24  ;;  %4544 = vtanh.f32 %v2600_v16  ;;  %v2604_v52 = vadd.f32 %v2060_v41, %v5128_v15 }
 0x1be   :  { %2970 = vadd.xlane.f32.xlu1 %v2839_v36  ;;  %v4535_v17 = vpop.eup %4534  ;;  %v7103_v36 = vld [vmem:[#allocation8_spill] sm:$0xff]  ;;  %v5820_v14 = vadd.f32 %v2228_v7, %v5202_v53  ;;  %v2244_v46 = vrot.slane %v5825_v32, %v5195_v40  ;;  %v1393_v31 = vcombine.high %v7104_v37, %v7104_v37  ;;  %v2851_v2 = vmul.f32 %v4533_v12, %v5292_v24  ;;  %v7105_v7 = vld [vmem:[#allocation10_spill] sm:$0xff] }
 0x1bf   :  { %v1392_v56 = vcombine.high %v7103_v36, %v7103_v36  ;;  %4546 = vtanh.f32 %v2635_v58  ;;  %v2886_v54 = vmul.f32 %v4535_v17, %v5292_v24  ;;  %v1441_v21 = vcombine.high %v7105_v7, %v7105_v7  ;;  %v7108_v37 = vld [vmem:[#allocation12_spill] sm:$0xff] }
 0x1c0   :  { %3040 = vadd.xlane.f32.xlu0 %v2874_v10  ;;  %v4537_v10 = vpop.eup %4536  ;;  %4548 = vtanh.f32 %v2604_v52  ;;  %v2092_v15 = vrot.slane %v1393_v31, %v5195_v40  ;;  %v4225_v12 = vcombine.low %v5161_v6, %v5161_v6  ;;  %v7106_v16 = vcombine.low %v4983_v59, %v5161_v6 }
 0x1c1   :  { %v2076_v38 = vrot.slane %v1392_v56, %v5195_v40  ;;  %v4539_v19 = vpop.eup %4538  ;;  %4550 = vtanh.f32 %v5674_v9  ;;  %v2108_v62 = vrot.slane %v1441_v21, %v5195_v40  ;;  %v1490_v31 = vcombine.high %v7108_v37, %v7108_v37 }
 0x1c2   :  { %2978 = vadd.xlane.f32.xlu1 %v2843_v49  ;;  %v5840_v49 = vadd.f32 %v2244_v46, %v5202_v53  ;;  %v5854_v17 = vrot.slane %v7106_v16, %v5147_v33  ;;  %v2890_v41 = vmul.f32 %v4539_v19, %v5292_v24  ;;  %v2612_v56 = vadd.f32 %v2092_v15, %v5130_v22 }
 0x1c3   :  { %v2608_v63 = vadd.f32 %v2076_v38, %v5130_v22  ;;  %v5868_v6 = vrot.slane %v4225_v12, %v5147_v33  ;;  %v4227_v46 = vcombine.low %v5164_v34, %v5164_v34  ;;  %v2616_v52 = vadd.f32 %v2108_v62, %v5132_v13 }
 0x1c4   :  { %3048 = vadd.xlane.f32.xlu0 %v2878_v5  ;;  %v4541_v55 = vpop.eup %4540  ;;  %v2855_v5 = vmul.f32 %v4537_v10, %v5292_v24  ;;  %v5865_v59 = vrot.slane %v5854_v17, %v5147_v33  ;;  %v1491_v12 = vcombine.high %v5435_v1, %v5435_v1  ;;  %v1588_v1 = vcombine.high %v5758_v29, %v5758_v29 }
 0x1c5   :  { %4552 = vtanh.f32 %v2608_v63  ;;  %v5894_v63 = vrot.slane %v4227_v46, %v5147_v33  ;;  %v1589_v29 = vcombine.high %v5785_v42, %v5785_v42 }
 0x1c6   :  { %2986 = vadd.xlane.f32.xlu1 %v2847_v60  ;;  %v4543_v36 = vpop.eup %4542  ;;  %v7107_v60 = vld [vmem:[#allocation11_spill] sm:$0xff]  ;;  %4554 = vtanh.f32 %v5683_v4  ;;  %v5888_v4 = vrot.slane %v5868_v6, %v5147_v33  ;;  %v2204_v37 = vrot.slane %v1588_v1, %v5195_v40 }
 0x1c7   :  { %v1442_v58 = vcombine.high %v7107_v60, %v7107_v60  ;;  %v4545_v9 = vpop.eup %4544  ;;  %v2894_v22 = vmul.f32 %v4543_v36, %v5292_v24  ;;  %4556 = vtanh.f32 %v2612_v56  ;;  %v5908_v36 = vrot.slane %v5894_v63, %v5147_v33 }
 0x1c8   :  { %3056 = vadd.xlane.f32.xlu0 %v2882_v50  ;;  %v2859_v50 = vmul.f32 %v4541_v55, %v5292_v24  ;;  %v2256_v24 = vrot.slane %v5865_v59, %v5195_v40  ;;  %4558 = vtanh.f32 %v5706_v28  ;;  %v2140_v55 = vrot.slane %v1490_v31, %v5195_v40 }
 0x1c9   :  { %v4547_v10 = vpop.eup %4546  ;;  %v2124_v38 = vrot.slane %v1442_v58, %v5195_v40  ;;  %4560 = vtanh.f32 %v2616_v52  ;;  %v2272_v16 = vrot.slane %v5888_v4, %v5195_v40  ;;  %v2156_v58 = vrot.slane %v1491_v12, %v5195_v40 }
 0x1ca   :  { %2994 = vadd.xlane.f32.xlu1 %v2851_v2  ;;  %v5881_v2 = vld [vmem:[%s7038_s5] ss:$0 sm:$0xff]  ;;  %v4549_v19 = vpop.eup %4548  ;;  %4562 = vtanh.f32 %v5720_v8  ;;  %v2624_v60 = vadd.f32 %v2140_v55, %v5134_v39  ;;  %v7110_v8 = vld [vmem:[#allocation13_spill] sm:$0xff] }
 0x1cb   :  { %v2863_v34 = vmul.f32 %v5881_v2, %v4545_v9  ;;  %v2898_v15 = vmul.f32 %v5881_v2, %v4547_v10  ;;  %v4551_v7 = vpop.eup %4550  ;;  %v2620_v21 = vadd.f32 %v2124_v38, %v5132_v13  ;;  %v2336_v10 = vrot.slane %v5908_v36, %v5195_v40 }
 0x1cc   :  { %3064 = vadd.xlane.f32.xlu0 %v2886_v54  ;;  %v4229_v54 = vcombine.low %v5167_v20, %v5167_v20  ;;  %v2867_v20 = vmul.f32 %v5881_v2, %v4549_v19  ;;  %v2900_v56 = vmul.f32 %v5881_v2, %v4551_v7  ;;  %v1637_v38 = vcombine.high %v5793_v35, %v5793_v35 }
 0x1cd   :  { %4564 = vtanh.f32 %v2620_v21  ;;  %v2628_v19 = vadd.f32 %v2156_v58, %v5134_v39  ;;  %v2220_v7 = vrot.slane %v1589_v29, %v5195_v40  ;;  %v2673_v55 = vadd.f32 %v2336_v10, %v5211_v48 }
 0x1ce   :  { %3002 = vadd.xlane.f32.xlu1 %v2855_v5  ;;  %v7109_v5 = vld [vmem:[#allocation4_spill] sm:$0xff]  ;;  %v5911_v13 = vrot.slane %v4229_v54, %v5147_v33  ;;  %v1638_v39 = vcombine.high %v5825_v32, %v5825_v32 }
 0x1cf   :  { %v2653_v28 = vadd.f32 %v2256_v24, %v7109_v5  ;;  %v2657_v46 = vadd.f32 %v2272_v16, %v7109_v5  ;;  %v5951_v16 = vadd.f32 %v2220_v7, %v5199_v57 }
 0x1d0   :  { %3072 = vadd.xlane.f32.xlu0 %v2890_v41  ;;  %v4553_v41 = vpop.eup %4552  ;;  %v5928_v52 = vrot.slane %v5911_v13, %v5147_v33 }
 0x1d1   :  { %v4555_v62 = vpop.eup %4554  ;;  %v2871_v9 = vmul.f32 %v5881_v2, %v4553_v41  ;;  %4566 = vtanh.f32 %v2653_v28 }
 0x1d2   :  { %3010 = vadd.xlane.f32.xlu1 %v2859_v50  ;;  %v1539_v50 = vcombine.high %v7110_v8, %v7110_v8  ;;  %v2904_v31 = vmul.f32 %v5881_v2, %v4555_v62  ;;  %4568 = vtanh.f32 %v2624_v60  ;;  %v2400_v12 = vrot.slane %v5928_v52, %v5195_v40 }
 0x1d3   :  { %4570 = vtanh.f32 %v2657_v46  ;;  %v2252_v8 = vrot.slane %v1638_v39, %v5195_v40 }
 0x1d4   :  { %3080 = vadd.xlane.f32.xlu0 %v2894_v22  ;;  %v4557_v22 = vpop.eup %4556  ;;  %v2172_v54 = vrot.slane %v1539_v50, %v5195_v40  ;;  %4572 = vtanh.f32 %v2628_v19  ;;  %v2689_v58 = vadd.f32 %v2400_v12, %v5217_v61 }
 0x1d5   :  { %v4559_v42 = vpop.eup %4558  ;;  %v2875_v35 = vmul.f32 %v5881_v2, %v4557_v22  ;;  %4574 = vtanh.f32 %v2673_v55  ;;  %v5964_v46 = vadd.f32 %v2252_v8, %v5202_v53  ;;  %v4683_v55 = vmov 0.0  }
 0x1d6   :  { %3018 = vadd.xlane.f32.xlu1 %v2863_v34  ;;  %v7111_v34 = vld [vmem:[#allocation14_spill] sm:$0xff]  ;;  %v4561_v21 = vpop.eup %4560  ;;  %v2908_v28 = vmul.f32 %v5881_v2, %v4559_v42  ;;  %v2632_v1 = vadd.f32 %v2172_v54, %v5136_v3  ;;  %v1654_v54 = vcombine.high %v5854_v17, %v5854_v17  ;;  %3351 = vst [vmem:[%s7040_s7] sm:$0xff] %v4683_v55  ;;  %3352 = vst [vmem:[%s7040_s7 + $0x8] sm:$0xff] %v4683_v55 }
 0x1d7   :  { %v1540_v24 = vcombine.high %v7111_v34, %v7111_v34  ;;  %v4563_v41 = vpop.eup %4562  ;;  %v2879_v32 = vmul.f32 %v5881_v2, %v4561_v21  ;;  %3353 = vst [vmem:[%s7040_s7 + $0x10] sm:$0xff] %v4683_v55  ;;  %3354 = vst [vmem:[%s7040_s7 + $0x18] sm:$0xff] %v4683_v55  ;;  %v6034_v17 = vstv %s4361_s30 }
 0x1d8   :  { %3088 = vadd.xlane.f32.xlu0 %v2898_v15  ;;  %v5939_v15 = vadd.f32 %v2204_v37, %v5199_v57  ;;  %v4565_v60 = vpop.eup %4564  ;;  %v2912_v50 = vmul.f32 %v5881_v2, %v4563_v41  ;;  %4576 = vtanh.f32 %v2632_v1  ;;  %3355 = vst [vmem:[%s7040_s7 + $0x20] sm:$0xff] %v4683_v55  ;;  %3356 = vst [vmem:[%s7040_s7 + $0x28] sm:$0xff] %v4683_v55 }
 0x1d9   :  { %v2883_v29 = vmul.f32 %v5881_v2, %v4565_v60  ;;  %4578 = vtanh.f32 %v2689_v58  ;;  %3357 = vst [vmem:[%s7040_s7 + $0x30] sm:$0xff] %v4683_v55  ;;  %3358 = vst [vmem:[%s7040_s7 + $0x38] sm:$0xff] %v4683_v55  ;;  %v6041_v41 = vrot.slane %v1654_v54, %v5147_v33  ;;  %v1655_v1 = vcombine.high %v5868_v6, %v5868_v6  ;;  %v7114_v6 = vld [vmem:[#allocation15_spill] sm:$0xff] }
 0x1da   :  { %3026 = vadd.xlane.f32.xlu1 %v2867_v20  ;;  %v2236_v20 = vrot.slane %v1637_v38, %v5195_v40  ;;  %3359 = vst [vmem:[%s7040_s7 + $0x40] sm:$0xff] %v4683_v55  ;;  %3360 = vst [vmem:[%s7040_s7 + $0x48] sm:$0xff] %v4683_v55 }
 0x1db   :  { %v4567_v57 = vpop.eup %4566  ;;  %3361 = vst [vmem:[%s7040_s7 + $0x50] sm:$0xff] %v4683_v55  ;;  %3362 = vst [vmem:[%s7040_s7 + $0x58] sm:$0xff] %v4683_v55 }
 0x1dc   :  { %3092 = vadd.xlane.f32.xlu0 %v2900_v56  ;;  %v2188_v56 = vrot.slane %v1540_v24, %v5195_v40  ;;  %v5956_v62 = vadd.f32 %v2236_v20, %v5202_v53  ;;  %v4569_v22 = vpop.eup %4568  ;;  %v2916_v37 = vmul.f32 %v5881_v2, %v4567_v57  ;;  %3363 = vst [vmem:[%s7040_s7 + $0x60] sm:$0xff] %v4683_v55  ;;  %3364 = vst [vmem:[%s7040_s7 + $0x68] sm:$0xff] %v4683_v55 }
 0x1dd   :  { %v4571_v38 = vpop.eup %4570  ;;  %3365 = vst [vmem:[%s7040_s7 + $0x70] sm:$0xff] %v4683_v55  ;;  %3366 = vst [vmem:[%s7040_s7 + $0x78] sm:$0xff] %v4683_v55 }
 0x1de   :  { %3034 = vadd.xlane.f32.xlu1 %v2871_v9  ;;  %v2636_v9 = vadd.f32 %v2188_v56, %v5136_v3  ;;  %v2887_v3 = vmul.f32 %v5881_v2, %v4569_v22  ;;  %v4573_v34 = vpop.eup %4572  ;;  %v2920_v24 = vmul.f32 %v5881_v2, %v4571_v38  ;;  %v7113_v56 = vld [vmem:[#allocation3_spill] sm:$0xff] }
 0x1df   :  { %v4575_v42 = vpop.eup %4574  ;;  %v2891_v21 = vmul.f32 %v5881_v2, %v4573_v34 }
 0x1e0   :  { %3100 = vadd.xlane.f32.xlu0 %v2904_v31  ;;  %4580 = vtanh.f32 %v2636_v9  ;;  %v2936_v39 = vmul.f32 %v5881_v2, %v4575_v42 }
 0x1e1   :  { %4582 = vtanh.f32 %v5768_v30  ;;  %v1684_v30 = vcombine.high %v5865_v59, %v5865_v59 }
 0x1e2   :  { %3042 = vadd.xlane.f32.xlu1 %v2875_v35  ;;  %4584 = vtanh.f32 %v5782_v27  ;;  %v7112_v35 = vlaneseq  ;;  %v4577_v27 = vpop.eup %4576 }
 0x1e3   :  { %4586 = vtanh.f32 %v5789_v44  ;;  %v4579_v20 = vpop.eup %4578  ;;  %v2895_v60 = vmul.f32 %v5881_v2, %v4577_v27  ;;  %v2264_v58 = vrot.slane %v1684_v30, %v5195_v40 }
 0x1e4   :  { %3108 = vadd.xlane.f32.xlu0 %v2908_v28  ;;  %v3496_v7 = vand.u32 127, %v7112_v35  ;;  %4588 = vtanh.f32 %v5806_v23  ;;  %v1685_v23 = vcombine.high %v5888_v4, %v5888_v4  ;;  %v2952_v22 = vmul.f32 %v5881_v2, %v4579_v20 }
 0x1e5   :  { %4590 = vtanh.f32 %v5803_v45  ;;  %v2260_v45 = vrot.slane %v6041_v41, %v5195_v40  ;;  %v6067_v4 = vrot.slane %v1655_v1, %v5147_v33 }
 0x1e6   :  { %3050 = vadd.xlane.f32.xlu1 %v2879_v32  ;;  %v6046_v32 = vsub.s32 %v3496_v7, %v7113_v56  ;;  %4592 = vtanh.f32 %v5820_v14  ;;  %v2280_v14 = vrot.slane %v1685_v23, %v5195_v40  ;;  %v1752_v7 = vcombine.high %v5486_v18, %v5486_v18 }
 0x1e7   :  { %4594 = vtanh.f32 %v5829_v25  ;;  %v2276_v25 = vrot.slane %v6067_v4, %v5195_v40 }
 0x1e8   :  { %3116 = vadd.xlane.f32.xlu0 %v2912_v50  ;;  %v1703_v50 = vcombine.high %v7114_v6, %v7114_v6  ;;  %4596 = vtanh.f32 %v5840_v49  ;;  %v2659_v56 = vadd.f32 %v2280_v14, %v7109_v5 }
 0x1e9   :  { %v5967_v10 = vpop.xlane.xlu0 %2964 }
 0x1ea   :  { %3058 = vadd.xlane.f32.xlu1 %v2883_v29  ;;  %v4581_v8 = vpop.eup %4580  ;;  %v6077_v35 = vrot.slane %v1703_v50, %v5147_v33 }
 0x1eb   :  { %v5970_v31 = vpop.xlane.xlu1 %2968  ;;  %v4583_v38 = vpop.eup %4582  ;;  %v2899_v34 = vmul.f32 %v5881_v2, %v4581_v8 }
 0x1ec   :  { %3124 = vadd.xlane.f32.xlu0 %v2916_v37  ;;  %v4585_v42 = vpop.eup %4584  ;;  %v2902_v30 = vmul.f32 %v5881_v2, %v4583_v38  ;;  %v2292_v49 = vrot.slane %v6077_v35, %v5195_v40  ;;  %v7117_v38 = vld [vmem:[#allocation19_spill] sm:$0xff] }
 0x1ed   :  { %v5973_v53 = vpop.xlane.xlu0 %2972  ;;  %v4587_v55 = vpop.eup %4586  ;;  %v2901_v18 = vmul.f32 %v5881_v2, %v4585_v42 }
 0x1ee   :  { %3066 = vadd.xlane.f32.xlu1 %v2887_v3  ;;  %v2906_v6 = vmul.f32 %v5881_v2, %v4587_v55 }
 0x1ef   :  { %v5977_v19 = vpop.xlane.xlu1 %2974 }
 0x1f0   :  { %3132 = vadd.xlane.f32.xlu0 %v2920_v24  ;;  %v2655_v24 = vadd.f32 %v2264_v58, %v7109_v5 }
 0x1f1   :  { %v2981_v59 = vpop.xlane.xlu0 %2980 }
 0x1f2   :  { %v3231_v12 = vadd.f32 %v6034_v17, %v2981_v59  ;;  %3074 = vadd.xlane.f32.xlu1 %v2891_v21  ;;  %v2654_v59 = vadd.f32 %v2260_v45, %v7109_v5  ;;  %4598 = vtanh.f32 %v2655_v24  ;;  %v1831_v45 = vcombine.high %v7117_v38, %v7117_v38 }
 0x1f3   :  { %v2983_v28 = vpop.xlane.xlu1 %2982 }
 0x1f4   :  { %v3232_v44 = vadd.f32 %v6034_v17, %v2983_v28  ;;  %3164 = vadd.xlane.f32.xlu0 %v2936_v39  ;;  %v3532_v9 = vrot.slane %v3231_v12, %v6046_v32  ;;  %v7115_v12 = vld [vmem:[#allocation16_spill] sm:$0xff]  ;;  %v4589_v28 = vpop.eup %4588  ;;  %4600 = vtanh.f32 %v2654_v59 }
 0x1f5   :  { %v6051_v57 = vpop.xlane.xlu0 %2988  ;;  %v1733_v39 = vcombine.high %v7115_v12, %v7115_v12  ;;  %v4591_v50 = vpop.eup %4590  ;;  %4602 = vtanh.f32 %v2659_v56  ;;  %v1899_v56 = vcombine.high %v5556_v43, %v5556_v43  ;;  %v1851_v43 = vcombine.high %v5911_v13, %v5911_v13 }
 0x1f6   :  { %v3536_v29 = vrot.slane %v3232_v44, %v6046_v32  ;;  %3082 = vadd.xlane.f32.xlu1 %v2895_v60  ;;  %v6097_v44 = vrot.slane %v1752_v7, %v5147_v33  ;;  %v7116_v60 = vld [vmem:[#allocation18_spill] sm:$0xff]  ;;  %v4593_v14 = vpop.eup %4592 }
 0x1f7   :  { %v6061_v37 = vpop.xlane.xlu1 %2990  ;;  %v1801_v58 = vcombine.high %v7116_v60, %v7116_v60  ;;  %v4595_v12 = vpop.eup %4594 }
 0x1f8   :  { %v6070_v3 = vsel %vm4009_vm0, %v3536_v29, %v3532_v9  ;;  %3196 = vadd.xlane.f32.xlu0 %v2952_v22  ;;  %v2658_v29 = vadd.f32 %v2276_v25, %v7109_v5  ;;  %v2296_v22 = vrot.slane %v1733_v39, %v5195_v40  ;;  %v2910_v25 = vmul.f32 %v5881_v2, %v4591_v50  ;;  %v4597_v60 = vpop.eup %4596 }
 0x1f9   :  { %v2997_v54 = vpop.xlane.xlu0 %2996  ;;  %v6120_v55 = vrot.slane %v1801_v58, %v5147_v33  ;;  %v2913_v13 = vmul.f32 %v5881_v2, %v4597_v60  ;;  %v7119_v60 = vld [vmem:[#allocation17_spill] sm:$0xff] }
 0x1fa   :  { %v3239_v21 = vadd.f32 %v6034_v17, %v2997_v54  ;;  %3090 = vadd.xlane.f32.xlu1 %v2899_v34  ;;  %v7118_v34 = vld [vmem:[#allocation20_spill] sm:$0xff]  ;;  %v2905_v54 = vmul.f32 %v5881_v2, %v4589_v28  ;;  %4604 = vtanh.f32 %v2658_v29  ;;  %v1929_v28 = vcombine.high %v5571_v51, %v5571_v51 }
 0x1fb   :  { %v2999_v27 = vpop.xlane.xlu1 %2998  ;;  %v1850_v24 = vcombine.high %v7118_v34, %v7118_v34 }
 0x1fc   :  { %v3240_v20 = vadd.f32 %v6034_v17, %v2999_v27  ;;  %3096 = vadd.xlane.f32.xlu0 %v2902_v30  ;;  %v3564_v8 = vrot.slane %v3239_v21, %v6046_v32  ;;  %v2662_v21 = vadd.f32 %v2292_v49, %v5208_v0  ;;  %v2324_v30 = vrot.slane %v6097_v44, %v5195_v40  ;;  %v4599_v51 = vpop.eup %4598 }
 0x1fd   :  { %v6091_v1 = vpop.xlane.xlu0 %3004  ;;  %v1753_v27 = vcombine.high %v5894_v63, %v5894_v63  ;;  %v2909_v49 = vmul.f32 %v5881_v2, %v4593_v14  ;;  %v2424_v34 = vrot.slane %v1929_v28, %v5195_v40  ;;  %v6170_v28 = vrot.slane %v1851_v43, %v5147_v33 }
 0x1fe   :  { %v3568_v23 = vrot.slane %v3240_v20, %v6046_v32  ;;  %3094 = vadd.xlane.f32.xlu1 %v2901_v18  ;;  %v2663_v20 = vadd.f32 %v2296_v22, %v5208_v0  ;;  %v2360_v18 = vrot.slane %v1831_v45, %v5195_v40  ;;  %4606 = vtanh.f32 %v2662_v21  ;;  %v4601_v14 = vpop.eup %4600 }
 0x1ff   :  { %v6104_v9 = vpop.xlane.xlu1 %3006  ;;  %v2914_v22 = vmul.f32 %v5881_v2, %v4595_v12  ;;  %v4603_v12 = vpop.eup %4602 }
 0x200   :  { %v6113_v42 = vsel %vm4009_vm0, %v3568_v23, %v3564_v8  ;;  %3104 = vadd.xlane.f32.xlu0 %v2906_v6  ;;  %v2670_v8 = vadd.f32 %v2324_v30, %v5211_v48  ;;  %v2356_v23 = vrot.slane %v6120_v55, %v5195_v40  ;;  %v6140_v6 = vrot.slane %v1850_v24, %v5147_v33 }
 0x201   :  { %v3013_v7 = vpop.xlane.xlu0 %3012  ;;  %4608 = vtanh.f32 %v2663_v20  ;;  %v2679_v45 = vadd.f32 %v2360_v18, %v5214_v11  ;;  %v6152_v24 = vrot.slane %v1753_v27, %v5147_v33  ;;  %v2695_v20 = vadd.f32 %v2424_v34, %v5220_v47 }
 0x202   :  { %v3247_v59 = vadd.f32 %v6034_v17, %v3013_v7  ;;  %3102 = vadd.xlane.f32.xlu1 %v2905_v54  ;;  %4610 = vtanh.f32 %v2670_v8  ;;  %v2678_v21 = vadd.f32 %v2356_v23, %v5214_v11  ;;  %v2388_v30 = vrot.slane %v6140_v6, %v5195_v40 }
 0x203   :  { %v3015_v39 = vpop.xlane.xlu1 %3014  ;;  %4612 = vtanh.f32 %v2679_v45  ;;  %v2340_v18 = vrot.slane %v6152_v24, %v5195_v40  ;;  %v1782_v8 = vcombine.high %v7119_v60, %v7119_v60  ;;  %v1734_v34 = vcombine.high %v5594_v26, %v5594_v26 }
 0x204   :  { %v3248_v63 = vadd.f32 %v6034_v17, %v3015_v39  ;;  %3112 = vadd.xlane.f32.xlu0 %v2910_v25  ;;  %v3596_v50 = vrot.slane %v3247_v59, %v6046_v32  ;;  %v6162_v59 = vrot.slane %v1899_v56, %v5147_v33  ;;  %v2918_v25 = vmul.f32 %v5881_v2, %v4599_v51 }
 0x205   :  { %v6134_v58 = vpop.xlane.xlu0 %3020  ;;  %v2917_v56 = vmul.f32 %v5881_v2, %v4601_v14  ;;  %4614 = vtanh.f32 %v2678_v21  ;;  %v2686_v51 = vadd.f32 %v2388_v30, %v5217_v61  ;;  %v2674_v14 = vadd.f32 %v2340_v18, %v5211_v48  ;;  %v7120_v21 = vld [vmem:[#allocation21_spill] sm:$0xff] }
 0x206   :  { %v3600_v29 = vrot.slane %v3248_v63, %v6046_v32  ;;  %3110 = vadd.xlane.f32.xlu1 %v2909_v49  ;;  %v4605_v49 = vpop.eup %4604  ;;  %4616 = vtanh.f32 %v2695_v20  ;;  %v1880_v30 = vcombine.high %v7120_v21, %v7120_v21  ;;  %v2328_v18 = vrot.slane %v1782_v8, %v5195_v40 }
 0x207   :  { %v6147_v38 = vpop.xlane.xlu1 %3022  ;;  %4618 = vtanh.f32 %v2686_v51  ;;  %v7124_v51 = vld [vmem:[#allocation23_spill] sm:$0xff] }
 0x208   :  { %v6155_v54 = vsel %vm4009_vm0, %v3600_v29, %v3596_v50  ;;  %3120 = vadd.xlane.f32.xlu0 %v2914_v22  ;;  %v2420_v50 = vrot.slane %v6162_v59, %v5195_v40  ;;  %v2922_v22 = vmul.f32 %v5881_v2, %v4603_v12  ;;  %v4607_v45 = vpop.eup %4606  ;;  %4620 = vtanh.f32 %v2674_v14 }
 0x209   :  { %v3029_v7 = vpop.xlane.xlu0 %3028  ;;  %v2925_v60 = vmul.f32 %v5881_v2, %v4607_v45  ;;  %v2392_v14 = vrot.slane %v1880_v30, %v5195_v40 }
 0x20a   :  { %v3255_v27 = vadd.f32 %v6034_v17, %v3029_v7  ;;  %3118 = vadd.xlane.f32.xlu1 %v2913_v13  ;;  %v2404_v7 = vrot.slane %v6170_v28, %v5195_v40  ;;  %v2694_v20 = vadd.f32 %v2420_v50, %v5220_v47  ;;  %v1802_v50 = vcombine.high %v7124_v51, %v7124_v51 }
 0x20b   :  { %v3031_v39 = vpop.xlane.xlu1 %3030  ;;  %v4609_v12 = vpop.eup %4608 }
 0x20c   :  { %v3256_v63 = vadd.f32 %v6034_v17, %v3031_v39  ;;  %3128 = vadd.xlane.f32.xlu0 %v2918_v25  ;;  %v3628_v43 = vrot.slane %v3255_v27, %v6046_v32  ;;  %v2921_v25 = vmul.f32 %v5881_v2, %v4605_v49  ;;  %v7122_v39 = vld [vmem:[#allocation22_spill] sm:$0xff]  ;;  %v2690_v21 = vadd.f32 %v2404_v7, %v5217_v61 }
 0x20d   :  { %v6176_v23 = vpop.xlane.xlu0 %3036  ;;  %v1704_v26 = vcombine.high %v7122_v39, %v7122_v39  ;;  %v2312_v39 = vrot.slane %v1734_v34, %v5195_v40  ;;  %4622 = vtanh.f32 %v2694_v20 }
 0x20e   :  { %v3632_v29 = vrot.slane %v3256_v63, %v6046_v32  ;;  %3126 = vadd.xlane.f32.xlu1 %v2917_v56  ;;  %4624 = vtanh.f32 %v2690_v21 }
 0x20f   :  { %v6186_v13 = vpop.xlane.xlu1 %3038  ;;  %v6216_v7 = vrot.slane %v1704_v26, %v5147_v33  ;;  %v2667_v20 = vadd.f32 %v2312_v39, %v5208_v0  ;;  %v7127_v26 = vld [vmem:[#allocation25_spill] sm:$0xff]  ;;  %v6237_v39 = vrot.slane %v1802_v50, %v5147_v33 }
 0x210   :  { %v6194_v27 = vsel %vm4009_vm0, %v3632_v29, %v3628_v43  ;;  %3136 = vadd.xlane.f32.xlu0 %v2922_v22  ;;  %v4611_v43 = vpop.eup %4610  ;;  %v7123_v29 = vld [vmem:[#allocation24_spill] sm:$0xff] }
 0x211   :  { %7121 = vst [vmem:[#allocation5_spill] sm:$0xff] %v6194_v27  ;;  %v3045_v63 = vpop.xlane.xlu0 %3044  ;;  %v1832_v22 = vcombine.high %v7123_v29, %v7123_v29  ;;  %v2671_v29 = vadd.f32 %v2328_v18, %v5211_v48  ;;  %v1900_v18 = vcombine.high %v7127_v26, %v7127_v26  ;;  %v2308_v21 = vrot.slane %v6216_v7, %v5195_v40 }
 0x212   :  { %v3263_v56 = vadd.f32 %v6034_v17, %v3045_v63  ;;  %3134 = vadd.xlane.f32.xlu1 %v2921_v25  ;;  %v2926_v25 = vmul.f32 %v5881_v2, %v4609_v12  ;;  %v4613_v63 = vpop.eup %4612  ;;  %v7126_v12 = vld [vmem:[#allocation26_spill] sm:$0xff] }
 0x213   :  { %v3047_v49 = vpop.xlane.xlu1 %3046  ;;  %v1930_v27 = vcombine.high %v7126_v12, %v7126_v12  ;;  %v2376_v30 = vrot.slane %v1832_v22, %v5195_v40  ;;  %4626 = vtanh.f32 %v2671_v29  ;;  %v2687_v12 = vadd.f32 %v2392_v14, %v5217_v61 }
 0x214   :  { %v3264_v8 = vadd.f32 %v6034_v17, %v3047_v49  ;;  %3142 = vadd.xlane.f32.xlu0 %v2925_v60  ;;  %v3660_v34 = vrot.slane %v3263_v56, %v6046_v32  ;;  %v2933_v60 = vmul.f32 %v5881_v2, %v4611_v43  ;;  %v4615_v49 = vpop.eup %4614  ;;  %v2942_v43 = vmul.f32 %v5881_v2, %v4613_v63 }
 0x215   :  { %v6211_v45 = vpop.xlane.xlu0 %3052  ;;  %4628 = vtanh.f32 %v2667_v20  ;;  %v2683_v63 = vadd.f32 %v2376_v30, %v5214_v11  ;;  %v2440_v29 = vrot.slane %v1930_v27, %v5195_v40  ;;  %v6251_v20 = vrot.slane %v1900_v18, %v5147_v33 }
 0x216   :  { %7125 = vst [vmem:[#allocation6_spill] sm:$0xff] %v6211_v45  ;;  %v3664_v51 = vrot.slane %v3264_v8, %v6046_v32  ;;  %3144 = vadd.xlane.f32.xlu1 %v2926_v25  ;;  %v4617_v8 = vpop.eup %4616  ;;  %4630 = vtanh.f32 %v2687_v12 }
 0x217   :  { %v6223_v45 = vpop.xlane.xlu1 %3054  ;;  %v2958_v26 = vmul.f32 %v5881_v2, %v4617_v8  ;;  %4632 = vtanh.f32 %v2683_v63  ;;  %v2699_v12 = vadd.f32 %v2440_v29, %v5220_v47 }
 0x218   :  { %v6230_v56 = vsel %vm4009_vm0, %v3664_v51, %v3660_v34  ;;  %3158 = vadd.xlane.f32.xlu0 %v2933_v60  ;;  %v2941_v34 = vmul.f32 %v5881_v2, %v4615_v49  ;;  %v4619_v51 = vpop.eup %4618  ;;  %v2372_v49 = vrot.slane %v6237_v39, %v5195_v40 }
 0x219   :  { %7128 = vst [vmem:[#allocation7_spill] sm:$0xff] %v6230_v56  ;;  %v3061_v25 = vpop.xlane.xlu0 %3060  ;;  %v4621_v56 = vpop.eup %4620 }
 0x21a   :  { %v3271_v22 = vadd.f32 %v6034_v17, %v3061_v25  ;;  %3176 = vadd.xlane.f32.xlu1 %v2942_v43  ;;  %v2666_v43 = vadd.f32 %v2308_v21, %v5208_v0  ;;  %v2949_v25 = vmul.f32 %v5881_v2, %v4619_v51  ;;  %v4623_v8 = vpop.eup %4622  ;;  %v2937_v33 = vmul.f32 %v5881_v2, %v4621_v56 }
 0x21b   :  { %v3063_v60 = vpop.xlane.xlu1 %3062  ;;  %v4625_v18 = vpop.eup %4624  ;;  %v2682_v51 = vadd.f32 %v2372_v49, %v5214_v11  ;;  %v2957_v29 = vmul.f32 %v5881_v2, %v4623_v8 }
 0x21c   :  { %v3272_v14 = vadd.f32 %v6034_v17, %v3063_v60  ;;  %3174 = vadd.xlane.f32.xlu0 %v2941_v34  ;;  %v3692_v30 = vrot.slane %v3271_v22, %v6046_v32  ;;  %v1783_v22 = vcombine.high %v5908_v36, %v5908_v36  ;;  %4634 = vtanh.f32 %v2666_v43 }
 0x21d   :  { %v6245_v50 = vpop.xlane.xlu0 %3068  ;;  %4636 = vtanh.f32 %v2699_v12  ;;  %v2953_v36 = vmul.f32 %v5881_v2, %v4625_v18  ;;  %v1881_v43 = vcombine.high %v5928_v52, %v5928_v52  ;;  %v3223_v52 = vadd.f32 %v6034_v17, %v5967_v10 }
 0x21e   :  { %v3696_v27 = vrot.slane %v3272_v14, %v6046_v32  ;;  %3208 = vadd.xlane.f32.xlu1 %v2958_v26  ;;  %v2436_v14 = vrot.slane %v6251_v20, %v5195_v40  ;;  %v4627_v26 = vpop.eup %4626  ;;  %4638 = vtanh.f32 %v2682_v51  ;;  %v1735_v51 = vcombine.high %v6077_v35, %v6077_v35 }
 0x21f   :  { %v6256_v34 = vpop.xlane.xlu1 %3070  ;;  %4640 = vtanh.f32 %v5939_v15 }
 0x220   :  { %v6260_v21 = vsel %vm4009_vm0, %v3696_v27, %v3692_v30  ;;  %3190 = vadd.xlane.f32.xlu0 %v2949_v25  ;;  %v4629_v27 = vpop.eup %4628  ;;  %v2698_v25 = vadd.f32 %v2436_v14, %v5220_v47 }
 0x221   :  { %v3077_v60 = vpop.xlane.xlu0 %3076  ;;  %v2930_v14 = vmul.f32 %v5881_v2, %v4629_v27  ;;  %v1833_v27 = vcombine.high %v6120_v55, %v6120_v55  ;;  %v2300_v55 = vrot.slane %v1735_v51, %v5195_v40 }
 0x222   :  { %v3279_v63 = vadd.f32 %v6034_v17, %v3077_v60  ;;  %3166 = vadd.xlane.f32.xlu1 %v2937_v33  ;;  %v2344_v33 = vrot.slane %v1783_v22, %v5195_v40  ;;  %v2934_v60 = vmul.f32 %v5881_v2, %v4627_v26  ;;  %v3225_v26 = vadd.f32 %v6034_v17, %v5970_v31 }
 0x223   :  { %v3079_v30 = vpop.xlane.xlu1 %3078  ;;  %4642 = vtanh.f32 %v2698_v25  ;;  %v3500_v31 = vrot.slane %v3223_v52, %v6046_v32 }
 0x224   :  { %v3280_v56 = vadd.f32 %v6034_v17, %v3079_v30  ;;  %3206 = vadd.xlane.f32.xlu0 %v2957_v29  ;;  %v3724_v8 = vrot.slane %v3279_v63, %v6046_v32  ;;  %v4631_v29 = vpop.eup %4630  ;;  %v2675_v15 = vadd.f32 %v2344_v33, %v5211_v48  ;;  %4644 = vtanh.f32 %v5951_v16 }
 0x225   :  { %v6274_v49 = vpop.xlane.xlu0 %3084  ;;  %v4633_v63 = vpop.eup %4632  ;;  %v2950_v35 = vmul.f32 %v5881_v2, %v4631_v29 }
 0x226   :  { %v3728_v12 = vrot.slane %v3280_v56, %v6046_v32  ;;  %3198 = vadd.xlane.f32.xlu1 %v2953_v36  ;;  %v2408_v56 = vrot.slane %v1881_v43, %v5195_v40  ;;  %v4635_v36 = vpop.eup %4634  ;;  %v2946_v25 = vmul.f32 %v5881_v2, %v4633_v63  ;;  %4646 = vtanh.f32 %v2675_v15 }
 0x227   :  { %v6281_v18 = vpop.xlane.xlu1 %3086  ;;  %v4637_v33 = vpop.eup %4636  ;;  %v2929_v52 = vmul.f32 %v5881_v2, %v4635_v36  ;;  %v1784_v63 = vcombine.high %v6097_v44, %v6097_v44  ;;  %4648 = vtanh.f32 %v5956_v62  ;;  %v2364_v44 = vrot.slane %v1833_v27, %v5195_v40 }
 0x228   :  { %v6289_v22 = vsel %vm4009_vm0, %v3728_v12, %v3724_v8  ;;  %3160 = vadd.xlane.f32.xlu0 %v2934_v60  ;;  %v1686_v8 = vcombine.high %v6041_v41, %v6041_v41  ;;  %v3508_v60 = vrot.slane %v3225_v26, %v6046_v32  ;;  %v2691_v41 = vadd.f32 %v2408_v56, %v5217_v61 }
 0x229   :  { %v2967_v30 = vpop.xlane.xlu0 %2966  ;;  %v2962_v51 = vmul.f32 %v5881_v2, %v4637_v33  ;;  %v1931_v36 = vcombine.high %v6162_v59, %v6162_v59  ;;  %v1882_v33 = vcombine.high %v6140_v6, %v6140_v6  ;;  %v1687_v59 = vcombine.high %v6067_v4, %v6067_v4 }
 0x22a   :  { %v3224_v10 = vadd.f32 %v6034_v17, %v2967_v30  ;;  %3152 = vadd.xlane.f32.xlu1 %v2930_v14  ;;  %v4639_v14 = vpop.eup %4638  ;;  %v2268_v26 = vrot.slane %v1686_v8, %v5195_v40  ;;  %4650 = vtanh.f32 %v2691_v41  ;;  %v1736_v4 = vcombine.high %v6216_v7, %v6216_v7 }
 0x22b   :  { %v6302_v12 = vpop.xlane.xlu1 %3140  ;;  %v4641_v56 = vpop.eup %4640  ;;  %v2945_v62 = vmul.f32 %v5881_v2, %v4639_v14  ;;  %4652 = vtanh.f32 %v5964_v46  ;;  %v2428_v46 = vrot.slane %v1931_v36, %v5195_v40  ;;  %v1785_v36 = vcombine.high %v6152_v24, %v6152_v24 }
 0x22c   :  { %v3504_v43 = vrot.slane %v3224_v10, %v6046_v32  ;;  %3192 = vadd.xlane.f32.xlu0 %v2950_v35  ;;  %v2664_v35 = vadd.f32 %v2300_v55, %v5208_v0  ;;  %v2903_v27 = vmul.f32 %v5881_v2, %v4641_v56  ;;  %v2680_v55 = vadd.f32 %v2364_v44, %v5214_v11 }
 0x22d   :  { %v6309_v29 = vpop.xlane.xlu0 %2976  ;;  %v4643_v8 = vpop.eup %4642  ;;  %v2284_v44 = vrot.slane %v1687_v59, %v5195_v40 }
 0x22e   :  { %v4010_v16 = vsel %vm4009_vm0, %v3504_v43, %v3500_v31  ;;  %3184 = vadd.xlane.f32.xlu1 %v2946_v25  ;;  %v2656_v43 = vadd.f32 %v2268_v26, %v7109_v5  ;;  %v2332_v25 = vrot.slane %v1784_v63, %v5195_v40  ;;  %4654 = vtanh.f32 %v2664_v35 }
 0x22f   :  { %v6317_v30 = vpop.xlane.xlu1 %3156  ;;  %v6322_v15 = vsel %vm4011_vm1, %v3508_v60, %v4010_v16  ;;  %v4645_v60 = vpop.eup %4644  ;;  %v2961_v16 = vmul.f32 %v5881_v2, %v4643_v8  ;;  %v2396_v63 = vrot.slane %v1882_v33, %v5195_v40  ;;  %v2696_v35 = vadd.f32 %v2428_v46, %v5220_v47 }
 0x230   :  { %3150 = vadd.xlane.f32.xlu0 %v2929_v52  ;;  %v4647_v52 = vpop.eup %4646  ;;  %4656 = vtanh.f32 %v2656_v43  ;;  %v2672_v6 = vadd.f32 %v2332_v25, %v5211_v48  ;;  %v2907_v26 = vmul.f32 %v5881_v2, %v4645_v60  ;;  %v2316_v25 = vrot.slane %v1736_v4, %v5195_v40 }
 0x231   :  { %v6325_v10 = vpop.xlane.xlu0 %2984  ;;  %4658 = vtanh.f32 %v2680_v55  ;;  %v2688_v7 = vadd.f32 %v2396_v63, %v5217_v61  ;;  %v1834_v33 = vcombine.high %v6237_v39, %v6237_v39  ;;  %v2660_v24 = vadd.f32 %v2284_v44, %v7109_v5 }
 0x232   :  { %3216 = vadd.xlane.f32.xlu1 %v2962_v51  ;;  %v4649_v51 = vpop.eup %4648  ;;  %4660 = vtanh.f32 %v2672_v6  ;;  %v2348_v55 = vrot.slane %v1785_v36, %v5195_v40  ;;  %v1883_v46 = vcombine.high %v6170_v28, %v6170_v28  ;;  %v2668_v39 = vadd.f32 %v2316_v25, %v5208_v0 }
 0x233   :  { %v6332_v31 = vpop.xlane.xlu1 %3172  ;;  %4662 = vtanh.f32 %v2696_v35  ;;  %v2380_v63 = vrot.slane %v1834_v33, %v5195_v40  ;;  %v1932_v4 = vcombine.high %v6251_v20, %v6251_v20 }
 0x234   :  { %3182 = vadd.xlane.f32.xlu0 %v2945_v62  ;;  %v2938_v62 = vmul.f32 %v5881_v2, %v4647_v52  ;;  %v4651_v8 = vpop.eup %4650  ;;  %4664 = vtanh.f32 %v2688_v7  ;;  %v2676_v28 = vadd.f32 %v2348_v55, %v5211_v48  ;;  %v2412_v35 = vrot.slane %v1883_v46, %v5195_v40 }
 0x235   :  { %v6342_v41 = vpop.xlane.xlu0 %2992  ;;  %v4653_v60 = vpop.eup %4652  ;;  %4666 = vtanh.f32 %v2660_v24  ;;  %v2684_v20 = vadd.f32 %v2380_v63, %v5214_v11  ;;  %v4679_v63 = vld [vmem:[%s7038_s5] ss:$0 sm:$0xff] }
 0x236   :  { %3098 = vadd.xlane.f32.xlu1 %v2903_v27  ;;  %v2911_v27 = vmul.f32 %v5881_v2, %v4649_v51  ;;  %v2915_v5 = vmul.f32 %v5881_v2, %v4653_v60  ;;  %4668 = vtanh.f32 %v2668_v39  ;;  %v2692_v48 = vadd.f32 %v2412_v35, %v5217_v61 }
 0x237   :  { %v6347_v14 = vpop.xlane.xlu1 %3188  ;;  %4670 = vtanh.f32 %v2676_v28  ;;  %v3228_v39 = vadd.f32 %v6034_v17, %v5977_v19 }
 0x238   :  { %3214 = vadd.xlane.f32.xlu0 %v2961_v16  ;;  %v2954_v16 = vmul.f32 %v5881_v2, %v4651_v8  ;;  %v4655_v52 = vpop.eup %4654  ;;  %4672 = vtanh.f32 %v2684_v20 }
 0x239   :  { %v6354_v56 = vpop.xlane.xlu0 %3000  ;;  %v2927_v44 = vmul.f32 %v5881_v2, %v4655_v52  ;;  %4674 = vtanh.f32 %v2692_v48  ;;  %v3520_v20 = vrot.slane %v3228_v39, %v6046_v32 }
 0x23a   :  { %3106 = vadd.xlane.f32.xlu1 %v2907_v26  ;;  %v4657_v26 = vpop.eup %4656 }
 0x23b   :  { %v6361_v43 = vpop.xlane.xlu1 %3204  ;;  %v4659_v0 = vpop.eup %4658  ;;  %v2919_v8 = vmul.f32 %v5881_v2, %v4657_v26 }
 0x23c   :  { %3168 = vadd.xlane.f32.xlu0 %v2938_v62  ;;  %v2444_v62 = vrot.slane %v1932_v4, %v5195_v40  ;;  %v4661_v7 = vpop.eup %4660  ;;  %v2943_v33 = vmul.f32 %v5881_v2, %v4659_v0 }
 0x23d   :  { %v6368_v59 = vpop.xlane.xlu0 %3008  ;;  %v2935_v40 = vmul.f32 %v5881_v2, %v4661_v7 }
 0x23e   :  { %3114 = vadd.xlane.f32.xlu1 %v2911_v27  ;;  %v4663_v27 = vpop.eup %4662  ;;  %v2700_v11 = vadd.f32 %v2444_v62, %v5220_v47 }
 0x23f   :  { %v6375_v6 = vpop.xlane.xlu1 %3148  ;;  %v4665_v24 = vpop.eup %4664  ;;  %v2959_v46 = vmul.f32 %v5881_v2, %v4663_v27  ;;  %v3229_v2 = vadd.f32 %v6034_v17, %v6309_v29 }
 0x240   :  { %3200 = vadd.xlane.f32.xlu0 %v2954_v16  ;;  %v4667_v61 = vpop.eup %4666  ;;  %v3227_v16 = vadd.f32 %v6034_v17, %v5973_v53  ;;  %4676 = vtanh.f32 %v2700_v11  ;;  %v2951_v4 = vmul.f32 %v4679_v63, %v4665_v24  ;;  %v3235_v24 = vadd.f32 %v6034_v17, %v6051_v57 }
 0x241   :  { %v6382_v51 = vpop.xlane.xlu0 %3016  ;;  %v2923_v19 = vmul.f32 %v4679_v63, %v4667_v61  ;;  %v3524_v48 = vrot.slane %v3229_v2, %v6046_v32  ;;  %v3237_v2 = vadd.f32 %v6034_v17, %v6342_v41 }
 0x242   :  { %3122 = vadd.xlane.f32.xlu1 %v2915_v5  ;;  %v4669_v5 = vpop.eup %4668  ;;  %v3516_v35 = vrot.slane %v3227_v16, %v6046_v32 }
 0x243   :  { %v6387_v36 = vpop.xlane.xlu1 %3180  ;;  %v4671_v28 = vpop.eup %4670 }
 0x244   :  { %3146 = vadd.xlane.f32.xlu0 %v2927_v44  ;;  %v3233_v44 = vadd.f32 %v6034_v17, %v6325_v10  ;;  %v4673_v7 = vpop.eup %4672 }
 0x245   :  { %v6392_v25 = vpop.xlane.xlu0 %3024 }
 0x246   :  { %3130 = vadd.xlane.f32.xlu1 %v2919_v8  ;;  %v2931_v8 = vmul.f32 %v4679_v63, %v4669_v5 }
 0x247   :  { %v6396_v60 = vpop.xlane.xlu1 %3212 }
 0x248   :  { %3178 = vadd.xlane.f32.xlu0 %v2943_v33 }
 0x249   :  { %v6400_v55 = vpop.xlane.xlu0 %3032 }
 0x24a   :  { %3162 = vadd.xlane.f32.xlu1 %v2935_v40  ;;  %v2939_v40 = vmul.f32 %v4679_v63, %v4671_v28 }
 0x24b   :  { %v2971_v52 = vpop.xlane.xlu1 %2970 }
 0x24c   :  { %v3226_v47 = vadd.f32 %v6034_v17, %v2971_v52  ;;  %3210 = vadd.xlane.f32.xlu0 %v2959_v46  ;;  %v3540_v46 = vrot.slane %v3233_v44, %v6046_v32  ;;  %v3236_v52 = vadd.f32 %v6034_v17, %v6061_v37 }
 0x24d   :  { %v6413_v26 = vpop.xlane.xlu0 %3040 }
 0x24e   :  { %v3512_v53 = vrot.slane %v3226_v47, %v6046_v32  ;;  %3194 = vadd.xlane.f32.xlu1 %v2951_v4  ;;  %v2947_v4 = vmul.f32 %v4679_v63, %v4673_v7  ;;  %v4024_v28 = vsel %vm4011_vm1, %v3540_v46, %v6070_v3  ;;  %v3552_v44 = vrot.slane %v3236_v52, %v6046_v32 }
 0x24f   :  { %v2979_v0 = vpop.xlane.xlu1 %2978 }
 0x250   :  { %v4014_v29 = vsel %vm4013_vm2, %v3512_v53, %v6322_v15  ;;  %v3230_v62 = vadd.f32 %v6034_v17, %v2979_v0  ;;  %3138 = vadd.xlane.f32.xlu0 %v2923_v19  ;;  %v4675_v15 = vpop.eup %4674  ;;  %v3548_v19 = vrot.slane %v3235_v24, %v6046_v32  ;;  %v3245_v24 = vadd.f32 %v6034_v17, %v6368_v59 }
 0x251   :  { %v4016_v33 = vsel %vm4015_vm3, %v3516_v35, %v4014_v29  ;;  %v6425_v27 = vpop.xlane.xlu0 %3048  ;;  %v4677_v5 = vpop.eup %4676  ;;  %v2955_v37 = vmul.f32 %v4679_v63, %v4675_v15  ;;  %v3241_v35 = vadd.f32 %v6034_v17, %v6354_v56  ;;  %v3243_v56 = vadd.f32 %v6034_v17, %v6091_v1 }
 0x252   :  { %v4018_v10 = vsel %vm4017_vm4, %v3520_v20, %v4016_v33  ;;  %v3528_v11 = vrot.slane %v3230_v62, %v6046_v32  ;;  %3154 = vadd.xlane.f32.xlu1 %v2931_v8  ;;  %v2963_v29 = vmul.f32 %v4679_v63, %v4677_v5  ;;  %v3556_v62 = vrot.slane %v3237_v2, %v6046_v32 }
 0x253   :  { %v4020_v61 = vsel %vm4019_vm5, %v3524_v48, %v4018_v10  ;;  %v2987_v16 = vpop.xlane.xlu1 %2986  ;;  %v3572_v33 = vrot.slane %v3241_v35, %v6046_v32  ;;  %v3244_v63 = vadd.f32 %v6034_v17, %v6104_v9  ;;  %v3252_v35 = vadd.f32 %v6034_v17, %v6147_v38 }
 0x254   :  { %v4022_v39 = vsel %vm4021_vm6, %v3528_v11, %v4020_v61  ;;  %v3234_v47 = vadd.f32 %v6034_v17, %v2987_v16  ;;  %3170 = vadd.xlane.f32.xlu0 %v2939_v40  ;;  %v3580_v61 = vrot.slane %v3243_v56, %v6046_v32  ;;  %v3249_v16 = vadd.f32 %v6034_v17, %v6382_v51 }
 0x255   :  { %4145 = vst.msk [vmem:[%s7040_s7] sm:$0xff] %vm4144_vm7, %v4022_v39  ;;  %v6443_v57 = vpop.xlane.xlu0 %3056  ;;  %v4031_v9 = vsel %vm4011_vm1, %v3572_v33, %v6113_v42  ;;  %v3584_v59 = vrot.slane %v3244_v63, %v6046_v32  ;;  %v3251_v51 = vadd.f32 %v6034_v17, %v6134_v58 }
 0x256   :  { %v3544_v53 = vrot.slane %v3234_v47, %v6046_v32  ;;  %3186 = vadd.xlane.f32.xlu1 %v2947_v4  ;;  %v3588_v4 = vrot.slane %v3245_v24, %v6046_v32  ;;  %v3260_v24 = vadd.f32 %v6034_v17, %v6186_v13 }
 0x257   :  { %v2995_v41 = vpop.xlane.xlu1 %2994 }
 0x258   :  { %v4025_v0 = vsel %vm4013_vm2, %v3544_v53, %v4024_v28  ;;  %v3238_v20 = vadd.f32 %v6034_v17, %v2995_v41  ;;  %3202 = vadd.xlane.f32.xlu0 %v2955_v37  ;;  %v3604_v37 = vrot.slane %v3249_v16, %v6046_v32 }
 0x259   :  { %v4026_v8 = vsel %vm4015_vm3, %v3548_v19, %v4025_v0  ;;  %v6456_v7 = vpop.xlane.xlu0 %3064  ;;  %v3253_v0 = vadd.f32 %v6034_v17, %v6392_v25  ;;  %v3616_v25 = vrot.slane %v3252_v35, %v6046_v32 }
 0x25a   :  { %v4027_v3 = vsel %vm4017_vm4, %v3552_v44, %v4026_v8  ;;  %v3560_v48 = vrot.slane %v3238_v20, %v6046_v32  ;;  %3218 = vadd.xlane.f32.xlu1 %v2963_v29  ;;  %v3612_v29 = vrot.slane %v3251_v51, %v6046_v32  ;;  %v4038_v38 = vsel %vm4011_vm1, %v3604_v37, %v6155_v54 }
 0x25b   :  { %v4028_v10 = vsel %vm4019_vm5, %v3556_v62, %v4027_v3  ;;  %v3003_v11 = vpop.xlane.xlu1 %3002  ;;  %v3257_v62 = vadd.f32 %v6034_v17, %v6400_v55  ;;  %v3620_v56 = vrot.slane %v3253_v0, %v6046_v32  ;;  %v3259_v55 = vadd.f32 %v6034_v17, %v6176_v23 }
 0x25c   :  { %v4029_v40 = vsel %vm4021_vm6, %v3560_v48, %v4028_v10  ;;  %v3242_v15 = vadd.f32 %v6034_v17, %v3003_v11  ;;  %v3268_v0 = vadd.f32 %v6034_v17, %v6223_v45 }
 0x25d   :  { %4146 = vst.msk [vmem:[%s7040_s7 + $0x8] sm:$0xff] %vm4144_vm7, %v4029_v40  ;;  %v6474_v1 = vpop.xlane.xlu0 %3072  ;;  %v3636_v63 = vrot.slane %v3257_v62, %v6046_v32 }
 0x25e   :  { %v3576_v46 = vrot.slane %v3242_v15, %v6046_v32 }
 0x25f   :  { %v3011_v52 = vpop.xlane.xlu1 %3010 }
 0x260   :  { %v4032_v39 = vsel %vm4013_vm2, %v3576_v46, %v4031_v9  ;;  %v3246_v47 = vadd.f32 %v6034_v17, %v3011_v52  ;;  %v3261_v9 = vadd.f32 %v6034_v17, %v6413_v26  ;;  %v3644_v52 = vrot.slane %v3259_v55, %v6046_v32 }
 0x261   :  { %v4033_v5 = vsel %vm4015_vm3, %v3580_v61, %v4032_v39  ;;  %v6487_v2 = vpop.xlane.xlu0 %3080  ;;  %v3265_v39 = vadd.f32 %v6034_v17, %v6425_v27  ;;  %v3648_v26 = vrot.slane %v3260_v24, %v6046_v32 }
 0x262   :  { %v4034_v53 = vsel %vm4017_vm4, %v3584_v59, %v4033_v5  ;;  %v3592_v42 = vrot.slane %v3246_v47, %v6046_v32  ;;  %v7129_v59 = vld [vmem:[#allocation5_spill] sm:$0xff] }
 0x263   :  { %v4035_v19 = vsel %vm4019_vm5, %v3588_v4, %v4034_v53  ;;  %v3019_v28 = vpop.xlane.xlu1 %3018  ;;  %v4045_v13 = vsel %vm4011_vm1, %v3636_v63, %v7129_v59  ;;  %v3652_v53 = vrot.slane %v3261_v9, %v6046_v32  ;;  %v3668_v35 = vrot.slane %v3265_v39, %v6046_v32 }
 0x264   :  { %v4036_v41 = vsel %vm4021_vm6, %v3592_v42, %v4035_v19  ;;  %v3250_v44 = vadd.f32 %v6034_v17, %v3019_v28  ;;  %v7130_v28 = vld [vmem:[#allocation6_spill] sm:$0xff]  ;;  %v3276_v9 = vadd.f32 %v6034_v17, %v6256_v34  ;;  %v3277_v59 = vadd.f32 %v6034_v17, %v6474_v1 }
 0x265   :  { %4147 = vst.msk [vmem:[%s7040_s7 + $0x10] sm:$0xff] %vm4144_vm7, %v4036_v41  ;;  %v6505_v58 = vpop.xlane.xlu0 %3088  ;;  %v3267_v27 = vadd.f32 %v6034_v17, %v7130_v28 }
 0x266   :  { %v3608_v20 = vrot.slane %v3250_v44, %v6046_v32  ;;  %v3712_v1 = vrot.slane %v3276_v9, %v6046_v32 }
 0x267   :  { %v3027_v8 = vpop.xlane.xlu1 %3026 }
 0x268   :  { %v4039_v3 = vsel %vm4013_vm2, %v3608_v20, %v4038_v38  ;;  %v3254_v48 = vadd.f32 %v6034_v17, %v3027_v8  ;;  %v3269_v38 = vadd.f32 %v6034_v17, %v6443_v57  ;;  %v3680_v57 = vrot.slane %v3268_v0, %v6046_v32 }
 0x269   :  { %v4040_v33 = vsel %vm4015_vm3, %v3612_v29, %v4039_v3  ;;  %v6518_v10 = vpop.xlane.xlu0 %3092  ;;  %v7131_v3 = vld [vmem:[#allocation7_spill] sm:$0xff] }
 0x26a   :  { %v4041_v11 = vsel %vm4017_vm4, %v3616_v25, %v4040_v33  ;;  %v3624_v54 = vrot.slane %v3254_v48, %v6046_v32  ;;  %v3676_v25 = vrot.slane %v3267_v27, %v6046_v32  ;;  %v4052_v45 = vsel %vm4011_vm1, %v3668_v35, %v7131_v3 }
 0x26b   :  { %v4042_v40 = vsel %vm4019_vm5, %v3620_v56, %v4041_v11  ;;  %v3035_v15 = vpop.xlane.xlu1 %3034  ;;  %v3273_v48 = vadd.f32 %v6034_v17, %v6456_v7  ;;  %v3275_v7 = vadd.f32 %v6034_v17, %v6245_v50 }
 0x26c   :  { %v4043_v46 = vsel %vm4021_vm6, %v3624_v54, %v4042_v40  ;;  %v3258_v61 = vadd.f32 %v6034_v17, %v3035_v15  ;;  %v3684_v54 = vrot.slane %v3269_v38, %v6046_v32 }
 0x26d   :  { %4148 = vst.msk [vmem:[%s7040_s7 + $0x18] sm:$0xff] %vm4144_vm7, %v4043_v46  ;;  %v6536_v23 = vpop.xlane.xlu0 %3100  ;;  %v3700_v24 = vrot.slane %v3273_v48, %v6046_v32  ;;  %v3708_v39 = vrot.slane %v3275_v7, %v6046_v32 }
 0x26e   :  { %v3640_v16 = vrot.slane %v3258_v61, %v6046_v32 }
 0x26f   :  { %v3043_v47 = vpop.xlane.xlu1 %3042  ;;  %v4059_v34 = vsel %vm4011_vm1, %v3700_v24, %v6260_v21 }
 0x270   :  { %v4046_v4 = vsel %vm4013_vm2, %v3640_v16, %v4045_v13  ;;  %v3262_v5 = vadd.f32 %v6034_v17, %v3043_v47  ;;  %v3281_v47 = vadd.f32 %v6034_v17, %v6487_v2  ;;  %v3283_v2 = vadd.f32 %v6034_v17, %v6274_v49 }
 0x271   :  { %v4047_v42 = vsel %vm4015_vm3, %v3644_v52, %v4046_v4  ;;  %v6549_v51 = vpop.xlane.xlu0 %3108 }
 0x272   :  { %v4048_v37 = vsel %vm4017_vm4, %v3648_v26, %v4047_v42  ;;  %v3656_v19 = vrot.slane %v3262_v5, %v6046_v32  ;;  %v3732_v28 = vrot.slane %v3281_v47, %v6046_v32  ;;  %v3740_v38 = vrot.slane %v3283_v2, %v6046_v32 }
 0x273   :  { %v4049_v41 = vsel %vm4019_vm5, %v3652_v53, %v4048_v37  ;;  %v3051_v44 = vpop.xlane.xlu1 %3050  ;;  %v3716_v53 = vrot.slane %v3277_v59, %v6046_v32  ;;  %v6686_v2 = vadd.f32 %v6034_v17, %v6302_v12  ;;  %v6708_v12 = vadd.f32 %v6034_v17, %v6375_v6 }
 0x274   :  { %v4050_v20 = vsel %vm4021_vm6, %v3656_v19, %v4049_v41  ;;  %v3266_v29 = vadd.f32 %v6034_v17, %v3051_v44  ;;  %v3284_v41 = vadd.f32 %v6034_v17, %v6281_v18  ;;  %v4066_v18 = vsel %vm4011_vm1, %v3732_v28, %v6289_v22 }
 0x275   :  { %4149 = vst.msk [vmem:[%s7040_s7 + $0x20] sm:$0xff] %vm4144_vm7, %v4050_v20  ;;  %v6567_v62 = vpop.xlane.xlu0 %3116  ;;  %v3285_v20 = vadd.f32 %v6034_v17, %v6505_v58  ;;  %v6690_v28 = vadd.f32 %v6034_v17, %v6317_v30  ;;  %v6712_v30 = vadd.f32 %v6034_v17, %v6387_v36  ;;  %v3287_v6 = vadd.f32 %v6034_v17, %v6518_v10 }
 0x276   :  { %v3672_v8 = vrot.slane %v3266_v29, %v6046_v32  ;;  %v3868_v10 = vrot.slane %v6708_v12, %v6046_v32 }
 0x277   :  { %v3059_v56 = vpop.xlane.xlu1 %3058 }
 0x278   :  { %v4053_v33 = vsel %vm4013_vm2, %v3672_v8, %v4052_v45  ;;  %v3270_v11 = vadd.f32 %v6034_v17, %v3059_v56  ;;  %v3748_v45 = vrot.slane %v3285_v20, %v6046_v32  ;;  %v3884_v20 = vrot.slane %v6690_v28, %v6046_v32 }
 0x279   :  { %v4054_v55 = vsel %vm4015_vm3, %v3676_v25, %v4053_v33  ;;  %v6580_v63 = vpop.xlane.xlu0 %3124  ;;  %v3744_v25 = vrot.slane %v3284_v41, %v6046_v32 }
 0x27a   :  { %v4055_v40 = vsel %vm4017_vm4, %v3680_v57, %v4054_v55  ;;  %v3688_v15 = vrot.slane %v3270_v11, %v6046_v32 }
 0x27b   :  { %v4056_v46 = vsel %vm4019_vm5, %v3684_v54, %v4055_v40  ;;  %v3067_v61 = vpop.xlane.xlu1 %3066 }
 0x27c   :  { %v4057_v16 = vsel %vm4021_vm6, %v3688_v15, %v4056_v46  ;;  %v3274_v52 = vadd.f32 %v6034_v17, %v3067_v61 }
 0x27d   :  { %4150 = vst.msk [vmem:[%s7040_s7 + $0x28] sm:$0xff] %vm4144_vm7, %v4057_v16  ;;  %v6598_v50 = vpop.xlane.xlu0 %3132 }
 0x27e   :  { %v3704_v13 = vrot.slane %v3274_v52, %v6046_v32 }
 0x27f   :  { %v3075_v26 = vpop.xlane.xlu1 %3074 }
 0x280   :  { %v4060_v4 = vsel %vm4013_vm2, %v3704_v13, %v4059_v34  ;;  %v3278_v5 = vadd.f32 %v6034_v17, %v3075_v26 }
 0x281   :  { %v4061_v42 = vsel %vm4015_vm3, %v3708_v39, %v4060_v4  ;;  %v6611_v37 = vpop.xlane.xlu0 %3164 }
 0x282   :  { %v4062_v19 = vsel %vm4017_vm4, %v3712_v1, %v4061_v42  ;;  %v3720_v21 = vrot.slane %v3278_v5, %v6046_v32 }
 0x283   :  { %v4063_v27 = vsel %vm4019_vm5, %v3716_v53, %v4062_v19  ;;  %v3083_v35 = vpop.xlane.xlu1 %3082 }
 0x284   :  { %v4064_v44 = vsel %vm4021_vm6, %v3720_v21, %v4063_v27  ;;  %v3282_v0 = vadd.f32 %v6034_v17, %v3083_v35  ;;  %v6694_v27 = vadd.f32 %v6034_v17, %v6332_v31  ;;  %v6698_v35 = vadd.f32 %v6034_v17, %v6347_v14 }
 0x285   :  { %4151 = vst.msk [vmem:[%s7040_s7 + $0x30] sm:$0xff] %vm4144_vm7, %v4064_v44  ;;  %v6629_v49 = vpop.xlane.xlu0 %3196  ;;  %v6704_v44 = vadd.f32 %v6034_v17, %v6361_v43  ;;  %v3852_v14 = vrot.slane %v6686_v2, %v6046_v32  ;;  %v6723_v43 = vadd.f32 %v6034_v17, %v6396_v60 }
 0x286   :  { %v3736_v29 = vrot.slane %v3282_v0, %v6046_v32  ;;  %v3916_v36 = vrot.slane %v6694_v27, %v6046_v32 }
 0x287   :  { %v3091_v8 = vpop.xlane.xlu1 %3090  ;;  %v3980_v60 = vrot.slane %v6704_v44, %v6046_v32 }
 0x288   :  { %v4067_v3 = vsel %vm4013_vm2, %v3736_v29, %v4066_v18  ;;  %v3286_v58 = vadd.f32 %v6034_v17, %v3091_v8  ;;  %v3948_v29 = vrot.slane %v6698_v35, %v6046_v32  ;;  %v3295_v18 = vadd.f32 %v6034_v17, %v6549_v51 }
 0x289   :  { %v4068_v48 = vsel %vm4015_vm3, %v3740_v38, %v4067_v3  ;;  %v3097_v56 = vpop.xlane.xlu0 %3096  ;;  %v3291_v38 = vadd.f32 %v6034_v17, %v6536_v23  ;;  %v3303_v23 = vadd.f32 %v6034_v17, %v6580_v63 }
 0x28a   :  { %v4069_v57 = vsel %vm4017_vm4, %v3744_v25, %v4068_v48  ;;  %v3752_v33 = vrot.slane %v3286_v58, %v6046_v32  ;;  %v6746_v58 = vadd.f32 %v6034_v17, %v6567_v62  ;;  %v3289_v51 = vadd.f32 %v6034_v17, %v3097_v56 }
 0x28b   :  { %v4070_v11 = vsel %vm4019_vm5, %v3748_v45, %v4069_v57  ;;  %v3095_v54 = vpop.xlane.xlu1 %3094  ;;  %v6763_v62 = vadd.f32 %v6034_v17, %v6611_v37  ;;  %v3772_v63 = vrot.slane %v3291_v38, %v6046_v32  ;;  %v3788_v56 = vrot.slane %v3295_v18, %v6046_v32 }
 0x28c   :  { %v4071_v22 = vsel %vm4021_vm6, %v3752_v33, %v4070_v11  ;;  %v3288_v31 = vadd.f32 %v6034_v17, %v3095_v54  ;;  %v3756_v33 = vrot.slane %v3287_v6, %v6046_v32  ;;  %v6759_v11 = vadd.f32 %v6034_v17, %v6598_v50 }
 0x28d   :  { %4152 = vst.msk [vmem:[%s7040_s7 + $0x38] sm:$0xff] %vm4144_vm7, %v4071_v22  ;;  %v3105_v55 = vpop.xlane.xlu0 %3104  ;;  %v3804_v37 = vrot.slane %v6746_v58, %v6046_v32  ;;  %v3820_v38 = vrot.slane %v3303_v23, %v6046_v32  ;;  %v3764_v18 = vrot.slane %v3289_v51, %v6046_v32 }
 0x28e   :  { %v3760_v3 = vrot.slane %v3288_v31, %v6046_v32  ;;  %v3293_v54 = vadd.f32 %v6034_v17, %v3105_v55  ;;  %v7132_v35 = vrot.slane %v6759_v11, %v6046_v32  ;;  %v7133_v11 = vrot.slane %v6712_v30, %v6046_v32 }
 0x28f   :  { %v3103_v40 = vpop.xlane.xlu1 %3102  ;;  %v7134_v30 = vrot.slane %v6763_v62, %v6046_v32  ;;  %v7135_v62 = vrot.slane %v6723_v43, %v6046_v32 }
 0x290   :  { %v3292_v22 = vadd.f32 %v6034_v17, %v3103_v40  ;;  %v4072_v31 = vsel %vm4009_vm0, %v3760_v3, %v3756_v33  ;;  %v3780_v58 = vrot.slane %v3293_v54, %v6046_v32 }
 0x291   :  { %v3113_v15 = vpop.xlane.xlu0 %3112 }
 0x292   :  { %v3297_v6 = vadd.f32 %v6034_v17, %v3113_v15  ;;  %v3776_v23 = vrot.slane %v3292_v22, %v6046_v32 }
 0x293   :  { %v3111_v7 = vpop.xlane.xlu1 %3110 }
 0x294   :  { %v3296_v45 = vadd.f32 %v6034_v17, %v3111_v7 }
 0x295   :  { %v6648_v24 = vpop.xlane.xlu0 %3120 }
 0x296   :  { %v3792_v55 = vrot.slane %v3296_v45, %v6046_v32  ;;  %v4073_v45 = vsel %vm4011_vm1, %v3764_v18, %v4072_v31  ;;  %v3301_v54 = vadd.f32 %v6034_v17, %v6648_v24 }
 0x297   :  { %v6650_v46 = vpop.xlane.xlu1 %3118 }
 0x299   :  { %v6652_v61 = vpop.xlane.xlu0 %3128 }
 0x29a   :  { %v3305_v22 = vadd.f32 %v6034_v17, %v6652_v61 }
 0x29b   :  { %v3127_v9 = vpop.xlane.xlu1 %3126 }
 0x29c   :  { %v3304_v50 = vadd.f32 %v6034_v17, %v3127_v9  ;;  %v6786_v9 = vadd.f32 %v6034_v17, %v6629_v49 }
 0x29d   :  { %v6654_v16 = vpop.xlane.xlu0 %3136 }
 0x29e   :  { %v3824_v15 = vrot.slane %v3304_v50, %v6046_v32  ;;  %v6810_v50 = vadd.f32 %v6034_v17, %v6654_v16 }
 0x29f   :  { %v6656_v52 = vpop.xlane.xlu1 %3134 }
 0x2a1   :  { %v6658_v59 = vpop.xlane.xlu0 %3142 }
 0x2a2   :  { %v3312_v51 = vadd.f32 %v6034_v17, %v6658_v59 }
 0x2a3   :  { %v6660_v13 = vpop.xlane.xlu1 %3144 }
 0x2a4   :  { %v3856_v24 = vrot.slane %v3312_v51, %v6046_v32  ;;  %v3313_v61 = vadd.f32 %v6034_v17, %v6660_v13  ;;  %v3964_v51 = vrot.slane %v6786_v9, %v6046_v32  ;;  %v3812_v13 = vrot.slane %v3301_v54, %v6046_v32 }
 0x2a5   :  { %v6662_v39 = vpop.xlane.xlu0 %3158 }
 0x2a6   :  { %v3320_v16 = vadd.f32 %v6034_v17, %v6662_v39 }
 0x2a7   :  { %v6664_v34 = vpop.xlane.xlu1 %3176 }
 0x2a8   :  { %v3329_v2 = vadd.f32 %v6034_v17, %v6664_v34 }
 0x2a9   :  { %v6666_v47 = vpop.xlane.xlu0 %3174 }
 0x2ab   :  { %v6668_v26 = vpop.xlane.xlu1 %3208 }
 0x2ad   :  { %v6670_v1 = vpop.xlane.xlu0 %3190 }
 0x2af   :  { %v6672_v4 = vpop.xlane.xlu1 %3166 }
 0x2b1   :  { %v6674_v5 = vpop.xlane.xlu0 %3206 }
 0x2b3   :  { %v6676_v53 = vpop.xlane.xlu1 %3198 }
 0x2b5   :  { %v6678_v42 = vpop.xlane.xlu0 %3160 }
 0x2b7   :  { %v6680_v19 = vpop.xlane.xlu1 %3152 }
 0x2b8   :  { %v3317_v12 = vadd.f32 %v6034_v17, %v6680_v19  ;;  %v3340_v19 = vadd.f32 %v6034_v17, %v6676_v53 }
 0x2b9   :  { %v6682_v21 = vpop.xlane.xlu0 %3192 }
 0x2ba   :  { %v3876_v53 = vrot.slane %v3317_v12, %v6046_v32 }
 0x2bb   :  { %v6700_v41 = vpop.xlane.xlu1 %3184 }
 0x2bd   :  { %v6715_v0 = vpop.xlane.xlu0 %3150 }
 0x2bf   :  { %v6735_v8 = vpop.xlane.xlu1 %3216 }
 0x2c1   :  { %v6752_v48 = vpop.xlane.xlu0 %3182 }
 0x2c3   :  { %v3099_v7 = vpop.xlane.xlu1 %3098 }
 0x2c4   :  { %v3290_v57 = vadd.f32 %v6034_v17, %v3099_v7  ;;  %v3796_v7 = vrot.slane %v3297_v6, %v6046_v32  ;;  %v3300_v6 = vadd.f32 %v6034_v17, %v6650_v46  ;;  %v4086_v46 = vsel %vm4009_vm0, %v3824_v15, %v3820_v38 }
 0x2c5   :  { %v6778_v25 = vpop.xlane.xlu0 %3214  ;;  %v3844_v15 = vrot.slane %v6810_v50, %v6046_v32 }
 0x2c6   :  { %v3768_v3 = vrot.slane %v3290_v57, %v6046_v32  ;;  %v4079_v57 = vsel %vm4009_vm0, %v3792_v55, %v3788_v56  ;;  %v3808_v39 = vrot.slane %v3300_v6, %v6046_v32 }
 0x2c7   :  { %v3107_v33 = vpop.xlane.xlu1 %3106 }
 0x2c8   :  { %v4074_v40 = vsel %vm4013_vm2, %v3768_v3, %v4073_v45  ;;  %v3294_v49 = vadd.f32 %v6034_v17, %v3107_v33  ;;  %v3828_v45 = vrot.slane %v3305_v22, %v6046_v32 }
 0x2c9   :  { %v4075_v59 = vsel %vm4015_vm3, %v3772_v63, %v4074_v40  ;;  %v6804_v31 = vpop.xlane.xlu0 %3168  ;;  %v3328_v63 = vadd.f32 %v6034_v17, %v6666_v47  ;;  %v4080_v47 = vsel %vm4011_vm1, %v3796_v7, %v4079_v57  ;;  %v3860_v7 = vrot.slane %v3313_v61, %v6046_v32 }
 0x2ca   :  { %v4076_v18 = vsel %vm4017_vm4, %v3776_v23, %v4075_v59  ;;  %v3784_v56 = vrot.slane %v3294_v49, %v6046_v32  ;;  %v4093_v49 = vsel %vm4009_vm0, %v3856_v24, %v3852_v14  ;;  %v4087_v22 = vsel %vm4011_vm1, %v3828_v45, %v4086_v46 }
 0x2cb   :  { %v4077_v55 = vsel %vm4019_vm5, %v3780_v58, %v4076_v18  ;;  %v3115_v40 = vpop.xlane.xlu1 %3114  ;;  %v6841_v58 = vadd.f32 %v6034_v17, %v6656_v52  ;;  %v3920_v57 = vrot.slane %v3328_v63, %v6046_v32  ;;  %v3888_v59 = vrot.slane %v3320_v16, %v6046_v32 }
 0x2cc   :  { %v4078_v3 = vsel %vm4021_vm6, %v3784_v56, %v4077_v55  ;;  %v3298_v23 = vadd.f32 %v6034_v17, %v3115_v40  ;;  %v3336_v52 = vadd.f32 %v6034_v17, %v6670_v1  ;;  %v3345_v14 = vadd.f32 %v6034_v17, %v6668_v26 }
 0x2cd   :  { %4153 = vst.msk [vmem:[%s7040_s7 + $0x40] sm:$0xff] %vm4144_vm7, %v4078_v3  ;;  %v6834_v38 = vpop.xlane.xlu0 %3200  ;;  %v3344_v56 = vadd.f32 %v6034_v17, %v6674_v5  ;;  %v3840_v63 = vrot.slane %v6841_v58, %v6046_v32  ;;  %v4094_v34 = vsel %vm4011_vm1, %v3860_v7, %v4093_v49  ;;  %v4107_v26 = vsel %vm4009_vm0, %v3920_v57, %v3916_v36 }
 0x2ce   :  { %v3800_v33 = vrot.slane %v3298_v23, %v6046_v32  ;;  %v3321_v5 = vadd.f32 %v6034_v17, %v6678_v42  ;;  %v3952_v16 = vrot.slane %v3336_v52, %v6046_v32  ;;  %v4100_v27 = vsel %vm4009_vm0, %v3888_v59, %v3884_v20 }
 0x2cf   :  { %v3123_v54 = vpop.xlane.xlu1 %3122  ;;  %v3924_v36 = vrot.slane %v3329_v2, %v6046_v32  ;;  %v3988_v42 = vrot.slane %v3345_v14, %v6046_v32  ;;  %v3337_v49 = vadd.f32 %v6034_v17, %v6682_v21 }
 0x2d0   :  { %v4081_v6 = vsel %vm4013_vm2, %v3800_v33, %v4080_v47  ;;  %v3302_v18 = vadd.f32 %v6034_v17, %v3123_v54  ;;  %v3892_v33 = vrot.slane %v3321_v5, %v6046_v32 }
 0x2d1   :  { %v4082_v24 = vsel %vm4015_vm3, %v3804_v37, %v4081_v6  ;;  %v3147_v61 = vpop.xlane.xlu0 %3146  ;;  %v4108_v57 = vsel %vm4011_vm1, %v3924_v36, %v4107_v26  ;;  %v3332_v26 = vadd.f32 %v6034_v17, %v6752_v48  ;;  %v3325_v48 = vadd.f32 %v6034_v17, %v6804_v31 }
 0x2d2   :  { %v4083_v1 = vsel %vm4017_vm4, %v3808_v39, %v4082_v24  ;;  %v3816_v55 = vrot.slane %v3302_v18, %v6046_v32  ;;  %v3314_v40 = vadd.f32 %v6034_v17, %v3147_v61  ;;  %v3324_v39 = vadd.f32 %v6034_v17, %v6672_v4 }
 0x2d3   :  { %v4084_v37 = vsel %vm4019_vm5, %v3812_v13, %v4083_v1  ;;  %v3131_v46 = vpop.xlane.xlu1 %3130  ;;  %v3984_v13 = vrot.slane %v3344_v56, %v6046_v32  ;;  %v4114_v4 = vsel %vm4009_vm0, %v3952_v16, %v3948_v29  ;;  %v4101_v14 = vsel %vm4011_vm1, %v3892_v33, %v4100_v27 }
 0x2d4   :  { %v4085_v3 = vsel %vm4021_vm6, %v3816_v55, %v4084_v37  ;;  %v3864_v23 = vrot.slane %v3314_v40, %v6046_v32  ;;  %v3306_v45 = vadd.f32 %v6034_v17, %v3131_v46  ;;  %v3904_v18 = vrot.slane %v3324_v39, %v6046_v32 }
 0x2d5   :  { %4154 = vst.msk [vmem:[%s7040_s7 + $0x48] sm:$0xff] %vm4144_vm7, %v4085_v3  ;;  %v3179_v47 = vpop.xlane.xlu0 %3178  ;;  %v4121_v21 = vsel %vm4009_vm0, %v3984_v13, %v3980_v60  ;;  %v3333_v27 = vadd.f32 %v6034_v17, %v6700_v41  ;;  %v3348_v41 = vadd.f32 %v6034_v17, %v6778_v25  ;;  %v3968_v25 = vrot.slane %v3340_v19, %v6046_v32 }
 0x2d6   :  { %v4095_v58 = vsel %vm4013_vm2, %v3864_v23, %v4094_v34  ;;  %v3832_v28 = vrot.slane %v3306_v45, %v6046_v32  ;;  %v3330_v20 = vadd.f32 %v6034_v17, %v3179_v47  ;;  %v4122_v55 = vsel %vm4011_vm1, %v3988_v42, %v4121_v21 }
 0x2d7   :  { %v4096_v7 = vsel %vm4015_vm3, %v3868_v10, %v4095_v58  ;;  %v3163_v54 = vpop.xlane.xlu1 %3162  ;;  %v3316_v10 = vadd.f32 %v6034_v17, %v6715_v0  ;;  %v3956_v0 = vrot.slane %v3337_v49, %v6046_v32  ;;  %v3936_v58 = vrot.slane %v3332_v26, %v6046_v32 }
 0x2d8   :  { %v4088_v59 = vsel %vm4013_vm2, %v3832_v28, %v4087_v22  ;;  %v3928_v52 = vrot.slane %v3330_v20, %v6046_v32  ;;  %v3322_v6 = vadd.f32 %v6034_v17, %v3163_v54  ;;  %v3908_v9 = vrot.slane %v3325_v48, %v6046_v32 }
 0x2d9   :  { %v4089_v29 = vsel %vm4015_vm3, %v7132_v35, %v4088_v59  ;;  %v3211_v22 = vpop.xlane.xlu0 %3210  ;;  %v3872_v34 = vrot.slane %v3316_v10, %v6046_v32  ;;  %v4115_v45 = vsel %vm4011_vm1, %v3956_v0, %v4114_v4 }
 0x2da   :  { %v4109_v2 = vsel %vm4013_vm2, %v3928_v52, %v4108_v57  ;;  %v3896_v44 = vrot.slane %v3322_v6, %v6046_v32  ;;  %v3346_v60 = vadd.f32 %v6034_v17, %v3211_v22  ;;  %v4090_v23 = vsel %vm4017_vm4, %v3840_v63, %v4089_v29 }
 0x2db   :  { %v4110_v56 = vsel %vm4015_vm3, %v7133_v11, %v4109_v2  ;;  %v3195_v24 = vpop.xlane.xlu1 %3194  ;;  %v4097_v63 = vsel %vm4017_vm4, %v3872_v34, %v4096_v7  ;;  %v4091_v31 = vsel %vm4019_vm5, %v3844_v15, %v4090_v23  ;;  %v3940_v52 = vrot.slane %v3333_v27, %v6046_v32 }
 0x2dc   :  { %v4102_v61 = vsel %vm4013_vm2, %v3896_v44, %v4101_v14  ;;  %v3992_v1 = vrot.slane %v3346_v60, %v6046_v32  ;;  %v3338_v40 = vadd.f32 %v6034_v17, %v3195_v24  ;;  %v4098_v50 = vsel %vm4019_vm5, %v3876_v53, %v4097_v63 }
 0x2dd   :  { %v4103_v5 = vsel %vm4015_vm3, %v7134_v30, %v4102_v61  ;;  %v3139_v37 = vpop.xlane.xlu0 %3138  ;;  %v4111_v4 = vsel %vm4017_vm4, %v3936_v58, %v4110_v56  ;;  %v4000_v6 = vrot.slane %v3348_v41, %v6046_v32 }
 0x2de   :  { %v4123_v46 = vsel %vm4013_vm2, %v3992_v1, %v4122_v55  ;;  %v3960_v16 = vrot.slane %v3338_v40, %v6046_v32  ;;  %v3310_v3 = vadd.f32 %v6034_v17, %v3139_v37  ;;  %v4104_v7 = vsel %vm4017_vm4, %v3904_v18, %v4103_v5 }
 0x2df   :  { %v4124_v36 = vsel %vm4015_vm3, %v7135_v62, %v4123_v46  ;;  %v3155_v42 = vpop.xlane.xlu1 %3154  ;;  %v4105_v21 = vsel %vm4019_vm5, %v3908_v9, %v4104_v7  ;;  %v4112_v18 = vsel %vm4019_vm5, %v3940_v52, %v4111_v4 }
 0x2e0   :  { %v4116_v13 = vsel %vm4013_vm2, %v3960_v16, %v4115_v45  ;;  %v3848_v47 = vrot.slane %v3310_v3, %v6046_v32  ;;  %v3318_v39 = vadd.f32 %v6034_v17, %v3155_v42  ;;  %v4125_v19 = vsel %vm4017_vm4, %v4000_v6, %v4124_v36 }
 0x2e1   :  { %v4117_v43 = vsel %vm4015_vm3, %v3964_v51, %v4116_v13  ;;  %v3171_v28 = vpop.xlane.xlu0 %3170  ;;  %v3341_v51 = vadd.f32 %v6034_v17, %v6834_v38  ;;  %v3349_v38 = vadd.f32 %v6034_v17, %v6735_v8 }
 0x2e2   :  { %v4092_v20 = vsel %vm4021_vm6, %v3848_v47, %v4091_v31  ;;  %v3880_v33 = vrot.slane %v3318_v39, %v6046_v32  ;;  %v3326_v49 = vadd.f32 %v6034_v17, %v3171_v28  ;;  %v4118_v22 = vsel %vm4017_vm4, %v3968_v25, %v4117_v43 }
 0x2e3   :  { %4155 = vst.msk [vmem:[%s7040_s7 + $0x50] sm:$0xff] %vm4144_vm7, %v4092_v20  ;;  %v3187_v15 = vpop.xlane.xlu1 %3186  ;;  %v3972_v8 = vrot.slane %v3341_v51, %v6046_v32  ;;  %v4004_v0 = vrot.slane %v3349_v38, %v6046_v32 }
 0x2e4   :  { %v4099_v57 = vsel %vm4021_vm6, %v3880_v33, %v4098_v50  ;;  %v3912_v54 = vrot.slane %v3326_v49, %v6046_v32  ;;  %v3334_v59 = vadd.f32 %v6034_v17, %v3187_v15 }
 0x2e5   :  { %4156 = vst.msk [vmem:[%s7040_s7 + $0x58] sm:$0xff] %vm4144_vm7, %v4099_v57  ;;  %v3203_v12 = vpop.xlane.xlu0 %3202  ;;  %v4119_v11 = vsel %vm4019_vm5, %v3972_v8, %v4118_v22 }
 0x2e6   :  { %v4106_v10 = vsel %vm4021_vm6, %v3912_v54, %v4105_v21  ;;  %v3944_v35 = vrot.slane %v3334_v59, %v6046_v32  ;;  %v3342_v29 = vadd.f32 %v6034_v17, %v3203_v12 }
 0x2e7   :  { %4157 = vst.msk [vmem:[%s7040_s7 + $0x60] sm:$0xff] %vm4144_vm7, %v4106_v10  ;;  %v3219_v2 = vpop.xlane.xlu1 %3218 }
 0x2e8   :  { %v4113_v44 = vsel %vm4021_vm6, %v3944_v35, %v4112_v18  ;;  %v3976_v60 = vrot.slane %v3342_v29, %v6046_v32  ;;  %v3350_v14 = vadd.f32 %v6034_v17, %v3219_v2  ;;  %v4126_v17 = vsel %vm4019_vm5, %v4004_v0, %v4125_v19 }
 0x2e9   :  { %4158 = vst.msk [vmem:[%s7040_s7 + $0x68] sm:$0xff] %vm4144_vm7, %v4113_v44 }
 0x2ea   :  { %v4120_v56 = vsel %vm4021_vm6, %v3976_v60, %v4119_v11  ;;  %v4008_v24 = vrot.slane %v3350_v14, %v6046_v32 }
 0x2eb   :  { %4159 = vst.msk [vmem:[%s7040_s7 + $0x70] sm:$0xff] %vm4144_vm7, %v4120_v56 }
 0x2ec   :  { %v4127_v61 = vsel %vm4021_vm6, %v4008_v24, %v4126_v17 }
 0x2ed   :  { %4160 = vst.msk [vmem:[%s7040_s7 + $0x78] sm:$0xff] %vm4144_vm7, %v4127_v61 }

// kernel: dependency_parser_forward.4
= control target key start
LH: loop header
LB: loop body
LE: loop exit
PB: predicated region body
PF: predicated region fallthrough
CT: control target
= control target key end

     0   :  { %s3625_s15 = smov 0   ;;  %s3627_s16 = smov 0   ;;  %s4473_s0 = inlined_call_operand.vmem [shape: bf16[8,16,256], index: 0, kind: input, shape index: {}]   ;;  %s4474_s1 = inlined_call_operand.vmem [shape: bf16[2,256,512], index: 1, kind: input, shape index: {}]   ;;  %s4475_s2 = inlined_call_operand.vmem [shape: bf16[2,128,512], index: 2, kind: input, shape index: {}]   ;;  %s4476_s3 = inlined_call_operand.vmem [shape: f32[2,1,512], index: 3, kind: input, shape index: {}]   ;;  %s4477_s4 = inlined_call_operand.vmem [shape: bf16[8,16,256], index: 4, kind: output, shape index: {}]  }
   0x1   :  { %s3629_s17 = smov 0  }
   0x2 LB: > { %s3638_s18 = sadd.s32 4294967295, %s3597_s17   ;;  %s3640_s19 = sadd.s32 1, %s3597_s17   ;;  %s3597_s17 = sphi %s3629_s17, %s4481_s17   ;;  %s3593_s16 = sphi %s3627_s16, %s4480_s16   ;;  %s3589_s15 = sphi %s3625_s15, %s4479_s15  }
   0x3   : > { %s117_s20 = ssub.s32 %s3597_s17, %s3640_s19  ;;  %s120_s21 = sadd.s32 1, %s3593_s16 }
   0x4   : > { %p118_p0 = scmp.eq.s32.totalorder %s117_s20, 0  ;;  %p130_p1 = scmp.ne.s32.totalorder %s3593_s16, %s3589_s15 }
   0x5   : > { %p131_p2 = scmp.eq.s32.totalorder %s3638_s18, 1  ;;  %p2801_p3 = scmp.ge.s32.totalorder %s3597_s17, 1 }
   0x6   : > { %s3648_s22 = scalar_select %p118_p0, %s3593_s16, %s120_s21  }
   0x7   : > { %p3652_p4 = por %p131_p2, %p130_p1  ;;  %p181_p5 = scmp.lt.s32.totalorder %s3597_s17, 3 }
   0x9   : > { %p182_p6 = pnand %p2801_p3, %p181_p5 }
   0xa   : > { %p215_p7 = scmp.lt.s32.totalorder (!%p182_p6), %s3638_s18, 1  ;;  %v3217_v0 = vld [vmem:[%s4473_s0 + $0x4] ss:$8 sps:$4 sm:$0xff] (!%p182_p6)   ;;  %s212_s9 = sand.u32 (!%p182_p6), 1, %s3589_s15  }
   0xb   : > { %185 = sbr.rel (%p182_p6) target bundleno = 2281 (0x8e9), region = 36  ;;  %796 = vmatprep.mubr.bf16.mxu0 (!%p182_p6), %v3217_v0  ;;  %909 = vmatprep.mubr.bf16.mxu1 (!%p182_p6), %v3217_v0  ;;  %s2802_s10 = sshll.u32 (!%p182_p6), %s212_s9, 6 }
   0xc   : > { %s4041_s12 = scalar_lea.vmem (!%p182_p6), [#allocation3], %s2802_s10 }
  0x12   : > { %s3661_s26 = scalar_select %p215_p7, %s3638_s18, 1 }
  0x13   : > { %s4080_s15 = scalar_select %p131_p2, 6, 1 }
  0x14   : > { %s3020_s27 = sshll.u32 %s3661_s26, 9  ;;  %s3021_s5 = sshll.u32 %s3661_s26, 8 }
  0x15   : > { %s3667_s30 = scalar_lea.vmem %s4474_s1, %s3020_s27  ;;  %s3719_s8 = scalar_lea.vmem %s4475_s2, %s3021_s5 }
  0x16   : > { %v3119_v1 = vld [vmem:[%s3667_s30 + $0x4] ss:$16 sps:$4 sm:$0xff]   ;;  %v3121_v2 = vld [vmem:[%s3667_s30 + $0xc] ss:$16 sps:$4 sm:$0xff]   ;;  %v3123_v3 = vld [vmem:[%s3667_s30] ss:$16 sps:$4 sm:$0xff]  }
  0x17   : > { %764 = vmatprep.subr.bf16.mxu0 %v3119_v1  ;;  %v3124_v4 = vld [vmem:[%s3667_s30 + $0x8] ss:$16 sps:$4 sm:$0xff]   ;;  %877 = vmatprep.subr.bf16.mxu1 %v3121_v2  ;;  %v3125_v5 = vld [vmem:[%s3667_s30 + $0x24] ss:$16 sps:$4 sm:$0xff]   ;;  %v3127_v6 = vld [vmem:[%s3667_s30 + $0x2c] ss:$16 sps:$4 sm:$0xff]  }
  0x18   : > { %765 = vmatpush1.bf16.msra.mxu0 %v3123_v3  ;;  %878 = vmatpush1.bf16.msra.mxu1 %v3124_v4  ;;  %v3129_v7 = vld [vmem:[%s3667_s30 + $0x20] ss:$16 sps:$4 sm:$0xff]   ;;  %v3130_v8 = vld [vmem:[%s3667_s30 + $0x28] ss:$16 sps:$4 sm:$0xff]   ;;  %v3131_v9 = vld [vmem:[%s3667_s30 + $0x44] ss:$16 sps:$4 sm:$0xff]  }
  0x19   : > { %766 = vmatprep.subr.bf16.mxu0 %v3125_v5  ;;  %879 = vmatprep.subr.bf16.mxu1 %v3127_v6  ;;  %v3133_v10 = vld [vmem:[%s3667_s30 + $0x4c] ss:$16 sps:$4 sm:$0xff]   ;;  %v3135_v11 = vld [vmem:[%s3667_s30 + $0x40] ss:$16 sps:$4 sm:$0xff]   ;;  %v3136_v12 = vld [vmem:[%s3667_s30 + $0x48] ss:$16 sps:$4 sm:$0xff]  }
  0x1a   : > { %v3137_v13 = vld [vmem:[%s3667_s30 + $0x64] ss:$16 sps:$4 sm:$0xff]   ;;  %v3139_v14 = vld [vmem:[%s3667_s30 + $0x6c] ss:$16 sps:$4 sm:$0xff]   ;;  %v3141_v15 = vld [vmem:[%s3667_s30 + $0x60] ss:$16 sps:$4 sm:$0xff]  }
  0x1b   : > { %v3142_v16 = vld [vmem:[%s3667_s30 + $0x68] ss:$16 sps:$4 sm:$0xff]   ;;  %v3143_v17 = vld [vmem:[%s3667_s30 + $0x84] ss:$16 sps:$4 sm:$0xff]   ;;  %v3145_v18 = vld [vmem:[%s3667_s30 + $0x8c] ss:$16 sps:$4 sm:$0xff]  }
  0x1c   : > { %767 = vmatpush1.bf16.msra.mxu0 %v3129_v7  ;;  %880 = vmatpush1.bf16.msra.mxu1 %v3130_v8  ;;  %v3147_v19 = vld [vmem:[%s3667_s30 + $0x80] ss:$16 sps:$4 sm:$0xff]   ;;  %v3148_v20 = vld [vmem:[%s3667_s30 + $0x88] ss:$16 sps:$4 sm:$0xff]   ;;  %v3149_v21 = vld [vmem:[%s3667_s30 + $0xa4] ss:$16 sps:$4 sm:$0xff]  }
  0x1d   : > { %768 = vmatprep.subr.bf16.mxu0 %v3131_v9  ;;  %881 = vmatprep.subr.bf16.mxu1 %v3133_v10  ;;  %v3151_v22 = vld [vmem:[%s3667_s30 + $0xac] ss:$16 sps:$4 sm:$0xff]   ;;  %v3153_v23 = vld [vmem:[%s3667_s30 + $0xa0] ss:$16 sps:$4 sm:$0xff]   ;;  %v3154_v24 = vld [vmem:[%s3667_s30 + $0xa8] ss:$16 sps:$4 sm:$0xff]  }
  0x1e   : > { %v3155_v25 = vld [vmem:[%s3667_s30 + $0xc4] ss:$16 sps:$4 sm:$0xff]   ;;  %v3157_v26 = vld [vmem:[%s3667_s30 + $0xcc] ss:$16 sps:$4 sm:$0xff]   ;;  %v3159_v27 = vld [vmem:[%s3667_s30 + $0xc0] ss:$16 sps:$4 sm:$0xff]  }
  0x1f   : > { %v3160_v28 = vld [vmem:[%s3667_s30 + $0xc8] ss:$16 sps:$4 sm:$0xff]   ;;  %v3161_v29 = vld [vmem:[%s3667_s30 + $0xe4] ss:$16 sps:$4 sm:$0xff]   ;;  %v3163_v30 = vld [vmem:[%s3667_s30 + $0xec] ss:$16 sps:$4 sm:$0xff]  }
  0x20   : > { %769 = vmatpush1.bf16.msra.mxu0 %v3135_v11  ;;  %882 = vmatpush1.bf16.msra.mxu1 %v3136_v12  ;;  %v3165_v31 = vld [vmem:[%s3667_s30 + $0xe0] ss:$16 sps:$4 sm:$0xff]   ;;  %v3166_v32 = vld [vmem:[%s3667_s30 + $0xe8] ss:$16 sps:$4 sm:$0xff]   ;;  %v3167_v33 = vld [vmem:[%s3667_s30 + $0x104] ss:$16 sps:$4 sm:$0xff]  }
  0x21   : > { %770 = vmatprep.subr.bf16.mxu0 %v3137_v13  ;;  %883 = vmatprep.subr.bf16.mxu1 %v3139_v14  ;;  %v3169_v34 = vld [vmem:[%s3667_s30 + $0x10c] ss:$16 sps:$4 sm:$0xff]   ;;  %v3171_v35 = vld [vmem:[%s3667_s30 + $0x100] ss:$16 sps:$4 sm:$0xff]   ;;  %v3172_v36 = vld [vmem:[%s3667_s30 + $0x108] ss:$16 sps:$4 sm:$0xff]  }
  0x22   : > { %v3173_v37 = vld [vmem:[%s3667_s30 + $0x124] ss:$16 sps:$4 sm:$0xff]   ;;  %v3175_v38 = vld [vmem:[%s3667_s30 + $0x12c] ss:$16 sps:$4 sm:$0xff]   ;;  %v3177_v39 = vld [vmem:[%s3667_s30 + $0x120] ss:$16 sps:$4 sm:$0xff]  }
  0x23   : > { %v3178_v40 = vld [vmem:[%s3667_s30 + $0x128] ss:$16 sps:$4 sm:$0xff]   ;;  %v3179_v41 = vld [vmem:[%s3667_s30 + $0x144] ss:$16 sps:$4 sm:$0xff]   ;;  %v3181_v42 = vld [vmem:[%s3667_s30 + $0x14c] ss:$16 sps:$4 sm:$0xff]  }
  0x24   : > { %771 = vmatpush1.bf16.msra.mxu0 %v3141_v15  ;;  %884 = vmatpush1.bf16.msra.mxu1 %v3142_v16  ;;  %v3183_v43 = vld [vmem:[%s3667_s30 + $0x140] ss:$16 sps:$4 sm:$0xff]   ;;  %v3184_v44 = vld [vmem:[%s3667_s30 + $0x148] ss:$16 sps:$4 sm:$0xff]   ;;  %v3185_v45 = vld [vmem:[%s3667_s30 + $0x164] ss:$16 sps:$4 sm:$0xff]  }
  0x25   : > { %772 = vmatprep.subr.bf16.mxu0 %v3143_v17  ;;  %885 = vmatprep.subr.bf16.mxu1 %v3145_v18  ;;  %v3187_v46 = vld [vmem:[%s3667_s30 + $0x16c] ss:$16 sps:$4 sm:$0xff]   ;;  %v3189_v47 = vld [vmem:[%s3667_s30 + $0x160] ss:$16 sps:$4 sm:$0xff]   ;;  %v3190_v48 = vld [vmem:[%s3667_s30 + $0x168] ss:$16 sps:$4 sm:$0xff]  }
  0x26   : > { %v3191_v49 = vld [vmem:[%s3667_s30 + $0x184] ss:$16 sps:$4 sm:$0xff]   ;;  %v3193_v50 = vld [vmem:[%s3667_s30 + $0x18c] ss:$16 sps:$4 sm:$0xff]   ;;  %v3195_v51 = vld [vmem:[%s3667_s30 + $0x180] ss:$16 sps:$4 sm:$0xff]  }
  0x27   : > { %v3196_v52 = vld [vmem:[%s3667_s30 + $0x188] ss:$16 sps:$4 sm:$0xff]   ;;  %v3197_v53 = vld [vmem:[%s3667_s30 + $0x1a4] ss:$16 sps:$4 sm:$0xff]   ;;  %v3199_v54 = vld [vmem:[%s3667_s30 + $0x1ac] ss:$16 sps:$4 sm:$0xff]  }
  0x28   : > { %773 = vmatpush1.bf16.msra.mxu0 %v3147_v19  ;;  %886 = vmatpush1.bf16.msra.mxu1 %v3148_v20  ;;  %v3201_v55 = vld [vmem:[%s3667_s30 + $0x1a0] ss:$16 sps:$4 sm:$0xff]   ;;  %v3202_v56 = vld [vmem:[%s3667_s30 + $0x1a8] ss:$16 sps:$4 sm:$0xff]   ;;  %v3203_v57 = vld [vmem:[%s3667_s30 + $0x1c4] ss:$16 sps:$4 sm:$0xff]  }
  0x29   : > { %774 = vmatprep.subr.bf16.mxu0 %v3149_v21  ;;  %887 = vmatprep.subr.bf16.mxu1 %v3151_v22  ;;  %v3205_v58 = vld [vmem:[%s3667_s30 + $0x1cc] ss:$16 sps:$4 sm:$0xff]   ;;  %v3207_v59 = vld [vmem:[%s3667_s30 + $0x1c0] ss:$16 sps:$4 sm:$0xff]   ;;  %v3208_v60 = vld [vmem:[%s3667_s30 + $0x1c8] ss:$16 sps:$4 sm:$0xff]  }
  0x2a   : > { %v3209_v61 = vld [vmem:[%s3667_s30 + $0x1e4] ss:$16 sps:$4 sm:$0xff]   ;;  %v3211_v62 = vld [vmem:[%s3667_s30 + $0x1ec] ss:$16 sps:$4 sm:$0xff]   ;;  %v3213_v63 = vld [vmem:[%s3667_s30 + $0x1e0] ss:$16 sps:$4 sm:$0xff]  }
  0x2b   : > { %v3214_v0 = vld [vmem:[%s3667_s30 + $0x1e8] ss:$16 sps:$4 sm:$0xff]   ;;  %v3740_v1 = vld [vmem:[%s3719_s8 + $0x4] ss:$16 sps:$4 sm:$0xff]   ;;  %v3743_v2 = vld [vmem:[%s3719_s8 + $0xc] ss:$16 sps:$4 sm:$0xff]  }
  0x2c   : > { %775 = vmatpush1.bf16.msra.mxu0 %v3153_v23  ;;  %888 = vmatpush1.bf16.msra.mxu1 %v3154_v24  ;;  %v3215_v3 = vld [vmem:[%s4473_s0] ss:$8 sps:$4 sm:$0xff]   ;;  %v3221_v5 = vld [vmem:[%s4473_s0 + $0x14] ss:$8 sps:$4 sm:$0xff]   ;;  %v3223_v12 = vld [vmem:[%s4473_s0 + $0x10] ss:$8 sps:$4 sm:$0xff]  }
  0x2d   : > { %776 = vmatprep.subr.bf16.mxu0 %v3155_v25  ;;  %889 = vmatprep.subr.bf16.mxu1 %v3157_v26  ;;  %v3749_v4 = vld [vmem:[%s3719_s8] ss:$16 sps:$4 sm:$0xff]   ;;  %v3756_v6 = vld [vmem:[%s3719_s8 + $0x24] ss:$16 sps:$4 sm:$0xff]   ;;  %v3760_v7 = vld [vmem:[%s3719_s8 + $0x8] ss:$16 sps:$4 sm:$0xff]  }
  0x2e   : > { %v3763_v8 = vld [vmem:[%s3719_s8 + $0x2c] ss:$16 sps:$4 sm:$0xff]   ;;  %v3767_v9 = vld [vmem:[%s3719_s8 + $0x20] ss:$16 sps:$4 sm:$0xff]   ;;  %v3771_v10 = vld [vmem:[%s3719_s8 + $0x44] ss:$16 sps:$4 sm:$0xff]  }
  0x2f   : > { %v3775_v11 = vld [vmem:[%s3719_s8 + $0x28] ss:$16 sps:$4 sm:$0xff]   ;;  %v3227_v13 = vld [vmem:[%s4473_s0 + $0x24] ss:$8 sps:$4 sm:$0xff]   ;;  %v3787_v14 = vld [vmem:[%s3719_s8 + $0x40] ss:$16 sps:$4 sm:$0xff]  }
  0x30   : > { %777 = vmatpush1.bf16.msra.mxu0 %v3159_v27  ;;  %890 = vmatpush1.bf16.msra.mxu1 %v3160_v28  ;;  %v3790_v15 = vld [vmem:[%s3719_s8 + $0x4c] ss:$16 sps:$4 sm:$0xff]   ;;  %v3793_v16 = vld [vmem:[%s3719_s8 + $0x64] ss:$16 sps:$4 sm:$0xff]   ;;  %v3797_v17 = vld [vmem:[%s3719_s8 + $0x48] ss:$16 sps:$4 sm:$0xff]  }
  0x31   : > { %778 = vmatprep.subr.bf16.mxu0 %v3161_v29  ;;  %891 = vmatprep.subr.bf16.mxu1 %v3163_v30  ;;  %v3800_v18 = vld [vmem:[%s3719_s8 + $0x6c] ss:$16 sps:$4 sm:$0xff]   ;;  %v3804_v19 = vld [vmem:[%s3719_s8 + $0x60] ss:$16 sps:$4 sm:$0xff]   ;;  %v3809_v20 = vld [vmem:[%s3719_s8 + $0x84] ss:$16 sps:$4 sm:$0xff]  }
  0x32   : > { %v3813_v21 = vld [vmem:[%s3719_s8 + $0x68] ss:$16 sps:$4 sm:$0xff]   ;;  %v3236_v23 = vld [vmem:[%s4473_s0 + $0x34] ss:$8 sps:$4 sm:$0xff]   ;;  %v3824_v24 = vld [vmem:[%s3719_s8 + $0x80] ss:$16 sps:$4 sm:$0xff]  }
  0x33   : > { %v3229_v22 = vld [vmem:[%s4473_s0 + $0x20] ss:$8 sps:$4 sm:$0xff]   ;;  %v3827_v25 = vld [vmem:[%s3719_s8 + $0x8c] ss:$16 sps:$4 sm:$0xff]   ;;  %v3831_v26 = vld [vmem:[%s3719_s8 + $0xa4] ss:$16 sps:$4 sm:$0xff]  }
  0x34   : > { %779 = vmatpush1.bf16.msra.mxu0 %v3165_v31  ;;  %892 = vmatpush1.bf16.msra.mxu1 %v3166_v32  ;;  %v3835_v27 = vld [vmem:[%s3719_s8 + $0x88] ss:$16 sps:$4 sm:$0xff]   ;;  %v3838_v28 = vld [vmem:[%s3719_s8 + $0xac] ss:$16 sps:$4 sm:$0xff]   ;;  %v3842_v29 = vld [vmem:[%s3719_s8 + $0xa0] ss:$16 sps:$4 sm:$0xff]  }
  0x35   : > { %780 = vmatprep.subr.bf16.mxu0 %v3167_v33  ;;  %893 = vmatprep.subr.bf16.mxu1 %v3169_v34  ;;  %v3847_v30 = vld [vmem:[%s3719_s8 + $0xc4] ss:$16 sps:$4 sm:$0xff]   ;;  %v3851_v31 = vld [vmem:[%s3719_s8 + $0xa8] ss:$16 sps:$4 sm:$0xff]   ;;  %v3862_v34 = vld [vmem:[%s3719_s8 + $0xc0] ss:$16 sps:$4 sm:$0xff]  }
  0x36   : > { %v3238_v32 = vld [vmem:[%s4473_s0 + $0x30] ss:$8 sps:$4 sm:$0xff]   ;;  %v3245_v33 = vld [vmem:[%s4473_s0 + $0x44] ss:$8 sps:$4 sm:$0xff]   ;;  %s2807_s28 = sshll.u32 %s3661_s26, 2  ;;  %s3026_s14 = sshll.u32 %s4080_s15, 5 }
  0x37   : > { %s228_s5 = scalar_lea.vmem %s4476_s3, %s2807_s28  ;;  %s1389_s17 = scalar_lea.vmem [#allocation2], %s3026_s14 }
  0x38   : > { %781 = vmatpush1.bf16.msra.mxu0 %v3171_v35  ;;  %894 = vmatpush1.bf16.msra.mxu1 %v3172_v36  ;;  %v3865_v35 = vld [vmem:[%s3719_s8 + $0xcc] ss:$16 sps:$4 sm:$0xff]   ;;  %v3870_v36 = vld [vmem:[%s3719_s8 + $0xe4] ss:$16 sps:$4 sm:$0xff]   ;;  %s4030_s26 = scalar_select %p131_p2, 7, 0 }
  0x39   : > { %782 = vmatprep.subr.bf16.mxu0 %v3173_v37  ;;  %895 = vmatprep.subr.bf16.mxu1 %v3175_v38  ;;  %v3873_v37 = vld [vmem:[%s3719_s8 + $0xc8] ss:$16 sps:$4 sm:$0xff]   ;;  %v3876_v38 = vld [vmem:[%s3719_s8 + $0xec] ss:$16 sps:$4 sm:$0xff]   ;;  %s3029_s20 = sshll.u32 %s4080_s15, 3 }
  0x3a   : > { %s3022_s6 = sshll.u32 %s4030_s26, 5  ;;  %s3025_s11 = sshll.u32 %s4030_s26, 3 }
  0x3b   : > { %s1058_s7 = scalar_lea.vmem [#allocation2], %s3022_s6  ;;  %s1383_s13 = scalar_lea.vmem %s4041_s12, %s3025_s11 [#allocation3] }
  0x3c   : > { %783 = vmatpush1.bf16.msra.mxu0 %v3177_v39  ;;  %896 = vmatpush1.bf16.msra.mxu1 %v3178_v40  ;;  %v3880_v39 = vld [vmem:[%s3719_s8 + $0xe0] ss:$16 sps:$4 sm:$0xff]   ;;  %v3886_v40 = vld [vmem:[%s3719_s8 + $0xe8] ss:$16 sps:$4 sm:$0xff]   ;;  %s1554_s21 = scalar_lea.vmem %s4041_s12, %s3029_s20 [#allocation3] }
  0x3d   : > { %784 = vmatprep.subr.bf16.mxu0 %v3179_v41  ;;  %897 = vmatprep.subr.bf16.mxu1 %v3181_v42  ;;  %v3247_v41 = vld [vmem:[%s4473_s0 + $0x40] ss:$8 sps:$4 sm:$0xff]   ;;  %v3254_v42 = vld [vmem:[%s4473_s0 + $0x54] ss:$8 sps:$4 sm:$0xff]   ;;  %s4225_s24 = scalar_select %p131_p2, 5, 2 }
  0x3e   : > { %s4274_s29 = scalar_select %p131_p2, 4, 3 }
  0x3f   : > { %s3030_s25 = sshll.u32 %s4225_s24, 5 }
  0x40   : > { %785 = vmatpush1.bf16.msra.mxu0 %v3183_v43  ;;  %898 = vmatpush1.bf16.msra.mxu1 %v3184_v44  ;;  %v3256_v43 = vld [vmem:[%s4473_s0 + $0x50] ss:$8 sps:$4 sm:$0xff]   ;;  %v3263_v44 = vld [vmem:[%s4473_s0 + $0x64] ss:$8 sps:$4 sm:$0xff]   ;;  %s1560_s27 = scalar_lea.vmem [#allocation2], %s3030_s25  ;;  %s3034_s30 = sshll.u32 %s4274_s29, 5 }
  0x41   : > { %786 = vmatprep.subr.bf16.mxu0 %v3185_v45  ;;  %899 = vmatprep.subr.bf16.mxu1 %v3187_v46  ;;  %v3265_v45 = vld [vmem:[%s4473_s0 + $0x60] ss:$8 sps:$4 sm:$0xff]   ;;  %v3272_v46 = vld [vmem:[%s4473_s0 + $0x74] ss:$8 sps:$4 sm:$0xff]   ;;  %s3037_s26 = sshll.u32 %s4274_s29, 3 }
  0x42   : > { %s1896_s6 = scalar_lea.vmem %s4041_s12, %s3037_s26 [#allocation3] }
  0x43   : > { %s4372_s15 = scalar_select %p131_p2, 2, 5 }
  0x44   : > { %787 = vmatpush1.bf16.msra.mxu0 %v3189_v47  ;;  %900 = vmatpush1.bf16.msra.mxu1 %v3190_v48  ;;  %v3274_v47 = vld [vmem:[%s4473_s0 + $0x70] ss:$8 sps:$4 sm:$0xff]   ;;  %v3599_v48 = vmov 0   ;;  %s4434_s29 = scalar_select %p131_p2, 0, 7 }
  0x45   : > { %788 = vmatprep.subr.bf16.mxu0 %v3191_v49  ;;  %901 = vmatprep.subr.bf16.mxu1 %v3193_v50  ;;  %v344_v49 = vlaneseq  ;;  %s3042_s14 = sshll.u32 %s4372_s15, 5  ;;  %s3045_s20 = sshll.u32 %s4372_s15, 3 }
  0x46   : > { %s3053_s26 = sshll.u32 %s4434_s29, 3 }
  0x47   : > { %v345_v50 = vshrl.u32 %v344_v49, 7 }
  0x48   : > { %789 = vmatpush1.bf16.msra.mxu0 %v3195_v51  ;;  %902 = vmatpush1.bf16.msra.mxu1 %v3196_v52 }
  0x49   : > { %790 = vmatprep.subr.bf16.mxu0 %v3197_v53  ;;  %903 = vmatprep.subr.bf16.mxu1 %v3199_v54  ;;  %v346_v51 = vsub.s32 0, %v345_v50  ;;  %v354_v52 = vsub.s32 2, %v345_v50  ;;  %v326_v53 = vld [vmem:[%s228_s5] sm:$0xf]  ;;  %v350_v54 = vsub.s32 1, %v345_v50  ;;  %s1731_s5 = scalar_lea.vmem [#allocation2], %s3034_s30 }
  0x4a   : > { %s3050_s30 = sshll.u32 %s4434_s29, 5 }
  0x4c   : > { %791 = vmatpush1.bf16.msra.mxu0 %v3201_v55  ;;  %904 = vmatpush1.bf16.msra.mxu1 %v3202_v56  ;;  %v358_v55 = vsub.s32 3, %v345_v50  ;;  %v3956_v56 = vrot.slane %v326_v53, %v346_v51 }
  0x4d   : > { %792 = vmatprep.subr.bf16.mxu0 %v3203_v57  ;;  %905 = vmatprep.subr.bf16.mxu1 %v3205_v58  ;;  %v3958_v57 = vrot.slane %v326_v53, %v354_v52  ;;  %v3960_v58 = vrot.slane %v326_v53, %v350_v54 }
  0x50   : > { %793 = vmatpush1.bf16.msra.mxu0 %v3207_v59  ;;  %906 = vmatpush1.bf16.msra.mxu1 %v3208_v60  ;;  %v3962_v59 = vrot.slane %v326_v53, %v358_v55 }
  0x51   : > { %794 = vmatprep.subr.bf16.mxu0 %v3209_v61  ;;  %907 = vmatprep.subr.bf16.mxu1 %v3211_v62 }
  0x54   : > { %795 = vmatpush1.bf16.msra.mxu0 %v3213_v63  ;;  %908 = vmatpush1.bf16.msra.mxu1 %v3214_v0 }
  0x55   : > { %1231 = vmatprep.subr.bf16.mxu0 %v3740_v1  ;;  %1274 = vmatprep.subr.bf16.mxu1 %v3743_v2 }
  0x57   : > { %797 = vmatmul.mubr.bf16.vlgmr.msra.gmra.mrb[0].mxu0 %v3215_v3  ;;  %910 = vmatmul.mubr.bf16.vlgmr.msra.gmra.mrb[0].mxu1 %v3215_v3 }
  0x58   : > { %1232 = vmatpush1.bf16.msra.mxu0 %v3749_v4  ;;  %806 = vmatprep.mubr.bf16.mxu0 %v3221_v5 }
  0x59   : > { %919 = vmatprep.mubr.bf16.mxu1 %v3221_v5  ;;  %1233 = vmatprep.subr.bf16.mxu0 %v3756_v6 }
  0x5a   : > { %1275 = vmatpush1.bf16.msra.mxu1 %v3760_v7 }
  0x5b   : > { %1276 = vmatprep.subr.bf16.mxu1 %v3763_v8 }
  0x5c   : > { %1234 = vmatpush1.bf16.msra.mxu0 %v3767_v9 }
  0x5d   : > { %1235 = vmatprep.subr.bf16.mxu0 %v3771_v10 }
  0x5e   : > { %1277 = vmatpush1.bf16.msra.mxu1 %v3775_v11 }
  0x5f   : > { %807 = vmatmul.mubr.bf16.gmra.mrb[4].mxu0 %v3223_v12  ;;  %920 = vmatmul.mubr.bf16.gmra.mrb[4].mxu1 %v3223_v12 }
  0x60   : > { %816 = vmatprep.mubr.bf16.mxu0 %v3227_v13  ;;  %929 = vmatprep.mubr.bf16.mxu1 %v3227_v13 }
  0x61   : > { %1236 = vmatpush1.bf16.msra.mxu0 %v3787_v14  ;;  %1278 = vmatprep.subr.bf16.mxu1 %v3790_v15 }
  0x62   : > { %1237 = vmatprep.subr.bf16.mxu0 %v3793_v16  ;;  %1279 = vmatpush1.bf16.msra.mxu1 %v3797_v17 }
  0x63   : > { %1280 = vmatprep.subr.bf16.mxu1 %v3800_v18 }
  0x65   : > { %1238 = vmatpush1.bf16.msra.mxu0 %v3804_v19 }
  0x66   : > { %1239 = vmatprep.subr.bf16.mxu0 %v3809_v20  ;;  %1281 = vmatpush1.bf16.msra.mxu1 %v3813_v21 }
  0x67   : > { %817 = vmatmul.mubr.bf16.gmra.mrb[8].mxu0 %v3229_v22  ;;  %930 = vmatmul.mubr.bf16.gmra.mrb[8].mxu1 %v3229_v22 }
  0x68   : > { %826 = vmatprep.mubr.bf16.mxu0 %v3236_v23  ;;  %939 = vmatprep.mubr.bf16.mxu1 %v3236_v23 }
  0x69   : > { %1240 = vmatpush1.bf16.msra.mxu0 %v3824_v24  ;;  %1282 = vmatprep.subr.bf16.mxu1 %v3827_v25 }
  0x6a   : > { %1241 = vmatprep.subr.bf16.mxu0 %v3831_v26  ;;  %1283 = vmatpush1.bf16.msra.mxu1 %v3835_v27 }
  0x6b   : > { %1284 = vmatprep.subr.bf16.mxu1 %v3838_v28 }
  0x6d   : > { %1242 = vmatpush1.bf16.msra.mxu0 %v3842_v29 }
  0x6e   : > { %1243 = vmatprep.subr.bf16.mxu0 %v3847_v30  ;;  %1285 = vmatpush1.bf16.msra.mxu1 %v3851_v31 }
  0x6f   : > { %827 = vmatmul.mubr.bf16.gmra.mrb[12].mxu0 %v3238_v32  ;;  %940 = vmatmul.mubr.bf16.gmra.mrb[12].mxu1 %v3238_v32 }
  0x70   : > { %836 = vmatprep.mubr.bf16.mxu0 %v3245_v33  ;;  %949 = vmatprep.mubr.bf16.mxu1 %v3245_v33 }
  0x71   : > { %1244 = vmatpush1.bf16.msra.mxu0 %v3862_v34  ;;  %1286 = vmatprep.subr.bf16.mxu1 %v3865_v35 }
  0x72   : > { %1245 = vmatprep.subr.bf16.mxu0 %v3870_v36  ;;  %1287 = vmatpush1.bf16.msra.mxu1 %v3873_v37 }
  0x73   : > { %1288 = vmatprep.subr.bf16.mxu1 %v3876_v38 }
  0x75   : > { %1246 = vmatpush1.bf16.msra.mxu0 %v3880_v39 }
  0x76   : > { %1289 = vmatpush1.bf16.msra.mxu1 %v3886_v40  ;;  %1402 = vmatprep.subr.bf16.mxu0 %v3740_v1 }
  0x77   : > { %837 = vmatmul.mubr.bf16.gmra.mrb[16].mxu0 %v3247_v41  ;;  %950 = vmatmul.mubr.bf16.gmra.mrb[16].mxu1 %v3247_v41 }
  0x78   : > { %846 = vmatprep.mubr.bf16.mxu0 %v3254_v42  ;;  %959 = vmatprep.mubr.bf16.mxu1 %v3254_v42 }
  0x79   : > { %1445 = vmatprep.subr.bf16.mxu1 %v3743_v2 }
  0x7f   : > { %847 = vmatmul.mubr.bf16.gmra.mrb[20].mxu0 %v3256_v43  ;;  %960 = vmatmul.mubr.bf16.gmra.mrb[20].mxu1 %v3256_v43 }
  0x80   : > { %856 = vmatprep.mubr.bf16.mxu0 %v3263_v44  ;;  %969 = vmatprep.mubr.bf16.mxu1 %v3263_v44 }
  0x87   : > { %857 = vmatmul.mubr.bf16.gmra.mrb[24].mxu0 %v3265_v45  ;;  %970 = vmatmul.mubr.bf16.gmra.mrb[24].mxu1 %v3265_v45 }
  0x88   : > { %866 = vmatprep.mubr.bf16.mxu0 %v3272_v46  ;;  %979 = vmatprep.mubr.bf16.mxu1 %v3272_v46 }
  0x8f   : > { %867 = vmatmul.mubr.bf16.gmra.mrb[28].mxu0 %v3274_v47  ;;  %980 = vmatmul.mubr.bf16.gmra.mrb[28].mxu1 %v3274_v47 }
  0x90   : > { %1263 = vmatprep.mubr.bf16.mxu0 %v3599_v48  ;;  %1306 = vmatprep.mubr.bf16.mxu1 %v3599_v48 }
  0x97   : > { %1264 = vmatmul.mubr.bf16.vlgmr.msra.gmra.mrb[32].mxu0 %v3599_v48  ;;  %1307 = vmatmul.mubr.bf16.vlgmr.msra.gmra.mrb[32].mxu1 %v3599_v48 }
  0x98   : > { %1403 = vmatpush1.bf16.msra.mxu0 %v3749_v4  ;;  %1446 = vmatpush1.bf16.msra.mxu1 %v3760_v7 }
  0x99   : > { %1404 = vmatprep.subr.bf16.mxu0 %v3756_v6  ;;  %1447 = vmatprep.subr.bf16.mxu1 %v3763_v8 }
  0x9a   : > { %1434 = vmatprep.mubr.bf16.mxu0 %v3599_v48  ;;  %1477 = vmatprep.mubr.bf16.mxu1 %v3599_v48 }
  0x9c   : > { %1405 = vmatpush1.bf16.msra.mxu0 %v3767_v9  ;;  %1448 = vmatpush1.bf16.msra.mxu1 %v3775_v11 }
  0x9d   : > { %1406 = vmatprep.subr.bf16.mxu0 %v3771_v10  ;;  %1449 = vmatprep.subr.bf16.mxu1 %v3790_v15 }
  0xa0   : > { %1407 = vmatpush1.bf16.msra.mxu0 %v3787_v14  ;;  %1450 = vmatpush1.bf16.msra.mxu1 %v3797_v17 }
  0xa1   : > { %1408 = vmatprep.subr.bf16.mxu0 %v3793_v16  ;;  %1451 = vmatprep.subr.bf16.mxu1 %v3800_v18 }
  0xa4   : > { %1409 = vmatpush1.bf16.msra.mxu0 %v3804_v19  ;;  %1452 = vmatpush1.bf16.msra.mxu1 %v3813_v21 }
  0xa5   : > { %1410 = vmatprep.subr.bf16.mxu0 %v3809_v20  ;;  %1453 = vmatprep.subr.bf16.mxu1 %v3827_v25 }
  0xa8   : > { %1411 = vmatpush1.bf16.msra.mxu0 %v3824_v24  ;;  %1454 = vmatpush1.bf16.msra.mxu1 %v3835_v27 }
  0xa9   : > { %1412 = vmatprep.subr.bf16.mxu0 %v3831_v26  ;;  %1455 = vmatprep.subr.bf16.mxu1 %v3838_v28 }
  0xac   : > { %1413 = vmatpush1.bf16.msra.mxu0 %v3842_v29  ;;  %1456 = vmatpush1.bf16.msra.mxu1 %v3851_v31 }
  0xad   : > { %1414 = vmatprep.subr.bf16.mxu0 %v3847_v30  ;;  %1457 = vmatprep.subr.bf16.mxu1 %v3865_v35 }
  0xb0   : > { %1415 = vmatpush1.bf16.msra.mxu0 %v3862_v34  ;;  %1458 = vmatpush1.bf16.msra.mxu1 %v3873_v37 }
  0xb1   : > { %1416 = vmatprep.subr.bf16.mxu0 %v3870_v36  ;;  %1459 = vmatprep.subr.bf16.mxu1 %v3876_v38 }
  0xb4   : > { %1417 = vmatpush1.bf16.msra.mxu0 %v3880_v39  ;;  %1460 = vmatpush1.bf16.msra.mxu1 %v3886_v40 }
  0xb5   : > { %1573 = vmatprep.subr.bf16.mxu0 %v3740_v1  ;;  %1616 = vmatprep.subr.bf16.mxu1 %v3743_v2 }
 0x12a   : > { %v798_v60 = vpop.f32.mrb[0].mxu0  ;;  %v911_v61 = vpop.f32.mrb[0].mxu1 }
 0x12b   : > { %v799_v62 = vadd.f32 %v798_v60, %v3956_v56  ;;  %v800_v63 = vpop.f32.mrb[1].mxu0  ;;  %v912_v0 = vadd.f32 %v911_v61, %v3958_v57  ;;  %v913_v3 = vpop.f32.mrb[1].mxu1 }
 0x12c   : > { %v801_v5 = vadd.f32 %v800_v63, %v3960_v58  ;;  %v802_v12 = vpop.f32.mrb[2].mxu0  ;;  %v914_v13 = vadd.f32 %v913_v3, %v3962_v59  ;;  %v915_v22 = vpop.f32.mrb[2].mxu1 }
 0x12d   : > { %v803_v23 = vadd.f32 %v802_v12, %v3956_v56  ;;  %v804_v32 = vpop.f32.mrb[3].mxu0  ;;  %v916_v33 = vadd.f32 %v915_v22, %v3958_v57  ;;  %v917_v41 = vpop.f32.mrb[3].mxu1 }
 0x12e   : > { %v805_v42 = vadd.f32 %v804_v32, %v3960_v58  ;;  %v918_v43 = vadd.f32 %v917_v41, %v3962_v59 }
 0x12f   : > { %v990_v44 = vpack.c.bf16 %v803_v23, %v799_v62  ;;  %v992_v45 = vpack.c.bf16 %v916_v33, %v912_v0 }
 0x130   : > { %v991_v46 = vpack.c.bf16 %v805_v42, %v801_v5  ;;  %v993_v47 = vpack.c.bf16 %v918_v43, %v914_v13 }
 0x131   : > { %1022 = vst [vmem:[#allocation2] sm:$0xff] %v990_v44  ;;  %1024 = vst [vmem:[#allocation2 + $0x10] sm:$0xff] %v992_v45 }
 0x132   : > { %1023 = vst [vmem:[#allocation2 + $0x8] sm:$0xff] %v991_v46  ;;  %v808_v49 = vpop.f32.mrb[4].mxu0  ;;  %1025 = vst [vmem:[#allocation2 + $0x18] sm:$0xff] %v993_v47  ;;  %v921_v50 = vpop.f32.mrb[4].mxu1 }
 0x133   : > { %v809_v51 = vadd.f32 %v808_v49, %v3956_v56  ;;  %v810_v52 = vpop.f32.mrb[5].mxu0  ;;  %v922_v53 = vadd.f32 %v921_v50, %v3958_v57  ;;  %v923_v54 = vpop.f32.mrb[5].mxu1 }
 0x134   : > { %v811_v55 = vadd.f32 %v810_v52, %v3960_v58  ;;  %v812_v60 = vpop.f32.mrb[6].mxu0  ;;  %v924_v61 = vadd.f32 %v923_v54, %v3962_v59  ;;  %v925_v62 = vpop.f32.mrb[6].mxu1 }
 0x135   : > { %v813_v63 = vadd.f32 %v812_v60, %v3956_v56  ;;  %v814_v0 = vpop.f32.mrb[7].mxu0  ;;  %v926_v3 = vadd.f32 %v925_v62, %v3958_v57  ;;  %v927_v5 = vpop.f32.mrb[7].mxu1 }
 0x136   : > { %v815_v12 = vadd.f32 %v814_v0, %v3960_v58  ;;  %v928_v13 = vadd.f32 %v927_v5, %v3962_v59 }
 0x137   : > { %v994_v22 = vpack.c.bf16 %v813_v63, %v809_v51  ;;  %v996_v23 = vpack.c.bf16 %v926_v3, %v922_v53 }
 0x138   : > { %v995_v32 = vpack.c.bf16 %v815_v12, %v811_v55  ;;  %v997_v33 = vpack.c.bf16 %v928_v13, %v924_v61 }
 0x139   : > { %1026 = vst [vmem:[#allocation2 + $0x20] sm:$0xff] %v994_v22  ;;  %1028 = vst [vmem:[#allocation2 + $0x30] sm:$0xff] %v996_v23 }
 0x13a   : > { %1027 = vst [vmem:[#allocation2 + $0x28] sm:$0xff] %v995_v32  ;;  %v818_v41 = vpop.f32.mrb[8].mxu0  ;;  %1029 = vst [vmem:[#allocation2 + $0x38] sm:$0xff] %v997_v33  ;;  %v931_v42 = vpop.f32.mrb[8].mxu1 }
 0x13b   : > { %v819_v43 = vadd.f32 %v818_v41, %v3956_v56  ;;  %v820_v44 = vpop.f32.mrb[9].mxu0  ;;  %v932_v45 = vadd.f32 %v931_v42, %v3958_v57  ;;  %v933_v46 = vpop.f32.mrb[9].mxu1 }
 0x13c   : > { %v821_v47 = vadd.f32 %v820_v44, %v3960_v58  ;;  %v822_v49 = vpop.f32.mrb[10].mxu0  ;;  %v934_v50 = vadd.f32 %v933_v46, %v3962_v59  ;;  %v935_v51 = vpop.f32.mrb[10].mxu1 }
 0x13d   : > { %v823_v52 = vadd.f32 %v822_v49, %v3956_v56  ;;  %v824_v53 = vpop.f32.mrb[11].mxu0  ;;  %v936_v54 = vadd.f32 %v935_v51, %v3958_v57  ;;  %v937_v55 = vpop.f32.mrb[11].mxu1 }
 0x13e   : > { %v825_v60 = vadd.f32 %v824_v53, %v3960_v58  ;;  %v938_v61 = vadd.f32 %v937_v55, %v3962_v59 }
 0x13f   : > { %v998_v62 = vpack.c.bf16 %v823_v52, %v819_v43  ;;  %v1000_v63 = vpack.c.bf16 %v936_v54, %v932_v45 }
 0x140   : > { %v999_v0 = vpack.c.bf16 %v825_v60, %v821_v47  ;;  %v1001_v3 = vpack.c.bf16 %v938_v61, %v934_v50 }
 0x141   : > { %1030 = vst [vmem:[#allocation2 + $0x40] sm:$0xff] %v998_v62  ;;  %1032 = vst [vmem:[#allocation2 + $0x50] sm:$0xff] %v1000_v63 }
 0x142   : > { %1031 = vst [vmem:[#allocation2 + $0x48] sm:$0xff] %v999_v0  ;;  %v828_v5 = vpop.f32.mrb[12].mxu0  ;;  %1033 = vst [vmem:[#allocation2 + $0x58] sm:$0xff] %v1001_v3  ;;  %v941_v12 = vpop.f32.mrb[12].mxu1 }
 0x143   : > { %v829_v13 = vadd.f32 %v828_v5, %v3956_v56  ;;  %v830_v22 = vpop.f32.mrb[13].mxu0  ;;  %v942_v23 = vadd.f32 %v941_v12, %v3958_v57  ;;  %v943_v32 = vpop.f32.mrb[13].mxu1 }
 0x144   : > { %v831_v33 = vadd.f32 %v830_v22, %v3960_v58  ;;  %v832_v41 = vpop.f32.mrb[14].mxu0  ;;  %v944_v42 = vadd.f32 %v943_v32, %v3962_v59  ;;  %v945_v43 = vpop.f32.mrb[14].mxu1 }
 0x145   : > { %v833_v44 = vadd.f32 %v832_v41, %v3956_v56  ;;  %v834_v45 = vpop.f32.mrb[15].mxu0  ;;  %v946_v46 = vadd.f32 %v945_v43, %v3958_v57  ;;  %v947_v47 = vpop.f32.mrb[15].mxu1 }
 0x146   : > { %v835_v49 = vadd.f32 %v834_v45, %v3960_v58  ;;  %v948_v50 = vadd.f32 %v947_v47, %v3962_v59 }
 0x147   : > { %v1002_v51 = vpack.c.bf16 %v833_v44, %v829_v13  ;;  %v1004_v52 = vpack.c.bf16 %v946_v46, %v942_v23 }
 0x148   : > { %v1003_v53 = vpack.c.bf16 %v835_v49, %v831_v33  ;;  %v1005_v54 = vpack.c.bf16 %v948_v50, %v944_v42 }
 0x149   : > { %1034 = vst [vmem:[#allocation2 + $0x60] sm:$0xff] %v1002_v51  ;;  %1036 = vst [vmem:[#allocation2 + $0x70] sm:$0xff] %v1004_v52 }
 0x14a   : > { %1035 = vst [vmem:[#allocation2 + $0x68] sm:$0xff] %v1003_v53  ;;  %v838_v55 = vpop.f32.mrb[16].mxu0  ;;  %1037 = vst [vmem:[#allocation2 + $0x78] sm:$0xff] %v1005_v54  ;;  %v951_v60 = vpop.f32.mrb[16].mxu1 }
 0x14b   : > { %v839_v61 = vadd.f32 %v838_v55, %v3956_v56  ;;  %v840_v62 = vpop.f32.mrb[17].mxu0  ;;  %v952_v63 = vadd.f32 %v951_v60, %v3958_v57  ;;  %v953_v0 = vpop.f32.mrb[17].mxu1 }
 0x14c   : > { %v841_v3 = vadd.f32 %v840_v62, %v3960_v58  ;;  %v842_v5 = vpop.f32.mrb[18].mxu0  ;;  %v954_v12 = vadd.f32 %v953_v0, %v3962_v59  ;;  %v955_v13 = vpop.f32.mrb[18].mxu1 }
 0x14d   : > { %v843_v22 = vadd.f32 %v842_v5, %v3956_v56  ;;  %v844_v23 = vpop.f32.mrb[19].mxu0  ;;  %v956_v32 = vadd.f32 %v955_v13, %v3958_v57  ;;  %v957_v33 = vpop.f32.mrb[19].mxu1 }
 0x14e   : > { %v845_v41 = vadd.f32 %v844_v23, %v3960_v58  ;;  %v958_v42 = vadd.f32 %v957_v33, %v3962_v59 }
 0x14f   : > { %v1006_v43 = vpack.c.bf16 %v843_v22, %v839_v61  ;;  %v1008_v44 = vpack.c.bf16 %v956_v32, %v952_v63 }
 0x150   : > { %v1007_v45 = vpack.c.bf16 %v845_v41, %v841_v3  ;;  %v1009_v46 = vpack.c.bf16 %v958_v42, %v954_v12 }
 0x151   : > { %1038 = vst [vmem:[#allocation2 + $0x80] sm:$0xff] %v1006_v43  ;;  %1040 = vst [vmem:[#allocation2 + $0x90] sm:$0xff] %v1008_v44 }
 0x152   : > { %1039 = vst [vmem:[#allocation2 + $0x88] sm:$0xff] %v1007_v45  ;;  %1041 = vst [vmem:[#allocation2 + $0x98] sm:$0xff] %v1009_v46  ;;  %v848_v47 = vpop.f32.mrb[20].mxu0  ;;  %v961_v49 = vpop.f32.mrb[20].mxu1 }
 0x153   : > { %v849_v50 = vadd.f32 %v848_v47, %v3956_v56  ;;  %v962_v51 = vadd.f32 %v961_v49, %v3958_v57  ;;  %v850_v52 = vpop.f32.mrb[21].mxu0  ;;  %v963_v53 = vpop.f32.mrb[21].mxu1 }
 0x154   : > { %v851_v54 = vadd.f32 %v850_v52, %v3960_v58  ;;  %v964_v55 = vadd.f32 %v963_v53, %v3962_v59  ;;  %v852_v60 = vpop.f32.mrb[22].mxu0  ;;  %v965_v61 = vpop.f32.mrb[22].mxu1 }
 0x155   : > { %v853_v62 = vadd.f32 %v852_v60, %v3956_v56  ;;  %v966_v63 = vadd.f32 %v965_v61, %v3958_v57  ;;  %v854_v0 = vpop.f32.mrb[23].mxu0  ;;  %v967_v3 = vpop.f32.mrb[23].mxu1 }
 0x156   : > { %v855_v5 = vadd.f32 %v854_v0, %v3960_v58  ;;  %v968_v12 = vadd.f32 %v967_v3, %v3962_v59 }
 0x157   : > { %v1010_v13 = vpack.c.bf16 %v853_v62, %v849_v50  ;;  %v1012_v22 = vpack.c.bf16 %v966_v63, %v962_v51 }
 0x158   : > { %v1011_v23 = vpack.c.bf16 %v855_v5, %v851_v54  ;;  %v1013_v32 = vpack.c.bf16 %v968_v12, %v964_v55 }
 0x159   : > { %1042 = vst [vmem:[#allocation2 + $0xa0] sm:$0xff] %v1010_v13  ;;  %1044 = vst [vmem:[#allocation2 + $0xb0] sm:$0xff] %v1012_v22 }
 0x15a   : > { %1043 = vst [vmem:[#allocation2 + $0xa8] sm:$0xff] %v1011_v23  ;;  %1045 = vst [vmem:[#allocation2 + $0xb8] sm:$0xff] %v1013_v32  ;;  %v858_v33 = vpop.f32.mrb[24].mxu0  ;;  %v971_v41 = vpop.f32.mrb[24].mxu1 }
 0x15b   : > { %v859_v42 = vadd.f32 %v858_v33, %v3956_v56  ;;  %v972_v43 = vadd.f32 %v971_v41, %v3958_v57  ;;  %v860_v44 = vpop.f32.mrb[25].mxu0  ;;  %v973_v45 = vpop.f32.mrb[25].mxu1 }
 0x15c   : > { %v861_v46 = vadd.f32 %v860_v44, %v3960_v58  ;;  %v974_v47 = vadd.f32 %v973_v45, %v3962_v59  ;;  %v862_v49 = vpop.f32.mrb[26].mxu0  ;;  %v975_v50 = vpop.f32.mrb[26].mxu1 }
 0x15d   : > { %v863_v51 = vadd.f32 %v862_v49, %v3956_v56  ;;  %v976_v52 = vadd.f32 %v975_v50, %v3958_v57  ;;  %v864_v53 = vpop.f32.mrb[27].mxu0  ;;  %v977_v54 = vpop.f32.mrb[27].mxu1 }
 0x15e   : > { %v865_v55 = vadd.f32 %v864_v53, %v3960_v58  ;;  %v978_v60 = vadd.f32 %v977_v54, %v3962_v59 }
 0x15f   : > { %v1014_v61 = vpack.c.bf16 %v863_v51, %v859_v42  ;;  %v1016_v62 = vpack.c.bf16 %v976_v52, %v972_v43 }
 0x160   : > { %v1015_v63 = vpack.c.bf16 %v865_v55, %v861_v46  ;;  %v1017_v0 = vpack.c.bf16 %v978_v60, %v974_v47 }
 0x161   : > { %1046 = vst [vmem:[#allocation2 + $0xc0] sm:$0xff] %v1014_v61  ;;  %1048 = vst [vmem:[#allocation2 + $0xd0] sm:$0xff] %v1016_v62 }
 0x162   : > { %1047 = vst [vmem:[#allocation2 + $0xc8] sm:$0xff] %v1015_v63  ;;  %1049 = vst [vmem:[#allocation2 + $0xd8] sm:$0xff] %v1017_v0  ;;  %v868_v3 = vpop.f32.mrb[28].mxu0  ;;  %v981_v5 = vpop.f32.mrb[28].mxu1 }
 0x163   : > { %v869_v12 = vadd.f32 %v868_v3, %v3956_v56  ;;  %v982_v13 = vadd.f32 %v981_v5, %v3958_v57  ;;  %v870_v22 = vpop.f32.mrb[29].mxu0  ;;  %v983_v23 = vpop.f32.mrb[29].mxu1 }
 0x164   : > { %v871_v32 = vadd.f32 %v870_v22, %v3960_v58  ;;  %v984_v33 = vadd.f32 %v983_v23, %v3962_v59  ;;  %v872_v41 = vpop.f32.mrb[30].mxu0  ;;  %v985_v42 = vpop.f32.mrb[30].mxu1 }
 0x165   : > { %v873_v43 = vadd.f32 %v872_v41, %v3956_v56  ;;  %v986_v44 = vadd.f32 %v985_v42, %v3958_v57  ;;  %v874_v45 = vpop.f32.mrb[31].mxu0  ;;  %v987_v46 = vpop.f32.mrb[31].mxu1 }
 0x166   : > { %v875_v47 = vadd.f32 %v874_v45, %v3960_v58  ;;  %v988_v49 = vadd.f32 %v987_v46, %v3962_v59 }
 0x167   : > { %v1018_v50 = vpack.c.bf16 %v873_v43, %v869_v12  ;;  %v1020_v51 = vpack.c.bf16 %v986_v44, %v982_v13 }
 0x168   : > { %v1019_v52 = vpack.c.bf16 %v875_v47, %v871_v32  ;;  %v1021_v53 = vpack.c.bf16 %v988_v49, %v984_v33 }
 0x169   : > { %1050 = vst [vmem:[#allocation2 + $0xe0] sm:$0xff] %v1018_v50  ;;  %1052 = vst [vmem:[#allocation2 + $0xf0] sm:$0xff] %v1020_v51 }
 0x16a   : > { %1051 = vst [vmem:[#allocation2 + $0xe8] sm:$0xff] %v1019_v52  ;;  %1053 = vst [vmem:[#allocation2 + $0xf8] sm:$0xff] %v1021_v53  ;;  %v1265_v56 = vpop.f32.mrb[32].mxu0  ;;  %v1308_v57 = vpop.f32.mrb[32].mxu1 }
 0x16b   : > { %v1267_v54 = vpop.f32.mrb[33].mxu0  ;;  %v1310_v55 = vpop.f32.mrb[33].mxu1 }
 0x16c   : > { %v1269_v58 = vpop.f32.mrb[34].mxu0  ;;  %v1312_v60 = vpop.f32.mrb[34].mxu1 }
 0x16d   : > { %v1271_v59 = vpop.f32.mrb[35].mxu0  ;;  %v1314_v61 = vpop.f32.mrb[35].mxu1 }
 0x171   : > { %v1059_v62 = vld [vmem:[%s1058_s7] sm:$0xff]  ;;  %v1060_v0 = vld [vmem:[%s1058_s7 + $0x8] sm:$0xff]  ;;  %v1062_v23 = vld [vmem:[%s1058_s7 + $0x18] sm:$0xff] }
 0x172   : > { %v1063_v63 = vunpack.c.l.bf16 %v1059_v62  ;;  %v1067_v3 = vunpack.c.h.bf16 %v1059_v62  ;;  %v1064_v5 = vunpack.c.l.bf16 %v1060_v0  ;;  %v1068_v12 = vunpack.c.h.bf16 %v1060_v0  ;;  %v1061_v43 = vld [vmem:[%s1058_s7 + $0x10] sm:$0xff]  ;;  %s4323_s7 = scalar_select %p131_p2, 3, 4 }
 0x173   : > { %v1066_v46 = vunpack.c.l.bf16 %v1062_v23  ;;  %v1070_v47 = vunpack.c.h.bf16 %v1062_v23  ;;  %v1065_v49 = vunpack.c.l.bf16 %v1061_v43  ;;  %v1069_v50 = vunpack.c.h.bf16 %v1061_v43 }
 0x174   : > { %v1317_v13 = vadd.f32 %v1265_v56, %v1063_v63  ;;  %v1321_v22 = vadd.f32 %v1269_v58, %v1067_v3  ;;  %v1318_v32 = vadd.f32 %v1267_v54, %v1064_v5  ;;  %v1322_v33 = vadd.f32 %v1271_v59, %v1068_v12  ;;  %s3038_s9 = sshll.u32 %s4323_s7, 5  ;;  %s3041_s11 = sshll.u32 %s4323_s7, 3 }
 0x175   : > { %v1320_v51 = vadd.f32 %v1310_v55, %v1066_v46  ;;  %v1324_v52 = vadd.f32 %v1314_v61, %v1070_v47  ;;  %v1319_v53 = vadd.f32 %v1308_v57, %v1065_v49  ;;  %v1323_v56 = vadd.f32 %v1312_v60, %v1069_v50  ;;  %s1902_s10 = scalar_lea.vmem [#allocation2], %s3038_s9  ;;  %s3017_s7 = sshll.u32 (%p3652_p4), %s3638_s18, 2 }
 0x176   : > { %v2922_v41 = vmul.f32 -1.442695, %v1317_v13  ;;  %v2923_v42 = vmul.f32 -1.442695, %v1321_v22  ;;  %v2924_v44 = vmul.f32 -1.442695, %v1318_v32 }
 0x177   : > { %v2925_v45 = vmul.f32 -1.442695, %v1322_v33  ;;  %v2926_v58 = vmul.f32 -1.442695, %v1320_v51  ;;  %v2927_v54 = vmul.f32 -1.442695, %v1324_v52 }
 0x178   : > { %3287 = vpow2.f32 %v2922_v41 }
 0x179   : > { %3289 = vpow2.f32 %v2924_v44 }
 0x17a   : > { %3291 = vpow2.f32 %v2923_v42 }
 0x17b   : > { %3293 = vpow2.f32 %v2925_v45 }
 0x17c   : > { %3295 = vtanh.f32 %v1319_v53 }
 0x17d   : > { %3297 = vtanh.f32 %v1323_v56 }
 0x17e   : > { %3299 = vpow2.f32 %v2926_v58 }
 0x17f   : > { %3301 = vpow2.f32 %v2927_v54 }
 0x182   : > { %v3288_v59 = vpop.eup %3287 }
 0x183   : > { %v3290_v62 = vpop.eup %3289  ;;  %v1331_v63 = vadd.f32 1.0, %v3288_v59 }
 0x184   : > { %v3292_v0 = vpop.eup %3291  ;;  %v1343_v3 = vadd.f32 1.0, %v3290_v62 }
 0x185   : > { %v3294_v5 = vpop.eup %3293  ;;  %3303 = vrcp.f32 %v1331_v63  ;;  %v1332_v12 = vadd.f32 1.0, %v3292_v0 }
 0x186   : > { %3305 = vrcp.f32 %v1343_v3  ;;  %v1344_v13 = vadd.f32 1.0, %v3294_v5  ;;  %v3296_v57 = vpop.eup %3295 }
 0x187   : > { %3307 = vrcp.f32 %v1332_v12  ;;  %v3298_v55 = vpop.eup %3297 }
 0x188   : > { %3309 = vrcp.f32 %v1344_v13  ;;  %v3300_v60 = vpop.eup %3299 }
 0x189   : > { %v3302_v61 = vpop.eup %3301  ;;  %v1357_v33 = vadd.f32 1.0, %v3300_v60 }
 0x18a   : > { %v1358_v45 = vadd.f32 1.0, %v3302_v61 }
 0x18b   : > { %3311 = vrcp.f32 %v1357_v33 }
 0x18f   : > { %v3304_v22 = vpop.eup %3303 }
 0x190   : > { %v3306_v23 = vpop.eup %3305  ;;  %v1365_v32 = vmul.f32 %v3304_v22, %v3296_v57 }
 0x191   : > { %v3308_v41 = vpop.eup %3307  ;;  %v1363_v42 = vmul.f32 0.0, %v3306_v23 }
 0x192   : > { %v3310_v43 = vpop.eup %3309  ;;  %v1366_v44 = vmul.f32 %v3308_v41, %v3298_v55 }
 0x193   : > { %v1364_v46 = vmul.f32 0.0, %v3310_v43  ;;  %v4033_v47 = vadd.f32 %v1365_v32, %v1363_v42 }
 0x195   : > { %3313 = vtanh.f32 %v4033_v47  ;;  %v4036_v49 = vadd.f32 %v1366_v44, %v1364_v46  ;;  %v3312_v50 = vpop.eup %3311 }
 0x196   : > { %3315 = vrcp.f32 %v1358_v45 }
 0x197   : > { %3317 = vtanh.f32 %v4036_v49 }
 0x19f   : > { %v3314_v51 = vpop.eup %3313 }
 0x1a0   : > { %v3316_v52 = vpop.eup %3315  ;;  %v1371_v53 = vmul.f32 %v3314_v51, %v3312_v50 }
 0x1a1   : > { %v3318_v56 = vpop.eup %3317 }
 0x1a2   : > { %v1372_v58 = vmul.f32 %v3318_v56, %v3316_v52 }
 0x1a4   : > { %v1373_v54 = vpack.c.bf16 %v1372_v58, %v1371_v53 }
 0x1a6   : > { %3058 = vst [vmem:[%s1383_s13] sm:$0xff] %v1373_v54   ;;  %1435 = vmatmul.mubr.bf16.vlgmr.msra.gmra.mrb[36].mxu0 %v1373_v54  ;;  %1478 = vmatmul.mubr.bf16.vlgmr.msra.gmra.mrb[36].mxu1 %v1373_v54  ;;  %s2067_s13 = scalar_lea.vmem %s4041_s12, %s3041_s11 [#allocation3]  ;;  %s2591_s11 = scalar_lea.vmem (%p3652_p4), %s4477_s4, %s3017_s7 }
 0x1a7   : > { %1574 = vmatpush1.bf16.msra.mxu0 %v3749_v4  ;;  %1617 = vmatpush1.bf16.msra.mxu1 %v3760_v7  ;;  %v1390_v4 = vld [vmem:[%s1389_s17] sm:$0xff] }
 0x1a8   : > { %1575 = vmatprep.subr.bf16.mxu0 %v3756_v6  ;;  %1618 = vmatprep.subr.bf16.mxu1 %v3763_v8  ;;  %v1391_v6 = vld [vmem:[%s1389_s17 + $0x8] sm:$0xff]  ;;  %v1394_v7 = vunpack.c.l.bf16 %v1390_v4 }
 0x1a9   : > { %1605 = vmatprep.mubr.bf16.mxu0 %v3599_v48  ;;  %1648 = vmatprep.mubr.bf16.mxu1 %v3599_v48 }
 0x1ab   : > { %1576 = vmatpush1.bf16.msra.mxu0 %v3767_v9  ;;  %1619 = vmatpush1.bf16.msra.mxu1 %v3775_v11 }
 0x1ac   : > { %1577 = vmatprep.subr.bf16.mxu0 %v3771_v10  ;;  %1620 = vmatprep.subr.bf16.mxu1 %v3790_v15  ;;  %v1395_v10 = vunpack.c.l.bf16 %v1391_v6 }
 0x1af   : > { %1578 = vmatpush1.bf16.msra.mxu0 %v3787_v14  ;;  %1621 = vmatpush1.bf16.msra.mxu1 %v3797_v17 }
 0x1b0   : > { %1579 = vmatprep.subr.bf16.mxu0 %v3793_v16  ;;  %1622 = vmatprep.subr.bf16.mxu1 %v3800_v18  ;;  %v1398_v16 = vunpack.c.h.bf16 %v1390_v4 }
 0x1b3   : > { %1580 = vmatpush1.bf16.msra.mxu0 %v3804_v19  ;;  %1623 = vmatpush1.bf16.msra.mxu1 %v3813_v21 }
 0x1b4   : > { %1581 = vmatprep.subr.bf16.mxu0 %v3809_v20  ;;  %1624 = vmatprep.subr.bf16.mxu1 %v3827_v25  ;;  %v1393_v20 = vld [vmem:[%s1389_s17 + $0x18] sm:$0xff] }
 0x1b7   : > { %1582 = vmatpush1.bf16.msra.mxu0 %v3824_v24  ;;  %1625 = vmatpush1.bf16.msra.mxu1 %v3835_v27 }
 0x1b8   : > { %1583 = vmatprep.subr.bf16.mxu0 %v3831_v26  ;;  %1626 = vmatprep.subr.bf16.mxu1 %v3838_v28 }
 0x1bb   : > { %1584 = vmatpush1.bf16.msra.mxu0 %v3842_v29  ;;  %1627 = vmatpush1.bf16.msra.mxu1 %v3851_v31  ;;  %v1392_v29 = vld [vmem:[%s1389_s17 + $0x10] sm:$0xff]  ;;  %s2073_s17 = scalar_lea.vmem [#allocation2], %s3042_s14 }
 0x1bc   : > { %1585 = vmatprep.subr.bf16.mxu0 %v3847_v30  ;;  %1628 = vmatprep.subr.bf16.mxu1 %v3865_v35  ;;  %v1397_v30 = vunpack.c.l.bf16 %v1393_v20  ;;  %v1396_v35 = vunpack.c.l.bf16 %v1392_v29 }
 0x1bf   : > { %1586 = vmatpush1.bf16.msra.mxu0 %v3862_v34  ;;  %1629 = vmatpush1.bf16.msra.mxu1 %v3873_v37 }
 0x1c0   : > { %1587 = vmatprep.subr.bf16.mxu0 %v3870_v36  ;;  %1630 = vmatprep.subr.bf16.mxu1 %v3876_v38  ;;  %v1401_v36 = vunpack.c.h.bf16 %v1393_v20  ;;  %v1400_v38 = vunpack.c.h.bf16 %v1392_v29  ;;  %v4148_v20 = vld [vmem:[%s3719_s8 + $0x68] ss:$16 sps:$4 sm:$0xff]   ;;  %v4176_v29 = vld [vmem:[%s3719_s8 + $0xa0] ss:$16 sps:$4 sm:$0xff]  }
 0x1c3   : > { %1588 = vmatpush1.bf16.msra.mxu0 %v3880_v39  ;;  %1631 = vmatpush1.bf16.msra.mxu1 %v3886_v40 }
 0x1c4   : > { %1744 = vmatprep.subr.bf16.mxu0 %v3740_v1  ;;  %1787 = vmatprep.subr.bf16.mxu1 %v3743_v2  ;;  %v1399_v2 = vunpack.c.h.bf16 %v1391_v6 }
 0x279   : > { %v1436_v8 = vpop.f32.mrb[36].mxu0  ;;  %v1479_v9 = vpop.f32.mrb[36].mxu1 }
 0x27a   : > { %v1488_v11 = vadd.f32 %v1436_v8, %v1394_v7  ;;  %v1438_v14 = vpop.f32.mrb[37].mxu0  ;;  %v1481_v15 = vpop.f32.mrb[37].mxu1  ;;  %v1490_v37 = vadd.f32 %v1479_v9, %v1396_v35  ;;  %v4094_v7 = vld [vmem:[%s3719_s8] ss:$16 sps:$4 sm:$0xff]   ;;  %v4098_v8 = vld [vmem:[%s3719_s8 + $0x8] ss:$16 sps:$4 sm:$0xff]  }
 0x27b   : > { %v1489_v17 = vadd.f32 %v1438_v14, %v1395_v10  ;;  %v1440_v1 = vpop.f32.mrb[38].mxu0  ;;  %v1483_v18 = vpop.f32.mrb[38].mxu1  ;;  %v1491_v34 = vadd.f32 %v1481_v15, %v1397_v30  ;;  %v4102_v9 = vld [vmem:[%s3719_s8 + $0x24] ss:$16 sps:$4 sm:$0xff]   ;;  %v4106_v10 = vld [vmem:[%s3719_s8 + $0x2c] ss:$16 sps:$4 sm:$0xff]  }
 0x27c   : > { %v2934_v19 = vmul.f32 -1.442695, %v1488_v11  ;;  %v1492_v21 = vadd.f32 %v1440_v1, %v1398_v16  ;;  %v1442_v24 = vpop.f32.mrb[39].mxu0  ;;  %v1485_v25 = vpop.f32.mrb[39].mxu1  ;;  %v1494_v59 = vadd.f32 %v1483_v18, %v1400_v38  ;;  %v4112_v11 = vld [vmem:[%s3719_s8 + $0x20] ss:$16 sps:$4 sm:$0xff]  }
 0x27d   : > { %v2936_v26 = vmul.f32 -1.442695, %v1489_v17  ;;  %v1493_v27 = vadd.f32 %v1442_v24, %v1399_v2  ;;  %v2938_v39 = vmul.f32 -1.442695, %v1491_v34  ;;  %v1495_v40 = vadd.f32 %v1485_v25, %v1401_v36  ;;  %v4116_v14 = vld [vmem:[%s3719_s8 + $0x28] ss:$16 sps:$4 sm:$0xff]  }
 0x27e   : > { %3319 = vpow2.f32 %v2934_v19  ;;  %v2935_v28 = vmul.f32 -1.442695, %v1492_v21  ;;  %v4120_v15 = vld [vmem:[%s3719_s8 + $0x44] ss:$16 sps:$4 sm:$0xff]   ;;  %v4124_v16 = vld [vmem:[%s3719_s8 + $0x4c] ss:$16 sps:$4 sm:$0xff]  }
 0x27f   : > { %3321 = vpow2.f32 %v2936_v26  ;;  %v2937_v31 = vmul.f32 -1.442695, %v1493_v27  ;;  %v2939_v3 = vmul.f32 -1.442695, %v1495_v40  ;;  %v4128_v17 = vld [vmem:[%s3719_s8 + $0x40] ss:$16 sps:$4 sm:$0xff]  }
 0x280   : > { %3323 = vpow2.f32 %v2935_v28  ;;  %v4132_v1 = vld [vmem:[%s3719_s8 + $0x48] ss:$16 sps:$4 sm:$0xff]   ;;  %v4136_v18 = vld [vmem:[%s3719_s8 + $0x64] ss:$16 sps:$4 sm:$0xff]   ;;  %v4140_v2 = vld [vmem:[%s3719_s8 + $0x6c] ss:$16 sps:$4 sm:$0xff]  }
 0x281   : > { %3325 = vpow2.f32 %v2937_v31  ;;  %v4144_v19 = vld [vmem:[%s3719_s8 + $0x60] ss:$16 sps:$4 sm:$0xff]   ;;  %v4152_v21 = vld [vmem:[%s3719_s8 + $0x84] ss:$16 sps:$4 sm:$0xff]   ;;  %v4156_v24 = vld [vmem:[%s3719_s8 + $0x8c] ss:$16 sps:$4 sm:$0xff]  }
 0x282   : > { %3327 = vtanh.f32 %v1490_v37  ;;  %v4160_v25 = vld [vmem:[%s3719_s8 + $0x80] ss:$16 sps:$4 sm:$0xff]   ;;  %v4164_v26 = vld [vmem:[%s3719_s8 + $0x88] ss:$16 sps:$4 sm:$0xff]   ;;  %v4168_v27 = vld [vmem:[%s3719_s8 + $0xa4] ss:$16 sps:$4 sm:$0xff]  }
 0x283   : > { %3329 = vpow2.f32 %v2938_v39  ;;  %v4172_v28 = vld [vmem:[%s3719_s8 + $0xac] ss:$16 sps:$4 sm:$0xff]   ;;  %v4180_v30 = vld [vmem:[%s3719_s8 + $0xa8] ss:$16 sps:$4 sm:$0xff]   ;;  %v4184_v31 = vld [vmem:[%s3719_s8 + $0xc4] ss:$16 sps:$4 sm:$0xff]  }
 0x284   : > { %3331 = vtanh.f32 %v1494_v59  ;;  %v4188_v34 = vld [vmem:[%s3719_s8 + $0xcc] ss:$16 sps:$4 sm:$0xff]   ;;  %v4192_v35 = vld [vmem:[%s3719_s8 + $0xc0] ss:$16 sps:$4 sm:$0xff]   ;;  %v4196_v36 = vld [vmem:[%s3719_s8 + $0xc8] ss:$16 sps:$4 sm:$0xff]  }
 0x285   : > { %v4200_v37 = vld [vmem:[%s3719_s8 + $0xe4] ss:$16 sps:$4 sm:$0xff]   ;;  %v4204_v38 = vld [vmem:[%s3719_s8 + $0xec] ss:$16 sps:$4 sm:$0xff]   ;;  %v4208_v39 = vld [vmem:[%s3719_s8 + $0xe0] ss:$16 sps:$4 sm:$0xff]  }
 0x286   : > { %v4212_v40 = vld [vmem:[%s3719_s8 + $0xe8] ss:$16 sps:$4 sm:$0xff]   ;;  %v4216_v59 = vld [vmem:[%s3719_s8 + $0x4] ss:$16 sps:$4 sm:$0xff]  }
 0x288   : > { %v3320_v62 = vpop.eup %3319 }
 0x289   : > { %v3322_v63 = vpop.eup %3321  ;;  %v1502_v0 = vadd.f32 1.0, %v3320_v62  ;;  %v4220_v62 = vld [vmem:[%s3719_s8 + $0xc] ss:$16 sps:$4 sm:$0xff]   ;;  %s3033_s8 = sshll.u32 %s4225_s24, 3 }
 0x28a   : > { %v1514_v5 = vadd.f32 1.0, %v3322_v63  ;;  %v3324_v12 = vpop.eup %3323  ;;  %v1561_v63 = vld [vmem:[%s1560_s27] sm:$0xff]  ;;  %s1725_s28 = scalar_lea.vmem %s4041_s12, %s3033_s8 [#allocation3] }
 0x28b   : > { %3333 = vrcp.f32 %v1502_v0  ;;  %v1503_v13 = vadd.f32 1.0, %v3324_v12  ;;  %v3326_v57 = vpop.eup %3325  ;;  %v1562_v0 = vld [vmem:[%s1560_s27 + $0x8] sm:$0xff]  ;;  %s4419_s24 = scalar_select %p131_p2, 1, 6 }
 0x28c   : > { %3335 = vrcp.f32 %v1514_v5  ;;  %v1515_v55 = vadd.f32 1.0, %v3326_v57  ;;  %v3328_v60 = vpop.eup %3327 }
 0x28d   : > { %3337 = vpow2.f32 %v2939_v3  ;;  %v3330_v61 = vpop.eup %3329  ;;  %v1565_v3 = vunpack.c.l.bf16 %v1561_v63  ;;  %s3046_s25 = sshll.u32 %s4419_s24, 5  ;;  %s3049_s8 = sshll.u32 %s4419_s24, 3 }
 0x28e   : > { %3339 = vrcp.f32 %v1503_v13  ;;  %v3332_v22 = vpop.eup %3331  ;;  %v1528_v44 = vadd.f32 1.0, %v3330_v61  ;;  %v1566_v13 = vunpack.c.l.bf16 %v1562_v0  ;;  %v1569_v61 = vunpack.c.h.bf16 %v1561_v63 }
 0x28f   : > { %3341 = vrcp.f32 %v1515_v55 }
 0x290   : > { %3343 = vrcp.f32 %v1528_v44 }
 0x295   : > { %v3334_v23 = vpop.eup %3333 }
 0x296   : > { %v3336_v32 = vpop.eup %3335  ;;  %v1536_v33 = vmul.f32 %v3334_v23, %v3328_v60 }
 0x297   : > { %v3338_v41 = vpop.eup %3337  ;;  %v1534_v42 = vmul.f32 %v3336_v32, %v4033_v47 }
 0x298   : > { %v3340_v43 = vpop.eup %3339  ;;  %v1529_v51 = vadd.f32 1.0, %v3338_v41 }
 0x299   : > { %v4084_v45 = vadd.f32 %v1536_v33, %v1534_v42  ;;  %v1537_v46 = vmul.f32 %v3340_v43, %v3332_v22  ;;  %v3342_v50 = vpop.eup %3341  ;;  %v1570_v33 = vunpack.c.h.bf16 %v1562_v0  ;;  %v1564_v42 = vld [vmem:[%s1560_s27 + $0x18] sm:$0xff] }
 0x29a   : > { %v1535_v52 = vmul.f32 %v3342_v50, %v4036_v49  ;;  %v3344_v47 = vpop.eup %3343 }
 0x29b   : > { %3345 = vtanh.f32 %v4084_v45 }
 0x29c   : > { %v4088_v53 = vadd.f32 %v1537_v46, %v1535_v52  ;;  %3347 = vrcp.f32 %v1529_v51 }
 0x29e   : > { %3349 = vtanh.f32 %v4088_v53 }
 0x2a5   : > { %v3346_v56 = vpop.eup %3345 }
 0x2a6   : > { %v3348_v58 = vpop.eup %3347  ;;  %v1542_v4 = vmul.f32 %v3346_v56, %v3344_v47  ;;  %v1563_v47 = vld [vmem:[%s1560_s27 + $0x10] sm:$0xff]  ;;  %v1568_v56 = vunpack.c.l.bf16 %v1564_v42  ;;  %s2244_s27 = scalar_lea.vmem [#allocation2], %s3046_s25 }
 0x2a7   : > { %v1571_v63 = vunpack.c.h.bf16 %v1563_v47 }
 0x2a8   : > { %v3350_v54 = vpop.eup %3349 }
 0x2a9   : > { %v1543_v6 = vmul.f32 %v3350_v54, %v3348_v58 }
 0x2ab   : > { %v1544_v49 = vpack.c.bf16 %v1543_v6, %v1542_v4  ;;  %v1567_v4 = vunpack.c.l.bf16 %v1563_v47  ;;  %v1572_v6 = vunpack.c.h.bf16 %v1564_v42 }
 0x2ad   : > { %3063 = vst [vmem:[%s1554_s21] sm:$0xff] %v1544_v49   ;;  %1606 = vmatmul.mubr.bf16.vlgmr.msra.gmra.mrb[40].mxu0 %v1544_v49  ;;  %1649 = vmatmul.mubr.bf16.vlgmr.msra.gmra.mrb[40].mxu1 %v1544_v49  ;;  %s2238_s21 = scalar_lea.vmem %s4041_s12, %s3045_s20 [#allocation3] }
 0x2ae   : > { %1745 = vmatpush1.bf16.msra.mxu0 %v4094_v7  ;;  %1788 = vmatpush1.bf16.msra.mxu1 %v4098_v8 }
 0x2af   : > { %1746 = vmatprep.subr.bf16.mxu0 %v4102_v9  ;;  %1789 = vmatprep.subr.bf16.mxu1 %v4106_v10 }
 0x2b0   : > { %1776 = vmatprep.mubr.bf16.mxu0 %v3599_v48  ;;  %1819 = vmatprep.mubr.bf16.mxu1 %v3599_v48 }
 0x2b2   : > { %1747 = vmatpush1.bf16.msra.mxu0 %v4112_v11  ;;  %1790 = vmatpush1.bf16.msra.mxu1 %v4116_v14 }
 0x2b3   : > { %1748 = vmatprep.subr.bf16.mxu0 %v4120_v15  ;;  %1791 = vmatprep.subr.bf16.mxu1 %v4124_v16 }
 0x2b6   : > { %1749 = vmatpush1.bf16.msra.mxu0 %v4128_v17  ;;  %1792 = vmatpush1.bf16.msra.mxu1 %v4132_v1 }
 0x2b7   : > { %1750 = vmatprep.subr.bf16.mxu0 %v4136_v18  ;;  %1793 = vmatprep.subr.bf16.mxu1 %v4140_v2 }
 0x2ba   : > { %1751 = vmatpush1.bf16.msra.mxu0 %v4144_v19  ;;  %1794 = vmatpush1.bf16.msra.mxu1 %v4148_v20 }
 0x2bb   : > { %1752 = vmatprep.subr.bf16.mxu0 %v4152_v21  ;;  %1795 = vmatprep.subr.bf16.mxu1 %v4156_v24 }
 0x2be   : > { %1753 = vmatpush1.bf16.msra.mxu0 %v4160_v25  ;;  %1796 = vmatpush1.bf16.msra.mxu1 %v4164_v26 }
 0x2bf   : > { %1754 = vmatprep.subr.bf16.mxu0 %v4168_v27  ;;  %1797 = vmatprep.subr.bf16.mxu1 %v4172_v28 }
 0x2c2   : > { %1755 = vmatpush1.bf16.msra.mxu0 %v4176_v29  ;;  %1798 = vmatpush1.bf16.msra.mxu1 %v4180_v30 }
 0x2c3   : > { %1756 = vmatprep.subr.bf16.mxu0 %v4184_v31  ;;  %1799 = vmatprep.subr.bf16.mxu1 %v4188_v34 }
 0x2c6   : > { %1757 = vmatpush1.bf16.msra.mxu0 %v4192_v35  ;;  %1800 = vmatpush1.bf16.msra.mxu1 %v4196_v36 }
 0x2c7   : > { %1758 = vmatprep.subr.bf16.mxu0 %v4200_v37  ;;  %1801 = vmatprep.subr.bf16.mxu1 %v4204_v38 }
 0x2ca   : > { %1759 = vmatpush1.bf16.msra.mxu0 %v4208_v39  ;;  %1802 = vmatpush1.bf16.msra.mxu1 %v4212_v40 }
 0x2cb   : > { %1915 = vmatprep.subr.bf16.mxu0 %v4216_v59  ;;  %1958 = vmatprep.subr.bf16.mxu1 %v4220_v62 }
 0x380   : > { %v1607_v5 = vpop.f32.mrb[40].mxu0  ;;  %v1650_v12 = vpop.f32.mrb[40].mxu1 }
 0x381   : > { %v1659_v57 = vadd.f32 %v1607_v5, %v1565_v3  ;;  %v1609_v55 = vpop.f32.mrb[41].mxu0  ;;  %v1652_v60 = vpop.f32.mrb[41].mxu1  ;;  %v1661_v49 = vadd.f32 %v1650_v12, %v1567_v4 }
 0x382   : > { %v1660_v22 = vadd.f32 %v1609_v55, %v1566_v13  ;;  %v1611_v23 = vpop.f32.mrb[42].mxu0  ;;  %v1654_v32 = vpop.f32.mrb[42].mxu1  ;;  %v1662_v54 = vadd.f32 %v1652_v60, %v1568_v56 }
 0x383   : > { %v2946_v41 = vmul.f32 -1.442695, %v1659_v57  ;;  %v1663_v43 = vadd.f32 %v1611_v23, %v1569_v61  ;;  %v1613_v44 = vpop.f32.mrb[43].mxu0  ;;  %v1656_v46 = vpop.f32.mrb[43].mxu1  ;;  %v1665_v5 = vadd.f32 %v1654_v32, %v1571_v63 }
 0x384   : > { %v2948_v50 = vmul.f32 -1.442695, %v1660_v22  ;;  %v1664_v51 = vadd.f32 %v1613_v44, %v1570_v33  ;;  %v2950_v0 = vmul.f32 -1.442695, %v1662_v54  ;;  %v1666_v3 = vadd.f32 %v1656_v46, %v1572_v6 }
 0x385   : > { %3351 = vpow2.f32 %v2946_v41  ;;  %v2947_v52 = vmul.f32 -1.442695, %v1663_v43 }
 0x386   : > { %3353 = vpow2.f32 %v2948_v50  ;;  %v2949_v58 = vmul.f32 -1.442695, %v1664_v51  ;;  %v2951_v61 = vmul.f32 -1.442695, %v1666_v3 }
 0x387   : > { %3355 = vpow2.f32 %v2947_v52 }
 0x388   : > { %3357 = vpow2.f32 %v2949_v58 }
 0x389   : > { %3359 = vtanh.f32 %v1661_v49 }
 0x38a   : > { %3361 = vpow2.f32 %v2950_v0 }
 0x38b   : > { %3363 = vtanh.f32 %v1665_v5 }
 0x38f   : > { %v3352_v13 = vpop.eup %3351 }
 0x390   : > { %v3354_v57 = vpop.eup %3353  ;;  %v1673_v55 = vadd.f32 1.0, %v3352_v13 }
 0x391   : > { %v1685_v22 = vadd.f32 1.0, %v3354_v57  ;;  %v3356_v23 = vpop.eup %3355 }
 0x392   : > { %3365 = vrcp.f32 %v1673_v55  ;;  %v1674_v60 = vadd.f32 1.0, %v3356_v23  ;;  %v3358_v33 = vpop.eup %3357  ;;  %v1733_v55 = vld [vmem:[%s1731_s5 + $0x8] sm:$0xff] }
 0x393   : > { %3367 = vrcp.f32 %v1685_v22  ;;  %v1686_v12 = vadd.f32 1.0, %v3358_v33  ;;  %v3360_v41 = vpop.eup %3359 }
 0x394   : > { %3369 = vpow2.f32 %v2951_v61  ;;  %v3362_v42 = vpop.eup %3361 }
 0x395   : > { %3371 = vrcp.f32 %v1674_v60  ;;  %v3364_v32 = vpop.eup %3363  ;;  %v1699_v47 = vadd.f32 1.0, %v3362_v42  ;;  %v1737_v60 = vunpack.c.l.bf16 %v1733_v55 }
 0x396   : > { %3373 = vrcp.f32 %v1686_v12 }
 0x397   : > { %3375 = vrcp.f32 %v1699_v47 }
 0x39c   : > { %v3366_v43 = vpop.eup %3365 }
 0x39d   : > { %v3368_v44 = vpop.eup %3367  ;;  %v1707_v46 = vmul.f32 %v3366_v43, %v3360_v41 }
 0x39e   : > { %v3370_v50 = vpop.eup %3369  ;;  %v1705_v51 = vmul.f32 %v3368_v44, %v4084_v45 }
 0x39f   : > { %v3372_v52 = vpop.eup %3371  ;;  %v1700_v4 = vadd.f32 1.0, %v3370_v50 }
 0x3a0   : > { %v4229_v56 = vadd.f32 %v1707_v46, %v1705_v51  ;;  %v1708_v58 = vmul.f32 %v3372_v52, %v3364_v32  ;;  %v3374_v54 = vpop.eup %3373  ;;  %v1741_v46 = vunpack.c.h.bf16 %v1733_v55  ;;  %v1735_v51 = vld [vmem:[%s1731_s5 + $0x18] sm:$0xff] }
 0x3a1   : > { %v1706_v6 = vmul.f32 %v3374_v54, %v4088_v53  ;;  %v3376_v45 = vpop.eup %3375  ;;  %v1732_v53 = vld [vmem:[%s1731_s5] sm:$0xff] }
 0x3a2   : > { %3377 = vtanh.f32 %v4229_v56  ;;  %v1736_v61 = vunpack.c.l.bf16 %v1732_v53  ;;  %v1740_v42 = vunpack.c.h.bf16 %v1732_v53 }
 0x3a3   : > { %v4233_v49 = vadd.f32 %v1708_v58, %v1706_v6  ;;  %3379 = vrcp.f32 %v1700_v4 }
 0x3a5   : > { %3381 = vtanh.f32 %v4233_v49 }
 0x3ac   : > { %v3378_v63 = vpop.eup %3377 }
 0x3ad   : > { %v3380_v0 = vpop.eup %3379  ;;  %v1713_v5 = vmul.f32 %v3378_v63, %v3376_v45  ;;  %v1734_v45 = vld [vmem:[%s1731_s5 + $0x10] sm:$0xff]  ;;  %v1739_v63 = vunpack.c.l.bf16 %v1735_v51  ;;  %s2415_s5 = scalar_lea.vmem [#allocation2], %s3050_s30 }
 0x3ae   : > { %v1742_v53 = vunpack.c.h.bf16 %v1734_v45 }
 0x3af   : > { %v3382_v3 = vpop.eup %3381 }
 0x3b0   : > { %v1714_v13 = vmul.f32 %v3382_v3, %v3380_v0 }
 0x3b2   : > { %v1715_v57 = vpack.c.bf16 %v1714_v13, %v1713_v5  ;;  %v1738_v5 = vunpack.c.l.bf16 %v1734_v45  ;;  %v1743_v13 = vunpack.c.h.bf16 %v1735_v51 }
 0x3b4   : > { %3068 = vst [vmem:[%s1725_s28] sm:$0xff] %v1715_v57   ;;  %1777 = vmatmul.mubr.bf16.vlgmr.msra.gmra.mrb[44].mxu0 %v1715_v57  ;;  %1820 = vmatmul.mubr.bf16.vlgmr.msra.gmra.mrb[44].mxu1 %v1715_v57  ;;  %s2409_s28 = scalar_lea.vmem %s4041_s12, %s3049_s8 [#allocation3] }
 0x3b5   : > { %1916 = vmatpush1.bf16.msra.mxu0 %v4094_v7  ;;  %1959 = vmatpush1.bf16.msra.mxu1 %v4098_v8 }
 0x3b6   : > { %1917 = vmatprep.subr.bf16.mxu0 %v4102_v9  ;;  %1960 = vmatprep.subr.bf16.mxu1 %v4106_v10 }
 0x3b7   : > { %1947 = vmatprep.mubr.bf16.mxu0 %v3599_v48  ;;  %1990 = vmatprep.mubr.bf16.mxu1 %v3599_v48 }
 0x3b9   : > { %1918 = vmatpush1.bf16.msra.mxu0 %v4112_v11  ;;  %1961 = vmatpush1.bf16.msra.mxu1 %v4116_v14 }
 0x3ba   : > { %1919 = vmatprep.subr.bf16.mxu0 %v4120_v15  ;;  %1962 = vmatprep.subr.bf16.mxu1 %v4124_v16 }
 0x3bd   : > { %1920 = vmatpush1.bf16.msra.mxu0 %v4128_v17  ;;  %1963 = vmatpush1.bf16.msra.mxu1 %v4132_v1 }
 0x3be   : > { %1921 = vmatprep.subr.bf16.mxu0 %v4136_v18  ;;  %1964 = vmatprep.subr.bf16.mxu1 %v4140_v2 }
 0x3c1   : > { %1922 = vmatpush1.bf16.msra.mxu0 %v4144_v19  ;;  %1965 = vmatpush1.bf16.msra.mxu1 %v4148_v20 }
 0x3c2   : > { %1923 = vmatprep.subr.bf16.mxu0 %v4152_v21  ;;  %1966 = vmatprep.subr.bf16.mxu1 %v4156_v24 }
 0x3c5   : > { %1924 = vmatpush1.bf16.msra.mxu0 %v4160_v25  ;;  %1967 = vmatpush1.bf16.msra.mxu1 %v4164_v26 }
 0x3c6   : > { %1925 = vmatprep.subr.bf16.mxu0 %v4168_v27  ;;  %1968 = vmatprep.subr.bf16.mxu1 %v4172_v28 }
 0x3c9   : > { %1926 = vmatpush1.bf16.msra.mxu0 %v4176_v29  ;;  %1969 = vmatpush1.bf16.msra.mxu1 %v4180_v30 }
 0x3ca   : > { %1927 = vmatprep.subr.bf16.mxu0 %v4184_v31  ;;  %1970 = vmatprep.subr.bf16.mxu1 %v4188_v34 }
 0x3cd   : > { %1928 = vmatpush1.bf16.msra.mxu0 %v4192_v35  ;;  %1971 = vmatpush1.bf16.msra.mxu1 %v4196_v36 }
 0x3ce   : > { %1929 = vmatprep.subr.bf16.mxu0 %v4200_v37  ;;  %1972 = vmatprep.subr.bf16.mxu1 %v4204_v38 }
 0x3d1   : > { %1930 = vmatpush1.bf16.msra.mxu0 %v4208_v39  ;;  %1973 = vmatpush1.bf16.msra.mxu1 %v4212_v40 }
 0x3d2   : > { %2086 = vmatprep.subr.bf16.mxu0 %v4216_v59  ;;  %2129 = vmatprep.subr.bf16.mxu1 %v4220_v62 }
 0x487   : > { %v1778_v22 = vpop.f32.mrb[44].mxu0  ;;  %v1821_v23 = vpop.f32.mrb[44].mxu1 }
 0x488   : > { %v1830_v33 = vadd.f32 %v1778_v22, %v1736_v61  ;;  %v1780_v12 = vpop.f32.mrb[45].mxu0  ;;  %v1823_v41 = vpop.f32.mrb[45].mxu1  ;;  %v1832_v57 = vadd.f32 %v1821_v23, %v1738_v5 }
 0x489   : > { %v1831_v32 = vadd.f32 %v1780_v12, %v1737_v60  ;;  %v1782_v43 = vpop.f32.mrb[46].mxu0  ;;  %v1825_v44 = vpop.f32.mrb[46].mxu1  ;;  %v1833_v3 = vadd.f32 %v1823_v41, %v1739_v63 }
 0x48a   : > { %v2958_v50 = vmul.f32 -1.442695, %v1830_v33  ;;  %v1834_v52 = vadd.f32 %v1782_v43, %v1740_v42  ;;  %v1784_v47 = vpop.f32.mrb[47].mxu0  ;;  %v1827_v58 = vpop.f32.mrb[47].mxu1  ;;  %v1836_v22 = vadd.f32 %v1825_v44, %v1742_v53 }
 0x48b   : > { %v2960_v54 = vmul.f32 -1.442695, %v1831_v32  ;;  %v1835_v4 = vadd.f32 %v1784_v47, %v1741_v46  ;;  %v2962_v55 = vmul.f32 -1.442695, %v1833_v3  ;;  %v1837_v61 = vadd.f32 %v1827_v58, %v1743_v13 }
 0x48c   : > { %3383 = vpow2.f32 %v2958_v50  ;;  %v2959_v6 = vmul.f32 -1.442695, %v1834_v52 }
 0x48d   : > { %3385 = vpow2.f32 %v2960_v54  ;;  %v2961_v0 = vmul.f32 -1.442695, %v1835_v4  ;;  %v2963_v42 = vmul.f32 -1.442695, %v1837_v61 }
 0x48e   : > { %3387 = vpow2.f32 %v2959_v6 }
 0x48f   : > { %3389 = vpow2.f32 %v2961_v0 }
 0x490   : > { %3391 = vtanh.f32 %v1832_v57 }
 0x491   : > { %3393 = vpow2.f32 %v2962_v55 }
 0x492   : > { %3395 = vtanh.f32 %v1836_v22 }
 0x496   : > { %v3384_v60 = vpop.eup %3383 }
 0x497   : > { %v3386_v33 = vpop.eup %3385  ;;  %v1844_v12 = vadd.f32 1.0, %v3384_v60 }
 0x498   : > { %v1856_v32 = vadd.f32 1.0, %v3386_v33  ;;  %v3388_v43 = vpop.eup %3387 }
 0x499   : > { %3397 = vrcp.f32 %v1844_v12  ;;  %v1845_v41 = vadd.f32 1.0, %v3388_v43  ;;  %v3390_v46 = vpop.eup %3389  ;;  %v1904_v12 = vld [vmem:[%s1902_s10 + $0x8] sm:$0xff] }
 0x49a   : > { %3399 = vrcp.f32 %v1856_v32  ;;  %v1857_v23 = vadd.f32 1.0, %v3390_v46  ;;  %v3392_v50 = vpop.eup %3391 }
 0x49b   : > { %3401 = vpow2.f32 %v2963_v42  ;;  %v3394_v51 = vpop.eup %3393 }
 0x49c   : > { %3403 = vrcp.f32 %v1845_v41  ;;  %v3396_v44 = vpop.eup %3395  ;;  %v1870_v45 = vadd.f32 1.0, %v3394_v51  ;;  %v1908_v41 = vunpack.c.l.bf16 %v1904_v12 }
 0x49d   : > { %3405 = vrcp.f32 %v1857_v23 }
 0x49e   : > { %3407 = vrcp.f32 %v1870_v45 }
 0x4a3   : > { %v3398_v52 = vpop.eup %3397 }
 0x4a4   : > { %v3400_v47 = vpop.eup %3399  ;;  %v1878_v58 = vmul.f32 %v3398_v52, %v3392_v50 }
 0x4a5   : > { %v3402_v54 = vpop.eup %3401  ;;  %v1876_v4 = vmul.f32 %v3400_v47, %v4229_v56 }
 0x4a6   : > { %v3404_v6 = vpop.eup %3403  ;;  %v1871_v5 = vadd.f32 1.0, %v3402_v54 }
 0x4a7   : > { %v4278_v63 = vadd.f32 %v1878_v58, %v1876_v4  ;;  %v1879_v0 = vmul.f32 %v3404_v6, %v3396_v44  ;;  %v3406_v3 = vpop.eup %3405  ;;  %v1912_v58 = vunpack.c.h.bf16 %v1904_v12  ;;  %v1906_v4 = vld [vmem:[%s1902_s10 + $0x18] sm:$0xff] }
 0x4a8   : > { %v1877_v13 = vmul.f32 %v3406_v3, %v4233_v49  ;;  %v3408_v56 = vpop.eup %3407  ;;  %v1903_v49 = vld [vmem:[%s1902_s10] sm:$0xff] }
 0x4a9   : > { %3409 = vtanh.f32 %v4278_v63  ;;  %v1907_v42 = vunpack.c.l.bf16 %v1903_v49  ;;  %v1911_v51 = vunpack.c.h.bf16 %v1903_v49 }
 0x4aa   : > { %v4282_v57 = vadd.f32 %v1879_v0, %v1877_v13  ;;  %3411 = vrcp.f32 %v1871_v5 }
 0x4ac   : > { %3413 = vtanh.f32 %v4282_v57 }
 0x4b3   : > { %v3410_v53 = vpop.eup %3409 }
 0x4b4   : > { %v3412_v55 = vpop.eup %3411  ;;  %v1884_v22 = vmul.f32 %v3410_v53, %v3408_v56  ;;  %v1905_v56 = vld [vmem:[%s1902_s10 + $0x10] sm:$0xff]  ;;  %v1910_v53 = vunpack.c.l.bf16 %v1906_v4 }
 0x4b5   : > { %v1913_v49 = vunpack.c.h.bf16 %v1905_v56 }
 0x4b6   : > { %v3414_v61 = vpop.eup %3413 }
 0x4b7   : > { %v1885_v60 = vmul.f32 %v3414_v61, %v3412_v55 }
 0x4b9   : > { %v1886_v33 = vpack.c.bf16 %v1885_v60, %v1884_v22  ;;  %v1909_v22 = vunpack.c.l.bf16 %v1905_v56  ;;  %v1914_v60 = vunpack.c.h.bf16 %v1906_v4 }
 0x4bb   : > { %3073 = vst [vmem:[%s1896_s6] sm:$0xff] %v1886_v33   ;;  %1948 = vmatmul.mubr.bf16.vlgmr.msra.gmra.mrb[48].mxu0 %v1886_v33  ;;  %1991 = vmatmul.mubr.bf16.vlgmr.msra.gmra.mrb[48].mxu1 %v1886_v33  ;;  %s2580_s6 = scalar_lea.vmem %s4041_s12, %s3053_s26 [#allocation3] }
 0x4bc   : > { %2087 = vmatpush1.bf16.msra.mxu0 %v4094_v7  ;;  %2130 = vmatpush1.bf16.msra.mxu1 %v4098_v8 }
 0x4bd   : > { %2088 = vmatprep.subr.bf16.mxu0 %v4102_v9  ;;  %2131 = vmatprep.subr.bf16.mxu1 %v4106_v10 }
 0x4be   : > { %2118 = vmatprep.mubr.bf16.mxu0 %v3599_v48  ;;  %2161 = vmatprep.mubr.bf16.mxu1 %v3599_v48 }
 0x4c0   : > { %2089 = vmatpush1.bf16.msra.mxu0 %v4112_v11  ;;  %2132 = vmatpush1.bf16.msra.mxu1 %v4116_v14 }
 0x4c1   : > { %2090 = vmatprep.subr.bf16.mxu0 %v4120_v15  ;;  %2133 = vmatprep.subr.bf16.mxu1 %v4124_v16 }
 0x4c4   : > { %2091 = vmatpush1.bf16.msra.mxu0 %v4128_v17  ;;  %2134 = vmatpush1.bf16.msra.mxu1 %v4132_v1 }
 0x4c5   : > { %2092 = vmatprep.subr.bf16.mxu0 %v4136_v18  ;;  %2135 = vmatprep.subr.bf16.mxu1 %v4140_v2 }
 0x4c8   : > { %2093 = vmatpush1.bf16.msra.mxu0 %v4144_v19  ;;  %2136 = vmatpush1.bf16.msra.mxu1 %v4148_v20 }
 0x4c9   : > { %2094 = vmatprep.subr.bf16.mxu0 %v4152_v21  ;;  %2137 = vmatprep.subr.bf16.mxu1 %v4156_v24 }
 0x4cc   : > { %2095 = vmatpush1.bf16.msra.mxu0 %v4160_v25  ;;  %2138 = vmatpush1.bf16.msra.mxu1 %v4164_v26 }
 0x4cd   : > { %2096 = vmatprep.subr.bf16.mxu0 %v4168_v27  ;;  %2139 = vmatprep.subr.bf16.mxu1 %v4172_v28 }
 0x4d0   : > { %2097 = vmatpush1.bf16.msra.mxu0 %v4176_v29  ;;  %2140 = vmatpush1.bf16.msra.mxu1 %v4180_v30 }
 0x4d1   : > { %2098 = vmatprep.subr.bf16.mxu0 %v4184_v31  ;;  %2141 = vmatprep.subr.bf16.mxu1 %v4188_v34 }
 0x4d4   : > { %2099 = vmatpush1.bf16.msra.mxu0 %v4192_v35  ;;  %2142 = vmatpush1.bf16.msra.mxu1 %v4196_v36 }
 0x4d5   : > { %2100 = vmatprep.subr.bf16.mxu0 %v4200_v37  ;;  %2143 = vmatprep.subr.bf16.mxu1 %v4204_v38 }
 0x4d8   : > { %2101 = vmatpush1.bf16.msra.mxu0 %v4208_v39  ;;  %2144 = vmatpush1.bf16.msra.mxu1 %v4212_v40 }
 0x4d9   : > { %2257 = vmatprep.subr.bf16.mxu0 %v4216_v59  ;;  %2300 = vmatprep.subr.bf16.mxu1 %v4220_v62 }
 0x58e   : > { %v1949_v32 = vpop.f32.mrb[48].mxu0  ;;  %v1992_v43 = vpop.f32.mrb[48].mxu1 }
 0x58f   : > { %v2001_v46 = vadd.f32 %v1949_v32, %v1907_v42  ;;  %v1951_v23 = vpop.f32.mrb[49].mxu0  ;;  %v1994_v50 = vpop.f32.mrb[49].mxu1  ;;  %v2003_v33 = vadd.f32 %v1992_v43, %v1909_v22 }
 0x590   : > { %v2002_v44 = vadd.f32 %v1951_v23, %v1908_v41  ;;  %v1953_v52 = vpop.f32.mrb[50].mxu0  ;;  %v1996_v47 = vpop.f32.mrb[50].mxu1  ;;  %v2004_v61 = vadd.f32 %v1994_v50, %v1910_v53 }
 0x591   : > { %v2970_v54 = vmul.f32 -1.442695, %v2001_v46  ;;  %v2005_v6 = vadd.f32 %v1953_v52, %v1911_v51  ;;  %v1955_v45 = vpop.f32.mrb[51].mxu0  ;;  %v1998_v0 = vpop.f32.mrb[51].mxu1  ;;  %v2007_v32 = vadd.f32 %v1996_v47, %v1913_v49 }
 0x592   : > { %v2972_v3 = vmul.f32 -1.442695, %v2002_v44  ;;  %v2006_v5 = vadd.f32 %v1955_v45, %v1912_v58  ;;  %v2974_v12 = vmul.f32 -1.442695, %v2004_v61  ;;  %v2008_v42 = vadd.f32 %v1998_v0, %v1914_v60 }
 0x593   : > { %3415 = vpow2.f32 %v2970_v54  ;;  %v2971_v13 = vmul.f32 -1.442695, %v2005_v6 }
 0x594   : > { %3417 = vpow2.f32 %v2972_v3  ;;  %v2973_v55 = vmul.f32 -1.442695, %v2006_v5  ;;  %v2975_v51 = vmul.f32 -1.442695, %v2008_v42 }
 0x595   : > { %3419 = vpow2.f32 %v2971_v13 }
 0x596   : > { %3421 = vpow2.f32 %v2973_v55 }
 0x597   : > { %3423 = vtanh.f32 %v2003_v33 }
 0x598   : > { %3425 = vpow2.f32 %v2974_v12 }
 0x599   : > { %3427 = vtanh.f32 %v2007_v32 }
 0x59d   : > { %v3416_v41 = vpop.eup %3415 }
 0x59e   : > { %v3418_v46 = vpop.eup %3417  ;;  %v2015_v23 = vadd.f32 1.0, %v3416_v41 }
 0x59f   : > { %v2027_v44 = vadd.f32 1.0, %v3418_v46  ;;  %v3420_v52 = vpop.eup %3419 }
 0x5a0   : > { %3429 = vrcp.f32 %v2015_v23  ;;  %v2016_v50 = vadd.f32 1.0, %v3420_v52  ;;  %v3422_v58 = vpop.eup %3421  ;;  %v2075_v23 = vld [vmem:[%s2073_s17 + $0x8] sm:$0xff] }
 0x5a1   : > { %3431 = vrcp.f32 %v2027_v44  ;;  %v2028_v43 = vadd.f32 1.0, %v3422_v58  ;;  %v3424_v54 = vpop.eup %3423 }
 0x5a2   : > { %3433 = vpow2.f32 %v2975_v51  ;;  %v3426_v4 = vpop.eup %3425 }
 0x5a3   : > { %3435 = vrcp.f32 %v2016_v50  ;;  %v3428_v47 = vpop.eup %3427  ;;  %v2041_v56 = vadd.f32 1.0, %v3426_v4  ;;  %v2079_v50 = vunpack.c.l.bf16 %v2075_v23 }
 0x5a4   : > { %3437 = vrcp.f32 %v2028_v43 }
 0x5a5   : > { %3439 = vrcp.f32 %v2041_v56 }
 0x5aa   : > { %v3430_v6 = vpop.eup %3429 }
 0x5ab   : > { %v3432_v45 = vpop.eup %3431  ;;  %v2049_v0 = vmul.f32 %v3430_v6, %v3424_v54 }
 0x5ac   : > { %v3434_v3 = vpop.eup %3433  ;;  %v2047_v5 = vmul.f32 %v3432_v45, %v4278_v63 }
 0x5ad   : > { %v3436_v13 = vpop.eup %3435  ;;  %v2042_v22 = vadd.f32 1.0, %v3434_v3 }
 0x5ae   : > { %v4327_v53 = vadd.f32 %v2049_v0, %v2047_v5  ;;  %v2050_v55 = vmul.f32 %v3436_v13, %v3428_v47  ;;  %v3438_v61 = vpop.eup %3437  ;;  %v2077_v0 = vld [vmem:[%s2073_s17 + $0x18] sm:$0xff] }
 0x5af   : > { %v2048_v60 = vmul.f32 %v3438_v61, %v4282_v57  ;;  %v3440_v63 = vpop.eup %3439  ;;  %v2074_v57 = vld [vmem:[%s2073_s17] sm:$0xff] }
 0x5b0   : > { %3441 = vtanh.f32 %v4327_v53  ;;  %v2078_v51 = vunpack.c.l.bf16 %v2074_v57  ;;  %v2082_v4 = vunpack.c.h.bf16 %v2074_v57 }
 0x5b1   : > { %v4331_v33 = vadd.f32 %v2050_v55, %v2048_v60  ;;  %3443 = vrcp.f32 %v2042_v22  ;;  %v2076_v22 = vld [vmem:[%s2073_s17 + $0x10] sm:$0xff]  ;;  %v2081_v60 = vunpack.c.l.bf16 %v2077_v0 }
 0x5b3   : > { %3445 = vtanh.f32 %v4331_v33 }
 0x5ba   : > { %v3442_v49 = vpop.eup %3441 }
 0x5bb   : > { %v3444_v12 = vpop.eup %3443  ;;  %v2055_v32 = vmul.f32 %v3442_v49, %v3440_v63 }
 0x5bd   : > { %v3446_v42 = vpop.eup %3445 }
 0x5be   : > { %v2056_v41 = vmul.f32 %v3446_v42, %v3444_v12  ;;  %v2080_v12 = vunpack.c.l.bf16 %v2076_v22  ;;  %v2085_v42 = vunpack.c.h.bf16 %v2077_v0 }
 0x5c0   : > { %v2057_v46 = vpack.c.bf16 %v2056_v41, %v2055_v32  ;;  %v2084_v41 = vunpack.c.h.bf16 %v2076_v22 }
 0x5c2   : > { %3078 = vst [vmem:[%s2067_s13] sm:$0xff] %v2057_v46   ;;  %2119 = vmatmul.mubr.bf16.vlgmr.msra.gmra.mrb[52].mxu0 %v2057_v46  ;;  %2162 = vmatmul.mubr.bf16.vlgmr.msra.gmra.mrb[52].mxu1 %v2057_v46 }
 0x5c3   : > { %2258 = vmatpush1.bf16.msra.mxu0 %v4094_v7  ;;  %2301 = vmatpush1.bf16.msra.mxu1 %v4098_v8 }
 0x5c4   : > { %2259 = vmatprep.subr.bf16.mxu0 %v4102_v9  ;;  %2302 = vmatprep.subr.bf16.mxu1 %v4106_v10 }
 0x5c5   : > { %2289 = vmatprep.mubr.bf16.mxu0 %v3599_v48  ;;  %2332 = vmatprep.mubr.bf16.mxu1 %v3599_v48 }
 0x5c7   : > { %2260 = vmatpush1.bf16.msra.mxu0 %v4112_v11  ;;  %2303 = vmatpush1.bf16.msra.mxu1 %v4116_v14 }
 0x5c8   : > { %2261 = vmatprep.subr.bf16.mxu0 %v4120_v15  ;;  %2304 = vmatprep.subr.bf16.mxu1 %v4124_v16 }
 0x5cb   : > { %2262 = vmatpush1.bf16.msra.mxu0 %v4128_v17  ;;  %2305 = vmatpush1.bf16.msra.mxu1 %v4132_v1 }
 0x5cc   : > { %2263 = vmatprep.subr.bf16.mxu0 %v4136_v18  ;;  %2306 = vmatprep.subr.bf16.mxu1 %v4140_v2 }
 0x5cf   : > { %2264 = vmatpush1.bf16.msra.mxu0 %v4144_v19  ;;  %2307 = vmatpush1.bf16.msra.mxu1 %v4148_v20 }
 0x5d0   : > { %2265 = vmatprep.subr.bf16.mxu0 %v4152_v21  ;;  %2308 = vmatprep.subr.bf16.mxu1 %v4156_v24 }
 0x5d3   : > { %2266 = vmatpush1.bf16.msra.mxu0 %v4160_v25  ;;  %2309 = vmatpush1.bf16.msra.mxu1 %v4164_v26 }
 0x5d4   : > { %2267 = vmatprep.subr.bf16.mxu0 %v4168_v27  ;;  %2310 = vmatprep.subr.bf16.mxu1 %v4172_v28 }
 0x5d7   : > { %2268 = vmatpush1.bf16.msra.mxu0 %v4176_v29  ;;  %2311 = vmatpush1.bf16.msra.mxu1 %v4180_v30 }
 0x5d8   : > { %2269 = vmatprep.subr.bf16.mxu0 %v4184_v31  ;;  %2312 = vmatprep.subr.bf16.mxu1 %v4188_v34 }
 0x5db   : > { %2270 = vmatpush1.bf16.msra.mxu0 %v4192_v35  ;;  %2313 = vmatpush1.bf16.msra.mxu1 %v4196_v36 }
 0x5dc   : > { %2271 = vmatprep.subr.bf16.mxu0 %v4200_v37  ;;  %2314 = vmatprep.subr.bf16.mxu1 %v4204_v38 }
 0x5df   : > { %2272 = vmatpush1.bf16.msra.mxu0 %v4208_v39  ;;  %2315 = vmatpush1.bf16.msra.mxu1 %v4212_v40 }
 0x5e0   : > { %2428 = vmatprep.subr.bf16.mxu0 %v4216_v59  ;;  %2471 = vmatprep.subr.bf16.mxu1 %v4220_v62  ;;  %v2083_v62 = vunpack.c.h.bf16 %v2075_v23 }
 0x695   : > { %v2120_v44 = vpop.f32.mrb[52].mxu0  ;;  %v2163_v52 = vpop.f32.mrb[52].mxu1 }
 0x696   : > { %v2172_v58 = vadd.f32 %v2120_v44, %v2078_v51  ;;  %v2122_v43 = vpop.f32.mrb[53].mxu0  ;;  %v2165_v54 = vpop.f32.mrb[53].mxu1  ;;  %v2174_v32 = vadd.f32 %v2163_v52, %v2080_v12 }
 0x697   : > { %v2173_v47 = vadd.f32 %v2122_v43, %v2079_v50  ;;  %v2124_v59 = vpop.f32.mrb[54].mxu0  ;;  %v2167_v6 = vpop.f32.mrb[54].mxu1  ;;  %v2175_v49 = vadd.f32 %v2165_v54, %v2081_v60 }
 0x698   : > { %v2982_v45 = vmul.f32 -1.442695, %v2172_v58  ;;  %v2176_v3 = vadd.f32 %v2124_v59, %v2082_v4  ;;  %v2126_v5 = vpop.f32.mrb[55].mxu0  ;;  %v2169_v13 = vpop.f32.mrb[55].mxu1  ;;  %v2178_v23 = vadd.f32 %v2167_v6, %v2084_v41 }
 0x699   : > { %v2984_v56 = vmul.f32 -1.442695, %v2173_v47  ;;  %v2177_v55 = vadd.f32 %v2126_v5, %v2083_v62  ;;  %v2986_v46 = vmul.f32 -1.442695, %v2175_v49  ;;  %v2179_v57 = vadd.f32 %v2169_v13, %v2085_v42 }
 0x69a   : > { %3447 = vpow2.f32 %v2982_v45  ;;  %v2983_v61 = vmul.f32 -1.442695, %v2176_v3 }
 0x69b   : > { %3449 = vpow2.f32 %v2984_v56  ;;  %v2985_v63 = vmul.f32 -1.442695, %v2177_v55  ;;  %v2987_v58 = vmul.f32 -1.442695, %v2179_v57 }
 0x69c   : > { %3451 = vpow2.f32 %v2983_v61 }
 0x69d   : > { %3453 = vpow2.f32 %v2985_v63 }
 0x69e   : > { %3455 = vtanh.f32 %v2174_v32 }
 0x69f   : > { %3457 = vpow2.f32 %v2986_v46 }
 0x6a0   : > { %3459 = vtanh.f32 %v2178_v23 }
 0x6a4   : > { %v3448_v51 = vpop.eup %3447 }
 0x6a5   : > { %v3450_v44 = vpop.eup %3449  ;;  %v2186_v50 = vadd.f32 1.0, %v3448_v51 }
 0x6a6   : > { %v2198_v43 = vadd.f32 1.0, %v3450_v44  ;;  %v3452_v4 = vpop.eup %3451 }
 0x6a7   : > { %3461 = vrcp.f32 %v2186_v50  ;;  %v2187_v54 = vadd.f32 1.0, %v3452_v4  ;;  %v3454_v47 = vpop.eup %3453 }
 0x6a8   : > { %3463 = vrcp.f32 %v2198_v43  ;;  %v2199_v52 = vadd.f32 1.0, %v3454_v47  ;;  %v3456_v59 = vpop.eup %3455 }
 0x6a9   : > { %3465 = vpow2.f32 %v2987_v58  ;;  %v3458_v62 = vpop.eup %3457 }
 0x6aa   : > { %3467 = vrcp.f32 %v2187_v54  ;;  %v3460_v6 = vpop.eup %3459  ;;  %v2212_v55 = vadd.f32 1.0, %v3458_v62 }
 0x6ab   : > { %3469 = vrcp.f32 %v2199_v52 }
 0x6ac   : > { %3471 = vrcp.f32 %v2212_v55 }
 0x6b1   : > { %v3462_v45 = vpop.eup %3461 }
 0x6b2   : > { %v3464_v0 = vpop.eup %3463  ;;  %v2220_v3 = vmul.f32 %v3462_v45, %v3456_v59 }
 0x6b3   : > { %v3466_v5 = vpop.eup %3465  ;;  %v2218_v13 = vmul.f32 %v3464_v0, %v4327_v53 }
 0x6b4   : > { %v3468_v56 = vpop.eup %3467  ;;  %v2213_v63 = vadd.f32 1.0, %v3466_v5 }
 0x6b5   : > { %v4376_v61 = vadd.f32 %v2220_v3, %v2218_v13  ;;  %v2221_v22 = vmul.f32 %v3468_v56, %v3460_v6  ;;  %v3470_v60 = vpop.eup %3469 }
 0x6b6   : > { %v2219_v49 = vmul.f32 %v3470_v60, %v4331_v33  ;;  %v3472_v53 = vpop.eup %3471 }
 0x6b7   : > { %3473 = vtanh.f32 %v4376_v61 }
 0x6b8   : > { %v4380_v12 = vadd.f32 %v2221_v22, %v2219_v49  ;;  %3475 = vrcp.f32 %v2213_v63 }
 0x6ba   : > { %3477 = vtanh.f32 %v4380_v12 }
 0x6c1   : > { %v3474_v42 = vpop.eup %3473 }
 0x6c2   : > { %v3476_v32 = vpop.eup %3475  ;;  %v2226_v46 = vmul.f32 %v3474_v42, %v3472_v53 }
 0x6c4   : > { %v3478_v41 = vpop.eup %3477 }
 0x6c5   : > { %v2227_v57 = vmul.f32 %v3478_v41, %v3476_v32 }
 0x6c7   : > { %v2228_v23 = vpack.c.bf16 %v2227_v57, %v2226_v46 }
 0x6c9   : > { %3083 = vst [vmem:[%s2238_s21] sm:$0xff] %v2228_v23   ;;  %2290 = vmatmul.mubr.bf16.vlgmr.msra.gmra.mrb[56].mxu0 %v2228_v23  ;;  %2333 = vmatmul.mubr.bf16.vlgmr.msra.gmra.mrb[56].mxu1 %v2228_v23 }
 0x6ca   : > { %2429 = vmatpush1.bf16.msra.mxu0 %v4094_v7  ;;  %2472 = vmatpush1.bf16.msra.mxu1 %v4098_v8  ;;  %v2246_v7 = vld [vmem:[%s2244_s27 + $0x8] sm:$0xff] }
 0x6cb   : > { %2430 = vmatprep.subr.bf16.mxu0 %v4102_v9  ;;  %2473 = vmatprep.subr.bf16.mxu1 %v4106_v10 }
 0x6cc   : > { %2460 = vmatprep.mubr.bf16.mxu0 %v3599_v48  ;;  %2503 = vmatprep.mubr.bf16.mxu1 %v3599_v48  ;;  %v2245_v48 = vld [vmem:[%s2244_s27] sm:$0xff] }
 0x6cd   : > { %v2249_v8 = vunpack.c.l.bf16 %v2245_v48 }
 0x6ce   : > { %2431 = vmatpush1.bf16.msra.mxu0 %v4112_v11  ;;  %2474 = vmatpush1.bf16.msra.mxu1 %v4116_v14  ;;  %v2250_v11 = vunpack.c.l.bf16 %v2246_v7 }
 0x6cf   : > { %2432 = vmatprep.subr.bf16.mxu0 %v4120_v15  ;;  %2475 = vmatprep.subr.bf16.mxu1 %v4124_v16 }
 0x6d2   : > { %2433 = vmatpush1.bf16.msra.mxu0 %v4128_v17  ;;  %2476 = vmatpush1.bf16.msra.mxu1 %v4132_v1  ;;  %v2253_v17 = vunpack.c.h.bf16 %v2245_v48 }
 0x6d3   : > { %2434 = vmatprep.subr.bf16.mxu0 %v4136_v18  ;;  %2477 = vmatprep.subr.bf16.mxu1 %v4140_v2 }
 0x6d6   : > { %2435 = vmatpush1.bf16.msra.mxu0 %v4144_v19  ;;  %2478 = vmatpush1.bf16.msra.mxu1 %v4148_v20  ;;  %v2254_v19 = vunpack.c.h.bf16 %v2246_v7 }
 0x6d7   : > { %2436 = vmatprep.subr.bf16.mxu0 %v4152_v21  ;;  %2479 = vmatprep.subr.bf16.mxu1 %v4156_v24  ;;  %v2248_v21 = vld [vmem:[%s2244_s27 + $0x18] sm:$0xff] }
 0x6da   : > { %2437 = vmatpush1.bf16.msra.mxu0 %v4160_v25  ;;  %2480 = vmatpush1.bf16.msra.mxu1 %v4164_v26 }
 0x6db   : > { %2438 = vmatprep.subr.bf16.mxu0 %v4168_v27  ;;  %2481 = vmatprep.subr.bf16.mxu1 %v4172_v28 }
 0x6de   : > { %2439 = vmatpush1.bf16.msra.mxu0 %v4176_v29  ;;  %2482 = vmatpush1.bf16.msra.mxu1 %v4180_v30  ;;  %v2247_v30 = vld [vmem:[%s2244_s27 + $0x10] sm:$0xff] }
 0x6df   : > { %2440 = vmatprep.subr.bf16.mxu0 %v4184_v31  ;;  %2483 = vmatprep.subr.bf16.mxu1 %v4188_v34  ;;  %v2252_v31 = vunpack.c.l.bf16 %v2248_v21 }
 0x6e2   : > { %2441 = vmatpush1.bf16.msra.mxu0 %v4192_v35  ;;  %2484 = vmatpush1.bf16.msra.mxu1 %v4196_v36  ;;  %v2251_v36 = vunpack.c.l.bf16 %v2247_v30 }
 0x6e3   : > { %2442 = vmatprep.subr.bf16.mxu0 %v4200_v37  ;;  %2485 = vmatprep.subr.bf16.mxu1 %v4204_v38  ;;  %v2256_v37 = vunpack.c.h.bf16 %v2248_v21 }
 0x6e6   : > { %2443 = vmatpush1.bf16.msra.mxu0 %v4208_v39  ;;  %2486 = vmatpush1.bf16.msra.mxu1 %v4212_v40  ;;  %v2255_v39 = vunpack.c.h.bf16 %v2247_v30 }
 0x79c   : > { %v2291_v9 = vpop.f32.mrb[56].mxu0  ;;  %v2334_v10 = vpop.f32.mrb[56].mxu1 }
 0x79d   : > { %v2343_v14 = vadd.f32 %v2291_v9, %v2249_v8  ;;  %v2293_v15 = vpop.f32.mrb[57].mxu0  ;;  %v2336_v16 = vpop.f32.mrb[57].mxu1  ;;  %v2345_v38 = vadd.f32 %v2334_v10, %v2251_v36  ;;  %v2417_v8 = vld [vmem:[%s2415_s5 + $0x8] sm:$0xff] }
 0x79e   : > { %v2344_v1 = vadd.f32 %v2293_v15, %v2250_v11  ;;  %v2295_v18 = vpop.f32.mrb[58].mxu0  ;;  %v2338_v2 = vpop.f32.mrb[58].mxu1  ;;  %v2346_v35 = vadd.f32 %v2336_v16, %v2252_v31  ;;  %v2418_v31 = vld [vmem:[%s2415_s5 + $0x10] sm:$0xff] }
 0x79f   : > { %v2994_v20 = vmul.f32 -1.442695, %v2343_v14  ;;  %v2347_v24 = vadd.f32 %v2295_v18, %v2253_v17  ;;  %v2297_v25 = vpop.f32.mrb[59].mxu0  ;;  %v2340_v26 = vpop.f32.mrb[59].mxu1  ;;  %v2349_v51 = vadd.f32 %v2338_v2, %v2255_v39  ;;  %v2421_v14 = vunpack.c.l.bf16 %v2417_v8 }
 0x7a0   : > { %v2996_v27 = vmul.f32 -1.442695, %v2344_v1  ;;  %v2348_v28 = vadd.f32 %v2297_v25, %v2254_v19  ;;  %v2998_v40 = vmul.f32 -1.442695, %v2346_v35  ;;  %v2350_v33 = vadd.f32 %v2340_v26, %v2256_v37 }
 0x7a1   : > { %3479 = vpow2.f32 %v2994_v20  ;;  %v2995_v29 = vmul.f32 -1.442695, %v2347_v24  ;;  %v2425_v20 = vunpack.c.h.bf16 %v2417_v8  ;;  %v2419_v24 = vld [vmem:[%s2415_s5 + $0x18] sm:$0xff]  ;;  %v2422_v37 = vunpack.c.l.bf16 %v2418_v31 }
 0x7a2   : > { %3481 = vpow2.f32 %v2996_v27  ;;  %v2997_v34 = vmul.f32 -1.442695, %v2348_v28  ;;  %v2999_v43 = vmul.f32 -1.442695, %v2350_v33 }
 0x7a3   : > { %3483 = vpow2.f32 %v2995_v29 }
 0x7a4   : > { %3485 = vpow2.f32 %v2997_v34  ;;  %v2423_v34 = vunpack.c.l.bf16 %v2419_v24 }
 0x7a5   : > { %3487 = vtanh.f32 %v2345_v38  ;;  %v2427_v38 = vunpack.c.h.bf16 %v2419_v24 }
 0x7a6   : > { %3489 = vpow2.f32 %v2998_v40  ;;  %v2426_v40 = vunpack.c.h.bf16 %v2418_v31 }
 0x7a7   : > { %3491 = vtanh.f32 %v2349_v51 }
 0x7ab   : > { %v3480_v44 = vpop.eup %3479 }
 0x7ac   : > { %v3482_v50 = vpop.eup %3481  ;;  %v2357_v58 = vadd.f32 1.0, %v3480_v44 }
 0x7ad   : > { %v2369_v4 = vadd.f32 1.0, %v3482_v50  ;;  %v3484_v54 = vpop.eup %3483 }
 0x7ae   : > { %3493 = vrcp.f32 %v2357_v58  ;;  %v2358_v47 = vadd.f32 1.0, %v3484_v54  ;;  %v3486_v52 = vpop.eup %3485 }
 0x7af   : > { %3495 = vrcp.f32 %v2369_v4  ;;  %v2370_v59 = vadd.f32 1.0, %v3486_v52  ;;  %v3488_v62 = vpop.eup %3487 }
 0x7b0   : > { %3497 = vpow2.f32 %v2999_v43  ;;  %v3490_v6 = vpop.eup %3489 }
 0x7b1   : > { %3499 = vrcp.f32 %v2358_v47  ;;  %v3492_v45 = vpop.eup %3491  ;;  %v2383_v22 = vadd.f32 1.0, %v3490_v6 }
 0x7b2   : > { %3501 = vrcp.f32 %v2370_v59 }
 0x7b3   : > { %3503 = vrcp.f32 %v2383_v22 }
 0x7b8   : > { %v3494_v0 = vpop.eup %3493 }
 0x7b9   : > { %v3496_v3 = vpop.eup %3495  ;;  %v2391_v5 = vmul.f32 %v3494_v0, %v3488_v62 }
 0x7ba   : > { %v3498_v13 = vpop.eup %3497  ;;  %v2389_v56 = vmul.f32 %v3496_v3, %v4376_v61 }
 0x7bb   : > { %v3500_v55 = vpop.eup %3499  ;;  %v2384_v53 = vadd.f32 1.0, %v3498_v13 }
 0x7bc   : > { %v4423_v60 = vadd.f32 %v2391_v5, %v2389_v56  ;;  %v2392_v63 = vmul.f32 %v3500_v55, %v3492_v45  ;;  %v3502_v49 = vpop.eup %3501 }
 0x7bd   : > { %v2390_v42 = vmul.f32 %v3502_v49, %v4380_v12  ;;  %v3504_v61 = vpop.eup %3503  ;;  %v2416_v12 = vld [vmem:[%s2415_s5] sm:$0xff] }
 0x7be   : > { %3505 = vtanh.f32 %v4423_v60  ;;  %v2420_v9 = vunpack.c.l.bf16 %v2416_v12  ;;  %v2424_v1 = vunpack.c.h.bf16 %v2416_v12 }
 0x7bf   : > { %v4427_v32 = vadd.f32 %v2392_v63, %v2390_v42  ;;  %3507 = vrcp.f32 %v2384_v53 }
 0x7c1   : > { %3509 = vtanh.f32 %v4427_v32 }
 0x7c8   : > { %v3506_v41 = vpop.eup %3505 }
 0x7c9   : > { %v3508_v46 = vpop.eup %3507  ;;  %v2397_v23 = vmul.f32 %v3506_v41, %v3504_v61 }
 0x7cb   : > { %v3510_v57 = vpop.eup %3509 }
 0x7cc   : > { %v2398_v48 = vmul.f32 %v3510_v57, %v3508_v46 }
 0x7ce   : > { %v2399_v7 = vpack.c.bf16 %v2398_v48, %v2397_v23 }
 0x7d0   : > { %3088 = vst [vmem:[%s2409_s28] sm:$0xff] %v2399_v7   ;;  %2461 = vmatmul.mubr.bf16.vlgmr.msra.gmra.mrb[60].mxu0 %v2399_v7  ;;  %2504 = vmatmul.mubr.bf16.vlgmr.msra.gmra.mrb[60].mxu1 %v2399_v7 }
 0x8a3   : > { %v2462_v10 = vpop.f32.mrb[60].mxu0  ;;  %v2505_v11 = vpop.f32.mrb[60].mxu1 }
 0x8a4   : > { %v2514_v15 = vadd.f32 %v2462_v10, %v2420_v9  ;;  %v2464_v16 = vpop.f32.mrb[61].mxu0  ;;  %v2507_v17 = vpop.f32.mrb[61].mxu1  ;;  %v2516_v39 = vadd.f32 %v2505_v11, %v2422_v37 }
 0x8a5   : > { %v2515_v18 = vadd.f32 %v2464_v16, %v2421_v14  ;;  %v2466_v2 = vpop.f32.mrb[62].mxu0  ;;  %v2509_v19 = vpop.f32.mrb[62].mxu1  ;;  %v2517_v36 = vadd.f32 %v2507_v17, %v2423_v34 }
 0x8a6   : > { %v3006_v21 = vmul.f32 -1.442695, %v2514_v15  ;;  %v2518_v25 = vadd.f32 %v2466_v2, %v2424_v1  ;;  %v2468_v26 = vpop.f32.mrb[63].mxu0  ;;  %v2511_v27 = vpop.f32.mrb[63].mxu1  ;;  %v2520_v44 = vadd.f32 %v2509_v19, %v2426_v40 }
 0x8a7   : > { %v3008_v28 = vmul.f32 -1.442695, %v2515_v18  ;;  %v2519_v29 = vadd.f32 %v2468_v26, %v2425_v20  ;;  %v3010_v33 = vmul.f32 -1.442695, %v2517_v36  ;;  %v2521_v51 = vadd.f32 %v2511_v27, %v2427_v38 }
 0x8a8   : > { %3511 = vpow2.f32 %v3006_v21  ;;  %v3007_v30 = vmul.f32 -1.442695, %v2518_v25 }
 0x8a9   : > { %3513 = vpow2.f32 %v3008_v28  ;;  %v3009_v35 = vmul.f32 -1.442695, %v2519_v29  ;;  %v3011_v4 = vmul.f32 -1.442695, %v2521_v51 }
 0x8aa   : > { %3515 = vpow2.f32 %v3007_v30 }
 0x8ab   : > { %3517 = vpow2.f32 %v3009_v35 }
 0x8ac   : > { %3519 = vtanh.f32 %v2516_v39 }
 0x8ad   : > { %3521 = vpow2.f32 %v3010_v33 }
 0x8ae   : > { %3523 = vtanh.f32 %v2520_v44 }
 0x8b2   : > { %v3512_v50 = vpop.eup %3511 }
 0x8b3   : > { %v3514_v58 = vpop.eup %3513  ;;  %v2528_v43 = vadd.f32 1.0, %v3512_v50 }
 0x8b4   : > { %v2540_v54 = vadd.f32 1.0, %v3514_v58  ;;  %v3516_v47 = vpop.eup %3515 }
 0x8b5   : > { %3525 = vrcp.f32 %v2528_v43  ;;  %v2529_v52 = vadd.f32 1.0, %v3516_v47  ;;  %v3518_v59 = vpop.eup %3517 }
 0x8b6   : > { %3527 = vrcp.f32 %v2540_v54  ;;  %v2541_v62 = vadd.f32 1.0, %v3518_v59  ;;  %v3520_v6 = vpop.eup %3519 }
 0x8b7   : > { %3529 = vpow2.f32 %v3011_v4  ;;  %v3522_v45 = vpop.eup %3521 }
 0x8b8   : > { %3531 = vrcp.f32 %v2529_v52  ;;  %v3524_v0 = vpop.eup %3523  ;;  %v2554_v56 = vadd.f32 1.0, %v3522_v45 }
 0x8b9   : > { %3533 = vrcp.f32 %v2541_v62 }
 0x8ba   : > { %3535 = vrcp.f32 %v2554_v56 }
 0x8bf   : > { %v3526_v3 = vpop.eup %3525 }
 0x8c0   : > { %v3528_v5 = vpop.eup %3527  ;;  %v2562_v13 = vmul.f32 %v3526_v3, %v3520_v6 }
 0x8c1   : > { %v3530_v55 = vpop.eup %3529  ;;  %v2560_v22 = vmul.f32 %v3528_v5, %v4423_v60 }
 0x8c2   : > { %v3532_v63 = vpop.eup %3531  ;;  %v2555_v61 = vadd.f32 1.0, %v3530_v55 }
 0x8c3   : > { %v2564_v49 = vadd.f32 %v2562_v13, %v2560_v22  ;;  %v2563_v53 = vmul.f32 %v3532_v63, %v3524_v0  ;;  %v3534_v42 = vpop.eup %3533 }
 0x8c4   : > { %v2561_v41 = vmul.f32 %v3534_v42, %v4427_v32  ;;  %v3536_v57 = vpop.eup %3535 }
 0x8c5   : > { %3537 = vtanh.f32 %v2564_v49 }
 0x8c6   : > { %v2565_v46 = vadd.f32 %v2563_v53, %v2561_v41  ;;  %3539 = vrcp.f32 %v2555_v61 }
 0x8c8   : > { %3541 = vtanh.f32 %v2565_v46 }
 0x8cf   : > { %v3538_v23 = vpop.eup %3537 }
 0x8d0   : > { %v2568_v48 = vmul.f32 %v3538_v23, %v3536_v57  ;;  %v3540_v7 = vpop.eup %3539 }
 0x8d1   : > { %2589 = sbr.rel (!%p3652_p4) target bundleno = 2281 (0x8e9), region = 40 }
 0x8d2   : > { %v3542_v60 = vpop.eup %3541 }
 0x8d3   : > { %v2569_v12 = vmul.f32 %v3542_v60, %v3540_v7 }
 0x8d5   : > { %v3092_v8 = vpack.c.bf16 %v2569_v12, %v2568_v48 }
 0x8d7   : > { %3093 = vst [vmem:[%s2580_s6] sm:$0xff] %v3092_v8  }
 0x8de   : > { %v2607_v32 = vld [vmem:[%s4041_s12] sm:$0xf]  ;;  %v2609_v9 = vld [vmem:[%s4041_s12 + $0x4] sm:$0xf]  ;;  %v2611_v10 = vld [vmem:[%s4041_s12 + $0x8] sm:$0xf] }
 0x8df   : > { %v2613_v11 = vld [vmem:[%s4041_s12 + $0xc] sm:$0xf]  ;;  %v2615_v14 = vld [vmem:[%s4041_s12 + $0x10] sm:$0xf]  ;;  %2608 = vst [vmem:[%s2591_s11] sm:$0xf] %v2607_v32 }
 0x8e0   : > { %2610 = vst [vmem:[%s2591_s11 + $0x8] sm:$0xf] %v2609_v9  ;;  %2612 = vst [vmem:[%s2591_s11 + $0x10] sm:$0xf] %v2611_v10  ;;  %v2617_v15 = vld [vmem:[%s4041_s12 + $0x14] sm:$0xf] }
 0x8e1   : > { %2614 = vst [vmem:[%s2591_s11 + $0x18] sm:$0xf] %v2613_v11  ;;  %2616 = vst [vmem:[%s2591_s11 + $0x20] sm:$0xf] %v2615_v14  ;;  %v2619_v16 = vld [vmem:[%s4041_s12 + $0x18] sm:$0xf] }
 0x8e2   : > { %v2621_v17 = vld [vmem:[%s4041_s12 + $0x1c] sm:$0xf]  ;;  %2618 = vst [vmem:[%s2591_s11 + $0x28] sm:$0xf] %v2617_v15  ;;  %2620 = vst [vmem:[%s2591_s11 + $0x30] sm:$0xf] %v2619_v16 }
 0x8e3   : > { %2622 = vst [vmem:[%s2591_s11 + $0x38] sm:$0xf] %v2621_v17  ;;  %v2623_v1 = vld [vmem:[%s4041_s12 + $0x20] sm:$0xf]  ;;  %v2625_v18 = vld [vmem:[%s4041_s12 + $0x24] sm:$0xf] }
 0x8e4   : > { %v2627_v2 = vld [vmem:[%s4041_s12 + $0x28] sm:$0xf]  ;;  %2624 = vst [vmem:[%s2591_s11 + $0x40] sm:$0xf] %v2623_v1  ;;  %2626 = vst [vmem:[%s2591_s11 + $0x48] sm:$0xf] %v2625_v18 }
 0x8e5   : > { %2628 = vst [vmem:[%s2591_s11 + $0x50] sm:$0xf] %v2627_v2  ;;  %v2629_v19 = vld [vmem:[%s4041_s12 + $0x2c] sm:$0xf]  ;;  %v2631_v20 = vld [vmem:[%s4041_s12 + $0x30] sm:$0xf] }
 0x8e6   : > { %v2633_v21 = vld [vmem:[%s4041_s12 + $0x34] sm:$0xf]  ;;  %2630 = vst [vmem:[%s2591_s11 + $0x58] sm:$0xf] %v2629_v19  ;;  %2632 = vst [vmem:[%s2591_s11 + $0x60] sm:$0xf] %v2631_v20 }
 0x8e7   : > { %2634 = vst [vmem:[%s2591_s11 + $0x68] sm:$0xf] %v2633_v21  ;;  %v2635_v24 = vld [vmem:[%s4041_s12 + $0x38] sm:$0xf]  ;;  %v2637_v25 = vld [vmem:[%s4041_s12 + $0x3c] sm:$0xf] }
 0x8e8   : > { %2636 = vst [vmem:[%s2591_s11 + $0x70] sm:$0xf] %v2635_v24  ;;  %2638 = vst [vmem:[%s2591_s11 + $0x78] sm:$0xf] %v2637_v25 }
 0x8e9 PF: > { %p11_p8 = scmp.ge.s32.totalorder %s3640_s19, 4   ;;  %s4479_s15 = smov %s3593_s16 }
 0x8ea   : > { %s4480_s16 = smov %s3648_s22  ;;  %s4481_s17 = smov %s3640_s19 }
 0x8eb   :  { %13 = sbr.rel (!%p11_p8) target bundleno = 2 (0x2), region = 129 }

</bundles_post_ra>
